<compile_context>
chip_gen: v5e
topology: v5e:2x2
jax: 0.10.0
libtpu: 0.0.40
codegen_flags: <defaults>
</compile_context>

<pallas_src>
import jax
import jax.numpy as jnp
from jax.experimental import pallas as pl
from jax.experimental.pallas import tpu as pltpu

# Keep both the XLA reference and the in-kernel dots at full f32 accuracy so the
# self-check tolerance can be tight (review: 2e-2 was far too loose).
jax.config.update("jax_default_matmul_precision", "highest")

# ----------------------------- hyper-parameters ------------------------------
B = 8              # batch size (== nn.LSTM sequence length, batch_first=False)
T = 6              # time_len; forward hardcodes time index 5 and steps 0..4
CD = 8             # changing_dim
INPUT_DIM = 20     # input_dim (>= 2 * changing_dim)
H = 32             # lstm_hidden_dim
HNS = 16           # hidden_next_state_dim
HO = 16            # hidden_outcome_dim
N = 5              # LSTM "batch" = the 5 time steps fed to the LSTM

F32 = jnp.float32

# Packed head-weight slab: row offsets are all multiples of 8 so every in-kernel
# slice is an aligned sublane window; lanes are zero-padded to HEAD_LANES.
HEAD_LANES = 16                              # max(HNS, CD, HO, 2)
R_W1 = 0                                     # hidden2tag1.weight.T     (H, HNS)
R_W2 = R_W1 + H                              # hidden2tag2.weight.T     (HNS, CD)->pad
R_W3H = R_W2 + HNS                           # hidden2outcome1 h-part   (H, HO)
R_W3X = R_W3H + H                            # hidden2outcome1 x-part   (INPUT_DIM, HO)
R_W4 = R_W3X + ((INPUT_DIM + 7) // 8) * 8    # hidden2outcome2.weight.T (HO, 2)->pad
R_END = R_W4 + HO                            # total rows = 120


# --------------------------------- kernel ------------------------------------
def lstm_next_state_kernel(pb_ref, wg_ref, bg_ref, hw_ref, hb_ref,
                           tag_ref, out_space_ref, lstm_out_ref, out_lin_ref):
    f32 = jnp.float32
    dot = lambda a, b: jnp.dot(a, b, preferred_element_type=f32)

    # Hoist loop-invariant parameter loads (leading-axis / 8-aligned slices only).
    Wx = [wg_ref[g, 0:CD, :] for g in range(4)]          # (CD, H) per gate [i,f,g,o]
    Wh = [wg_ref[g, CD:CD + H, :] for g in range(4)]     # (H, H)  per gate
    bg = [bg_ref[g] for g in range(4)]                   # (1, H)  per gate (b_ih+b_hh)
    W1T = hw_ref[R_W1:R_W1 + H, :]                       # (H, HNS)
    W2Tp = hw_ref[R_W2:R_W2 + HNS, :]                    # (HNS, 16), cols >= CD are 0
    W3hT = hw_ref[R_W3H:R_W3H + H, :]                    # (H, HO)
    W3xT = hw_ref[R_W3X:R_W3X + INPUT_DIM, :]            # (INPUT_DIM, HO)
    W4Tp = hw_ref[R_W4:R_W4 + HO, :]                     # (HO, 16), cols >= 2 are 0
    b1 = hb_ref[0]                                       # (1, 16)
    b2p = hb_ref[1]                                      # (1, 16), cols >= CD are 0
    b3 = hb_ref[2]                                       # (1, 16)
    b4p = hb_ref[3]                                      # (1, 16), cols >= 2 are 0

    h = jnp.zeros((N, H), f32)
    c = jnp.zeros((N, H), f32)
    h_last_rows = []
    feat5_rows = []

    # nn.LSTM(batch_first=False): recur over axis 0 (the original batch axis),
    # with the 5 time steps as the LSTM batch.  Unrolled (B is small & static).
    for t in range(B):
        x_t = pb_ref[t, 0:N, 0:CD].astype(f32)           # (N, CD)
        zi = dot(x_t, Wx[0]) + dot(h, Wh[0]) + bg[0]
        zf = dot(x_t, Wx[1]) + dot(h, Wh[1]) + bg[1]
        zg = dot(x_t, Wx[2]) + dot(h, Wh[2]) + bg[2]
        zo = dot(x_t, Wx[3]) + dot(h, Wh[3]) + bg[3]
        i_g = jax.nn.sigmoid(zi)
        f_g = jax.nn.sigmoid(zf)
        g_g = jnp.tanh(zg)
        o_g = jax.nn.sigmoid(zo)
        c = f_g * c + i_g * g_g
        h = o_g * jnp.tanh(c)
        lstm_out_ref[t] = h                              # lstm_out[t] = h_t  (N, H)

        # next-state head for this step (does not feed the recurrence)
        tag_t = dot(jax.nn.relu(dot(h, W1T) + b1), W2Tp) + b2p   # (N, 16)
        tag_ref[t] = tag_t[:, 0:CD]

        h_last_rows.append(h[N - 1:N, :])                # lstm_out[t, -1, :]
        feat5_rows.append(pb_ref[t, 5:6, :].astype(f32)) # patient_batch[t, 5, :]

    # Outcome head.  hidden2outcome1 is split so torch.cat is never materialized:
    # out_lin = h_last @ W3[:, :H].T + feats_t5 @ W3[:, H:].T + b3
    h_last = jnp.concatenate(h_last_rows, axis=0)        # (B, H)
    feats_t5 = jnp.concatenate(feat5_rows, axis=0)       # (B, INPUT_DIM)
    out_lin = dot(h_last, W3hT) + dot(feats_t5, W3xT) + b3   # (B, HO)
    out_lin_ref[...] = out_lin
    out_space_ref[...] = (dot(jax.nn.relu(out_lin), W4Tp) + b4p)[:, 0:2]


# ------------------------- wrapper & parameter packing -----------------------
def pack_params(params):
    """Parameter-only prep, done once per parameter set (outside the kernel)."""
    (W_ih, W_hh, b_ih, b_hh, W1, b1, W2, b2, W3, b3, W4, b4) = params

    # LSTM gate weights, PyTorch gate order [i, f, g, o]; transposed for x @ W.
    WihT = W_ih.reshape(4, H, CD).transpose(0, 2, 1)               # (4, CD, H)
    WhhT = W_hh.reshape(4, H, H).transpose(0, 2, 1)                # (4, H, H)
    w_gates = jnp.concatenate([WihT, WhhT], axis=1).astype(F32)    # (4, CD+H, H)
    b_gates = (b_ih + b_hh).reshape(4, 1, H).astype(F32)           # (4, 1, H)

    def pad_cols(w):
        return jnp.pad(w, ((0, 0), (0, HEAD_LANES - w.shape[1])))

    W3h, W3x = W3[:, :H], W3[:, H:]                                # split the cat
    head_w = jnp.zeros((R_END, HEAD_LANES), F32)
    head_w = head_w.at[R_W1:R_W1 + H].set(pad_cols(W1.T))
    head_w = head_w.at[R_W2:R_W2 + HNS].set(pad_cols(W2.T))
    head_w = head_w.at[R_W3H:R_W3H + H].set(pad_cols(W3h.T))
    head_w = head_w.at[R_W3X:R_W3X + INPUT_DIM].set(pad_cols(W3x.T))
    head_w = head_w.at[R_W4:R_W4 + HO].set(pad_cols(W4.T))

    def pad_bias(b):
        b = b.reshape(1, -1)
        return jnp.pad(b, ((0, 0), (0, HEAD_LANES - b.shape[1])))

    head_b = jnp.stack([pad_bias(b1), pad_bias(b2), pad_bias(b3), pad_bias(b4)],
                       axis=0).astype(F32)                          # (4, 1, 16)
    return w_gates, b_gates, head_w.astype(F32), head_b


@jax.jit
def lstm_next_state(patient_batch, w_gates, b_gates, head_w, head_b):
    vmem = lambda: pl.BlockSpec(memory_space=pltpu.MemorySpace.VMEM)
    out_shapes = (
        jax.ShapeDtypeStruct((B, N, CD), F32),   # tag_space
        jax.ShapeDtypeStruct((B, 2), F32),       # out_space
        jax.ShapeDtypeStruct((B, N, H), F32),    # lstm_out
        jax.ShapeDtypeStruct((B, HO), F32),      # out_space_linear
    )
    return pl.pallas_call(
        lstm_next_state_kernel,
        out_shape=out_shapes,
        in_specs=[vmem() for _ in range(5)],
        out_specs=tuple(vmem() for _ in range(4)),
    )(patient_batch, w_gates, b_gates, head_w, head_b)


# ------------------------------ pure-JAX reference ---------------------------
def reference_forward(pb, params):
    (W_ih, W_hh, b_ih, b_hh, W1, b1, W2, b2, W3, b3, W4, b4) = params
    x = pb[:, :N, :CD]                                  # (B, N, CD)
    h = jnp.zeros((N, H), F32)
    c = jnp.zeros((N, H), F32)
    outs = []
    for t in range(B):                                  # seq axis = axis 0 (batch_first=False)
        gates = x[t] @ W_ih.T + b_ih + h @ W_hh.T + b_hh
        i = jax.nn.sigmoid(gates[:, 0:H])
        f = jax.nn.sigmoid(gates[:, H:2 * H])
        g = jnp.tanh(gates[:, 2 * H:3 * H])
        o = jax.nn.sigmoid(gates[:, 3 * H:4 * H])
        c = f * c + i * g
        h = o * jnp.tanh(c)
        outs.append(h)
    lstm_out = jnp.stack(outs, axis=0)                  # (B, N, H)
    tag_space = jax.nn.relu(lstm_out @ W1.T + b1) @ W2.T + b2
    feats_t5 = pb[:, 5, :]
    outcome_cov = jnp.concatenate([lstm_out[:, -1, :], feats_t5], axis=1)
    out_lin = outcome_cov @ W3.T + b3
    out_space = jax.nn.relu(out_lin) @ W4.T + b4
    return tag_space, out_space, lstm_out, out_lin


# ----------------------------------- main -------------------------------------
if __name__ == "__main__":
    key = jax.random.PRNGKey(0)
    ks = jax.random.split(key, 13)
    u = lambda k, shape, s: jax.random.uniform(k, shape, F32, -s, s)

    patient_batch = jax.random.normal(ks[0], (B, T, INPUT_DIM), F32)

    s_lstm = 1.0 / (H ** 0.5)
    params = (
        u(ks[1], (4 * H, CD), s_lstm),                       # lstm.weight_ih_l0
        u(ks[2], (4 * H, H), s_lstm),                        # lstm.weight_hh_l0
        u(ks[3], (4 * H,), s_lstm),                          # lstm.bias_ih_l0
        u(ks[4], (4 * H,), s_lstm),                          # lstm.bias_hh_l0
        u(ks[5], (HNS, H), 1.0 / H ** 0.5),                  # hidden2tag1.weight
        u(ks[6], (HNS,), 1.0 / H ** 0.5),                    # hidden2tag1.bias
        u(ks[7], (CD, HNS), 1.0 / HNS ** 0.5),               # hidden2tag2.weight
        u(ks[8], (CD,), 1.0 / HNS ** 0.5),                   # hidden2tag2.bias
        u(ks[9], (HO, H + INPUT_DIM), 1.0 / (H + INPUT_DIM) ** 0.5),  # hidden2outcome1.weight
        u(ks[10], (HO,), 1.0 / (H + INPUT_DIM) ** 0.5),      # hidden2outcome1.bias
        u(ks[11], (2, HO), 1.0 / HO ** 0.5),                 # hidden2outcome2.weight
        u(ks[12], (2,), 1.0 / HO ** 0.5),                    # hidden2outcome2.bias
    )

    packed = pack_params(params)                 # parameter-only prep, done once
    outs = lstm_next_state(patient_batch, *packed)
    outs = jax.block_until_ready(outs)

    refs = reference_forward(patient_batch, params)
    names = ("tag_space", "out_space", "lstm_out", "out_space_linear")
    for name, a, b in zip(names, outs, refs):
        assert a.shape == b.shape, (name, a.shape, b.shape)
        err = float(jnp.max(jnp.abs(a - b)))
        assert jnp.allclose(a, b, rtol=2e-4, atol=2e-4), (name, err)

    print("KERNEL_OK")
</pallas_src>

<mosaic_0001>
module attributes {stable_mosaic.version = 11 : i64} {
  func.func @lstm_next_state_kernel(%arg0: memref<8x6x20xf32, #tpu.memory_space<vmem>>, %arg1: memref<4x40x32xf32, #tpu.memory_space<vmem>>, %arg2: memref<4x1x32xf32, #tpu.memory_space<vmem>>, %arg3: memref<120x16xf32, #tpu.memory_space<vmem>>, %arg4: memref<4x1x16xf32, #tpu.memory_space<vmem>>, %arg5: memref<8x5x8xf32, #tpu.memory_space<vmem>>, %arg6: memref<8x2xf32, #tpu.memory_space<vmem>>, %arg7: memref<8x5x32xf32, #tpu.memory_space<vmem>>, %arg8: memref<8x16xf32, #tpu.memory_space<vmem>>) attributes {dimension_semantics = [], scalar_prefetch = 0 : i64, scratch_operands = 0 : i64, tpu.core_type = #tpu.core_type<tc>} {
    %c0 = arith.constant 0 : index
    %c0_0 = arith.constant 0 : index
    %c0_1 = arith.constant 0 : index
    %0 = vector.load %arg1[%c0, %c0_0, %c0_1] : memref<4x40x32xf32, #tpu.memory_space<vmem>>, vector<1x8x32xf32>
    %1 = vector.shape_cast %0 : vector<1x8x32xf32> to vector<8x32xf32>
    %c1 = arith.constant 1 : index
    %c0_2 = arith.constant 0 : index
    %c0_3 = arith.constant 0 : index
    %2 = vector.load %arg1[%c1, %c0_2, %c0_3] : memref<4x40x32xf32, #tpu.memory_space<vmem>>, vector<1x8x32xf32>
    %3 = vector.shape_cast %2 : vector<1x8x32xf32> to vector<8x32xf32>
    %c2 = arith.constant 2 : index
    %c0_4 = arith.constant 0 : index
    %c0_5 = arith.constant 0 : index
    %4 = vector.load %arg1[%c2, %c0_4, %c0_5] : memref<4x40x32xf32, #tpu.memory_space<vmem>>, vector<1x8x32xf32>
    %5 = vector.shape_cast %4 : vector<1x8x32xf32> to vector<8x32xf32>
    %c3 = arith.constant 3 : index
    %c0_6 = arith.constant 0 : index
    %c0_7 = arith.constant 0 : index
    %6 = vector.load %arg1[%c3, %c0_6, %c0_7] : memref<4x40x32xf32, #tpu.memory_space<vmem>>, vector<1x8x32xf32>
    %7 = vector.shape_cast %6 : vector<1x8x32xf32> to vector<8x32xf32>
    %c0_8 = arith.constant 0 : index
    %c8 = arith.constant 8 : index
    %c0_9 = arith.constant 0 : index
    %8 = vector.load %arg1[%c0_8, %c8, %c0_9] : memref<4x40x32xf32, #tpu.memory_space<vmem>>, vector<1x32x32xf32>
    %9 = vector.shape_cast %8 : vector<1x32x32xf32> to vector<32x32xf32>
    %c1_10 = arith.constant 1 : index
    %c8_11 = arith.constant 8 : index
    %c0_12 = arith.constant 0 : index
    %10 = vector.load %arg1[%c1_10, %c8_11, %c0_12] : memref<4x40x32xf32, #tpu.memory_space<vmem>>, vector<1x32x32xf32>
    %11 = vector.shape_cast %10 : vector<1x32x32xf32> to vector<32x32xf32>
    %c2_13 = arith.constant 2 : index
    %c8_14 = arith.constant 8 : index
    %c0_15 = arith.constant 0 : index
    %12 = vector.load %arg1[%c2_13, %c8_14, %c0_15] : memref<4x40x32xf32, #tpu.memory_space<vmem>>, vector<1x32x32xf32>
    %13 = vector.shape_cast %12 : vector<1x32x32xf32> to vector<32x32xf32>
    %c3_16 = arith.constant 3 : index
    %c8_17 = arith.constant 8 : index
    %c0_18 = arith.constant 0 : index
    %14 = vector.load %arg1[%c3_16, %c8_17, %c0_18] : memref<4x40x32xf32, #tpu.memory_space<vmem>>, vector<1x32x32xf32>
    %15 = vector.shape_cast %14 : vector<1x32x32xf32> to vector<32x32xf32>
    %c0_19 = arith.constant 0 : index
    %c0_20 = arith.constant 0 : index
    %c0_21 = arith.constant 0 : index
    %16 = vector.load %arg2[%c0_19, %c0_20, %c0_21] : memref<4x1x32xf32, #tpu.memory_space<vmem>>, vector<1x1x32xf32>
    %17 = vector.shape_cast %16 : vector<1x1x32xf32> to vector<1x32xf32>
    %c1_22 = arith.constant 1 : index
    %c0_23 = arith.constant 0 : index
    %c0_24 = arith.constant 0 : index
    %18 = vector.load %arg2[%c1_22, %c0_23, %c0_24] : memref<4x1x32xf32, #tpu.memory_space<vmem>>, vector<1x1x32xf32>
    %19 = vector.shape_cast %18 : vector<1x1x32xf32> to vector<1x32xf32>
    %c2_25 = arith.constant 2 : index
    %c0_26 = arith.constant 0 : index
    %c0_27 = arith.constant 0 : index
    %20 = vector.load %arg2[%c2_25, %c0_26, %c0_27] : memref<4x1x32xf32, #tpu.memory_space<vmem>>, vector<1x1x32xf32>
    %21 = vector.shape_cast %20 : vector<1x1x32xf32> to vector<1x32xf32>
    %c3_28 = arith.constant 3 : index
    %c0_29 = arith.constant 0 : index
    %c0_30 = arith.constant 0 : index
    %22 = vector.load %arg2[%c3_28, %c0_29, %c0_30] : memref<4x1x32xf32, #tpu.memory_space<vmem>>, vector<1x1x32xf32>
    %23 = vector.shape_cast %22 : vector<1x1x32xf32> to vector<1x32xf32>
    %c0_31 = arith.constant 0 : index
    %c0_32 = arith.constant 0 : index
    %24 = vector.load %arg3[%c0_31, %c0_32] : memref<120x16xf32, #tpu.memory_space<vmem>>, vector<32x16xf32>
    %c32 = arith.constant 32 : index
    %c0_33 = arith.constant 0 : index
    %25 = vector.load %arg3[%c32, %c0_33] : memref<120x16xf32, #tpu.memory_space<vmem>>, vector<16x16xf32>
    %c48 = arith.constant 48 : index
    %c0_34 = arith.constant 0 : index
    %26 = vector.load %arg3[%c48, %c0_34] : memref<120x16xf32, #tpu.memory_space<vmem>>, vector<32x16xf32>
    %c80 = arith.constant 80 : index
    %c0_35 = arith.constant 0 : index
    %27 = vector.load %arg3[%c80, %c0_35] : memref<120x16xf32, #tpu.memory_space<vmem>>, vector<20x16xf32>
    %c104 = arith.constant 104 : index
    %c0_36 = arith.constant 0 : index
    %28 = vector.load %arg3[%c104, %c0_36] : memref<120x16xf32, #tpu.memory_space<vmem>>, vector<16x16xf32>
    %c0_37 = arith.constant 0 : index
    %c0_38 = arith.constant 0 : index
    %c0_39 = arith.constant 0 : index
    %29 = vector.load %arg4[%c0_37, %c0_38, %c0_39] : memref<4x1x16xf32, #tpu.memory_space<vmem>>, vector<1x1x16xf32>
    %30 = vector.shape_cast %29 : vector<1x1x16xf32> to vector<1x16xf32>
    %c1_40 = arith.constant 1 : index
    %c0_41 = arith.constant 0 : index
    %c0_42 = arith.constant 0 : index
    %31 = vector.load %arg4[%c1_40, %c0_41, %c0_42] : memref<4x1x16xf32, #tpu.memory_space<vmem>>, vector<1x1x16xf32>
    %32 = vector.shape_cast %31 : vector<1x1x16xf32> to vector<1x16xf32>
    %c2_43 = arith.constant 2 : index
    %c0_44 = arith.constant 0 : index
    %c0_45 = arith.constant 0 : index
    %33 = vector.load %arg4[%c2_43, %c0_44, %c0_45] : memref<4x1x16xf32, #tpu.memory_space<vmem>>, vector<1x1x16xf32>
    %34 = vector.shape_cast %33 : vector<1x1x16xf32> to vector<1x16xf32>
    %c3_46 = arith.constant 3 : index
    %c0_47 = arith.constant 0 : index
    %c0_48 = arith.constant 0 : index
    %35 = vector.load %arg4[%c3_46, %c0_47, %c0_48] : memref<4x1x16xf32, #tpu.memory_space<vmem>>, vector<1x1x16xf32>
    %36 = vector.shape_cast %35 : vector<1x1x16xf32> to vector<1x16xf32>
    %cst = arith.constant 0.000000e+00 : f32
    %37 = vector.broadcast %cst : f32 to vector<5x32xf32>
    %cst_49 = arith.constant 0.000000e+00 : f32
    %38 = vector.broadcast %cst_49 : f32 to vector<5x32xf32>
    %c0_50 = arith.constant 0 : index
    %c0_51 = arith.constant 0 : index
    %c0_52 = arith.constant 0 : index
    %39 = vector.load %arg0[%c0_50, %c0_51, %c0_52] : memref<8x6x20xf32, #tpu.memory_space<vmem>>, vector<1x5x8xf32>
    %40 = vector.shape_cast %39 : vector<1x5x8xf32> to vector<5x8xf32>
    %cst_53 = arith.constant dense<0.000000e+00> : vector<5x32xf32>
    %41 = tpu.matmul %40, %1, %cst_53 {dimension_numbers = #tpu.dot_dimension_numbers<[1], [0], [0], [1], [0, 0, 1, 1], [], []>, precision = #tpu.contract_precision<fp32>} : vector<5x8xf32>, vector<8x32xf32>, vector<5x32xf32> -> vector<5x32xf32>
    %cst_54 = arith.constant dense<0.000000e+00> : vector<5x32xf32>
    %42 = tpu.matmul %37, %9, %cst_54 {dimension_numbers = #tpu.dot_dimension_numbers<[1], [0], [0], [1], [0, 0, 1, 1], [], []>, precision = #tpu.contract_precision<fp32>} : vector<5x32xf32>, vector<32x32xf32>, vector<5x32xf32> -> vector<5x32xf32>
    %43 = arith.addf %41, %42 : vector<5x32xf32>
    %44 = vector.broadcast %17 : vector<1x32xf32> to vector<5x32xf32>
    %45 = arith.addf %43, %44 : vector<5x32xf32>
    %cst_55 = arith.constant dense<0.000000e+00> : vector<5x32xf32>
    %46 = tpu.matmul %40, %3, %cst_55 {dimension_numbers = #tpu.dot_dimension_numbers<[1], [0], [0], [1], [0, 0, 1, 1], [], []>, precision = #tpu.contract_precision<fp32>} : vector<5x8xf32>, vector<8x32xf32>, vector<5x32xf32> -> vector<5x32xf32>
    %cst_56 = arith.constant dense<0.000000e+00> : vector<5x32xf32>
    %47 = tpu.matmul %37, %11, %cst_56 {dimension_numbers = #tpu.dot_dimension_numbers<[1], [0], [0], [1], [0, 0, 1, 1], [], []>, precision = #tpu.contract_precision<fp32>} : vector<5x32xf32>, vector<32x32xf32>, vector<5x32xf32> -> vector<5x32xf32>
    %48 = arith.addf %46, %47 : vector<5x32xf32>
    %49 = vector.broadcast %19 : vector<1x32xf32> to vector<5x32xf32>
    %50 = arith.addf %48, %49 : vector<5x32xf32>
    %cst_57 = arith.constant dense<0.000000e+00> : vector<5x32xf32>
    %51 = tpu.matmul %40, %5, %cst_57 {dimension_numbers = #tpu.dot_dimension_numbers<[1], [0], [0], [1], [0, 0, 1, 1], [], []>, precision = #tpu.contract_precision<fp32>} : vector<5x8xf32>, vector<8x32xf32>, vector<5x32xf32> -> vector<5x32xf32>
    %cst_58 = arith.constant dense<0.000000e+00> : vector<5x32xf32>
    %52 = tpu.matmul %37, %13, %cst_58 {dimension_numbers = #tpu.dot_dimension_numbers<[1], [0], [0], [1], [0, 0, 1, 1], [], []>, precision = #tpu.contract_precision<fp32>} : vector<5x32xf32>, vector<32x32xf32>, vector<5x32xf32> -> vector<5x32xf32>
    %53 = arith.addf %51, %52 : vector<5x32xf32>
    %54 = vector.broadcast %21 : vector<1x32xf32> to vector<5x32xf32>
    %55 = arith.addf %53, %54 : vector<5x32xf32>
    %cst_59 = arith.constant dense<0.000000e+00> : vector<5x32xf32>
    %56 = tpu.matmul %40, %7, %cst_59 {dimension_numbers = #tpu.dot_dimension_numbers<[1], [0], [0], [1], [0, 0, 1, 1], [], []>, precision = #tpu.contract_precision<fp32>} : vector<5x8xf32>, vector<8x32xf32>, vector<5x32xf32> -> vector<5x32xf32>
    %cst_60 = arith.constant dense<0.000000e+00> : vector<5x32xf32>
    %57 = tpu.matmul %37, %15, %cst_60 {dimension_numbers = #tpu.dot_dimension_numbers<[1], [0], [0], [1], [0, 0, 1, 1], [], []>, precision = #tpu.contract_precision<fp32>} : vector<5x32xf32>, vector<32x32xf32>, vector<5x32xf32> -> vector<5x32xf32>
    %58 = arith.addf %56, %57 : vector<5x32xf32>
    %59 = vector.broadcast %23 : vector<1x32xf32> to vector<5x32xf32>
    %60 = arith.addf %58, %59 : vector<5x32xf32>
    %61 = arith.negf %45 : vector<5x32xf32>
    %62 = math.exp %61 : vector<5x32xf32>
    %cst_61 = arith.constant 1.000000e+00 : f32
    %63 = vector.broadcast %cst_61 : f32 to vector<5x32xf32>
    %64 = arith.addf %63, %62 : vector<5x32xf32>
    %65 = arith.divf %63, %64 : vector<5x32xf32>
    %66 = arith.negf %50 : vector<5x32xf32>
    %67 = math.exp %66 : vector<5x32xf32>
    %cst_62 = arith.constant 1.000000e+00 : f32
    %68 = vector.broadcast %cst_62 : f32 to vector<5x32xf32>
    %69 = arith.addf %68, %67 : vector<5x32xf32>
    %70 = arith.divf %68, %69 : vector<5x32xf32>
    %71 = math.tanh %55 : vector<5x32xf32>
    %72 = arith.negf %60 : vector<5x32xf32>
    %73 = math.exp %72 : vector<5x32xf32>
    %cst_63 = arith.constant 1.000000e+00 : f32
    %74 = vector.broadcast %cst_63 : f32 to vector<5x32xf32>
    %75 = arith.addf %74, %73 : vector<5x32xf32>
    %76 = arith.divf %74, %75 : vector<5x32xf32>
    %77 = arith.mulf %70, %38 : vector<5x32xf32>
    %78 = arith.mulf %65, %71 : vector<5x32xf32>
    %79 = arith.addf %77, %78 : vector<5x32xf32>
    %80 = math.tanh %79 : vector<5x32xf32>
    %81 = arith.mulf %76, %80 : vector<5x32xf32>
    %c0_64 = arith.constant 0 : index
    %c0_65 = arith.constant 0 : index
    %c0_66 = arith.constant 0 : index
    %82 = vector.load %arg7[%c0_64, %c0_65, %c0_66] : memref<8x5x32xf32, #tpu.memory_space<vmem>>, vector<1x5x32xf32>
    %83 = vector.shape_cast %82 : vector<1x5x32xf32> to vector<5x32xf32>
    %84 = vector.shape_cast %81 : vector<5x32xf32> to vector<1x5x32xf32>
    tpu.vector_store %arg7[%c0_64, %c0_65, %c0_66], %84 {strides = array<i32>} : memref<8x5x32xf32, #tpu.memory_space<vmem>>, vector<1x5x32xf32>,
    %cst_67 = arith.constant dense<0.000000e+00> : vector<5x16xf32>
    %85 = tpu.matmul %81, %24, %cst_67 {dimension_numbers = #tpu.dot_dimension_numbers<[1], [0], [0], [1], [0, 0, 1, 1], [], []>, precision = #tpu.contract_precision<fp32>} : vector<5x32xf32>, vector<32x16xf32>, vector<5x16xf32> -> vector<5x16xf32>
    %86 = vector.broadcast %30 : vector<1x16xf32> to vector<5x16xf32>
    %87 = arith.addf %85, %86 : vector<5x16xf32>
    %cst_68 = arith.constant 0.000000e+00 : f32
    %88 = vector.broadcast %cst_68 : f32 to vector<5x16xf32>
    %89 = arith.maximumf %87, %88 : vector<5x16xf32>
    %cst_69 = arith.constant dense<0.000000e+00> : vector<5x16xf32>
    %90 = tpu.matmul %89, %25, %cst_69 {dimension_numbers = #tpu.dot_dimension_numbers<[1], [0], [0], [1], [0, 0, 1, 1], [], []>, precision = #tpu.contract_precision<fp32>} : vector<5x16xf32>, vector<16x16xf32>, vector<5x16xf32> -> vector<5x16xf32>
    %91 = vector.broadcast %32 : vector<1x16xf32> to vector<5x16xf32>
    %92 = arith.addf %90, %91 : vector<5x16xf32>
    %93 = vector.extract_strided_slice %92 {offsets = [0, 0], sizes = [5, 8], strides = [1, 1]} : vector<5x16xf32> to vector<5x8xf32>
    %c0_70 = arith.constant 0 : index
    %c0_71 = arith.constant 0 : index
    %c0_72 = arith.constant 0 : index
    %94 = vector.load %arg5[%c0_70, %c0_71, %c0_72] : memref<8x5x8xf32, #tpu.memory_space<vmem>>, vector<1x5x8xf32>
    %95 = vector.shape_cast %94 : vector<1x5x8xf32> to vector<5x8xf32>
    %96 = vector.shape_cast %93 : vector<5x8xf32> to vector<1x5x8xf32>
    tpu.vector_store %arg5[%c0_70, %c0_71, %c0_72], %96 {strides = array<i32>} : memref<8x5x8xf32, #tpu.memory_space<vmem>>, vector<1x5x8xf32>,
    %97 = vector.extract_strided_slice %81 {offsets = [4, 0], sizes = [1, 32], strides = [1, 1]} : vector<5x32xf32> to vector<1x32xf32>
    %c0_73 = arith.constant 0 : index
    %c5 = arith.constant 5 : index
    %c0_74 = arith.constant 0 : index
    %98 = vector.load %arg0[%c0_73, %c5, %c0_74] : memref<8x6x20xf32, #tpu.memory_space<vmem>>, vector<1x1x20xf32>
    %99 = vector.shape_cast %98 : vector<1x1x20xf32> to vector<1x20xf32>
    %c1_75 = arith.constant 1 : index
    %c0_76 = arith.constant 0 : index
    %c0_77 = arith.constant 0 : index
    %100 = vector.load %arg0[%c1_75, %c0_76, %c0_77] : memref<8x6x20xf32, #tpu.memory_space<vmem>>, vector<1x5x8xf32>
    %101 = vector.shape_cast %100 : vector<1x5x8xf32> to vector<5x8xf32>
    %cst_78 = arith.constant dense<0.000000e+00> : vector<5x32xf32>
    %102 = tpu.matmul %101, %1, %cst_78 {dimension_numbers = #tpu.dot_dimension_numbers<[1], [0], [0], [1], [0, 0, 1, 1], [], []>, precision = #tpu.contract_precision<fp32>} : vector<5x8xf32>, vector<8x32xf32>, vector<5x32xf32> -> vector<5x32xf32>
    %cst_79 = arith.constant dense<0.000000e+00> : vector<5x32xf32>
    %103 = tpu.matmul %81, %9, %cst_79 {dimension_numbers = #tpu.dot_dimension_numbers<[1], [0], [0], [1], [0, 0, 1, 1], [], []>, precision = #tpu.contract_precision<fp32>} : vector<5x32xf32>, vector<32x32xf32>, vector<5x32xf32> -> vector<5x32xf32>
    %104 = arith.addf %102, %103 : vector<5x32xf32>
    %105 = vector.broadcast %17 : vector<1x32xf32> to vector<5x32xf32>
    %106 = arith.addf %104, %105 : vector<5x32xf32>
    %cst_80 = arith.constant dense<0.000000e+00> : vector<5x32xf32>
    %107 = tpu.matmul %101, %3, %cst_80 {dimension_numbers = #tpu.dot_dimension_numbers<[1], [0], [0], [1], [0, 0, 1, 1], [], []>, precision = #tpu.contract_precision<fp32>} : vector<5x8xf32>, vector<8x32xf32>, vector<5x32xf32> -> vector<5x32xf32>
    %cst_81 = arith.constant dense<0.000000e+00> : vector<5x32xf32>
    %108 = tpu.matmul %81, %11, %cst_81 {dimension_numbers = #tpu.dot_dimension_numbers<[1], [0], [0], [1], [0, 0, 1, 1], [], []>, precision = #tpu.contract_precision<fp32>} : vector<5x32xf32>, vector<32x32xf32>, vector<5x32xf32> -> vector<5x32xf32>
    %109 = arith.addf %107, %108 : vector<5x32xf32>
    %110 = vector.broadcast %19 : vector<1x32xf32> to vector<5x32xf32>
    %111 = arith.addf %109, %110 : vector<5x32xf32>
    %cst_82 = arith.constant dense<0.000000e+00> : vector<5x32xf32>
    %112 = tpu.matmul %101, %5, %cst_82 {dimension_numbers = #tpu.dot_dimension_numbers<[1], [0], [0], [1], [0, 0, 1, 1], [], []>, precision = #tpu.contract_precision<fp32>} : vector<5x8xf32>, vector<8x32xf32>, vector<5x32xf32> -> vector<5x32xf32>
    %cst_83 = arith.constant dense<0.000000e+00> : vector<5x32xf32>
    %113 = tpu.matmul %81, %13, %cst_83 {dimension_numbers = #tpu.dot_dimension_numbers<[1], [0], [0], [1], [0, 0, 1, 1], [], []>, precision = #tpu.contract_precision<fp32>} : vector<5x32xf32>, vector<32x32xf32>, vector<5x32xf32> -> vector<5x32xf32>
    %114 = arith.addf %112, %113 : vector<5x32xf32>
    %115 = vector.broadcast %21 : vector<1x32xf32> to vector<5x32xf32>
    %116 = arith.addf %114, %115 : vector<5x32xf32>
    %cst_84 = arith.constant dense<0.000000e+00> : vector<5x32xf32>
    %117 = tpu.matmul %101, %7, %cst_84 {dimension_numbers = #tpu.dot_dimension_numbers<[1], [0], [0], [1], [0, 0, 1, 1], [], []>, precision = #tpu.contract_precision<fp32>} : vector<5x8xf32>, vector<8x32xf32>, vector<5x32xf32> -> vector<5x32xf32>
    %cst_85 = arith.constant dense<0.000000e+00> : vector<5x32xf32>
    %118 = tpu.matmul %81, %15, %cst_85 {dimension_numbers = #tpu.dot_dimension_numbers<[1], [0], [0], [1], [0, 0, 1, 1], [], []>, precision = #tpu.contract_precision<fp32>} : vector<5x32xf32>, vector<32x32xf32>, vector<5x32xf32> -> vector<5x32xf32>
    %119 = arith.addf %117, %118 : vector<5x32xf32>
    %120 = vector.broadcast %23 : vector<1x32xf32> to vector<5x32xf32>
    %121 = arith.addf %119, %120 : vector<5x32xf32>
    %122 = arith.negf %106 : vector<5x32xf32>
    %123 = math.exp %122 : vector<5x32xf32>
    %cst_86 = arith.constant 1.000000e+00 : f32
    %124 = vector.broadcast %cst_86 : f32 to vector<5x32xf32>
    %125 = arith.addf %124, %123 : vector<5x32xf32>
    %126 = arith.divf %124, %125 : vector<5x32xf32>
    %127 = arith.negf %111 : vector<5x32xf32>
    %128 = math.exp %127 : vector<5x32xf32>
    %cst_87 = arith.constant 1.000000e+00 : f32
    %129 = vector.broadcast %cst_87 : f32 to vector<5x32xf32>
    %130 = arith.addf %129, %128 : vector<5x32xf32>
    %131 = arith.divf %129, %130 : vector<5x32xf32>
    %132 = math.tanh %116 : vector<5x32xf32>
    %133 = arith.negf %121 : vector<5x32xf32>
    %134 = math.exp %133 : vector<5x32xf32>
    %cst_88 = arith.constant 1.000000e+00 : f32
    %135 = vector.broadcast %cst_88 : f32 to vector<5x32xf32>
    %136 = arith.addf %135, %134 : vector<5x32xf32>
    %137 = arith.divf %135, %136 : vector<5x32xf32>
    %138 = arith.mulf %131, %79 : vector<5x32xf32>
    %139 = arith.mulf %126, %132 : vector<5x32xf32>
    %140 = arith.addf %138, %139 : vector<5x32xf32>
    %141 = math.tanh %140 : vector<5x32xf32>
    %142 = arith.mulf %137, %141 : vector<5x32xf32>
    %c1_89 = arith.constant 1 : index
    %c0_90 = arith.constant 0 : index
    %c0_91 = arith.constant 0 : index
    %143 = vector.load %arg7[%c1_89, %c0_90, %c0_91] : memref<8x5x32xf32, #tpu.memory_space<vmem>>, vector<1x5x32xf32>
    %144 = vector.shape_cast %143 : vector<1x5x32xf32> to vector<5x32xf32>
    %145 = vector.shape_cast %142 : vector<5x32xf32> to vector<1x5x32xf32>
    tpu.vector_store %arg7[%c1_89, %c0_90, %c0_91], %145 {strides = array<i32>} : memref<8x5x32xf32, #tpu.memory_space<vmem>>, vector<1x5x32xf32>,
    %cst_92 = arith.constant dense<0.000000e+00> : vector<5x16xf32>
    %146 = tpu.matmul %142, %24, %cst_92 {dimension_numbers = #tpu.dot_dimension_numbers<[1], [0], [0], [1], [0, 0, 1, 1], [], []>, precision = #tpu.contract_precision<fp32>} : vector<5x32xf32>, vector<32x16xf32>, vector<5x16xf32> -> vector<5x16xf32>
    %147 = vector.broadcast %30 : vector<1x16xf32> to vector<5x16xf32>
    %148 = arith.addf %146, %147 : vector<5x16xf32>
    %cst_93 = arith.constant 0.000000e+00 : f32
    %149 = vector.broadcast %cst_93 : f32 to vector<5x16xf32>
    %150 = arith.maximumf %148, %149 : vector<5x16xf32>
    %cst_94 = arith.constant dense<0.000000e+00> : vector<5x16xf32>
    %151 = tpu.matmul %150, %25, %cst_94 {dimension_numbers = #tpu.dot_dimension_numbers<[1], [0], [0], [1], [0, 0, 1, 1], [], []>, precision = #tpu.contract_precision<fp32>} : vector<5x16xf32>, vector<16x16xf32>, vector<5x16xf32> -> vector<5x16xf32>
    %152 = vector.broadcast %32 : vector<1x16xf32> to vector<5x16xf32>
    %153 = arith.addf %151, %152 : vector<5x16xf32>
    %154 = vector.extract_strided_slice %153 {offsets = [0, 0], sizes = [5, 8], strides = [1, 1]} : vector<5x16xf32> to vector<5x8xf32>
    %c1_95 = arith.constant 1 : index
    %c0_96 = arith.constant 0 : index
    %c0_97 = arith.constant 0 : index
    %155 = vector.load %arg5[%c1_95, %c0_96, %c0_97] : memref<8x5x8xf32, #tpu.memory_space<vmem>>, vector<1x5x8xf32>
    %156 = vector.shape_cast %155 : vector<1x5x8xf32> to vector<5x8xf32>
    %157 = vector.shape_cast %154 : vector<5x8xf32> to vector<1x5x8xf32>
    tpu.vector_store %arg5[%c1_95, %c0_96, %c0_97], %157 {strides = array<i32>} : memref<8x5x8xf32, #tpu.memory_space<vmem>>, vector<1x5x8xf32>,
    %158 = vector.extract_strided_slice %142 {offsets = [4, 0], sizes = [1, 32], strides = [1, 1]} : vector<5x32xf32> to vector<1x32xf32>
    %c1_98 = arith.constant 1 : index
    %c5_99 = arith.constant 5 : index
    %c0_100 = arith.constant 0 : index
    %159 = vector.load %arg0[%c1_98, %c5_99, %c0_100] : memref<8x6x20xf32, #tpu.memory_space<vmem>>, vector<1x1x20xf32>
    %160 = vector.shape_cast %159 : vector<1x1x20xf32> to vector<1x20xf32>
    %c2_101 = arith.constant 2 : index
    %c0_102 = arith.constant 0 : index
    %c0_103 = arith.constant 0 : index
    %161 = vector.load %arg0[%c2_101, %c0_102, %c0_103] : memref<8x6x20xf32, #tpu.memory_space<vmem>>, vector<1x5x8xf32>
    %162 = vector.shape_cast %161 : vector<1x5x8xf32> to vector<5x8xf32>
    %cst_104 = arith.constant dense<0.000000e+00> : vector<5x32xf32>
    %163 = tpu.matmul %162, %1, %cst_104 {dimension_numbers = #tpu.dot_dimension_numbers<[1], [0], [0], [1], [0, 0, 1, 1], [], []>, precision = #tpu.contract_precision<fp32>} : vector<5x8xf32>, vector<8x32xf32>, vector<5x32xf32> -> vector<5x32xf32>
    %cst_105 = arith.constant dense<0.000000e+00> : vector<5x32xf32>
    %164 = tpu.matmul %142, %9, %cst_105 {dimension_numbers = #tpu.dot_dimension_numbers<[1], [0], [0], [1], [0, 0, 1, 1], [], []>, precision = #tpu.contract_precision<fp32>} : vector<5x32xf32>, vector<32x32xf32>, vector<5x32xf32> -> vector<5x32xf32>
    %165 = arith.addf %163, %164 : vector<5x32xf32>
    %166 = vector.broadcast %17 : vector<1x32xf32> to vector<5x32xf32>
    %167 = arith.addf %165, %166 : vector<5x32xf32>
    %cst_106 = arith.constant dense<0.000000e+00> : vector<5x32xf32>
    %168 = tpu.matmul %162, %3, %cst_106 {dimension_numbers = #tpu.dot_dimension_numbers<[1], [0], [0], [1], [0, 0, 1, 1], [], []>, precision = #tpu.contract_precision<fp32>} : vector<5x8xf32>, vector<8x32xf32>, vector<5x32xf32> -> vector<5x32xf32>
    %cst_107 = arith.constant dense<0.000000e+00> : vector<5x32xf32>
    %169 = tpu.matmul %142, %11, %cst_107 {dimension_numbers = #tpu.dot_dimension_numbers<[1], [0], [0], [1], [0, 0, 1, 1], [], []>, precision = #tpu.contract_precision<fp32>} : vector<5x32xf32>, vector<32x32xf32>, vector<5x32xf32> -> vector<5x32xf32>
    %170 = arith.addf %168, %169 : vector<5x32xf32>
    %171 = vector.broadcast %19 : vector<1x32xf32> to vector<5x32xf32>
    %172 = arith.addf %170, %171 : vector<5x32xf32>
    %cst_108 = arith.constant dense<0.000000e+00> : vector<5x32xf32>
    %173 = tpu.matmul %162, %5, %cst_108 {dimension_numbers = #tpu.dot_dimension_numbers<[1], [0], [0], [1], [0, 0, 1, 1], [], []>, precision = #tpu.contract_precision<fp32>} : vector<5x8xf32>, vector<8x32xf32>, vector<5x32xf32> -> vector<5x32xf32>
    %cst_109 = arith.constant dense<0.000000e+00> : vector<5x32xf32>
    %174 = tpu.matmul %142, %13, %cst_109 {dimension_numbers = #tpu.dot_dimension_numbers<[1], [0], [0], [1], [0, 0, 1, 1], [], []>, precision = #tpu.contract_precision<fp32>} : vector<5x32xf32>, vector<32x32xf32>, vector<5x32xf32> -> vector<5x32xf32>
    %175 = arith.addf %173, %174 : vector<5x32xf32>
    %176 = vector.broadcast %21 : vector<1x32xf32> to vector<5x32xf32>
    %177 = arith.addf %175, %176 : vector<5x32xf32>
    %cst_110 = arith.constant dense<0.000000e+00> : vector<5x32xf32>
    %178 = tpu.matmul %162, %7, %cst_110 {dimension_numbers = #tpu.dot_dimension_numbers<[1], [0], [0], [1], [0, 0, 1, 1], [], []>, precision = #tpu.contract_precision<fp32>} : vector<5x8xf32>, vector<8x32xf32>, vector<5x32xf32> -> vector<5x32xf32>
    %cst_111 = arith.constant dense<0.000000e+00> : vector<5x32xf32>
    %179 = tpu.matmul %142, %15, %cst_111 {dimension_numbers = #tpu.dot_dimension_numbers<[1], [0], [0], [1], [0, 0, 1, 1], [], []>, precision = #tpu.contract_precision<fp32>} : vector<5x32xf32>, vector<32x32xf32>, vector<5x32xf32> -> vector<5x32xf32>
    %180 = arith.addf %178, %179 : vector<5x32xf32>
    %181 = vector.broadcast %23 : vector<1x32xf32> to vector<5x32xf32>
    %182 = arith.addf %180, %181 : vector<5x32xf32>
    %183 = arith.negf %167 : vector<5x32xf32>
    %184 = math.exp %183 : vector<5x32xf32>
    %cst_112 = arith.constant 1.000000e+00 : f32
    %185 = vector.broadcast %cst_112 : f32 to vector<5x32xf32>
    %186 = arith.addf %185, %184 : vector<5x32xf32>
    %187 = arith.divf %185, %186 : vector<5x32xf32>
    %188 = arith.negf %172 : vector<5x32xf32>
    %189 = math.exp %188 : vector<5x32xf32>
    %cst_113 = arith.constant 1.000000e+00 : f32
    %190 = vector.broadcast %cst_113 : f32 to vector<5x32xf32>
    %191 = arith.addf %190, %189 : vector<5x32xf32>
    %192 = arith.divf %190, %191 : vector<5x32xf32>
    %193 = math.tanh %177 : vector<5x32xf32>
    %194 = arith.negf %182 : vector<5x32xf32>
    %195 = math.exp %194 : vector<5x32xf32>
    %cst_114 = arith.constant 1.000000e+00 : f32
    %196 = vector.broadcast %cst_114 : f32 to vector<5x32xf32>
    %197 = arith.addf %196, %195 : vector<5x32xf32>
    %198 = arith.divf %196, %197 : vector<5x32xf32>
    %199 = arith.mulf %192, %140 : vector<5x32xf32>
    %200 = arith.mulf %187, %193 : vector<5x32xf32>
    %201 = arith.addf %199, %200 : vector<5x32xf32>
    %202 = math.tanh %201 : vector<5x32xf32>
    %203 = arith.mulf %198, %202 : vector<5x32xf32>
    %c2_115 = arith.constant 2 : index
    %c0_116 = arith.constant 0 : index
    %c0_117 = arith.constant 0 : index
    %204 = vector.load %arg7[%c2_115, %c0_116, %c0_117] : memref<8x5x32xf32, #tpu.memory_space<vmem>>, vector<1x5x32xf32>
    %205 = vector.shape_cast %204 : vector<1x5x32xf32> to vector<5x32xf32>
    %206 = vector.shape_cast %203 : vector<5x32xf32> to vector<1x5x32xf32>
    tpu.vector_store %arg7[%c2_115, %c0_116, %c0_117], %206 {strides = array<i32>} : memref<8x5x32xf32, #tpu.memory_space<vmem>>, vector<1x5x32xf32>,
    %cst_118 = arith.constant dense<0.000000e+00> : vector<5x16xf32>
    %207 = tpu.matmul %203, %24, %cst_118 {dimension_numbers = #tpu.dot_dimension_numbers<[1], [0], [0], [1], [0, 0, 1, 1], [], []>, precision = #tpu.contract_precision<fp32>} : vector<5x32xf32>, vector<32x16xf32>, vector<5x16xf32> -> vector<5x16xf32>
    %208 = vector.broadcast %30 : vector<1x16xf32> to vector<5x16xf32>
    %209 = arith.addf %207, %208 : vector<5x16xf32>
    %cst_119 = arith.constant 0.000000e+00 : f32
    %210 = vector.broadcast %cst_119 : f32 to vector<5x16xf32>
    %211 = arith.maximumf %209, %210 : vector<5x16xf32>
    %cst_120 = arith.constant dense<0.000000e+00> : vector<5x16xf32>
    %212 = tpu.matmul %211, %25, %cst_120 {dimension_numbers = #tpu.dot_dimension_numbers<[1], [0], [0], [1], [0, 0, 1, 1], [], []>, precision = #tpu.contract_precision<fp32>} : vector<5x16xf32>, vector<16x16xf32>, vector<5x16xf32> -> vector<5x16xf32>
    %213 = vector.broadcast %32 : vector<1x16xf32> to vector<5x16xf32>
    %214 = arith.addf %212, %213 : vector<5x16xf32>
    %215 = vector.extract_strided_slice %214 {offsets = [0, 0], sizes = [5, 8], strides = [1, 1]} : vector<5x16xf32> to vector<5x8xf32>
    %c2_121 = arith.constant 2 : index
    %c0_122 = arith.constant 0 : index
    %c0_123 = arith.constant 0 : index
    %216 = vector.load %arg5[%c2_121, %c0_122, %c0_123] : memref<8x5x8xf32, #tpu.memory_space<vmem>>, vector<1x5x8xf32>
    %217 = vector.shape_cast %216 : vector<1x5x8xf32> to vector<5x8xf32>
    %218 = vector.shape_cast %215 : vector<5x8xf32> to vector<1x5x8xf32>
    tpu.vector_store %arg5[%c2_121, %c0_122, %c0_123], %218 {strides = array<i32>} : memref<8x5x8xf32, #tpu.memory_space<vmem>>, vector<1x5x8xf32>,
    %219 = vector.extract_strided_slice %203 {offsets = [4, 0], sizes = [1, 32], strides = [1, 1]} : vector<5x32xf32> to vector<1x32xf32>
    %c2_124 = arith.constant 2 : index
    %c5_125 = arith.constant 5 : index
    %c0_126 = arith.constant 0 : index
    %220 = vector.load %arg0[%c2_124, %c5_125, %c0_126] : memref<8x6x20xf32, #tpu.memory_space<vmem>>, vector<1x1x20xf32>
    %221 = vector.shape_cast %220 : vector<1x1x20xf32> to vector<1x20xf32>
    %c3_127 = arith.constant 3 : index
    %c0_128 = arith.constant 0 : index
    %c0_129 = arith.constant 0 : index
    %222 = vector.load %arg0[%c3_127, %c0_128, %c0_129] : memref<8x6x20xf32, #tpu.memory_space<vmem>>, vector<1x5x8xf32>
    %223 = vector.shape_cast %222 : vector<1x5x8xf32> to vector<5x8xf32>
    %cst_130 = arith.constant dense<0.000000e+00> : vector<5x32xf32>
    %224 = tpu.matmul %223, %1, %cst_130 {dimension_numbers = #tpu.dot_dimension_numbers<[1], [0], [0], [1], [0, 0, 1, 1], [], []>, precision = #tpu.contract_precision<fp32>} : vector<5x8xf32>, vector<8x32xf32>, vector<5x32xf32> -> vector<5x32xf32>
    %cst_131 = arith.constant dense<0.000000e+00> : vector<5x32xf32>
    %225 = tpu.matmul %203, %9, %cst_131 {dimension_numbers = #tpu.dot_dimension_numbers<[1], [0], [0], [1], [0, 0, 1, 1], [], []>, precision = #tpu.contract_precision<fp32>} : vector<5x32xf32>, vector<32x32xf32>, vector<5x32xf32> -> vector<5x32xf32>
    %226 = arith.addf %224, %225 : vector<5x32xf32>
    %227 = vector.broadcast %17 : vector<1x32xf32> to vector<5x32xf32>
    %228 = arith.addf %226, %227 : vector<5x32xf32>
    %cst_132 = arith.constant dense<0.000000e+00> : vector<5x32xf32>
    %229 = tpu.matmul %223, %3, %cst_132 {dimension_numbers = #tpu.dot_dimension_numbers<[1], [0], [0], [1], [0, 0, 1, 1], [], []>, precision = #tpu.contract_precision<fp32>} : vector<5x8xf32>, vector<8x32xf32>, vector<5x32xf32> -> vector<5x32xf32>
    %cst_133 = arith.constant dense<0.000000e+00> : vector<5x32xf32>
    %230 = tpu.matmul %203, %11, %cst_133 {dimension_numbers = #tpu.dot_dimension_numbers<[1], [0], [0], [1], [0, 0, 1, 1], [], []>, precision = #tpu.contract_precision<fp32>} : vector<5x32xf32>, vector<32x32xf32>, vector<5x32xf32> -> vector<5x32xf32>
    %231 = arith.addf %229, %230 : vector<5x32xf32>
    %232 = vector.broadcast %19 : vector<1x32xf32> to vector<5x32xf32>
    %233 = arith.addf %231, %232 : vector<5x32xf32>
    %cst_134 = arith.constant dense<0.000000e+00> : vector<5x32xf32>
    %234 = tpu.matmul %223, %5, %cst_134 {dimension_numbers = #tpu.dot_dimension_numbers<[1], [0], [0], [1], [0, 0, 1, 1], [], []>, precision = #tpu.contract_precision<fp32>} : vector<5x8xf32>, vector<8x32xf32>, vector<5x32xf32> -> vector<5x32xf32>
    %cst_135 = arith.constant dense<0.000000e+00> : vector<5x32xf32>
    %235 = tpu.matmul %203, %13, %cst_135 {dimension_numbers = #tpu.dot_dimension_numbers<[1], [0], [0], [1], [0, 0, 1, 1], [], []>, precision = #tpu.contract_precision<fp32>} : vector<5x32xf32>, vector<32x32xf32>, vector<5x32xf32> -> vector<5x32xf32>
    %236 = arith.addf %234, %235 : vector<5x32xf32>
    %237 = vector.broadcast %21 : vector<1x32xf32> to vector<5x32xf32>
    %238 = arith.addf %236, %237 : vector<5x32xf32>
    %cst_136 = arith.constant dense<0.000000e+00> : vector<5x32xf32>
    %239 = tpu.matmul %223, %7, %cst_136 {dimension_numbers = #tpu.dot_dimension_numbers<[1], [0], [0], [1], [0, 0, 1, 1], [], []>, precision = #tpu.contract_precision<fp32>} : vector<5x8xf32>, vector<8x32xf32>, vector<5x32xf32> -> vector<5x32xf32>
    %cst_137 = arith.constant dense<0.000000e+00> : vector<5x32xf32>
    %240 = tpu.matmul %203, %15, %cst_137 {dimension_numbers = #tpu.dot_dimension_numbers<[1], [0], [0], [1], [0, 0, 1, 1], [], []>, precision = #tpu.contract_precision<fp32>} : vector<5x32xf32>, vector<32x32xf32>, vector<5x32xf32> -> vector<5x32xf32>
    %241 = arith.addf %239, %240 : vector<5x32xf32>
    %242 = vector.broadcast %23 : vector<1x32xf32> to vector<5x32xf32>
    %243 = arith.addf %241, %242 : vector<5x32xf32>
    %244 = arith.negf %228 : vector<5x32xf32>
    %245 = math.exp %244 : vector<5x32xf32>
    %cst_138 = arith.constant 1.000000e+00 : f32
    %246 = vector.broadcast %cst_138 : f32 to vector<5x32xf32>
    %247 = arith.addf %246, %245 : vector<5x32xf32>
    %248 = arith.divf %246, %247 : vector<5x32xf32>
    %249 = arith.negf %233 : vector<5x32xf32>
    %250 = math.exp %249 : vector<5x32xf32>
    %cst_139 = arith.constant 1.000000e+00 : f32
    %251 = vector.broadcast %cst_139 : f32 to vector<5x32xf32>
    %252 = arith.addf %251, %250 : vector<5x32xf32>
    %253 = arith.divf %251, %252 : vector<5x32xf32>
    %254 = math.tanh %238 : vector<5x32xf32>
    %255 = arith.negf %243 : vector<5x32xf32>
    %256 = math.exp %255 : vector<5x32xf32>
    %cst_140 = arith.constant 1.000000e+00 : f32
    %257 = vector.broadcast %cst_140 : f32 to vector<5x32xf32>
    %258 = arith.addf %257, %256 : vector<5x32xf32>
    %259 = arith.divf %257, %258 : vector<5x32xf32>
    %260 = arith.mulf %253, %201 : vector<5x32xf32>
    %261 = arith.mulf %248, %254 : vector<5x32xf32>
    %262 = arith.addf %260, %261 : vector<5x32xf32>
    %263 = math.tanh %262 : vector<5x32xf32>
    %264 = arith.mulf %259, %263 : vector<5x32xf32>
    %c3_141 = arith.constant 3 : index
    %c0_142 = arith.constant 0 : index
    %c0_143 = arith.constant 0 : index
    %265 = vector.load %arg7[%c3_141, %c0_142, %c0_143] : memref<8x5x32xf32, #tpu.memory_space<vmem>>, vector<1x5x32xf32>
    %266 = vector.shape_cast %265 : vector<1x5x32xf32> to vector<5x32xf32>
    %267 = vector.shape_cast %264 : vector<5x32xf32> to vector<1x5x32xf32>
    tpu.vector_store %arg7[%c3_141, %c0_142, %c0_143], %267 {strides = array<i32>} : memref<8x5x32xf32, #tpu.memory_space<vmem>>, vector<1x5x32xf32>,
    %cst_144 = arith.constant dense<0.000000e+00> : vector<5x16xf32>
    %268 = tpu.matmul %264, %24, %cst_144 {dimension_numbers = #tpu.dot_dimension_numbers<[1], [0], [0], [1], [0, 0, 1, 1], [], []>, precision = #tpu.contract_precision<fp32>} : vector<5x32xf32>, vector<32x16xf32>, vector<5x16xf32> -> vector<5x16xf32>
    %269 = vector.broadcast %30 : vector<1x16xf32> to vector<5x16xf32>
    %270 = arith.addf %268, %269 : vector<5x16xf32>
    %cst_145 = arith.constant 0.000000e+00 : f32
    %271 = vector.broadcast %cst_145 : f32 to vector<5x16xf32>
    %272 = arith.maximumf %270, %271 : vector<5x16xf32>
    %cst_146 = arith.constant dense<0.000000e+00> : vector<5x16xf32>
    %273 = tpu.matmul %272, %25, %cst_146 {dimension_numbers = #tpu.dot_dimension_numbers<[1], [0], [0], [1], [0, 0, 1, 1], [], []>, precision = #tpu.contract_precision<fp32>} : vector<5x16xf32>, vector<16x16xf32>, vector<5x16xf32> -> vector<5x16xf32>
    %274 = vector.broadcast %32 : vector<1x16xf32> to vector<5x16xf32>
    %275 = arith.addf %273, %274 : vector<5x16xf32>
    %276 = vector.extract_strided_slice %275 {offsets = [0, 0], sizes = [5, 8], strides = [1, 1]} : vector<5x16xf32> to vector<5x8xf32>
    %c3_147 = arith.constant 3 : index
    %c0_148 = arith.constant 0 : index
    %c0_149 = arith.constant 0 : index
    %277 = vector.load %arg5[%c3_147, %c0_148, %c0_149] : memref<8x5x8xf32, #tpu.memory_space<vmem>>, vector<1x5x8xf32>
    %278 = vector.shape_cast %277 : vector<1x5x8xf32> to vector<5x8xf32>
    %279 = vector.shape_cast %276 : vector<5x8xf32> to vector<1x5x8xf32>
    tpu.vector_store %arg5[%c3_147, %c0_148, %c0_149], %279 {strides = array<i32>} : memref<8x5x8xf32, #tpu.memory_space<vmem>>, vector<1x5x8xf32>,
    %280 = vector.extract_strided_slice %264 {offsets = [4, 0], sizes = [1, 32], strides = [1, 1]} : vector<5x32xf32> to vector<1x32xf32>
    %c3_150 = arith.constant 3 : index
    %c5_151 = arith.constant 5 : index
    %c0_152 = arith.constant 0 : index
    %281 = vector.load %arg0[%c3_150, %c5_151, %c0_152] : memref<8x6x20xf32, #tpu.memory_space<vmem>>, vector<1x1x20xf32>
    %282 = vector.shape_cast %281 : vector<1x1x20xf32> to vector<1x20xf32>
    %c4 = arith.constant 4 : index
    %c0_153 = arith.constant 0 : index
    %c0_154 = arith.constant 0 : index
    %283 = vector.load %arg0[%c4, %c0_153, %c0_154] : memref<8x6x20xf32, #tpu.memory_space<vmem>>, vector<1x5x8xf32>
    %284 = vector.shape_cast %283 : vector<1x5x8xf32> to vector<5x8xf32>
    %cst_155 = arith.constant dense<0.000000e+00> : vector<5x32xf32>
    %285 = tpu.matmul %284, %1, %cst_155 {dimension_numbers = #tpu.dot_dimension_numbers<[1], [0], [0], [1], [0, 0, 1, 1], [], []>, precision = #tpu.contract_precision<fp32>} : vector<5x8xf32>, vector<8x32xf32>, vector<5x32xf32> -> vector<5x32xf32>
    %cst_156 = arith.constant dense<0.000000e+00> : vector<5x32xf32>
    %286 = tpu.matmul %264, %9, %cst_156 {dimension_numbers = #tpu.dot_dimension_numbers<[1], [0], [0], [1], [0, 0, 1, 1], [], []>, precision = #tpu.contract_precision<fp32>} : vector<5x32xf32>, vector<32x32xf32>, vector<5x32xf32> -> vector<5x32xf32>
    %287 = arith.addf %285, %286 : vector<5x32xf32>
    %288 = vector.broadcast %17 : vector<1x32xf32> to vector<5x32xf32>
    %289 = arith.addf %287, %288 : vector<5x32xf32>
    %cst_157 = arith.constant dense<0.000000e+00> : vector<5x32xf32>
    %290 = tpu.matmul %284, %3, %cst_157 {dimension_numbers = #tpu.dot_dimension_numbers<[1], [0], [0], [1], [0, 0, 1, 1], [], []>, precision = #tpu.contract_precision<fp32>} : vector<5x8xf32>, vector<8x32xf32>, vector<5x32xf32> -> vector<5x32xf32>
    %cst_158 = arith.constant dense<0.000000e+00> : vector<5x32xf32>
    %291 = tpu.matmul %264, %11, %cst_158 {dimension_numbers = #tpu.dot_dimension_numbers<[1], [0], [0], [1], [0, 0, 1, 1], [], []>, precision = #tpu.contract_precision<fp32>} : vector<5x32xf32>, vector<32x32xf32>, vector<5x32xf32> -> vector<5x32xf32>
    %292 = arith.addf %290, %291 : vector<5x32xf32>
    %293 = vector.broadcast %19 : vector<1x32xf32> to vector<5x32xf32>
    %294 = arith.addf %292, %293 : vector<5x32xf32>
    %cst_159 = arith.constant dense<0.000000e+00> : vector<5x32xf32>
    %295 = tpu.matmul %284, %5, %cst_159 {dimension_numbers = #tpu.dot_dimension_numbers<[1], [0], [0], [1], [0, 0, 1, 1], [], []>, precision = #tpu.contract_precision<fp32>} : vector<5x8xf32>, vector<8x32xf32>, vector<5x32xf32> -> vector<5x32xf32>
    %cst_160 = arith.constant dense<0.000000e+00> : vector<5x32xf32>
    %296 = tpu.matmul %264, %13, %cst_160 {dimension_numbers = #tpu.dot_dimension_numbers<[1], [0], [0], [1], [0, 0, 1, 1], [], []>, precision = #tpu.contract_precision<fp32>} : vector<5x32xf32>, vector<32x32xf32>, vector<5x32xf32> -> vector<5x32xf32>
    %297 = arith.addf %295, %296 : vector<5x32xf32>
    %298 = vector.broadcast %21 : vector<1x32xf32> to vector<5x32xf32>
    %299 = arith.addf %297, %298 : vector<5x32xf32>
    %cst_161 = arith.constant dense<0.000000e+00> : vector<5x32xf32>
    %300 = tpu.matmul %284, %7, %cst_161 {dimension_numbers = #tpu.dot_dimension_numbers<[1], [0], [0], [1], [0, 0, 1, 1], [], []>, precision = #tpu.contract_precision<fp32>} : vector<5x8xf32>, vector<8x32xf32>, vector<5x32xf32> -> vector<5x32xf32>
    %cst_162 = arith.constant dense<0.000000e+00> : vector<5x32xf32>
    %301 = tpu.matmul %264, %15, %cst_162 {dimension_numbers = #tpu.dot_dimension_numbers<[1], [0], [0], [1], [0, 0, 1, 1], [], []>, precision = #tpu.contract_precision<fp32>} : vector<5x32xf32>, vector<32x32xf32>, vector<5x32xf32> -> vector<5x32xf32>
    %302 = arith.addf %300, %301 : vector<5x32xf32>
    %303 = vector.broadcast %23 : vector<1x32xf32> to vector<5x32xf32>
    %304 = arith.addf %302, %303 : vector<5x32xf32>
    %305 = arith.negf %289 : vector<5x32xf32>
    %306 = math.exp %305 : vector<5x32xf32>
    %cst_163 = arith.constant 1.000000e+00 : f32
    %307 = vector.broadcast %cst_163 : f32 to vector<5x32xf32>
    %308 = arith.addf %307, %306 : vector<5x32xf32>
    %309 = arith.divf %307, %308 : vector<5x32xf32>
    %310 = arith.negf %294 : vector<5x32xf32>
    %311 = math.exp %310 : vector<5x32xf32>
    %cst_164 = arith.constant 1.000000e+00 : f32
    %312 = vector.broadcast %cst_164 : f32 to vector<5x32xf32>
    %313 = arith.addf %312, %311 : vector<5x32xf32>
    %314 = arith.divf %312, %313 : vector<5x32xf32>
    %315 = math.tanh %299 : vector<5x32xf32>
    %316 = arith.negf %304 : vector<5x32xf32>
    %317 = math.exp %316 : vector<5x32xf32>
    %cst_165 = arith.constant 1.000000e+00 : f32
    %318 = vector.broadcast %cst_165 : f32 to vector<5x32xf32>
    %319 = arith.addf %318, %317 : vector<5x32xf32>
    %320 = arith.divf %318, %319 : vector<5x32xf32>
    %321 = arith.mulf %314, %262 : vector<5x32xf32>
    %322 = arith.mulf %309, %315 : vector<5x32xf32>
    %323 = arith.addf %321, %322 : vector<5x32xf32>
    %324 = math.tanh %323 : vector<5x32xf32>
    %325 = arith.mulf %320, %324 : vector<5x32xf32>
    %c4_166 = arith.constant 4 : index
    %c0_167 = arith.constant 0 : index
    %c0_168 = arith.constant 0 : index
    %326 = vector.load %arg7[%c4_166, %c0_167, %c0_168] : memref<8x5x32xf32, #tpu.memory_space<vmem>>, vector<1x5x32xf32>
    %327 = vector.shape_cast %326 : vector<1x5x32xf32> to vector<5x32xf32>
    %328 = vector.shape_cast %325 : vector<5x32xf32> to vector<1x5x32xf32>
    tpu.vector_store %arg7[%c4_166, %c0_167, %c0_168], %328 {strides = array<i32>} : memref<8x5x32xf32, #tpu.memory_space<vmem>>, vector<1x5x32xf32>,
    %cst_169 = arith.constant dense<0.000000e+00> : vector<5x16xf32>
    %329 = tpu.matmul %325, %24, %cst_169 {dimension_numbers = #tpu.dot_dimension_numbers<[1], [0], [0], [1], [0, 0, 1, 1], [], []>, precision = #tpu.contract_precision<fp32>} : vector<5x32xf32>, vector<32x16xf32>, vector<5x16xf32> -> vector<5x16xf32>
    %330 = vector.broadcast %30 : vector<1x16xf32> to vector<5x16xf32>
    %331 = arith.addf %329, %330 : vector<5x16xf32>
    %cst_170 = arith.constant 0.000000e+00 : f32
    %332 = vector.broadcast %cst_170 : f32 to vector<5x16xf32>
    %333 = arith.maximumf %331, %332 : vector<5x16xf32>
    %cst_171 = arith.constant dense<0.000000e+00> : vector<5x16xf32>
    %334 = tpu.matmul %333, %25, %cst_171 {dimension_numbers = #tpu.dot_dimension_numbers<[1], [0], [0], [1], [0, 0, 1, 1], [], []>, precision = #tpu.contract_precision<fp32>} : vector<5x16xf32>, vector<16x16xf32>, vector<5x16xf32> -> vector<5x16xf32>
    %335 = vector.broadcast %32 : vector<1x16xf32> to vector<5x16xf32>
    %336 = arith.addf %334, %335 : vector<5x16xf32>
    %337 = vector.extract_strided_slice %336 {offsets = [0, 0], sizes = [5, 8], strides = [1, 1]} : vector<5x16xf32> to vector<5x8xf32>
    %c4_172 = arith.constant 4 : index
    %c0_173 = arith.constant 0 : index
    %c0_174 = arith.constant 0 : index
    %338 = vector.load %arg5[%c4_172, %c0_173, %c0_174] : memref<8x5x8xf32, #tpu.memory_space<vmem>>, vector<1x5x8xf32>
    %339 = vector.shape_cast %338 : vector<1x5x8xf32> to vector<5x8xf32>
    %340 = vector.shape_cast %337 : vector<5x8xf32> to vector<1x5x8xf32>
    tpu.vector_store %arg5[%c4_172, %c0_173, %c0_174], %340 {strides = array<i32>} : memref<8x5x8xf32, #tpu.memory_space<vmem>>, vector<1x5x8xf32>,
    %341 = vector.extract_strided_slice %325 {offsets = [4, 0], sizes = [1, 32], strides = [1, 1]} : vector<5x32xf32> to vector<1x32xf32>
    %c4_175 = arith.constant 4 : index
    %c5_176 = arith.constant 5 : index
    %c0_177 = arith.constant 0 : index
    %342 = vector.load %arg0[%c4_175, %c5_176, %c0_177] : memref<8x6x20xf32, #tpu.memory_space<vmem>>, vector<1x1x20xf32>
    %343 = vector.shape_cast %342 : vector<1x1x20xf32> to vector<1x20xf32>
    %c5_178 = arith.constant 5 : index
    %c0_179 = arith.constant 0 : index
    %c0_180 = arith.constant 0 : index
    %344 = vector.load %arg0[%c5_178, %c0_179, %c0_180] : memref<8x6x20xf32, #tpu.memory_space<vmem>>, vector<1x5x8xf32>
    %345 = vector.shape_cast %344 : vector<1x5x8xf32> to vector<5x8xf32>
    %cst_181 = arith.constant dense<0.000000e+00> : vector<5x32xf32>
    %346 = tpu.matmul %345, %1, %cst_181 {dimension_numbers = #tpu.dot_dimension_numbers<[1], [0], [0], [1], [0, 0, 1, 1], [], []>, precision = #tpu.contract_precision<fp32>} : vector<5x8xf32>, vector<8x32xf32>, vector<5x32xf32> -> vector<5x32xf32>
    %cst_182 = arith.constant dense<0.000000e+00> : vector<5x32xf32>
    %347 = tpu.matmul %325, %9, %cst_182 {dimension_numbers = #tpu.dot_dimension_numbers<[1], [0], [0], [1], [0, 0, 1, 1], [], []>, precision = #tpu.contract_precision<fp32>} : vector<5x32xf32>, vector<32x32xf32>, vector<5x32xf32> -> vector<5x32xf32>
    %348 = arith.addf %346, %347 : vector<5x32xf32>
    %349 = vector.broadcast %17 : vector<1x32xf32> to vector<5x32xf32>
    %350 = arith.addf %348, %349 : vector<5x32xf32>
    %cst_183 = arith.constant dense<0.000000e+00> : vector<5x32xf32>
    %351 = tpu.matmul %345, %3, %cst_183 {dimension_numbers = #tpu.dot_dimension_numbers<[1], [0], [0], [1], [0, 0, 1, 1], [], []>, precision = #tpu.contract_precision<fp32>} : vector<5x8xf32>, vector<8x32xf32>, vector<5x32xf32> -> vector<5x32xf32>
    %cst_184 = arith.constant dense<0.000000e+00> : vector<5x32xf32>
    %352 = tpu.matmul %325, %11, %cst_184 {dimension_numbers = #tpu.dot_dimension_numbers<[1], [0], [0], [1], [0, 0, 1, 1], [], []>, precision = #tpu.contract_precision<fp32>} : vector<5x32xf32>, vector<32x32xf32>, vector<5x32xf32> -> vector<5x32xf32>
    %353 = arith.addf %351, %352 : vector<5x32xf32>
    %354 = vector.broadcast %19 : vector<1x32xf32> to vector<5x32xf32>
    %355 = arith.addf %353, %354 : vector<5x32xf32>
    %cst_185 = arith.constant dense<0.000000e+00> : vector<5x32xf32>
    %356 = tpu.matmul %345, %5, %cst_185 {dimension_numbers = #tpu.dot_dimension_numbers<[1], [0], [0], [1], [0, 0, 1, 1], [], []>, precision = #tpu.contract_precision<fp32>} : vector<5x8xf32>, vector<8x32xf32>, vector<5x32xf32> -> vector<5x32xf32>
    %cst_186 = arith.constant dense<0.000000e+00> : vector<5x32xf32>
    %357 = tpu.matmul %325, %13, %cst_186 {dimension_numbers = #tpu.dot_dimension_numbers<[1], [0], [0], [1], [0, 0, 1, 1], [], []>, precision = #tpu.contract_precision<fp32>} : vector<5x32xf32>, vector<32x32xf32>, vector<5x32xf32> -> vector<5x32xf32>
    %358 = arith.addf %356, %357 : vector<5x32xf32>
    %359 = vector.broadcast %21 : vector<1x32xf32> to vector<5x32xf32>
    %360 = arith.addf %358, %359 : vector<5x32xf32>
    %cst_187 = arith.constant dense<0.000000e+00> : vector<5x32xf32>
    %361 = tpu.matmul %345, %7, %cst_187 {dimension_numbers = #tpu.dot_dimension_numbers<[1], [0], [0], [1], [0, 0, 1, 1], [], []>, precision = #tpu.contract_precision<fp32>} : vector<5x8xf32>, vector<8x32xf32>, vector<5x32xf32> -> vector<5x32xf32>
    %cst_188 = arith.constant dense<0.000000e+00> : vector<5x32xf32>
    %362 = tpu.matmul %325, %15, %cst_188 {dimension_numbers = #tpu.dot_dimension_numbers<[1], [0], [0], [1], [0, 0, 1, 1], [], []>, precision = #tpu.contract_precision<fp32>} : vector<5x32xf32>, vector<32x32xf32>, vector<5x32xf32> -> vector<5x32xf32>
    %363 = arith.addf %361, %362 : vector<5x32xf32>
    %364 = vector.broadcast %23 : vector<1x32xf32> to vector<5x32xf32>
    %365 = arith.addf %363, %364 : vector<5x32xf32>
    %366 = arith.negf %350 : vector<5x32xf32>
    %367 = math.exp %366 : vector<5x32xf32>
    %cst_189 = arith.constant 1.000000e+00 : f32
    %368 = vector.broadcast %cst_189 : f32 to vector<5x32xf32>
    %369 = arith.addf %368, %367 : vector<5x32xf32>
    %370 = arith.divf %368, %369 : vector<5x32xf32>
    %371 = arith.negf %355 : vector<5x32xf32>
    %372 = math.exp %371 : vector<5x32xf32>
    %cst_190 = arith.constant 1.000000e+00 : f32
    %373 = vector.broadcast %cst_190 : f32 to vector<5x32xf32>
    %374 = arith.addf %373, %372 : vector<5x32xf32>
    %375 = arith.divf %373, %374 : vector<5x32xf32>
    %376 = math.tanh %360 : vector<5x32xf32>
    %377 = arith.negf %365 : vector<5x32xf32>
    %378 = math.exp %377 : vector<5x32xf32>
    %cst_191 = arith.constant 1.000000e+00 : f32
    %379 = vector.broadcast %cst_191 : f32 to vector<5x32xf32>
    %380 = arith.addf %379, %378 : vector<5x32xf32>
    %381 = arith.divf %379, %380 : vector<5x32xf32>
    %382 = arith.mulf %375, %323 : vector<5x32xf32>
    %383 = arith.mulf %370, %376 : vector<5x32xf32>
    %384 = arith.addf %382, %383 : vector<5x32xf32>
    %385 = math.tanh %384 : vector<5x32xf32>
    %386 = arith.mulf %381, %385 : vector<5x32xf32>
    %c5_192 = arith.constant 5 : index
    %c0_193 = arith.constant 0 : index
    %c0_194 = arith.constant 0 : index
    %387 = vector.load %arg7[%c5_192, %c0_193, %c0_194] : memref<8x5x32xf32, #tpu.memory_space<vmem>>, vector<1x5x32xf32>
    %388 = vector.shape_cast %387 : vector<1x5x32xf32> to vector<5x32xf32>
    %389 = vector.shape_cast %386 : vector<5x32xf32> to vector<1x5x32xf32>
    tpu.vector_store %arg7[%c5_192, %c0_193, %c0_194], %389 {strides = array<i32>} : memref<8x5x32xf32, #tpu.memory_space<vmem>>, vector<1x5x32xf32>,
    %cst_195 = arith.constant dense<0.000000e+00> : vector<5x16xf32>
    %390 = tpu.matmul %386, %24, %cst_195 {dimension_numbers = #tpu.dot_dimension_numbers<[1], [0], [0], [1], [0, 0, 1, 1], [], []>, precision = #tpu.contract_precision<fp32>} : vector<5x32xf32>, vector<32x16xf32>, vector<5x16xf32> -> vector<5x16xf32>
    %391 = vector.broadcast %30 : vector<1x16xf32> to vector<5x16xf32>
    %392 = arith.addf %390, %391 : vector<5x16xf32>
    %cst_196 = arith.constant 0.000000e+00 : f32
    %393 = vector.broadcast %cst_196 : f32 to vector<5x16xf32>
    %394 = arith.maximumf %392, %393 : vector<5x16xf32>
    %cst_197 = arith.constant dense<0.000000e+00> : vector<5x16xf32>
    %395 = tpu.matmul %394, %25, %cst_197 {dimension_numbers = #tpu.dot_dimension_numbers<[1], [0], [0], [1], [0, 0, 1, 1], [], []>, precision = #tpu.contract_precision<fp32>} : vector<5x16xf32>, vector<16x16xf32>, vector<5x16xf32> -> vector<5x16xf32>
    %396 = vector.broadcast %32 : vector<1x16xf32> to vector<5x16xf32>
    %397 = arith.addf %395, %396 : vector<5x16xf32>
    %398 = vector.extract_strided_slice %397 {offsets = [0, 0], sizes = [5, 8], strides = [1, 1]} : vector<5x16xf32> to vector<5x8xf32>
    %c5_198 = arith.constant 5 : index
    %c0_199 = arith.constant 0 : index
    %c0_200 = arith.constant 0 : index
    %399 = vector.load %arg5[%c5_198, %c0_199, %c0_200] : memref<8x5x8xf32, #tpu.memory_space<vmem>>, vector<1x5x8xf32>
    %400 = vector.shape_cast %399 : vector<1x5x8xf32> to vector<5x8xf32>
    %401 = vector.shape_cast %398 : vector<5x8xf32> to vector<1x5x8xf32>
    tpu.vector_store %arg5[%c5_198, %c0_199, %c0_200], %401 {strides = array<i32>} : memref<8x5x8xf32, #tpu.memory_space<vmem>>, vector<1x5x8xf32>,
    %402 = vector.extract_strided_slice %386 {offsets = [4, 0], sizes = [1, 32], strides = [1, 1]} : vector<5x32xf32> to vector<1x32xf32>
    %c5_201 = arith.constant 5 : index
    %c5_202 = arith.constant 5 : index
    %c0_203 = arith.constant 0 : index
    %403 = vector.load %arg0[%c5_201, %c5_202, %c0_203] : memref<8x6x20xf32, #tpu.memory_space<vmem>>, vector<1x1x20xf32>
    %404 = vector.shape_cast %403 : vector<1x1x20xf32> to vector<1x20xf32>
    %c6 = arith.constant 6 : index
    %c0_204 = arith.constant 0 : index
    %c0_205 = arith.constant 0 : index
    %405 = vector.load %arg0[%c6, %c0_204, %c0_205] : memref<8x6x20xf32, #tpu.memory_space<vmem>>, vector<1x5x8xf32>
    %406 = vector.shape_cast %405 : vector<1x5x8xf32> to vector<5x8xf32>
    %cst_206 = arith.constant dense<0.000000e+00> : vector<5x32xf32>
    %407 = tpu.matmul %406, %1, %cst_206 {dimension_numbers = #tpu.dot_dimension_numbers<[1], [0], [0], [1], [0, 0, 1, 1], [], []>, precision = #tpu.contract_precision<fp32>} : vector<5x8xf32>, vector<8x32xf32>, vector<5x32xf32> -> vector<5x32xf32>
    %cst_207 = arith.constant dense<0.000000e+00> : vector<5x32xf32>
    %408 = tpu.matmul %386, %9, %cst_207 {dimension_numbers = #tpu.dot_dimension_numbers<[1], [0], [0], [1], [0, 0, 1, 1], [], []>, precision = #tpu.contract_precision<fp32>} : vector<5x32xf32>, vector<32x32xf32>, vector<5x32xf32> -> vector<5x32xf32>
    %409 = arith.addf %407, %408 : vector<5x32xf32>
    %410 = vector.broadcast %17 : vector<1x32xf32> to vector<5x32xf32>
    %411 = arith.addf %409, %410 : vector<5x32xf32>
    %cst_208 = arith.constant dense<0.000000e+00> : vector<5x32xf32>
    %412 = tpu.matmul %406, %3, %cst_208 {dimension_numbers = #tpu.dot_dimension_numbers<[1], [0], [0], [1], [0, 0, 1, 1], [], []>, precision = #tpu.contract_precision<fp32>} : vector<5x8xf32>, vector<8x32xf32>, vector<5x32xf32> -> vector<5x32xf32>
    %cst_209 = arith.constant dense<0.000000e+00> : vector<5x32xf32>
    %413 = tpu.matmul %386, %11, %cst_209 {dimension_numbers = #tpu.dot_dimension_numbers<[1], [0], [0], [1], [0, 0, 1, 1], [], []>, precision = #tpu.contract_precision<fp32>} : vector<5x32xf32>, vector<32x32xf32>, vector<5x32xf32> -> vector<5x32xf32>
    %414 = arith.addf %412, %413 : vector<5x32xf32>
    %415 = vector.broadcast %19 : vector<1x32xf32> to vector<5x32xf32>
    %416 = arith.addf %414, %415 : vector<5x32xf32>
    %cst_210 = arith.constant dense<0.000000e+00> : vector<5x32xf32>
    %417 = tpu.matmul %406, %5, %cst_210 {dimension_numbers = #tpu.dot_dimension_numbers<[1], [0], [0], [1], [0, 0, 1, 1], [], []>, precision = #tpu.contract_precision<fp32>} : vector<5x8xf32>, vector<8x32xf32>, vector<5x32xf32> -> vector<5x32xf32>
    %cst_211 = arith.constant dense<0.000000e+00> : vector<5x32xf32>
    %418 = tpu.matmul %386, %13, %cst_211 {dimension_numbers = #tpu.dot_dimension_numbers<[1], [0], [0], [1], [0, 0, 1, 1], [], []>, precision = #tpu.contract_precision<fp32>} : vector<5x32xf32>, vector<32x32xf32>, vector<5x32xf32> -> vector<5x32xf32>
    %419 = arith.addf %417, %418 : vector<5x32xf32>
    %420 = vector.broadcast %21 : vector<1x32xf32> to vector<5x32xf32>
    %421 = arith.addf %419, %420 : vector<5x32xf32>
    %cst_212 = arith.constant dense<0.000000e+00> : vector<5x32xf32>
    %422 = tpu.matmul %406, %7, %cst_212 {dimension_numbers = #tpu.dot_dimension_numbers<[1], [0], [0], [1], [0, 0, 1, 1], [], []>, precision = #tpu.contract_precision<fp32>} : vector<5x8xf32>, vector<8x32xf32>, vector<5x32xf32> -> vector<5x32xf32>
    %cst_213 = arith.constant dense<0.000000e+00> : vector<5x32xf32>
    %423 = tpu.matmul %386, %15, %cst_213 {dimension_numbers = #tpu.dot_dimension_numbers<[1], [0], [0], [1], [0, 0, 1, 1], [], []>, precision = #tpu.contract_precision<fp32>} : vector<5x32xf32>, vector<32x32xf32>, vector<5x32xf32> -> vector<5x32xf32>
    %424 = arith.addf %422, %423 : vector<5x32xf32>
    %425 = vector.broadcast %23 : vector<1x32xf32> to vector<5x32xf32>
    %426 = arith.addf %424, %425 : vector<5x32xf32>
    %427 = arith.negf %411 : vector<5x32xf32>
    %428 = math.exp %427 : vector<5x32xf32>
    %cst_214 = arith.constant 1.000000e+00 : f32
    %429 = vector.broadcast %cst_214 : f32 to vector<5x32xf32>
    %430 = arith.addf %429, %428 : vector<5x32xf32>
    %431 = arith.divf %429, %430 : vector<5x32xf32>
    %432 = arith.negf %416 : vector<5x32xf32>
    %433 = math.exp %432 : vector<5x32xf32>
    %cst_215 = arith.constant 1.000000e+00 : f32
    %434 = vector.broadcast %cst_215 : f32 to vector<5x32xf32>
    %435 = arith.addf %434, %433 : vector<5x32xf32>
    %436 = arith.divf %434, %435 : vector<5x32xf32>
    %437 = math.tanh %421 : vector<5x32xf32>
    %438 = arith.negf %426 : vector<5x32xf32>
    %439 = math.exp %438 : vector<5x32xf32>
    %cst_216 = arith.constant 1.000000e+00 : f32
    %440 = vector.broadcast %cst_216 : f32 to vector<5x32xf32>
    %441 = arith.addf %440, %439 : vector<5x32xf32>
    %442 = arith.divf %440, %441 : vector<5x32xf32>
    %443 = arith.mulf %436, %384 : vector<5x32xf32>
    %444 = arith.mulf %431, %437 : vector<5x32xf32>
    %445 = arith.addf %443, %444 : vector<5x32xf32>
    %446 = math.tanh %445 : vector<5x32xf32>
    %447 = arith.mulf %442, %446 : vector<5x32xf32>
    %c6_217 = arith.constant 6 : index
    %c0_218 = arith.constant 0 : index
    %c0_219 = arith.constant 0 : index
    %448 = vector.load %arg7[%c6_217, %c0_218, %c0_219] : memref<8x5x32xf32, #tpu.memory_space<vmem>>, vector<1x5x32xf32>
    %449 = vector.shape_cast %448 : vector<1x5x32xf32> to vector<5x32xf32>
    %450 = vector.shape_cast %447 : vector<5x32xf32> to vector<1x5x32xf32>
    tpu.vector_store %arg7[%c6_217, %c0_218, %c0_219], %450 {strides = array<i32>} : memref<8x5x32xf32, #tpu.memory_space<vmem>>, vector<1x5x32xf32>,
    %cst_220 = arith.constant dense<0.000000e+00> : vector<5x16xf32>
    %451 = tpu.matmul %447, %24, %cst_220 {dimension_numbers = #tpu.dot_dimension_numbers<[1], [0], [0], [1], [0, 0, 1, 1], [], []>, precision = #tpu.contract_precision<fp32>} : vector<5x32xf32>, vector<32x16xf32>, vector<5x16xf32> -> vector<5x16xf32>
    %452 = vector.broadcast %30 : vector<1x16xf32> to vector<5x16xf32>
    %453 = arith.addf %451, %452 : vector<5x16xf32>
    %cst_221 = arith.constant 0.000000e+00 : f32
    %454 = vector.broadcast %cst_221 : f32 to vector<5x16xf32>
    %455 = arith.maximumf %453, %454 : vector<5x16xf32>
    %cst_222 = arith.constant dense<0.000000e+00> : vector<5x16xf32>
    %456 = tpu.matmul %455, %25, %cst_222 {dimension_numbers = #tpu.dot_dimension_numbers<[1], [0], [0], [1], [0, 0, 1, 1], [], []>, precision = #tpu.contract_precision<fp32>} : vector<5x16xf32>, vector<16x16xf32>, vector<5x16xf32> -> vector<5x16xf32>
    %457 = vector.broadcast %32 : vector<1x16xf32> to vector<5x16xf32>
    %458 = arith.addf %456, %457 : vector<5x16xf32>
    %459 = vector.extract_strided_slice %458 {offsets = [0, 0], sizes = [5, 8], strides = [1, 1]} : vector<5x16xf32> to vector<5x8xf32>
    %c6_223 = arith.constant 6 : index
    %c0_224 = arith.constant 0 : index
    %c0_225 = arith.constant 0 : index
    %460 = vector.load %arg5[%c6_223, %c0_224, %c0_225] : memref<8x5x8xf32, #tpu.memory_space<vmem>>, vector<1x5x8xf32>
    %461 = vector.shape_cast %460 : vector<1x5x8xf32> to vector<5x8xf32>
    %462 = vector.shape_cast %459 : vector<5x8xf32> to vector<1x5x8xf32>
    tpu.vector_store %arg5[%c6_223, %c0_224, %c0_225], %462 {strides = array<i32>} : memref<8x5x8xf32, #tpu.memory_space<vmem>>, vector<1x5x8xf32>,
    %463 = vector.extract_strided_slice %447 {offsets = [4, 0], sizes = [1, 32], strides = [1, 1]} : vector<5x32xf32> to vector<1x32xf32>
    %c6_226 = arith.constant 6 : index
    %c5_227 = arith.constant 5 : index
    %c0_228 = arith.constant 0 : index
    %464 = vector.load %arg0[%c6_226, %c5_227, %c0_228] : memref<8x6x20xf32, #tpu.memory_space<vmem>>, vector<1x1x20xf32>
    %465 = vector.shape_cast %464 : vector<1x1x20xf32> to vector<1x20xf32>
    %c7 = arith.constant 7 : index
    %c0_229 = arith.constant 0 : index
    %c0_230 = arith.constant 0 : index
    %466 = vector.load %arg0[%c7, %c0_229, %c0_230] : memref<8x6x20xf32, #tpu.memory_space<vmem>>, vector<1x5x8xf32>
    %467 = vector.shape_cast %466 : vector<1x5x8xf32> to vector<5x8xf32>
    %cst_231 = arith.constant dense<0.000000e+00> : vector<5x32xf32>
    %468 = tpu.matmul %467, %1, %cst_231 {dimension_numbers = #tpu.dot_dimension_numbers<[1], [0], [0], [1], [0, 0, 1, 1], [], []>, precision = #tpu.contract_precision<fp32>} : vector<5x8xf32>, vector<8x32xf32>, vector<5x32xf32> -> vector<5x32xf32>
    %cst_232 = arith.constant dense<0.000000e+00> : vector<5x32xf32>
    %469 = tpu.matmul %447, %9, %cst_232 {dimension_numbers = #tpu.dot_dimension_numbers<[1], [0], [0], [1], [0, 0, 1, 1], [], []>, precision = #tpu.contract_precision<fp32>} : vector<5x32xf32>, vector<32x32xf32>, vector<5x32xf32> -> vector<5x32xf32>
    %470 = arith.addf %468, %469 : vector<5x32xf32>
    %471 = vector.broadcast %17 : vector<1x32xf32> to vector<5x32xf32>
    %472 = arith.addf %470, %471 : vector<5x32xf32>
    %cst_233 = arith.constant dense<0.000000e+00> : vector<5x32xf32>
    %473 = tpu.matmul %467, %3, %cst_233 {dimension_numbers = #tpu.dot_dimension_numbers<[1], [0], [0], [1], [0, 0, 1, 1], [], []>, precision = #tpu.contract_precision<fp32>} : vector<5x8xf32>, vector<8x32xf32>, vector<5x32xf32> -> vector<5x32xf32>
    %cst_234 = arith.constant dense<0.000000e+00> : vector<5x32xf32>
    %474 = tpu.matmul %447, %11, %cst_234 {dimension_numbers = #tpu.dot_dimension_numbers<[1], [0], [0], [1], [0, 0, 1, 1], [], []>, precision = #tpu.contract_precision<fp32>} : vector<5x32xf32>, vector<32x32xf32>, vector<5x32xf32> -> vector<5x32xf32>
    %475 = arith.addf %473, %474 : vector<5x32xf32>
    %476 = vector.broadcast %19 : vector<1x32xf32> to vector<5x32xf32>
    %477 = arith.addf %475, %476 : vector<5x32xf32>
    %cst_235 = arith.constant dense<0.000000e+00> : vector<5x32xf32>
    %478 = tpu.matmul %467, %5, %cst_235 {dimension_numbers = #tpu.dot_dimension_numbers<[1], [0], [0], [1], [0, 0, 1, 1], [], []>, precision = #tpu.contract_precision<fp32>} : vector<5x8xf32>, vector<8x32xf32>, vector<5x32xf32> -> vector<5x32xf32>
    %cst_236 = arith.constant dense<0.000000e+00> : vector<5x32xf32>
    %479 = tpu.matmul %447, %13, %cst_236 {dimension_numbers = #tpu.dot_dimension_numbers<[1], [0], [0], [1], [0, 0, 1, 1], [], []>, precision = #tpu.contract_precision<fp32>} : vector<5x32xf32>, vector<32x32xf32>, vector<5x32xf32> -> vector<5x32xf32>
    %480 = arith.addf %478, %479 : vector<5x32xf32>
    %481 = vector.broadcast %21 : vector<1x32xf32> to vector<5x32xf32>
    %482 = arith.addf %480, %481 : vector<5x32xf32>
    %cst_237 = arith.constant dense<0.000000e+00> : vector<5x32xf32>
    %483 = tpu.matmul %467, %7, %cst_237 {dimension_numbers = #tpu.dot_dimension_numbers<[1], [0], [0], [1], [0, 0, 1, 1], [], []>, precision = #tpu.contract_precision<fp32>} : vector<5x8xf32>, vector<8x32xf32>, vector<5x32xf32> -> vector<5x32xf32>
    %cst_238 = arith.constant dense<0.000000e+00> : vector<5x32xf32>
    %484 = tpu.matmul %447, %15, %cst_238 {dimension_numbers = #tpu.dot_dimension_numbers<[1], [0], [0], [1], [0, 0, 1, 1], [], []>, precision = #tpu.contract_precision<fp32>} : vector<5x32xf32>, vector<32x32xf32>, vector<5x32xf32> -> vector<5x32xf32>
    %485 = arith.addf %483, %484 : vector<5x32xf32>
    %486 = vector.broadcast %23 : vector<1x32xf32> to vector<5x32xf32>
    %487 = arith.addf %485, %486 : vector<5x32xf32>
    %488 = arith.negf %472 : vector<5x32xf32>
    %489 = math.exp %488 : vector<5x32xf32>
    %cst_239 = arith.constant 1.000000e+00 : f32
    %490 = vector.broadcast %cst_239 : f32 to vector<5x32xf32>
    %491 = arith.addf %490, %489 : vector<5x32xf32>
    %492 = arith.divf %490, %491 : vector<5x32xf32>
    %493 = arith.negf %477 : vector<5x32xf32>
    %494 = math.exp %493 : vector<5x32xf32>
    %cst_240 = arith.constant 1.000000e+00 : f32
    %495 = vector.broadcast %cst_240 : f32 to vector<5x32xf32>
    %496 = arith.addf %495, %494 : vector<5x32xf32>
    %497 = arith.divf %495, %496 : vector<5x32xf32>
    %498 = math.tanh %482 : vector<5x32xf32>
    %499 = arith.negf %487 : vector<5x32xf32>
    %500 = math.exp %499 : vector<5x32xf32>
    %cst_241 = arith.constant 1.000000e+00 : f32
    %501 = vector.broadcast %cst_241 : f32 to vector<5x32xf32>
    %502 = arith.addf %501, %500 : vector<5x32xf32>
    %503 = arith.divf %501, %502 : vector<5x32xf32>
    %504 = arith.mulf %497, %445 : vector<5x32xf32>
    %505 = arith.mulf %492, %498 : vector<5x32xf32>
    %506 = arith.addf %504, %505 : vector<5x32xf32>
    %507 = math.tanh %506 : vector<5x32xf32>
    %508 = arith.mulf %503, %507 : vector<5x32xf32>
    %c7_242 = arith.constant 7 : index
    %c0_243 = arith.constant 0 : index
    %c0_244 = arith.constant 0 : index
    %509 = vector.load %arg7[%c7_242, %c0_243, %c0_244] : memref<8x5x32xf32, #tpu.memory_space<vmem>>, vector<1x5x32xf32>
    %510 = vector.shape_cast %509 : vector<1x5x32xf32> to vector<5x32xf32>
    %511 = vector.shape_cast %508 : vector<5x32xf32> to vector<1x5x32xf32>
    tpu.vector_store %arg7[%c7_242, %c0_243, %c0_244], %511 {strides = array<i32>} : memref<8x5x32xf32, #tpu.memory_space<vmem>>, vector<1x5x32xf32>,
    %cst_245 = arith.constant dense<0.000000e+00> : vector<5x16xf32>
    %512 = tpu.matmul %508, %24, %cst_245 {dimension_numbers = #tpu.dot_dimension_numbers<[1], [0], [0], [1], [0, 0, 1, 1], [], []>, precision = #tpu.contract_precision<fp32>} : vector<5x32xf32>, vector<32x16xf32>, vector<5x16xf32> -> vector<5x16xf32>
    %513 = vector.broadcast %30 : vector<1x16xf32> to vector<5x16xf32>
    %514 = arith.addf %512, %513 : vector<5x16xf32>
    %cst_246 = arith.constant 0.000000e+00 : f32
    %515 = vector.broadcast %cst_246 : f32 to vector<5x16xf32>
    %516 = arith.maximumf %514, %515 : vector<5x16xf32>
    %cst_247 = arith.constant dense<0.000000e+00> : vector<5x16xf32>
    %517 = tpu.matmul %516, %25, %cst_247 {dimension_numbers = #tpu.dot_dimension_numbers<[1], [0], [0], [1], [0, 0, 1, 1], [], []>, precision = #tpu.contract_precision<fp32>} : vector<5x16xf32>, vector<16x16xf32>, vector<5x16xf32> -> vector<5x16xf32>
    %518 = vector.broadcast %32 : vector<1x16xf32> to vector<5x16xf32>
    %519 = arith.addf %517, %518 : vector<5x16xf32>
    %520 = vector.extract_strided_slice %519 {offsets = [0, 0], sizes = [5, 8], strides = [1, 1]} : vector<5x16xf32> to vector<5x8xf32>
    %c7_248 = arith.constant 7 : index
    %c0_249 = arith.constant 0 : index
    %c0_250 = arith.constant 0 : index
    %521 = vector.load %arg5[%c7_248, %c0_249, %c0_250] : memref<8x5x8xf32, #tpu.memory_space<vmem>>, vector<1x5x8xf32>
    %522 = vector.shape_cast %521 : vector<1x5x8xf32> to vector<5x8xf32>
    %523 = vector.shape_cast %520 : vector<5x8xf32> to vector<1x5x8xf32>
    tpu.vector_store %arg5[%c7_248, %c0_249, %c0_250], %523 {strides = array<i32>} : memref<8x5x8xf32, #tpu.memory_space<vmem>>, vector<1x5x8xf32>,
    %524 = vector.extract_strided_slice %508 {offsets = [4, 0], sizes = [1, 32], strides = [1, 1]} : vector<5x32xf32> to vector<1x32xf32>
    %c7_251 = arith.constant 7 : index
    %c5_252 = arith.constant 5 : index
    %c0_253 = arith.constant 0 : index
    %525 = vector.load %arg0[%c7_251, %c5_252, %c0_253] : memref<8x6x20xf32, #tpu.memory_space<vmem>>, vector<1x1x20xf32>
    %526 = vector.shape_cast %525 : vector<1x1x20xf32> to vector<1x20xf32>
    %527 = tpu.concatenate %97, %158, %219, %280, %341, %402, %463, %524 in 0 : vector<1x32xf32>, vector<1x32xf32>, vector<1x32xf32>, vector<1x32xf32>, vector<1x32xf32>, vector<1x32xf32>, vector<1x32xf32>, vector<1x32xf32> -> vector<8x32xf32>
    %528 = tpu.concatenate %99, %160, %221, %282, %343, %404, %465, %526 in 0 : vector<1x20xf32>, vector<1x20xf32>, vector<1x20xf32>, vector<1x20xf32>, vector<1x20xf32>, vector<1x20xf32>, vector<1x20xf32>, vector<1x20xf32> -> vector<8x20xf32>
    %cst_254 = arith.constant dense<0.000000e+00> : vector<8x16xf32>
    %529 = tpu.matmul %527, %26, %cst_254 {dimension_numbers = #tpu.dot_dimension_numbers<[1], [0], [0], [1], [0, 0, 1, 1], [], []>, precision = #tpu.contract_precision<fp32>} : vector<8x32xf32>, vector<32x16xf32>, vector<8x16xf32> -> vector<8x16xf32>
    %cst_255 = arith.constant dense<0.000000e+00> : vector<8x16xf32>
    %530 = tpu.matmul %528, %27, %cst_255 {dimension_numbers = #tpu.dot_dimension_numbers<[1], [0], [0], [1], [0, 0, 1, 1], [], []>, precision = #tpu.contract_precision<fp32>} : vector<8x20xf32>, vector<20x16xf32>, vector<8x16xf32> -> vector<8x16xf32>
    %531 = arith.addf %529, %530 : vector<8x16xf32>
    %532 = vector.broadcast %34 : vector<1x16xf32> to vector<8x16xf32>
    %533 = arith.addf %531, %532 : vector<8x16xf32>
    %c0_256 = arith.constant 0 : index
    %c0_257 = arith.constant 0 : index
    %534 = vector.load %arg8[%c0_256, %c0_257] : memref<8x16xf32, #tpu.memory_space<vmem>>, vector<8x16xf32>
    tpu.vector_store %arg8[%c0_256, %c0_257], %533 {strides = array<i32>} : memref<8x16xf32, #tpu.memory_space<vmem>>, vector<8x16xf32>,
    %cst_258 = arith.constant 0.000000e+00 : f32
    %535 = vector.broadcast %cst_258 : f32 to vector<8x16xf32>
    %536 = arith.maximumf %533, %535 : vector<8x16xf32>
    %cst_259 = arith.constant dense<0.000000e+00> : vector<8x16xf32>
    %537 = tpu.matmul %536, %28, %cst_259 {dimension_numbers = #tpu.dot_dimension_numbers<[1], [0], [0], [1], [0, 0, 1, 1], [], []>, precision = #tpu.contract_precision<fp32>} : vector<8x16xf32>, vector<16x16xf32>, vector<8x16xf32> -> vector<8x16xf32>
    %538 = vector.broadcast %36 : vector<1x16xf32> to vector<8x16xf32>
    %539 = arith.addf %537, %538 : vector<8x16xf32>
    %540 = vector.extract_strided_slice %539 {offsets = [0, 0], sizes = [8, 2], strides = [1, 1]} : vector<8x16xf32> to vector<8x2xf32>
    %c0_260 = arith.constant 0 : index
    %c0_261 = arith.constant 0 : index
    %541 = vector.load %arg6[%c0_260, %c0_261] : memref<8x2xf32, #tpu.memory_space<vmem>>, vector<8x2xf32>
    tpu.vector_store %arg6[%c0_260, %c0_261], %540 {strides = array<i32>} : memref<8x2xf32, #tpu.memory_space<vmem>>, vector<8x2xf32>,
    return
  }
}

</mosaic_0001>

<bundles_post_ra>
// kernel: lstm_next_state.1
= control target key start
LH: loop header
LB: loop body
LE: loop exit
PB: predicated region body
PF: predicated region fallthrough
CT: control target
= control target key end

     0   :  { %vm267_vm0 = vcmask 64512   ;;  %v17859_v33 = vmov 0.0   ;;  %s17850_s0 = inlined_call_operand.vmem [shape: f32[8,6,20], index: 0, kind: input, shape index: {}]   ;;  %s17851_s1 = inlined_call_operand.vmem [shape: f32[4,40,32], index: 1, kind: input, shape index: {}]   ;;  %s17852_s2 = inlined_call_operand.vmem [shape: f32[4,1,32], index: 2, kind: input, shape index: {}]   ;;  %s17853_s3 = inlined_call_operand.vmem [shape: f32[120,16], index: 3, kind: input, shape index: {}]   ;;  %s17854_s4 = inlined_call_operand.vmem [shape: f32[4,1,16], index: 4, kind: input, shape index: {}]   ;;  %s17855_s5 = inlined_call_operand.vmem [shape: f32[8,5,8], index: 5, kind: output, shape index: {0}]   ;;  %s17856_s6 = inlined_call_operand.vmem [shape: f32[8,2], index: 6, kind: output, shape index: {1}]   ;;  %s17857_s7 = inlined_call_operand.vmem [shape: f32[8,5,32], index: 7, kind: output, shape index: {2}]   ;;  %s17858_s8 = inlined_call_operand.hbm [shape: f32[8,16], index: 8, kind: output, shape index: {3}]  }
   0x1   :  { %v35_v0 = vld [vmem:[%s17851_s1 + $0x20] sm:$0xff]  ;;  %v34_v1 = vld [vmem:[%s17851_s1 + $0x18] sm:$0xff]  ;;  %v33_v2 = vld [vmem:[%s17851_s1 + $0x10] sm:$0xff] }
   0x2   :  { %v15051_v3 = vand.u32 4294901760, %v35_v0  ;;  %v15053_v4 = vand.u32 4294901760, %v34_v1  ;;  %v15055_v5 = vand.u32 4294901760, %v33_v2  ;;  %v32_v6 = vld [vmem:[%s17851_s1 + $0x8] sm:$0xff]  ;;  %v25_v7 = vld [vmem:[%s17851_s1] sm:$0xff]  ;;  %v14744_v36 = vld [vmem:[%s17851_s1 + $0x38] sm:$0xff] }
   0x3   :  { %v15063_v8 = vand.u32 4294901760, %v32_v6  ;;  %v15065_v9 = vand.u32 4294901760, %v25_v7  ;;  %v77_v10 = vld [vmem:[%s17850_s0] sm:$0x1f]  ;;  %v14746_v32 = vld [vmem:[%s17851_s1 + $0x48] sm:$0xff]  ;;  %v14743_v39 = vld [vmem:[%s17851_s1 + $0x30] sm:$0xff] }
   0x4   :  { %v15071_v11 = vsub.f32 %v35_v0, %v15051_v3  ;;  %95 = vmatpush.msra.mxu0 %v15051_v3  ;;  %v15075_v12 = vsub.f32 %v34_v1, %v15053_v4  ;;  %195 = vmatpush.msra.mxu3 %v15051_v3  ;;  %v15079_v13 = vsub.f32 %v33_v2, %v15055_v5  ;;  %v269_v14 = vsel %vm267_vm0, %v77_v10, 0  ;;  %v14745_v35 = vld [vmem:[%s17851_s1 + $0x40] sm:$0xff]  ;;  %v14740_v40 = vld [vmem:[%s17851_s1 + $0x28] sm:$0xff] }
   0x5   :  { %18153 = vst [vmem:[#allocation5_spill] sm:$0xff] %v15065_v9  ;;  %v15083_v15 = vsub.f32 %v32_v6, %v15063_v8  ;;  %v15086_v16 = vsub.f32 %v25_v7, %v15065_v9  ;;  %v15088_v17 = vand.u32 4294901760, %v269_v14  ;;  %v15164_v42 = vand.u32 4294901760, %v14746_v32 }
   0x6   :  { %18154 = vst [vmem:[#allocation6_spill] sm:$0xff] %v15079_v13  ;;  %166 = vmatpush.msra.mxu2 %v15071_v11  ;;  %97 = vmatpush.msra.mxu0 %v15053_v4  ;;  %v15093_v18 = vand.u32 4294901760, %v15071_v11  ;;  %v15096_v19 = vand.u32 4294901760, %v15075_v12  ;;  %v15099_v20 = vand.u32 4294901760, %v15079_v13  ;;  %v15166_v43 = vand.u32 4294901760, %v14745_v35 }
   0x7   :  { %18155 = vst [vmem:[#allocation7_spill] sm:$0xff] %v15083_v15  ;;  %197 = vmatpush.msra.mxu3 %v15053_v4  ;;  %v15103_v21 = vand.u32 4294901760, %v15086_v16  ;;  %v15106_v22 = vand.u32 4294901760, %v15083_v15  ;;  %v15109_v23 = vsub.f32 %v269_v14, %v15088_v17  ;;  %v15168_v44 = vand.u32 4294901760, %v14744_v36 }
   0x8   :  { %18156 = vst [vmem:[#allocation8_spill] sm:$0xff] %v15086_v16  ;;  %169 = vmatpush.msra.mxu2 %v15075_v12  ;;  %v126_v24 = vsub.f32 %v15071_v11, %v15093_v18  ;;  %99 = vmatpush.msra.mxu0 %v15055_v5  ;;  %v132_v25 = vsub.f32 %v15075_v12, %v15096_v19 }
   0x9   :  { %18157 = vst [vmem:[#allocation9_spill] sm:$0xff] %v15103_v21  ;;  %v138_v26 = vsub.f32 %v15079_v13, %v15099_v20  ;;  %199 = vmatpush.msra.mxu3 %v15055_v5  ;;  %v315_v27 = vsub.f32 %v15086_v16, %v15103_v21  ;;  %v15123_v28 = vand.u32 4294901760, %v15109_v23  ;;  %v144_v31 = vsub.f32 %v15083_v15, %v15106_v22 }
   0xa   :  { %v15125_v29 = vand.u32 4294901760, %v126_v24  ;;  %172 = vmatpush.msra.mxu2 %v15079_v13  ;;  %v15128_v30 = vand.u32 4294901760, %v132_v25  ;;  %101 = vmatpush.msra.mxu0 %v15063_v8  ;;  %18162 = vst [vmem:[#allocation14_spill] sm:$0xff] %v15164_v42 }
   0xb   :  { %201 = vmatpush.msra.mxu3 %v15063_v8  ;;  %107 = vmatmul.f32.vlgmr.msra.gmra.mxu0 %v17859_v33  ;;  %v15138_v34 = vand.u32 4294901760, %v315_v27  ;;  %v15148_v37 = vand.u32 4294901760, %v138_v26  ;;  %v291_v38 = vsub.f32 %v15109_v23, %v15123_v28  ;;  %v15162_v41 = vand.u32 4294901760, %v144_v31  ;;  %18163 = vst [vmem:[#allocation15_spill] sm:$0xff] %v15166_v43 }
   0xc   :  { %18158 = vst [vmem:[#allocation10_spill] sm:$0xff] %v15125_v29  ;;  %128 = vmatpush.msra.mxu1 %v15125_v29  ;;  %175 = vmatpush.msra.mxu2 %v15083_v15 }
   0xd   :  { %18159 = vst [vmem:[#allocation11_spill] sm:$0xff] %v15128_v30  ;;  %178 = vmatmul.f32.vlgmr.msra.gmra.mxu2 %v17859_v33  ;;  %205 = vmatmul.f32.vlgmr.msra.gmra.mxu3 %v17859_v33 }
   0xe   :  { %18160 = vst [vmem:[#allocation12_spill] sm:$0xff] %v15148_v37  ;;  %134 = vmatpush.msra.mxu1 %v15128_v30  ;;  %287 = vmatpush.msrb.mxu2 %v15065_v9 }
   0xf   :  { %18161 = vst [vmem:[#allocation13_spill] sm:$0xff] %v15162_v41  ;;  %224 = vmatpush.msrb.mxu0 %v15093_v18  ;;  %317 = vmatpush.msrb.mxu3 %v15138_v34 }
  0x10   :  { %18164 = vst [vmem:[#allocation16_spill] sm:$0xff] %v15168_v44 }
  0x11   :  { %14 = vsyncpa [#allocation3], 0  ;;  %140 = vmatpush.msra.mxu1 %v15148_v37  ;;  %389 = vmatpush.msra.mxu2 %v15103_v21  ;;  %v15175_v45 = vsub.f32 %v14746_v32, %v15164_v42  ;;  %v15178_v46 = vsub.f32 %v14745_v35, %v15166_v43  ;;  %v15180_v47 = vand.u32 4294901760, %v14743_v39  ;;  %v15183_v48 = vand.u32 4294901760, %v291_v38  ;;  %v14750_v1 = vld [vmem:[%s17851_s1 + $0x70] sm:$0xff]  ;;  %v14749_v6 = vld [vmem:[%s17851_s1 + $0x68] sm:$0xff] }
  0x12   :  { %228 = vmatpush.msrb.mxu0 %v15096_v19  ;;  %411 = vmatpush.msra.mxu3 %v15065_v9  ;;  %v15186_v49 = vand.u32 4294901760, %v14740_v40  ;;  %v15193_v51 = vsub.f32 %v14744_v36, %v15168_v44  ;;  %v15264_v10 = vand.u32 4294901760, %v14750_v1  ;;  %v14748_v24 = vld [vmem:[%s17851_s1 + $0x60] sm:$0xff]  ;;  %v15275_v25 = vand.u32 4294901760, %v14749_v6  ;;  %v14747_v26 = vld [vmem:[%s17851_s1 + $0x58] sm:$0xff]  ;;  %v14741_v27 = vld [vmem:[%s17851_s1 + $0x50] sm:$0xff] }
  0x13   :  { %18165 = vst [vmem:[#allocation17_spill] sm:$0xff] %v15175_v45  ;;  %146 = vmatpush.msra.mxu1 %v15162_v41  ;;  %v15190_v50 = vand.u32 4294901760, %v15175_v45  ;;  %v15199_v52 = vand.u32 4294901760, %v15178_v46  ;;  %v15202_v53 = vsub.f32 %v14743_v39, %v15180_v47  ;;  %v15290_v32 = vand.u32 4294901760, %v14748_v24  ;;  %s14996_s22 = smov [#allocation2]  }
  0x14   :  { %18166 = vst [vmem:[#allocation18_spill] sm:$0xff] %v15178_v46  ;;  %148 = vmatmul.f32.vlgmr.msra.gmra.mxu1 %v17859_v33  ;;  %232 = vmatpush.msrb.mxu0 %v15099_v20  ;;  %v15209_v55 = vsub.f32 %v14740_v40, %v15186_v49  ;;  %v15214_v56 = vand.u32 4294901760, %v15193_v51  ;;  %v15288_v31 = vsub.f32 %v14750_v1, %v15264_v10  ;;  %v15299_v36 = vand.u32 4294901760, %v14747_v26  ;;  %s14723_s23 = sshll.u32 %s14996_s22, 4  ;;  %s14724_s23 = int_to_ptr.vmem [resolvable:$true] %s14723_s23 }
  0x15   :  { %18167 = vst [vmem:[#allocation19_spill] sm:$0xff] %v15180_v47  ;;  %255 = vmatpush.msrb.mxu1 %v15051_v3  ;;  %293 = vmatmul.f32.vlgmr.msrb.gmra.mxu2 %v15183_v48  ;;  %v465_v54 = vsub.f32 %v15175_v45, %v15190_v50  ;;  %v471_v57 = vsub.f32 %v15178_v46, %v15199_v52  ;;  %v15223_v58 = vand.u32 4294901760, %v15202_v53  ;;  %v15301_v38 = vand.u32 4294901760, %v14741_v27 }
  0x16   :  { %18168 = vst [vmem:[#allocation20_spill] sm:$0xff] %v15186_v49  ;;  %236 = vmatpush.msrb.mxu0 %v15106_v22  ;;  %319 = vmatmul.f32.vlgmr.msrb.gmra.mxu3 %v15088_v17  ;;  %v15230_v60 = vand.u32 4294901760, %v15209_v55  ;;  %v477_v61 = vsub.f32 %v15193_v51, %v15214_v56  ;;  %v15297_v35 = vsub.f32 %v14749_v6, %v15275_v25  ;;  %v15308_v39 = vand.u32 4294901760, %v15288_v31 }
  0x17   :  { %18169 = vst [vmem:[#allocation21_spill] sm:$0xff] %v15190_v50  ;;  %257 = vmatpush.msrb.mxu1 %v15053_v4  ;;  %238 = vmatmul.f32.vlgmr.msrb.gmra.mxu0 %v17859_v33  ;;  %v15227_v59 = vand.u32 4294901760, %v465_v54  ;;  %v15240_v62 = vand.u32 4294901760, %v471_v57  ;;  %v483_v63 = vsub.f32 %v15202_v53, %v15223_v58  ;;  %v15311_v40 = vsub.f32 %v14748_v24, %v15290_v32 }
  0x18   :  { %18170 = vst [vmem:[#allocation22_spill] sm:$0xff] %v15193_v51  ;;  %340 = vmatpush.msra.mxu0 %v15086_v16  ;;  %505 = vmatpush.msrb.mxu2 %v15175_v45  ;;  %v650_v0 = vsub.f32 %v15209_v55, %v15230_v60  ;;  %v15253_v2 = vand.u32 4294901760, %v477_v61  ;;  %v15317_v54 = vand.u32 4294901760, %v15297_v35  ;;  %v15320_v57 = vsub.f32 %v14747_v26, %v15299_v36 }
  0x19   :  { %18171 = vst [vmem:[#allocation23_spill] sm:$0xff] %v15199_v52  ;;  %259 = vmatpush.msrb.mxu1 %v15055_v5  ;;  %534 = vmatpush.msrb.mxu3 %v15164_v42  ;;  %v15262_v7 = vand.u32 4294901760, %v483_v63  ;;  %v15323_v61 = vsub.f32 %v14741_v27, %v15301_v38  ;;  %v800_v63 = vsub.f32 %v15288_v31, %v15308_v39  ;;  %vm78_vm13 = vcmask 261120  }
  0x1a   :  { %18172 = vst [vmem:[#allocation24_spill] sm:$0xff] %v15202_v53  ;;  %434 = vmatpush.msrb.mxu0 %v15164_v42  ;;  %508 = vmatpush.msrb.mxu2 %v15178_v46  ;;  %v15268_v14 = vand.u32 4294901760, %v650_v0  ;;  %v15332_v0 = vand.u32 4294901760, %v15311_v40  ;;  %v806_v1 = vsub.f32 %v15297_v35, %v15317_v54  ;;  %v15341_v6 = vand.u32 4294901760, %v15320_v57 }
  0x1b   :  { %18173 = vst [vmem:[#allocation25_spill] sm:$0xff] %v15209_v55  ;;  %261 = vmatpush.msrb.mxu1 %v15063_v8  ;;  %536 = vmatpush.msrb.mxu3 %v15166_v43  ;;  %v15344_v24 = vand.u32 4294901760, %v15323_v61  ;;  %v15350_v26 = vand.u32 4294901760, %v800_v63  ;;  %vm1489_vm14 = vcmask 258048   ;;  %vm1686_vm15 = vcmask 130048  }
  0x1c   :  { %18174 = vst [vmem:[#allocation26_spill] sm:$0xff] %v15214_v56  ;;  %263 = vmatmul.f32.vlgmr.msrb.gmra.mxu1 %v17859_v33  ;;  %436 = vmatpush.msrb.mxu0 %v15166_v43  ;;  %v812_v27 = vsub.f32 %v15311_v40, %v15332_v0 }
  0x1d   :  { %18175 = vst [vmem:[#allocation27_spill] sm:$0xff] %v15223_v58  ;;  %363 = vmatpush.msra.mxu1 %v15065_v9  ;;  %511 = vmatpush.msrb.mxu2 %v15193_v51 }
  0x1e   :  { %18176 = vst [vmem:[#allocation28_spill] sm:$0xff] %v15227_v59  ;;  %391 = vmatmul.f32.vlgmr.msra.gmra.mxu2 %v15088_v17  ;;  %413 = vmatmul.f32.vlgmr.msra.gmra.mxu3 %v15088_v17  ;;  %v15367_v63 = vand.u32 4294901760, %v812_v27  ;;  %v14753_v27 = vld [vmem:[%s17851_s1 + $0x90] sm:$0xff] }
  0x1f   :  { %18177 = vst [vmem:[#allocation29_spill] sm:$0xff] %v15230_v60  ;;  %467 = vmatpush.msrb.mxu1 %v15227_v59  ;;  %343 = vmatmul.f32.vlgmr.msra.gmra.mxu0 %v15109_v23 }
  0x20   :  { %18178 = vst [vmem:[#allocation30_spill] sm:$0xff] %v15240_v62  ;;  %438 = vmatpush.msrb.mxu0 %v15168_v44  ;;  %514 = vmatpush.msrb.mxu2 %v15202_v53 }
  0x21   :  { %18179 = vst [vmem:[#allocation31_spill] sm:$0xff] %v15253_v2  ;;  %473 = vmatpush.msrb.mxu1 %v15240_v62  ;;  %538 = vmatpush.msrb.mxu3 %v15168_v44 }
  0x22   :  { %18180 = vst [vmem:[#allocation32_spill] sm:$0xff] %v15262_v7  ;;  %440 = vmatpush.msrb.mxu0 %v15180_v47  ;;  %622 = vmatpush.msra.mxu2 %v15186_v49 }
  0x23   :  { %18181 = vst [vmem:[#allocation33_spill] sm:$0xff] %v15264_v10  ;;  %479 = vmatpush.msrb.mxu1 %v15253_v2  ;;  %540 = vmatpush.msrb.mxu3 %v15180_v47 }
  0x24   :  { %18182 = vst [vmem:[#allocation34_spill] sm:$0xff] %v15268_v14  ;;  %367 = vmatmul.f32.vlgmr.msra.gmra.mxu1 %v15123_v28  ;;  %563 = vmatpush.msra.mxu0 %v15190_v50 }
  0x25   :  { %18183 = vst [vmem:[#allocation35_spill] sm:$0xff] %v15275_v25  ;;  %485 = vmatpush.msrb.mxu1 %v15262_v7  ;;  %652 = vmatpush.msra.mxu3 %v15268_v14 }
  0x26   :  { %18184 = vst [vmem:[#allocation36_spill] sm:$0xff] %v15288_v31  ;;  %517 = vmatmul.f32.vlgmr.msrb.gmra.mxu2 %v17859_v33  ;;  %544 = vmatmul.f32.vlgmr.msrb.gmra.mxu3 %v17859_v33 }
  0x27   :  { %18185 = vst [vmem:[#allocation37_spill] sm:$0xff] %v15290_v32  ;;  %446 = vmatmul.f32.vlgmr.msrb.gmra.mxu0 %v17859_v33  ;;  %594 = vmatpush.msra.mxu1 %v15164_v42 }
  0x28   :  { %18186 = vst [vmem:[#allocation38_spill] sm:$0xff] %v15297_v35  ;;  %567 = vmatpush.msra.mxu0 %v15199_v52  ;;  %724 = vmatpush.msrb.mxu2 %v15230_v60  ;;  %v18199_v60 = vmov 0.0  }
  0x29   :  { %18187 = vst [vmem:[#allocation39_spill] sm:$0xff] %v15299_v36  ;;  %596 = vmatpush.msra.mxu1 %v15166_v43  ;;  %746 = vmatpush.msrb.mxu3 %v15186_v49 }
  0x2a   :  { %18188 = vst [vmem:[#allocation40_spill] sm:$0xff] %v15301_v38  ;;  %571 = vmatpush.msra.mxu0 %v15214_v56 }
  0x2b   :  { %18189 = vst [vmem:[#allocation41_spill] sm:$0xff] %v15308_v39  ;;  %598 = vmatpush.msra.mxu1 %v15168_v44 }
  0x2c   :  { %18190 = vst [vmem:[#allocation42_spill] sm:$0xff] %v15311_v40  ;;  %487 = vmatmul.f32.vlgmr.msrb.gmra.mxu1 %v17859_v33  ;;  %575 = vmatpush.msra.mxu0 %v15223_v58 }
  0x2d   :  { %18191 = vst [vmem:[#allocation43_spill] sm:$0xff] %v15317_v54  ;;  %600 = vmatpush.msra.mxu1 %v15180_v47 }
  0x2e   :  { %18192 = vst [vmem:[#allocation44_spill] sm:$0xff] %v15320_v57  ;;  %675 = vmatpush.msrb.mxu0 %v15209_v55  ;;  %628 = vmatmul.f32.vlgmr.msra.gmra.mxu2 %v15183_v48 }
  0x2f   :  { %18193 = vst [vmem:[#allocation45_spill] sm:$0xff] %v15323_v61  ;;  %698 = vmatpush.msrb.mxu1 %v15186_v49  ;;  %577 = vmatmul.f32.vlgmr.msra.gmra.mxu0 %v17859_v33  ;;  %v15357_v33 = vand.u32 4294901760, %v806_v1  ;;  %v14754_v1 = vld [vmem:[%s17851_s1 + $0x98] sm:$0xff] }
  0x30   :  { %18194 = vst [vmem:[#allocation46_spill] sm:$0xff] %v15332_v0  ;;  %840 = vmatpush.msra.mxu2 %v15288_v31  ;;  %654 = vmatmul.f32.vlgmr.msra.gmra.mxu3 %v15088_v17  ;;  %v818_v31 = vsub.f32 %v15320_v57, %v15341_v6 }
  0x31   :  { %18195 = vst [vmem:[#allocation47_spill] sm:$0xff] %v15341_v6  ;;  %769 = vmatpush.msra.mxu0 %v15264_v10  ;;  %869 = vmatpush.msra.mxu3 %v15264_v10 }
  0x32   :  { %18196 = vst [vmem:[#allocation48_spill] sm:$0xff] %v15344_v24  ;;  %843 = vmatpush.msra.mxu2 %v15297_v35  ;;  %v985_v35 = vsub.f32 %v15323_v61, %v15344_v24 }
  0x33   :  { %18197 = vst [vmem:[#allocation49_spill] sm:$0xff] %v15350_v26  ;;  %771 = vmatpush.msra.mxu0 %v15275_v25  ;;  %871 = vmatpush.msra.mxu3 %v15275_v25 }
  0x34   :  { %846 = vmatpush.msra.mxu2 %v15311_v40  ;;  %18198 = vst [vmem:[#allocation50_spill] sm:$0xff] %v15357_v33  ;;  %602 = vmatmul.f32.vlgmr.msra.gmra.mxu1 %v18199_v60  ;;  %v15376_v40 = vand.u32 4294901760, %v818_v31  ;;  %v15378_v49 = vand.u32 4294901760, %v985_v35  ;;  %v14752_v31 = vld [vmem:[%s17851_s1 + $0x88] sm:$0xff]  ;;  %v15396_v35 = vand.u32 4294901760, %v14753_v27 }
  0x35   :  { %773 = vmatpush.msra.mxu0 %v15290_v32  ;;  %802 = vmatpush.msra.mxu1 %v15350_v26  ;;  %18200 = vst [vmem:[#allocation51_spill] sm:$0xff] %v15367_v63 }
  0x36   :  { %849 = vmatpush.msra.mxu2 %v15320_v57  ;;  %873 = vmatpush.msra.mxu3 %v15290_v32  ;;  %18201 = vst [vmem:[#allocation52_spill] sm:$0xff] %v15376_v40  ;;  %v15387_v57 = vand.u32 4294901760, %v14754_v1 }
  0x37   :  { %726 = vmatmul.f32.vlgmr.msrb.gmra.mxu2 %v15088_v17  ;;  %678 = vmatmul.f32.vlgmr.msrb.gmra.mxu0 %v15109_v23  ;;  %18202 = vst [vmem:[#allocation53_spill] sm:$0xff] %v15378_v49 }
  0x38   :  { %808 = vmatpush.msra.mxu1 %v15357_v33  ;;  %748 = vmatmul.f32.vlgmr.msrb.gmra.mxu3 %v15088_v17  ;;  %18203 = vst [vmem:[#allocation54_spill] sm:$0xff] %v15387_v57 }
  0x39   :  { %775 = vmatpush.msra.mxu0 %v15299_v36  ;;  %875 = vmatpush.msra.mxu3 %v15299_v36  ;;  %18204 = vst [vmem:[#allocation55_spill] sm:$0xff] %v15396_v35 }
  0x3a   :  { %814 = vmatpush.msra.mxu1 %v15367_v63  ;;  %957 = vmatpush.msrb.mxu2 %v15301_v38  ;;  %v14751_v63 = vld [vmem:[%s17851_s1 + $0x80] sm:$0xff] }
  0x3b   :  { %898 = vmatpush.msrb.mxu0 %v15308_v39  ;;  %987 = vmatpush.msrb.mxu3 %v15378_v49  ;;  %v14742_v39 = vld [vmem:[%s17851_s1 + $0x78] sm:$0xff]  ;;  %v15410_v49 = vand.u32 4294901760, %v14752_v31  ;;  %v15419_v33 = vand.u32 4294901760, %v14751_v63  ;;  %s14725_s1 = sshll.u32 %s17858_s8, 4  ;;  %s14726_s1 = int_to_ptr.hbm [resolvable:$true] %s14725_s1 }
  0x3c   :  { %820 = vmatpush.msra.mxu1 %v15376_v40  ;;  %v15408_v40 = vsub.f32 %v14754_v1, %v15387_v57  ;;  %v15421_v26 = vand.u32 4294901760, %v14742_v39 }
  0x3d   :  { %702 = vmatmul.f32.vlgmr.msrb.gmra.mxu1 %v15123_v28  ;;  %902 = vmatpush.msrb.mxu0 %v15317_v54  ;;  %18206 = vst [vmem:[#allocation57_spill] sm:$0xff] %v15410_v49  ;;  %v15417_v54 = vsub.f32 %v14753_v27, %v15396_v35 }
  0x3e   :  { %929 = vmatpush.msrb.mxu1 %v15264_v10  ;;  %18205 = vst [vmem:[#allocation56_spill] sm:$0xff] %v15408_v40  ;;  %v15428_v1 = vand.u32 4294901760, %v15408_v40 }
  0x3f   :  { %852 = vmatmul.f32.vlgmr.msra.gmra.mxu2 %v18199_v60  ;;  %906 = vmatpush.msrb.mxu0 %v15332_v0  ;;  %18207 = vst [vmem:[#allocation58_spill] sm:$0xff] %v15417_v54  ;;  %v15431_v0 = vsub.f32 %v14752_v31, %v15410_v49  ;;  %v15437_v27 = vand.u32 4294901760, %v15417_v54 }
  0x40   :  { %781 = vmatmul.f32.vlgmr.msra.gmra.mxu0 %v18199_v60  ;;  %931 = vmatpush.msrb.mxu1 %v15275_v25  ;;  %18208 = vst [vmem:[#allocation59_spill] sm:$0xff] %v15419_v33  ;;  %v1135_v31 = vsub.f32 %v15408_v40, %v15428_v1 }
  0x41   :  { %18209 = vst [vmem:[#allocation60_spill] sm:$0xff] %v15421_v26  ;;  %879 = vmatmul.f32.vlgmr.msra.gmra.mxu3 %v18199_v60  ;;  %910 = vmatpush.msrb.mxu0 %v15341_v6  ;;  %v15440_v6 = vsub.f32 %v14751_v63, %v15419_v33 }
  0x42   :  { %933 = vmatpush.msrb.mxu1 %v15290_v32  ;;  %1059 = vmatpush.msra.mxu2 %v15344_v24  ;;  %18210 = vst [vmem:[#allocation61_spill] sm:$0xff] %v15428_v1  ;;  %v15443_v24 = vsub.f32 %v14742_v39, %v15421_v26  ;;  %v1141_v39 = vsub.f32 %v15417_v54, %v15437_v27 }
  0x43   :  { %18211 = vst [vmem:[#allocation62_spill] sm:$0xff] %v15431_v0  ;;  %1010 = vmatpush.msra.mxu0 %v15323_v61  ;;  %1081 = vmatpush.msra.mxu3 %v15301_v38  ;;  %v15450_v61 = vand.u32 4294901760, %v15431_v0  ;;  %v15458_v63 = vand.u32 4294901760, %v15440_v6 }
  0x44   :  { %935 = vmatpush.msrb.mxu1 %v15299_v36  ;;  %18212 = vst [vmem:[#allocation63_spill] sm:$0xff] %v15437_v27  ;;  %v15467_v36 = vand.u32 4294901760, %v1135_v31  ;;  %v15474_v32 = vand.u32 4294901760, %v1141_v39 }
  0x45   :  { %18213 = vst [vmem:[#allocation64_spill] sm:$0xff] %v15440_v6  ;;  %822 = vmatmul.f32.vlgmr.msra.gmra.mxu1 %v18199_v60  ;;  %v1153_v25 = vsub.f32 %v15440_v6, %v15458_v63 }
  0x46   :  { %18214 = vst [vmem:[#allocation65_spill] sm:$0xff] %v15443_v24  ;;  %1033 = vmatpush.msra.mxu1 %v15301_v38  ;;  %v15461_v38 = vand.u32 4294901760, %v15443_v24 }
  0x47   :  { %18215 = vst [vmem:[#allocation66_spill] sm:$0xff] %v15450_v61  ;;  %963 = vmatmul.f32.vlgmr.msrb.gmra.mxu2 %v15183_v48  ;;  %v15490_v39 = vand.u32 4294901760, %v1153_v25 }
  0x48   :  { %912 = vmatmul.f32.vlgmr.msrb.gmra.mxu0 %v18199_v60  ;;  %1175 = vmatpush.msrb.mxu2 %v15408_v40  ;;  %18216 = vst [vmem:[#allocation67_spill] sm:$0xff] %v15458_v63  ;;  %v1147_v40 = vsub.f32 %v15431_v0, %v15450_v61 }
  0x49   :  { %18217 = vst [vmem:[#allocation68_spill] sm:$0xff] %v15461_v38  ;;  %989 = vmatmul.f32.vlgmr.msrb.gmra.mxu3 %v15088_v17  ;;  %1104 = vmatpush.msrb.mxu0 %v15387_v57 }
  0x4a   :  { %1178 = vmatpush.msrb.mxu2 %v15417_v54  ;;  %1204 = vmatpush.msrb.mxu3 %v15387_v57  ;;  %18218 = vst [vmem:[#allocation69_spill] sm:$0xff] %v15467_v36  ;;  %v1320_v54 = vsub.f32 %v15443_v24, %v15461_v38  ;;  %v15484_v31 = vand.u32 4294901760, %v1147_v40 }
  0x4b   :  { %1106 = vmatpush.msrb.mxu0 %v15396_v35  ;;  %18219 = vst [vmem:[#allocation70_spill] sm:$0xff] %v15474_v32 }
  0x4c   :  { %1181 = vmatpush.msrb.mxu2 %v15431_v0  ;;  %1206 = vmatpush.msrb.mxu3 %v15396_v35  ;;  %18220 = vst [vmem:[#allocation71_spill] sm:$0xff] %v15484_v31  ;;  %v15492_v0 = vand.u32 4294901760, %v1320_v54 }
  0x4d   :  { %937 = vmatmul.f32.vlgmr.msrb.gmra.mxu1 %v18199_v60  ;;  %1108 = vmatpush.msrb.mxu0 %v15410_v49  ;;  %18221 = vst [vmem:[#allocation72_spill] sm:$0xff] %v15490_v39 }
  0x4e   :  { %1137 = vmatpush.msrb.mxu1 %v15467_v36  ;;  %1184 = vmatpush.msrb.mxu2 %v15440_v6  ;;  %18222 = vst [vmem:[#allocation73_spill] sm:$0xff] %v15492_v0 }
  0x4f   :  { %1061 = vmatmul.f32.vlgmr.msra.gmra.mxu2 %v15088_v17  ;;  %1208 = vmatpush.msrb.mxu3 %v15410_v49 }
  0x50   :  { %1013 = vmatmul.f32.vlgmr.msra.gmra.mxu0 %v15109_v23  ;;  %1143 = vmatpush.msrb.mxu1 %v15474_v32 }
  0x51   :  { %1083 = vmatmul.f32.vlgmr.msra.gmra.mxu3 %v15088_v17  ;;  %1110 = vmatpush.msrb.mxu0 %v15419_v33 }
  0x52   :  { %1149 = vmatpush.msrb.mxu1 %v15484_v31  ;;  %1210 = vmatpush.msrb.mxu3 %v15419_v33 }
  0x53   :  { %1292 = vmatpush.msra.mxu2 %v15421_v26  ;;  %1233 = vmatpush.msra.mxu0 %v15428_v1 }
  0x54   :  { %1155 = vmatpush.msrb.mxu1 %v15490_v39  ;;  %1322 = vmatpush.msra.mxu3 %v15492_v0 }
  0x55   :  { %1037 = vmatmul.f32.vlgmr.msra.gmra.mxu1 %v15123_v28  ;;  %1237 = vmatpush.msra.mxu0 %v15437_v27 }
  0x56   :  { %1264 = vmatpush.msra.mxu1 %v15387_v57 }
  0x57   :  { %1187 = vmatmul.f32.vlgmr.msrb.gmra.mxu2 %v18199_v60  ;;  %1241 = vmatpush.msra.mxu0 %v15450_v61 }
  0x58   :  { %1116 = vmatmul.f32.vlgmr.msrb.gmra.mxu0 %v18199_v60  ;;  %1266 = vmatpush.msra.mxu1 %v15396_v35 }
  0x59   :  { %1214 = vmatmul.f32.vlgmr.msrb.gmra.mxu3 %v18199_v60  ;;  %1245 = vmatpush.msra.mxu0 %v15458_v63 }
  0x5a   :  { %1268 = vmatpush.msra.mxu1 %v15410_v49  ;;  %1394 = vmatpush.msrb.mxu2 %v15461_v38 }
  0x5b   :  { %1345 = vmatpush.msrb.mxu0 %v15443_v24  ;;  %1416 = vmatpush.msrb.mxu3 %v15421_v26 }
  0x5c   :  { %1270 = vmatpush.msra.mxu1 %v15419_v33 }
  0x5d   :  { %1157 = vmatmul.f32.vlgmr.msrb.gmra.mxu1 %v18199_v60 }
  0x5e   :  { %1368 = vmatpush.msrb.mxu1 %v15421_v26 }
  0x5f   :  { %1298 = vmatmul.f32.vlgmr.msra.gmra.mxu2 %v15183_v48 }
  0x60   :  { %1247 = vmatmul.f32.vlgmr.msra.gmra.mxu0 %v18199_v60 }
  0x61   :  { %1324 = vmatmul.f32.vlgmr.msra.gmra.mxu3 %v15088_v17 }
  0x65   :  { %1272 = vmatmul.f32.vlgmr.msra.gmra.mxu1 %v18199_v60 }
  0x67   :  { %1396 = vmatmul.f32.vlgmr.msrb.gmra.mxu2 %v15088_v17 }
  0x68   :  { %1348 = vmatmul.f32.vlgmr.msrb.gmra.mxu0 %v15109_v23 }
  0x69   :  { %1418 = vmatmul.f32.vlgmr.msrb.gmra.mxu3 %v15088_v17 }
  0x6d   :  { %1372 = vmatmul.f32.vlgmr.msrb.gmra.mxu1 %v15123_v28 }
  0x88   :  { %v108_v25 = vpop.f32.mrf.mxu0 }
  0x90   :  { %v179_v54 = vpop.f32.mrf.mxu2  ;;  %v206_v38 = vpop.f32.mrf.mxu3 }
  0x91   :  { %v149_v40 = vpop.f32.mrf.mxu1 }
  0x92   :  { %v150_v63 = vadd.f32 %v149_v40, %v108_v25 }
  0x94   :  { %v239_v26 = vpop.f32.mrf.mxu0  ;;  %v180_v39 = vadd.f32 %v179_v54, %v150_v63 }
  0x96   :  { %v207_v23 = vadd.f32 %v206_v38, %v180_v39 }
  0x98   :  { %v294_v6 = vpop.f32.mrf.mxu2  ;;  %v240_v32 = vadd.f32 %v239_v26, %v207_v23 }
  0x99   :  { %v264_v48 = vpop.f32.mrf.mxu1  ;;  %v320_v24 = vpop.f32.mrf.mxu3 }
  0x9a   :  { %v265_v57 = vadd.f32 %v264_v48, %v240_v32 }
  0x9c   :  { %v344_v0 = vpop.f32.mrf.mxu0  ;;  %v295_v40 = vadd.f32 %v294_v6, %v265_v57 }
  0x9e   :  { %v321_v63 = vadd.f32 %v320_v24, %v295_v40 }
  0xa1   :  { %v368_v61 = vpop.f32.mrf.mxu1  ;;  %v392_v60 = vpop.f32.mrf.mxu2 }
  0xa2   :  { %v414_v27 = vpop.f32.mrf.mxu3 }
  0xa4   :  { %v447_v1 = vpop.f32.mrf.mxu0 }
  0xa9   :  { %v488_v31 = vpop.f32.mrf.mxu1  ;;  %v518_v17 = vpop.f32.mrf.mxu2 }
  0xaa   :  { %v489_v33 = vadd.f32 %v488_v31, %v447_v1  ;;  %v545_v28 = vpop.f32.mrf.mxu3  ;;  %v345_v1 = vadd.f32 %v344_v0, %v321_v63 }
  0xac   :  { %v519_v49 = vadd.f32 %v518_v17, %v489_v33  ;;  %v578_v36 = vpop.f32.mrf.mxu0  ;;  %v369_v33 = vadd.f32 %v368_v61, %v345_v1 }
  0xae   :  { %v546_v35 = vadd.f32 %v545_v28, %v519_v49 }
  0xb0   :  { %v579_v10 = vadd.f32 %v578_v36, %v546_v35  ;;  %v393_v35 = vadd.f32 %v392_v60, %v369_v33 }
  0xb1   :  { %v603_v53 = vpop.f32.mrf.mxu1  ;;  %v629_v51 = vpop.f32.mrf.mxu2 }
  0xb2   :  { %v604_v55 = vadd.f32 %v603_v53, %v579_v10  ;;  %v415_v57 = vadd.f32 %v414_v27, %v393_v35 }
  0xb3   :  { %v655_v25 = vpop.f32.mrf.mxu3 }
  0xb4   :  { %v679_v46 = vpop.f32.mrf.mxu0  ;;  %v630_v14 = vadd.f32 %v629_v51, %v604_v55  ;;  %v15529_v51 = vld [vmem:[%s17852_s2] ss:$0 sm:$0xff] }
  0xb5   :  { %18223 = vst [vmem:[#allocation74_spill] sm:$0xff] %v15529_v51  ;;  %v420_v24 = vadd.f32 %v15529_v51, %v415_v57 }
  0xb6   :  { %v656_v54 = vadd.f32 %v655_v25, %v630_v14 }
  0xb7   :  { %v14761_v28 = vmul.f32 -1.442695, %v420_v24  ;;  %v58_v24 = vld [vmem:[%s17853_s3 + $0x18] sm:$0xff] }
  0xb8   :  { %v680_v26 = vadd.f32 %v679_v46, %v656_v54  ;;  %v15534_v46 = vld [vmem:[%s17852_s2 + $0x1] ss:$0 sm:$0xff] }
  0xb9   :  { %18224 = vst [vmem:[#allocation75_spill] sm:$0xff] %v15534_v46  ;;  %14823 = vpow2.f32 %v14761_v28 }
  0xba   :  { %v703_v38 = vpop.f32.mrf.mxu1  ;;  %v727_v39 = vpop.f32.mrf.mxu2 }
  0xbb   :  { %v749_v58 = vpop.f32.mrf.mxu3  ;;  %v704_v23 = vadd.f32 %v703_v38, %v680_v26 }
  0xbd   :  { %v782_v31 = vpop.f32.mrf.mxu0  ;;  %v728_v53 = vadd.f32 %v727_v39, %v704_v23 }
  0xbf   :  { %v750_v55 = vadd.f32 %v749_v58, %v728_v53  ;;  %v14824_v33 = vpop.eup %14823 }
  0xc0   :  { %v15540_v53 = vadd.f32 1.0, %v14824_v33 }
  0xc1   :  { %v755_v27 = vadd.f32 %v15534_v46, %v750_v55 }
  0xc2   :  { %v823_v49 = vpop.f32.mrf.mxu1  ;;  %v853_v32 = vpop.f32.mrf.mxu2  ;;  %vm1435_vm3 = vweird.f32 %v15540_v53 }
  0xc3   :  { %v824_v10 = vadd.f32 %v823_v49, %v782_v31  ;;  %v14762_v25 = vmul.f32 -1.442695, %v755_v27 }
  0xc4   :  { %v880_v36 = vpop.f32.mrf.mxu3 }
  0xc5   :  { %v913_v48 = vpop.f32.mrf.mxu0  ;;  %v854_v14 = vadd.f32 %v853_v32, %v824_v10  ;;  %14825 = vpow2.f32 %v14762_v25 }
  0xc6   :  { %14827 = vrcp.f32 %v15540_v53 }
  0xc7   :  { %v881_v17 = vadd.f32 %v880_v36, %v854_v14 }
  0xc9   :  { %v914_v40 = vadd.f32 %v913_v48, %v881_v17  ;;  %v15549_v17 = vand.u32 4294901760, %v58_v24 }
  0xca   :  { %v938_v61 = vpop.f32.mrf.mxu1  ;;  %v964_v0 = vpop.f32.mrf.mxu2 }
  0xcb   :  { %v939_v39 = vadd.f32 %v938_v61, %v914_v40  ;;  %v14826_v49 = vpop.eup %14825  ;;  %18225 = vst [vmem:[#allocation76_spill] sm:$0xff] %v15549_v17  ;;  %v15555_v40 = vsub.f32 %v58_v24, %v15549_v17  ;;  %1610 = vmatpush.msra.mxu3 %v15549_v17  ;;  %1510 = vmatpush.msra.mxu0 %v15549_v17 }
  0xcc   :  { %v990_v6 = vpop.f32.mrf.mxu3  ;;  %v15542_v10 = vadd.f32 1.0, %v14826_v49  ;;  %v15574_v49 = vpop.eup %14827 }
  0xcd   :  { %v1014_v60 = vpop.f32.mrf.mxu0  ;;  %v965_v1 = vadd.f32 %v964_v0, %v939_v39  ;;  %18226 = vst [vmem:[#allocation77_spill] sm:$0xff] %v15555_v40  ;;  %1581 = vmatpush.msra.mxu2 %v15555_v40  ;;  %vm1436_vm1 = vweird.f32 %v15574_v49 }
  0xce   :  { %14829 = vrcp.f32 %v15542_v10  ;;  %vm1454_vm4 = vweird.f32 %v15542_v10  ;;  %vm15660_vm5 = vmor %vm1435_vm3, %vm1436_vm1  ;;  %vm1849_vm1 = vcmask 61440  }
  0xcf   :  { %v991_v48 = vadd.f32 %v990_v6, %v965_v1  ;;  %v57_v6 = vld [vmem:[%s17853_s3 + $0x10] sm:$0xff]  ;;  %v56_v1 = vld [vmem:[%s17853_s3 + $0x8] sm:$0xff] }
  0xd1   :  { %v1015_v14 = vadd.f32 %v1014_v60, %v991_v48  ;;  %v15557_v60 = vand.u32 4294901760, %v57_v6 }
  0xd2   :  { %v1038_v63 = vpop.f32.mrf.mxu1  ;;  %v1062_v58 = vpop.f32.mrf.mxu2 }
  0xd3   :  { %18227 = vst [vmem:[#allocation78_spill] sm:$0xff] %v15557_v60  ;;  %v15568_v33 = vsub.f32 %v57_v6, %v15557_v60  ;;  %1612 = vmatpush.msra.mxu3 %v15557_v60  ;;  %1512 = vmatpush.msra.mxu0 %v15557_v60 }
  0xd4   :  { %v15538_v54 = vpop.f32.mrf.mxu3 }
  0xd5   :  { %v1117_v38 = vpop.f32.mrf.mxu0  ;;  %18229 = vst [vmem:[#allocation80_spill] sm:$0xff] %v15568_v33  ;;  %v15585_v48 = vand.u32 4294901760, %v15568_v33  ;;  %1584 = vmatpush.msra.mxu2 %v15568_v33 }
  0xd7   :  { %18231 = vst [vmem:[#allocation82_spill] sm:$0xff] %v15585_v48 }
  0xda   :  { %v1158_v31 = vpop.f32.mrf.mxu1  ;;  %v1188_v26 = vpop.f32.mrf.mxu2 }
  0xdb   :  { %v1159_v23 = vadd.f32 %v1158_v31, %v1117_v38  ;;  %v1039_v38 = vadd.f32 %v1038_v63, %v1015_v14  ;;  %v55_v63 = vld [vmem:[%s17853_s3] sm:$0xff] }
  0xdc   :  { %v1215_v32 = vpop.f32.mrf.mxu3 }
  0xdd   :  { %v1189_v35 = vadd.f32 %v1188_v26, %v1159_v23  ;;  %v1248_v36 = vpop.f32.mrf.mxu0  ;;  %v15565_v26 = vand.u32 4294901760, %v15555_v40  ;;  %v15571_v23 = vand.u32 4294901760, %v56_v1 }
  0xdf   :  { %v1216_v57 = vadd.f32 %v1215_v32, %v1189_v35  ;;  %18228 = vst [vmem:[#allocation79_spill] sm:$0xff] %v15565_v26  ;;  %v15580_v32 = vpop.eup %14829  ;;  %1614 = vmatpush.msra.mxu3 %v15571_v23  ;;  %1514 = vmatpush.msra.mxu0 %v15571_v23 }
  0xe0   :  { %18230 = vst [vmem:[#allocation81_spill] sm:$0xff] %v15571_v23  ;;  %vm1455_vm2 = vweird.f32 %v15580_v32 }
  0xe1   :  { %v1249_v55 = vadd.f32 %v1248_v36, %v1216_v57  ;;  %v1541_v36 = vsub.f32 %v15555_v40, %v15565_v26  ;;  %v15588_v57 = vsub.f32 %v56_v1, %v15571_v23  ;;  %vm1456_vm6 = vmor %vm1454_vm4, %vm1455_vm2 }
  0xe2   :  { %v1273_v61 = vpop.f32.mrf.mxu1  ;;  %v1299_v0 = vpop.f32.mrf.mxu2 }
  0xe3   :  { %v1274_v27 = vadd.f32 %v1273_v61, %v1249_v55  ;;  %18232 = vst [vmem:[#allocation83_spill] sm:$0xff] %v15588_v57  ;;  %v1063_v55 = vadd.f32 %v1062_v58, %v1039_v38  ;;  %v15600_v6 = vand.u32 4294901760, %v15588_v57  ;;  %1587 = vmatpush.msra.mxu2 %v15588_v57  ;;  %v1431_v58 = vmul.f32 %v15574_v49, %v15540_v53 }
  0xe4   :  { %v1325_v28 = vpop.f32.mrf.mxu3 }
  0xe5   :  { %v1300_v25 = vadd.f32 %v1299_v0, %v1274_v27  ;;  %v1349_v39 = vpop.f32.mrf.mxu0  ;;  %v15592_v0 = vand.u32 4294901760, %v55_v63  ;;  %v15595_v27 = vand.u32 4294901760, %v1541_v36  ;;  %18235 = vst [vmem:[#allocation86_spill] sm:$0xff] %v15600_v6  ;;  %v1553_v36 = vsub.f32 %v15588_v57, %v15600_v6 }
  0xe6   :  { %v1432_v46 = vsub.f32 1.0, %v1431_v58 }
  0xe7   :  { %v1326_v31 = vadd.f32 %v1325_v28, %v1300_v25  ;;  %18233 = vst [vmem:[#allocation84_spill] sm:$0xff] %v15592_v0  ;;  %v1547_v28 = vsub.f32 %v15568_v33, %v15585_v48  ;;  %v1450_v25 = vmul.f32 %v15580_v32, %v15542_v10  ;;  %1616 = vmatpush.msra.mxu3 %v15592_v0 }
  0xe8   :  { %18234 = vst [vmem:[#allocation85_spill] sm:$0xff] %v15595_v27  ;;  %1516 = vmatpush.msra.mxu0 %v15592_v0  ;;  %1543 = vmatpush.msra.mxu1 %v15595_v27  ;;  %v1433_v58 = vmul.f32 %v15574_v49, %v1432_v46  ;;  %v1441_v46 = vand.u32 2147483648, %v15540_v53 }
  0xe9   :  { %v1350_v35 = vadd.f32 %v1349_v39, %v1326_v31  ;;  %v15608_v39 = vsub.f32 %v55_v63, %v15592_v0  ;;  %v15615_v31 = vld [vmem:[%s17852_s2 + $0x3] ss:$0 sm:$0xff]  ;;  %v1451_v51 = vsub.f32 1.0, %v1450_v25 }
  0xea   :  { %v1373_v14 = vpop.f32.mrf.mxu1  ;;  %v1397_v61 = vpop.f32.mrf.mxu2  ;;  %18237 = vst [vmem:[#allocation88_spill] sm:$0xff] %v15615_v31  ;;  %1639 = vmatpush.msrb.mxu0 %v15565_v26 }
  0xeb   :  { %v1374_v24 = vadd.f32 %v1373_v14, %v1350_v35  ;;  %18236 = vst [vmem:[#allocation87_spill] sm:$0xff] %v15608_v39  ;;  %v15618_v35 = vand.u32 4294901760, %v1547_v28  ;;  %v15624_v63 = vand.u32 4294901760, %v15608_v39  ;;  %1590 = vmatpush.msra.mxu2 %v15608_v39  ;;  %v1085_v14 = vadd.f32 %v15538_v54, %v1063_v55 }
  0xec   :  { %v1419_v38 = vpop.f32.mrf.mxu3  ;;  %v15634_v28 = vand.u32 4294901760, %v1553_v36  ;;  %1643 = vmatpush.msrb.mxu0 %v15585_v48  ;;  %v1439_v36 = vand.u32 2147483647, %v15540_v53 }
  0xed   :  { %v1398_v1 = vadd.f32 %v1397_v61, %v1374_v24  ;;  %18238 = vst [vmem:[#allocation89_spill] sm:$0xff] %v15618_v35  ;;  %v15631_v61 = vld [vmem:[%s17852_s2 + $0x2] ss:$0 sm:$0xff]  ;;  %1549 = vmatpush.msra.mxu1 %v15618_v35  ;;  %v1559_v57 = vsub.f32 %v15608_v39, %v15624_v63 }
  0xee   :  { %18239 = vst [vmem:[#allocation90_spill] sm:$0xff] %v15624_v63  ;;  %1647 = vmatpush.msrb.mxu0 %v15600_v6  ;;  %v1090_v55 = vadd.f32 %v15631_v61, %v1085_v14  ;;  %v1458_v14 = vand.u32 2147483647, %v15542_v10  ;;  %vm1440_vm7 = vcmp.eq.f32.partialorder %v1439_v36, 8.507059e+37 }
  0xef   :  { %18240 = vst [vmem:[#allocation91_spill] sm:$0xff] %v15631_v61  ;;  %v1420_v24 = vadd.f32 %v1419_v38, %v1398_v1  ;;  %1555 = vmatpush.msra.mxu1 %v15634_v28  ;;  %v15642_v54 = vand.u32 4294901760, %v1559_v57  ;;  %v1452_v1 = vmul.f32 %v15580_v32, %v1451_v51  ;;  %v1434_v57 = vadd.f32 %v15574_v49, %v1433_v58 }
  0xf0   :  { %18241 = vst [vmem:[#allocation92_spill] sm:$0xff] %v15634_v28  ;;  %1651 = vmatpush.msrb.mxu0 %v15624_v63  ;;  %v1460_v51 = vand.u32 2147483648, %v15542_v10  ;;  %vm1459_vm8 = vcmp.eq.f32.partialorder %v1458_v14, 8.507059e+37  ;;  %v60_v14 = vld [vmem:[%s17853_s3 + $0x28] sm:$0xff] }
  0xf1   :  { %v1425_v33 = vadd.f32 %v15615_v31, %v1420_v24  ;;  %18242 = vst [vmem:[#allocation93_spill] sm:$0xff] %v15642_v54  ;;  %1561 = vmatpush.msra.mxu1 %v15642_v54  ;;  %v1442_v31 = vor.u32 1.1754944e-38, %v1441_v46 }
  0xf2   :  { %v1461_v61 = vor.u32 1.1754944e-38, %v1460_v51 }
  0xf3   :  { %v14763_v38 = vmul.f32 -1.442695, %v1425_v33  ;;  %1670 = vmatpush.msrb.mxu1 %v15549_v17  ;;  %v1453_v33 = vadd.f32 %v15580_v32, %v1452_v1 }
  0xf5   :  { %14831 = vpow2.f32 %v14763_v38  ;;  %1672 = vmatpush.msrb.mxu1 %v15557_v60  ;;  %v1457_v38 = vsel %vm1456_vm6, %v15580_v32, %v1453_v33 }
  0xf6   :  { %14833 = vtanh.f32 %v1090_v55  ;;  %v1438_v55 = vsel %vm15660_vm5, %v15574_v49, %v1434_v57  ;;  %v1462_v39 = vsel %vm1459_vm8, %v1461_v61, %v1457_v38 }
  0xf7   :  { %1674 = vmatpush.msrb.mxu1 %v15571_v23  ;;  %v1443_v53 = vsel %vm1440_vm7, %v1442_v31, %v1438_v55  ;;  %v1484_v63 = vmul.f32 0.0, %v1462_v39  ;;  %v59_v55 = vld [vmem:[%s17853_s3 + $0x20] sm:$0xff] }
  0xf9   :  { %1676 = vmatpush.msrb.mxu1 %v15592_v0 }
  0xfb   :  { %v14832_v24 = vpop.eup %14831 }
  0xfc   :  { %v1468_v1 = vadd.f32 1.0, %v14832_v24  ;;  %v14834_v58 = vpop.eup %14833  ;;  %v15704_v24 = vand.u32 4294901760, %v60_v14 }
  0xfd   :  { %v1485_v10 = vmul.f32 %v14834_v58, %v1443_v53 }
  0xfe   :  { %14835 = vrcp.f32 %v1468_v1  ;;  %v1480_v49 = vand.u32 2147483648, %v1468_v1  ;;  %v1478_v57 = vand.u32 2147483647, %v1468_v1  ;;  %vm1474_vm10 = vweird.f32 %v1468_v1  ;;  %1705 = vmatpush.msrb.mxu2 %v15704_v24 }
  0xff   :  { %v15671_v40 = vadd.f32 %v1485_v10, %v1484_v63  ;;  %v15710_v38 = vsub.f32 %v60_v14, %v15704_v24 }
 0x100   :  { %v1481_v51 = vor.u32 1.1754944e-38, %v1480_v49  ;;  %vm1479_vm12 = vcmp.eq.f32.partialorder %v1478_v57, 8.507059e+37 }
 0x101   :  { %14837 = vtanh.f32 %v15671_v40  ;;  %18245 = vst [vmem:[#allocation94_spill] sm:$0xff] %v15710_v38  ;;  %v15717_v58 = vand.u32 4294901760, %v15710_v38 }
 0x103   :  { %v1734_v10 = vsub.f32 %v15710_v38, %v15717_v58 }
 0x104   :  { %v14836_v6 = vpop.eup %14835 }
 0x105   :  { %v1470_v48 = vmul.f32 %v14836_v6, %v1468_v1  ;;  %vm1475_vm9 = vweird.f32 %v14836_v6  ;;  %v15712_v1 = vand.u32 4294901760, %v59_v55 }
 0x106   :  { %vm1476_vm11 = vmor %vm1474_vm10, %vm1475_vm9 }
 0x107   :  { %v1471_v26 = vsub.f32 1.0, %v1470_v48  ;;  %v14838_v31 = vpop.eup %14837  ;;  %v15720_v53 = vsub.f32 %v59_v55, %v15712_v1  ;;  %1707 = vmatpush.msrb.mxu2 %v15712_v1 }
 0x109   :  { %v1472_v32 = vmul.f32 %v14836_v6, %v1471_v26  ;;  %18246 = vst [vmem:[#allocation95_spill] sm:$0xff] %v15720_v53  ;;  %v15729_v49 = vand.u32 4294901760, %v15720_v53 }
 0x10b   :  { %v1473_v33 = vadd.f32 %v14836_v6, %v1472_v32  ;;  %18247 = vst [vmem:[#allocation96_spill] sm:$0xff] %v15729_v49  ;;  %v15735_v32 = vand.u32 4294901760, %v1734_v10  ;;  %v1740_v57 = vsub.f32 %v15720_v53, %v15729_v49 }
 0x10d   :  { %v1477_v46 = vsel %vm1476_vm11, %v14836_v6, %v1473_v33  ;;  %18248 = vst [vmem:[#allocation97_spill] sm:$0xff] %v15735_v32  ;;  %1736 = vmatpush.msrb.mxu3 %v15735_v32  ;;  %v15743_v33 = vand.u32 4294901760, %v1740_v57 }
 0x10e   :  { %v1482_v39 = vsel %vm1479_vm12, %v1481_v51, %v1477_v46  ;;  %v15754_v51 = vld [vmem:[%s17854_s4] ss:$0 sm:$0xff] }
 0x10f   :  { %v15674_v63 = vmul.f32 %v14838_v31, %v1482_v39  ;;  %18249 = vst [vmem:[#allocation98_spill] sm:$0xff] %v15743_v33  ;;  %1742 = vmatpush.msrb.mxu3 %v15743_v33 }
 0x111   :  { %1490 = vst.msk [vmem:[%s17857_s7] sm:$0x1f] %vm1489_vm14, %v15674_v63  ;;  %v1495_v26 = vsel %vm78_vm13, %v15674_v63, 0 }
 0x112   :  { %v15683_v48 = vand.u32 4294901760, %v1495_v26 }
 0x114   :  { %1563 = vmatmul.f32.vlgmr.msra.gmra.mxu1 %v15683_v48  ;;  %v15687_v6 = vsub.f32 %v1495_v26, %v15683_v48 }
 0x115   :  { %1789 = vmatpush.msra.mxu1 %v15704_v24 }
 0x116   :  { %1593 = vmatmul.f32.vlgmr.msra.gmra.mxu2 %v15687_v6  ;;  %v15691_v61 = vand.u32 4294901760, %v15687_v6 }
 0x117   :  { %1791 = vmatpush.msra.mxu1 %v15712_v1  ;;  %1816 = vmatpush.msra.mxu2 %v15717_v58 }
 0x118   :  { %1620 = vmatmul.f32.vlgmr.msra.gmra.mxu3 %v15691_v61  ;;  %v1520_v25 = vsub.f32 %v15687_v6, %v15691_v61 }
 0x119   :  { %1820 = vmatpush.msra.mxu2 %v15729_v49  ;;  %1841 = vmatpush.msra.mxu3 %v15704_v24 }
 0x11a   :  { %v15696_v36 = vand.u32 4294901760, %v1520_v25 }
 0x11b   :  { %1843 = vmatpush.msra.mxu3 %v15712_v1 }
 0x11c   :  { %1522 = vmatmul.f32.vlgmr.msra.gmra.mxu0 %v15696_v36  ;;  %1678 = vmatmul.f32.vlgmr.msrb.gmra.mxu1 %v15683_v48 }
 0x11d   :  { %1764 = vmatpush.msra.mxu0 %v15710_v38  ;;  %1900 = vmatpush.msrb.mxu1 %v15125_v29 }
 0x11f   :  { %1767 = vmatpush.msra.mxu0 %v15720_v53  ;;  %1906 = vmatpush.msrb.mxu1 %v15128_v30 }
 0x121   :  { %1912 = vmatpush.msrb.mxu1 %v15148_v37 }
 0x123   :  { %1918 = vmatpush.msrb.mxu1 %v15162_v41 }
 0x124   :  { %1653 = vmatmul.f32.vlgmr.msrb.gmra.mxu0 %v15683_v48 }
 0x125   :  { %1867 = vmatpush.msrb.mxu0 %v15051_v3 }
 0x127   :  { %1869 = vmatpush.msrb.mxu0 %v15053_v4 }
 0x129   :  { %1871 = vmatpush.msrb.mxu0 %v15055_v5 }
 0x12b   :  { %1873 = vmatpush.msrb.mxu0 %v15063_v8 }
 0x191   :  { %v1564_v46 = vpop.f32.mrf.mxu1 }
 0x199   :  { %v1523_v31 = vpop.f32.mrf.mxu0  ;;  %v1594_v25 = vpop.f32.mrf.mxu2 }
 0x19a   :  { %v1524_v39 = vadd.f32 %v15754_v51, %v1523_v31  ;;  %v1679_v37 = vpop.f32.mrf.mxu1 }
 0x19b   :  { %v1621_v55 = vpop.f32.mrf.mxu3 }
 0x19c   :  { %v1565_v26 = vadd.f32 %v1564_v46, %v1524_v39 }
 0x19e   :  { %v1595_v14 = vadd.f32 %v1594_v25, %v1565_v26  ;;  %v18250_v26 = vld [vmem:[#allocation27_spill] sm:$0xff]  ;;  %v18251_v25 = vld [vmem:[#allocation34_spill] sm:$0xff] }
 0x1a0   :  { %v1622_v10 = vadd.f32 %v1621_v55, %v1595_v14  ;;  %v18252_v14 = vld [vmem:[#allocation18_spill] sm:$0xff]  ;;  %v18253_v55 = vld [vmem:[#allocation25_spill] sm:$0xff] }
 0x1a1   :  { %v1654_v57 = vpop.f32.mrf.mxu0 }
 0x1a2   :  { %v1655_v41 = vadd.f32 %v1654_v57, %v1622_v10  ;;  %v18254_v10 = vld [vmem:[#allocation22_spill] sm:$0xff]  ;;  %v18255_v57 = vld [vmem:[#allocation24_spill] sm:$0xff] }
 0x1a4   :  { %v1680_v30 = vadd.f32 %v1679_v37, %v1655_v41 }
 0x1a6   :  { %v1682_v53 = vmax.f32 %v1680_v30, 0.0  ;;  %v14764_v30 = vld [vmem:[%s17850_s0 + $0x8] sm:$0x1f] }
 0x1a7   :  { %v2040_v37 = vsel %vm267_vm0, %v14764_v30, 0  ;;  %v18258_v30 = vld [vmem:[#allocation35_spill] sm:$0xff] }
 0x1a8   :  { %v1688_v29 = vsel %vm1686_vm15, %v1682_v53, 0  ;;  %v15776_v41 = vand.u32 4294901760, %v2040_v37 }
 0x1a9   :  { %v1708_v38 = vand.u32 4294901760, %v1688_v29 }
 0x1aa   :  { %v15786_v53 = vsub.f32 %v2040_v37, %v15776_v41  ;;  %v18260_v37 = vld [vmem:[#allocation37_spill] sm:$0xff] }
 0x1ab   :  { %v1709_v49 = vsub.f32 %v1688_v29, %v1708_v38  ;;  %1744 = vmatmul.f32.vlgmr.msrb.gmra.mxu3 %v1708_v38 }
 0x1ac   :  { %1967 = vmatpush.msrb.mxu3 %v15051_v3 }
 0x1ad   :  { %1770 = vmatmul.f32.vlgmr.msra.gmra.mxu0 %v1709_v49  ;;  %v1710_v31 = vand.u32 4294901760, %v1709_v49 }
 0x1ae   :  { %1969 = vmatpush.msrb.mxu3 %v15053_v4  ;;  %1996 = vmatpush.msra.mxu0 %v15093_v18 }
 0x1af   :  { %1795 = vmatmul.f32.vlgmr.msra.gmra.mxu1 %v1710_v31  ;;  %v1711_v46 = vsub.f32 %v1709_v49, %v1710_v31  ;;  %v15795_v49 = vand.u32 4294901760, %v15786_v53  ;;  %v18256_v31 = vld [vmem:[#allocation20_spill] sm:$0xff] }
 0x1b0   :  { %1971 = vmatpush.msrb.mxu3 %v15055_v5  ;;  %2000 = vmatpush.msra.mxu0 %v15096_v19 }
 0x1b1   :  { %v1712_v29 = vand.u32 4294901760, %v1711_v46  ;;  %2027 = vmatpush.msra.mxu1 %v15051_v3  ;;  %v18257_v46 = vld [vmem:[#allocation33_spill] sm:$0xff] }
 0x1b2   :  { %1973 = vmatpush.msrb.mxu3 %v15063_v8  ;;  %2004 = vmatpush.msra.mxu0 %v15099_v20 }
 0x1b3   :  { %1713 = vmatmul.f32.vlgmr.msrb.gmra.mxu2 %v1712_v29  ;;  %1845 = vmatmul.f32.vlgmr.msra.gmra.mxu3 %v1708_v38  ;;  %v18259_v29 = vld [vmem:[#allocation49_spill] sm:$0xff] }
 0x1b4   :  { %2029 = vmatpush.msra.mxu1 %v15053_v4  ;;  %1938 = vmatpush.msrb.mxu2 %v15071_v11 }
 0x1b5   :  { %1879 = vmatmul.f32.vlgmr.msrb.gmra.mxu0 %v15696_v36  ;;  %2088 = vmatpush.msra.mxu3 %v15138_v34 }
 0x1b6   :  { %2008 = vmatpush.msra.mxu0 %v15106_v22  ;;  %2031 = vmatpush.msra.mxu1 %v15055_v5 }
 0x1b7   :  { %1920 = vmatmul.f32.vlgmr.msrb.gmra.mxu1 %v15683_v48  ;;  %1941 = vmatpush.msrb.mxu2 %v15075_v12 }
 0x1b8   :  { %2033 = vmatpush.msra.mxu1 %v15063_v8  ;;  %2111 = vmatpush.msrb.mxu0 %v15086_v16 }
 0x1b9   :  { %1944 = vmatpush.msrb.mxu2 %v15079_v13 }
 0x1ba   :  { %2134 = vmatpush.msrb.mxu1 %v15065_v9 }
 0x1bb   :  { %1822 = vmatmul.f32.vlgmr.msra.gmra.mxu2 %v1708_v38  ;;  %1977 = vmatmul.f32.vlgmr.msrb.gmra.mxu3 %v15691_v61  ;;  %v2062_v38 = vsub.f32 %v15786_v53, %v15795_v49 }
 0x1bc   :  { %1947 = vmatpush.msrb.mxu2 %v15083_v15  ;;  %2182 = vmatpush.msrb.mxu3 %v15065_v9 }
 0x1bd   :  { %2010 = vmatmul.f32.vlgmr.msra.gmra.mxu0 %v15683_v48  ;;  %v15812_v39 = vand.u32 4294901760, %v2062_v38  ;;  %v18261_v38 = vld [vmem:[#allocation50_spill] sm:$0xff] }
 0x1be   :  { %2058 = vmatpush.msra.mxu2 %v15065_v9  ;;  %2202 = vmatpush.msra.mxu0 %v15164_v42 }
 0x1bf   :  { %2035 = vmatmul.f32.vlgmr.msra.gmra.mxu1 %v15683_v48 }
 0x1c0   :  { %2204 = vmatpush.msra.mxu0 %v15166_v43  ;;  %2235 = vmatpush.msra.mxu1 %v15227_v59 }
 0x1c2   :  { %2206 = vmatpush.msra.mxu0 %v15168_v44  ;;  %2241 = vmatpush.msra.mxu1 %v15240_v62 }
 0x1c3   :  { %1950 = vmatmul.f32.vlgmr.msrb.gmra.mxu2 %v15687_v6  ;;  %2090 = vmatmul.f32.vlgmr.msra.gmra.mxu3 %v15776_v41 }
 0x1c4   :  { %2160 = vmatpush.msrb.mxu2 %v15103_v21  ;;  %2208 = vmatpush.msra.mxu0 %v15180_v47 }
 0x1c5   :  { %2114 = vmatmul.f32.vlgmr.msrb.gmra.mxu0 %v15786_v53  ;;  %2247 = vmatpush.msra.mxu1 %v15253_v2 }
 0x1c6   :  { %2302 = vmatpush.msra.mxu3 %v15164_v42  ;;  %2331 = vmatpush.msrb.mxu0 %v15190_v50 }
 0x1c7   :  { %2138 = vmatmul.f32.vlgmr.msrb.gmra.mxu1 %v15795_v49 }
 0x1c8   :  { %2253 = vmatpush.msra.mxu1 %v15262_v7  ;;  %2304 = vmatpush.msra.mxu3 %v15166_v43 }
 0x1c9   :  { %2335 = vmatpush.msrb.mxu0 %v15199_v52 }
 0x1ca   :  { %2362 = vmatpush.msrb.mxu1 %v15164_v42  ;;  %2306 = vmatpush.msra.mxu3 %v15168_v44 }
 0x1cb   :  { %2064 = vmatmul.f32.vlgmr.msra.gmra.mxu2 %v15812_v39  ;;  %2184 = vmatmul.f32.vlgmr.msrb.gmra.mxu3 %v15776_v41 }
 0x1cc   :  { %2308 = vmatpush.msra.mxu3 %v15180_v47  ;;  %2339 = vmatpush.msrb.mxu0 %v15214_v56 }
 0x1cd   :  { %2214 = vmatmul.f32.vlgmr.msra.gmra.mxu0 %v15696_v36  ;;  %2364 = vmatpush.msrb.mxu1 %v15166_v43 }
 0x1ce   :  { %2273 = vmatpush.msra.mxu2 %v15175_v45  ;;  %2343 = vmatpush.msrb.mxu0 %v18250_v26 }
 0x1cf   :  { %2255 = vmatmul.f32.vlgmr.msra.gmra.mxu1 %v15683_v48  ;;  %2420 = vmatpush.msrb.mxu3 %v18251_v25 }
 0x1d0   :  { %2366 = vmatpush.msrb.mxu1 %v15168_v44  ;;  %2276 = vmatpush.msra.mxu2 %v18252_v14 }
 0x1d1   :  { %2443 = vmatpush.msra.mxu0 %v18253_v55  ;;  %v18265_v55 = vld [vmem:[#allocation41_spill] sm:$0xff] }
 0x1d2   :  { %2368 = vmatpush.msrb.mxu1 %v15180_v47  ;;  %2279 = vmatpush.msra.mxu2 %v18254_v10  ;;  %v18263_v10 = vld [vmem:[#allocation39_spill] sm:$0xff] }
 0x1d3   :  { %2162 = vmatmul.f32.vlgmr.msrb.gmra.mxu2 %v15776_v41  ;;  %2312 = vmatmul.f32.vlgmr.msra.gmra.mxu3 %v15691_v61 }
 0x1d4   :  { %2282 = vmatpush.msra.mxu2 %v18255_v57  ;;  %2466 = vmatpush.msra.mxu1 %v18256_v31  ;;  %v18262_v57 = vld [vmem:[#allocation29_spill] sm:$0xff] }
 0x1d5   :  { %2345 = vmatmul.f32.vlgmr.msrb.gmra.mxu0 %v15683_v48  ;;  %2514 = vmatpush.msra.mxu3 %v18256_v31 }
 0x1d6   :  { %2390 = vmatpush.msrb.mxu2 %v18256_v31  ;;  %2534 = vmatpush.msrb.mxu0 %v18257_v46  ;;  %v18264_v31 = vld [vmem:[#allocation51_spill] sm:$0xff] }
 0x1d7   :  { %2370 = vmatmul.f32.vlgmr.msrb.gmra.mxu1 %v15683_v48 }
 0x1d8   :  { %2536 = vmatpush.msrb.mxu0 %v18258_v30  ;;  %2567 = vmatpush.msrb.mxu1 %v18259_v29  ;;  %v18266_v29 = vld [vmem:[#allocation52_spill] sm:$0xff] }
 0x1da   :  { %2538 = vmatpush.msrb.mxu0 %v18260_v37  ;;  %2573 = vmatpush.msrb.mxu1 %v18261_v38  ;;  %v18267_v38 = vld [vmem:[#allocation43_spill] sm:$0xff] }
 0x1db   :  { %2285 = vmatmul.f32.vlgmr.msra.gmra.mxu2 %v15687_v6  ;;  %2422 = vmatmul.f32.vlgmr.msrb.gmra.mxu3 %v15776_v41 }
 0x1dc   :  { %2492 = vmatpush.msra.mxu2 %v18262_v57  ;;  %2540 = vmatpush.msrb.mxu0 %v18263_v10  ;;  %v18272_v57 = vld [vmem:[#allocation38_spill] sm:$0xff] }
 0x1dd   :  { %2446 = vmatmul.f32.vlgmr.msra.gmra.mxu0 %v15786_v53  ;;  %2579 = vmatpush.msrb.mxu1 %v18264_v31  ;;  %v18268_v31 = vld [vmem:[#allocation46_spill] sm:$0xff] }
 0x1de   :  { %2634 = vmatpush.msrb.mxu3 %v18257_v46  ;;  %2663 = vmatpush.msra.mxu0 %v18265_v55  ;;  %v18270_v55 = vld [vmem:[#allocation47_spill] sm:$0xff] }
 0x1df   :  { %2470 = vmatmul.f32.vlgmr.msra.gmra.mxu1 %v15795_v49 }
 0x1e0   :  { %2585 = vmatpush.msrb.mxu1 %v18266_v29  ;;  %2636 = vmatpush.msrb.mxu3 %v18258_v30  ;;  %v18269_v29 = vld [vmem:[#allocation36_spill] sm:$0xff] }
 0x1e1   :  { %2667 = vmatpush.msra.mxu0 %v18267_v38  ;;  %v18271_v38 = vld [vmem:[#allocation53_spill] sm:$0xff] }
 0x1e2   :  { %2694 = vmatpush.msra.mxu1 %v18257_v46  ;;  %2638 = vmatpush.msrb.mxu3 %v18260_v37  ;;  %v18273_v46 = vld [vmem:[#allocation45_spill] sm:$0xff] }
 0x1e3   :  { %2396 = vmatmul.f32.vlgmr.msrb.gmra.mxu2 %v15812_v39  ;;  %2516 = vmatmul.f32.vlgmr.msra.gmra.mxu3 %v15776_v41 }
 0x1e4   :  { %2640 = vmatpush.msrb.mxu3 %v18263_v10  ;;  %2671 = vmatpush.msra.mxu0 %v18268_v31  ;;  %v18274_v31 = vld [vmem:[#allocation42_spill] sm:$0xff] }
 0x1e5   :  { %2546 = vmatmul.f32.vlgmr.msrb.gmra.mxu0 %v15696_v36  ;;  %2696 = vmatpush.msra.mxu1 %v18258_v30  ;;  %v18285_v30 = vld [vmem:[#allocation61_spill] sm:$0xff] }
 0x1e6   :  { %2605 = vmatpush.msrb.mxu2 %v18269_v29  ;;  %2675 = vmatpush.msra.mxu0 %v18270_v55  ;;  %v18275_v29 = vld [vmem:[#allocation44_spill] sm:$0xff] }
 0x1e7   :  { %2587 = vmatmul.f32.vlgmr.msrb.gmra.mxu1 %v15683_v48  ;;  %2752 = vmatpush.msra.mxu3 %v18271_v38  ;;  %v18276_v55 = vld [vmem:[#allocation40_spill] sm:$0xff]  ;;  %v18277_v38 = vld [vmem:[#allocation54_spill] sm:$0xff] }
 0x1e8   :  { %2698 = vmatpush.msra.mxu1 %v18260_v37  ;;  %2608 = vmatpush.msrb.mxu2 %v18272_v57  ;;  %v18280_v57 = vld [vmem:[#allocation57_spill] sm:$0xff]  ;;  %v18283_v37 = vld [vmem:[#allocation59_spill] sm:$0xff] }
 0x1e9   :  { %2775 = vmatpush.msrb.mxu0 %v18273_v46  ;;  %v18278_v46 = vld [vmem:[#allocation55_spill] sm:$0xff] }
 0x1ea   :  { %2700 = vmatpush.msra.mxu1 %v18263_v10  ;;  %2611 = vmatpush.msrb.mxu2 %v18274_v31  ;;  %v18279_v31 = vld [vmem:[#allocation69_spill] sm:$0xff]  ;;  %v18281_v10 = vld [vmem:[#allocation70_spill] sm:$0xff] }
 0x1eb   :  { %2494 = vmatmul.f32.vlgmr.msra.gmra.mxu2 %v15776_v41  ;;  %2644 = vmatmul.f32.vlgmr.msrb.gmra.mxu3 %v15691_v61 }
 0x1ec   :  { %2614 = vmatpush.msrb.mxu2 %v18275_v29  ;;  %2798 = vmatpush.msrb.mxu1 %v18276_v55  ;;  %v18282_v29 = vld [vmem:[#allocation48_spill] sm:$0xff] }
 0x1ed   :  { %2677 = vmatmul.f32.vlgmr.msra.gmra.mxu0 %v15683_v48  ;;  %2846 = vmatpush.msrb.mxu3 %v18276_v55 }
 0x1ee   :  { %2722 = vmatpush.msra.mxu2 %v18276_v55  ;;  %2866 = vmatpush.msra.mxu0 %v18277_v38  ;;  %v18284_v55 = vld [vmem:[#allocation71_spill] sm:$0xff] }
 0x1ef   :  { %2702 = vmatmul.f32.vlgmr.msra.gmra.mxu1 %v15683_v48 }
 0x1f0   :  { %2868 = vmatpush.msra.mxu0 %v18278_v46  ;;  %2899 = vmatpush.msra.mxu1 %v18279_v31  ;;  %v18286_v31 = vld [vmem:[#allocation72_spill] sm:$0xff] }
 0x1f2   :  { %2870 = vmatpush.msra.mxu0 %v18280_v57  ;;  %2905 = vmatpush.msra.mxu1 %v18281_v10  ;;  %v18287_v10 = vld [vmem:[#allocation63_spill] sm:$0xff] }
 0x1f3   :  { %2617 = vmatmul.f32.vlgmr.msrb.gmra.mxu2 %v15687_v6  ;;  %2754 = vmatmul.f32.vlgmr.msra.gmra.mxu3 %v15776_v41 }
 0x1f4   :  { %2824 = vmatpush.msrb.mxu2 %v18282_v29  ;;  %2872 = vmatpush.msra.mxu0 %v18283_v37  ;;  %v18292_v29 = vld [vmem:[#allocation58_spill] sm:$0xff] }
 0x1f5   :  { %2778 = vmatmul.f32.vlgmr.msrb.gmra.mxu0 %v15786_v53  ;;  %2911 = vmatpush.msra.mxu1 %v18284_v55  ;;  %v18288_v55 = vld [vmem:[#allocation66_spill] sm:$0xff] }
 0x1f6   :  { %2966 = vmatpush.msra.mxu3 %v18277_v38  ;;  %2995 = vmatpush.msrb.mxu0 %v18285_v30  ;;  %v18290_v30 = vld [vmem:[#allocation67_spill] sm:$0xff] }
 0x1f7   :  { %2802 = vmatmul.f32.vlgmr.msrb.gmra.mxu1 %v15795_v49 }
 0x1f8   :  { %2917 = vmatpush.msra.mxu1 %v18286_v31  ;;  %2968 = vmatpush.msra.mxu3 %v18278_v46  ;;  %v18289_v31 = vld [vmem:[#allocation56_spill] sm:$0xff] }
 0x1f9   :  { %2999 = vmatpush.msrb.mxu0 %v18287_v10  ;;  %v18291_v10 = vld [vmem:[#allocation73_spill] sm:$0xff] }
 0x1fa   :  { %3026 = vmatpush.msrb.mxu1 %v18277_v38  ;;  %2970 = vmatpush.msra.mxu3 %v18280_v57  ;;  %v18293_v38 = vld [vmem:[#allocation65_spill] sm:$0xff] }
 0x1fb   :  { %2728 = vmatmul.f32.vlgmr.msra.gmra.mxu2 %v15812_v39  ;;  %2848 = vmatmul.f32.vlgmr.msrb.gmra.mxu3 %v15776_v41 }
 0x1fc   :  { %2972 = vmatpush.msra.mxu3 %v18283_v37  ;;  %3003 = vmatpush.msrb.mxu0 %v18288_v55  ;;  %v18294_v55 = vld [vmem:[#allocation62_spill] sm:$0xff] }
 0x1fd   :  { %2878 = vmatmul.f32.vlgmr.msra.gmra.mxu0 %v15696_v36  ;;  %3028 = vmatpush.msrb.mxu1 %v18278_v46  ;;  %v18295_v36 = vld [vmem:[#allocation64_spill] sm:$0xff] }
 0x1fe   :  { %2937 = vmatpush.msra.mxu2 %v18289_v31  ;;  %3007 = vmatpush.msrb.mxu0 %v18290_v30  ;;  %v18296_v30 = vld [vmem:[#allocation60_spill] sm:$0xff] }
 0x1ff   :  { %2919 = vmatmul.f32.vlgmr.msra.gmra.mxu1 %v15683_v48  ;;  %3084 = vmatpush.msrb.mxu3 %v18291_v10 }
 0x200   :  { %3030 = vmatpush.msrb.mxu1 %v18280_v57  ;;  %2940 = vmatpush.msra.mxu2 %v18292_v29 }
 0x201   :  { %3107 = vmatpush.msra.mxu0 %v18293_v38 }
 0x202   :  { %3032 = vmatpush.msrb.mxu1 %v18283_v37  ;;  %2943 = vmatpush.msra.mxu2 %v18294_v55 }
 0x203   :  { %2826 = vmatmul.f32.vlgmr.msrb.gmra.mxu2 %v15776_v41  ;;  %2976 = vmatmul.f32.vlgmr.msra.gmra.mxu3 %v15691_v61  ;;  %v18297_v61 = vld [vmem:[#allocation68_spill] sm:$0xff] }
 0x204   :  { %2946 = vmatpush.msra.mxu2 %v18295_v36  ;;  %3178 = vmatpush.msra.mxu3 %v18296_v30 }
 0x205   :  { %3009 = vmatmul.f32.vlgmr.msrb.gmra.mxu0 %v15683_v48  ;;  %3130 = vmatpush.msra.mxu1 %v18296_v30 }
 0x206   :  { %3054 = vmatpush.msrb.mxu2 %v18296_v30  ;;  %3266 = vmatpush.msrb.mxu0 %v15549_v17 }
 0x207   :  { %3034 = vmatmul.f32.vlgmr.msrb.gmra.mxu1 %v15683_v48  ;;  %v18298_v48 = vld [vmem:[#allocation79_spill] sm:$0xff] }
 0x208   :  { %3299 = vmatpush.msrb.mxu1 %v15595_v27  ;;  %3268 = vmatpush.msrb.mxu0 %v15557_v60 }
 0x20a   :  { %3305 = vmatpush.msrb.mxu1 %v15618_v35  ;;  %3270 = vmatpush.msrb.mxu0 %v15571_v23 }
 0x20b   :  { %2949 = vmatmul.f32.vlgmr.msra.gmra.mxu2 %v15687_v6  ;;  %3086 = vmatmul.f32.vlgmr.msrb.gmra.mxu3 %v15776_v41  ;;  %v18299_v6 = vld [vmem:[#allocation82_spill] sm:$0xff] }
 0x20c   :  { %3156 = vmatpush.msra.mxu2 %v18297_v61  ;;  %3311 = vmatpush.msrb.mxu1 %v15634_v28 }
 0x20d   :  { %3110 = vmatmul.f32.vlgmr.msra.gmra.mxu0 %v15786_v53  ;;  %3366 = vmatpush.msrb.mxu3 %v15549_v17  ;;  %v18300_v53 = vld [vmem:[#allocation77_spill] sm:$0xff] }
 0x20e   :  { %3317 = vmatpush.msrb.mxu1 %v15642_v54  ;;  %3272 = vmatpush.msrb.mxu0 %v15592_v0  ;;  %v18302_v54 = vld [vmem:[#allocation80_spill] sm:$0xff] }
 0x20f   :  { %3134 = vmatmul.f32.vlgmr.msra.gmra.mxu1 %v15795_v49  ;;  %3368 = vmatpush.msrb.mxu3 %v15557_v60  ;;  %v18301_v49 = vld [vmem:[#allocation86_spill] sm:$0xff] }
 0x210   :  { %3426 = vmatpush.msra.mxu1 %v15549_v17  ;;  %3395 = vmatpush.msra.mxu0 %v18298_v48  ;;  %v18303_v48 = vld [vmem:[#allocation90_spill] sm:$0xff] }
 0x211   :  { %3370 = vmatpush.msrb.mxu3 %v15571_v23 }
 0x212   :  { %3428 = vmatpush.msra.mxu1 %v15557_v60  ;;  %3399 = vmatpush.msra.mxu0 %v18299_v6  ;;  %v18304_v6 = vld [vmem:[#allocation83_spill] sm:$0xff] }
 0x213   :  { %3060 = vmatmul.f32.vlgmr.msrb.gmra.mxu2 %v15812_v39  ;;  %3180 = vmatmul.f32.vlgmr.msra.gmra.mxu3 %v15776_v41  ;;  %v18305_v39 = vld [vmem:[#allocation87_spill] sm:$0xff] }
 0x214   :  { %3337 = vmatpush.msrb.mxu2 %v18300_v53  ;;  %3372 = vmatpush.msrb.mxu3 %v15592_v0 }
 0x215   :  { %3430 = vmatpush.msra.mxu1 %v15571_v23  ;;  %3403 = vmatpush.msra.mxu0 %v18301_v49 }
 0x216   :  { %3340 = vmatpush.msrb.mxu2 %v18302_v54  ;;  %3488 = vmatpush.msra.mxu3 %v15735_v32 }
 0x217   :  { %3432 = vmatpush.msra.mxu1 %v15592_v0  ;;  %3407 = vmatpush.msra.mxu0 %v18303_v48  ;;  %v15965_v48 = vld [vmem:[%s17854_s4 + $0x1] ss:$0 sm:$0xff] }
 0x218   :  { %3343 = vmatpush.msrb.mxu2 %v18304_v6  ;;  %3494 = vmatpush.msra.mxu3 %v15743_v33  ;;  %18306 = vst [vmem:[#allocation99_spill] sm:$0xff] %v15965_v48 }
 0x21a   :  { %3346 = vmatpush.msrb.mxu2 %v18305_v39 }
 0x21b   :  { %3158 = vmatmul.f32.vlgmr.msra.gmra.mxu2 %v15776_v41 }
 0x21c   :  { %3457 = vmatpush.msra.mxu2 %v15704_v24 }
 0x21e   :  { %3459 = vmatpush.msra.mxu2 %v15712_v1 }
 0x22a   :  { %v1771_v49 = vpop.f32.mrf.mxu0 }
 0x22c   :  { %v1796_v54 = vpop.f32.mrf.mxu1 }
 0x22e   :  { %v1745_v53 = vpop.f32.mrf.mxu3 }
 0x232   :  { %v1880_v32 = vpop.f32.mrf.mxu0 }
 0x234   :  { %v1921_v6 = vpop.f32.mrf.mxu1 }
 0x236   :  { %v1714_v0 = vpop.f32.mrf.mxu2  ;;  %v1846_v33 = vpop.f32.mrf.mxu3 }
 0x237   :  { %v1715_v39 = vadd.f32 %v15965_v48, %v1714_v0 }
 0x239   :  { %v1746_v28 = vadd.f32 %v1745_v53, %v1715_v39 }
 0x23a   :  { %v2011_v41 = vpop.f32.mrf.mxu0 }
 0x23b   :  { %v1772_v61 = vadd.f32 %v1771_v49, %v1746_v28 }
 0x23c   :  { %v2036_v23 = vpop.f32.mrf.mxu1 }
 0x23d   :  { %v1797_v35 = vadd.f32 %v1796_v54, %v1772_v61  ;;  %v1922_v54 = vadd.f32 %v1921_v6, %v1880_v32 }
 0x23e   :  { %v1823_v60 = vpop.f32.mrf.mxu2  ;;  %v1978_v27 = vpop.f32.mrf.mxu3 }
 0x23f   :  { %v1824_v17 = vadd.f32 %v1823_v60, %v1797_v35 }
 0x241   :  { %v1847_v30 = vadd.f32 %v1846_v33, %v1824_v17 }
 0x242   :  { %v2115_v36 = vpop.f32.mrf.mxu0 }
 0x243   :  { %1850 = vst.msk [vmem:[%s17855_s5] sm:$0x1f] %vm1849_vm1, %v1847_v30 }
 0x244   :  { %v2139_v55 = vpop.f32.mrf.mxu1 }
 0x246   :  { %v1951_v38 = vpop.f32.mrf.mxu2  ;;  %v2091_v29 = vpop.f32.mrf.mxu3 }
 0x247   :  { %v1952_v35 = vadd.f32 %v1951_v38, %v1922_v54 }
 0x249   :  { %v1979_v17 = vadd.f32 %v1978_v27, %v1952_v35 }
 0x24a   :  { %v2215_v0 = vpop.f32.mrf.mxu0 }
 0x24b   :  { %v2012_v57 = vadd.f32 %v2011_v41, %v1979_v17 }
 0x24c   :  { %v2256_v53 = vpop.f32.mrf.mxu1 }
 0x24d   :  { %v2257_v33 = vadd.f32 %v2256_v53, %v2215_v0  ;;  %v2037_v25 = vadd.f32 %v2036_v23, %v2012_v57 }
 0x24e   :  { %v2065_v39 = vpop.f32.mrf.mxu2  ;;  %v2185_v28 = vpop.f32.mrf.mxu3 }
 0x24f   :  { %v2066_v7 = vadd.f32 %v2065_v39, %v2037_v25 }
 0x251   :  { %v2092_v2 = vadd.f32 %v2091_v29, %v2066_v7  ;;  %v18307_v29 = vld [vmem:[#allocation74_spill] sm:$0xff] }
 0x252   :  { %v2346_v49 = vpop.f32.mrf.mxu0 }
 0x253   :  { %v2116_v53 = vadd.f32 %v2115_v36, %v2092_v2 }
 0x254   :  { %v2371_v61 = vpop.f32.mrf.mxu1 }
 0x255   :  { %v2140_v41 = vadd.f32 %v2139_v55, %v2116_v53 }
 0x256   :  { %v2163_v48 = vpop.f32.mrf.mxu2  ;;  %v2313_v60 = vpop.f32.mrf.mxu3 }
 0x257   :  { %v2164_v23 = vadd.f32 %v2163_v48, %v2140_v41 }
 0x259   :  { %v2186_v57 = vadd.f32 %v2185_v28, %v2164_v23 }
 0x25a   :  { %v2447_v10 = vpop.f32.mrf.mxu0 }
 0x25c   :  { %v2471_v46 = vpop.f32.mrf.mxu1 }
 0x25e   :  { %v2286_v31 = vpop.f32.mrf.mxu2  ;;  %v2423_v37 = vpop.f32.mrf.mxu3 }
 0x25f   :  { %v2287_v30 = vadd.f32 %v2286_v31, %v2257_v33 }
 0x261   :  { %v2314_v14 = vadd.f32 %v2313_v60, %v2287_v30 }
 0x262   :  { %v2547_v32 = vpop.f32.mrf.mxu0 }
 0x263   :  { %v2347_v26 = vadd.f32 %v2346_v49, %v2314_v14 }
 0x264   :  { %v2588_v50 = vpop.f32.mrf.mxu1 }
 0x265   :  { %v2372_v45 = vadd.f32 %v2371_v61, %v2347_v26  ;;  %v2589_v49 = vadd.f32 %v2588_v50, %v2547_v32  ;;  %v18308_v61 = vld [vmem:[#allocation75_spill] sm:$0xff] }
 0x266   :  { %v2397_v56 = vpop.f32.mrf.mxu2  ;;  %v2517_v52 = vpop.f32.mrf.mxu3 }
 0x267   :  { %v2398_v6 = vadd.f32 %v2397_v56, %v2372_v45 }
 0x269   :  { %v2424_v38 = vadd.f32 %v2423_v37, %v2398_v6  ;;  %v2188_v37 = vadd.f32 %v18307_v29, %v2186_v57 }
 0x26a   :  { %v2678_v35 = vpop.f32.mrf.mxu0 }
 0x26b   :  { %v2448_v54 = vadd.f32 %v2447_v10, %v2424_v38  ;;  %v14765_v55 = vmul.f32 -1.442695, %v2188_v37 }
 0x26c   :  { %v2703_v31 = vpop.f32.mrf.mxu1 }
 0x26d   :  { %v2472_v17 = vadd.f32 %v2471_v46, %v2448_v54  ;;  %14839 = vpow2.f32 %v14765_v55 }
 0x26e   :  { %v2495_v27 = vpop.f32.mrf.mxu2  ;;  %v2645_v0 = vpop.f32.mrf.mxu3 }
 0x26f   :  { %v2496_v14 = vadd.f32 %v2495_v27, %v2472_v17 }
 0x271   :  { %v2518_v25 = vadd.f32 %v2517_v52, %v2496_v14 }
 0x272   :  { %v2779_v39 = vpop.f32.mrf.mxu0 }
 0x273   :  { %v2520_v2 = vadd.f32 %v18308_v61, %v2518_v25  ;;  %v14840_v32 = vpop.eup %14839 }
 0x274   :  { %v2803_v56 = vpop.f32.mrf.mxu1  ;;  %v3188_v41 = vadd.f32 1.0, %v14840_v32 }
 0x275   :  { %v14766_v33 = vmul.f32 -1.442695, %v2520_v2 }
 0x276   :  { %v2618_v60 = vpop.f32.mrf.mxu2  ;;  %v2755_v26 = vpop.f32.mrf.mxu3  ;;  %vm3194_vm4 = vweird.f32 %v3188_v41 }
 0x277   :  { %v2619_v45 = vadd.f32 %v2618_v60, %v2589_v49  ;;  %14841 = vpow2.f32 %v14766_v33 }
 0x278   :  { %14843 = vrcp.f32 %v3188_v41 }
 0x279   :  { %v2646_v10 = vadd.f32 %v2645_v0, %v2619_v45 }
 0x27a   :  { %v2879_v30 = vpop.f32.mrf.mxu0 }
 0x27b   :  { %v2679_v46 = vadd.f32 %v2678_v35, %v2646_v10 }
 0x27c   :  { %v2920_v28 = vpop.f32.mrf.mxu1 }
 0x27d   :  { %v2704_v50 = vadd.f32 %v2703_v31, %v2679_v46  ;;  %v2921_v6 = vadd.f32 %v2920_v28, %v2879_v30  ;;  %v14842_v27 = vpop.eup %14841 }
 0x27e   :  { %v2729_v7 = vpop.f32.mrf.mxu2  ;;  %v2849_v36 = vpop.f32.mrf.mxu3  ;;  %v3207_v0 = vadd.f32 1.0, %v14842_v27  ;;  %v18309_v27 = vld [vmem:[#allocation88_spill] sm:$0xff] }
 0x27f   :  { %v2730_v38 = vadd.f32 %v2729_v7, %v2704_v50  ;;  %v14844_v61 = vpop.eup %14843 }
 0x280   :  { %14845 = vrcp.f32 %v3207_v0  ;;  %vm3195_vm2 = vweird.f32 %v14844_v61  ;;  %vm3213_vm5 = vweird.f32 %v3207_v0 }
 0x281   :  { %v2756_v60 = vadd.f32 %v2755_v26, %v2730_v38  ;;  %v3190_v26 = vmul.f32 %v14844_v61, %v3188_v41  ;;  %vm3196_vm6 = vmor %vm3194_vm4, %vm3195_vm2 }
 0x282   :  { %v3010_v17 = vpop.f32.mrf.mxu0 }
 0x283   :  { %v2780_v49 = vadd.f32 %v2779_v39, %v2756_v60  ;;  %v3191_v39 = vsub.f32 1.0, %v3190_v26 }
 0x284   :  { %v3035_v14 = vpop.f32.mrf.mxu1 }
 0x285   :  { %v2804_v37 = vadd.f32 %v2803_v56, %v2780_v49  ;;  %v3217_v49 = vand.u32 2147483647, %v3207_v0 }
 0x286   :  { %v2827_v48 = vpop.f32.mrf.mxu2  ;;  %v2977_v52 = vpop.f32.mrf.mxu3 }
 0x287   :  { %v14846_v10 = vpop.eup %14845  ;;  %v2828_v33 = vadd.f32 %v2827_v48, %v2804_v37  ;;  %vm3218_vm9 = vcmp.eq.f32.partialorder %v3217_v49, 8.507059e+37  ;;  %v18315_v49 = vld [vmem:[#allocation11_spill] sm:$0xff] }
 0x288   :  { %v3209_v30 = vmul.f32 %v14846_v10, %v3207_v0  ;;  %vm3214_vm3 = vweird.f32 %v14846_v10 }
 0x289   :  { %v2850_v32 = vadd.f32 %v2849_v36, %v2828_v33  ;;  %v3198_v36 = vand.u32 2147483647, %v3188_v41  ;;  %vm3215_vm7 = vmor %vm3213_vm5, %vm3214_vm3  ;;  %vm14130_vm3 = vcmask 1040384  }
 0x28a   :  { %v3111_v29 = vpop.f32.mrf.mxu0  ;;  %v3210_v38 = vsub.f32 1.0, %v3209_v30 }
 0x28b   :  { %vm3199_vm8 = vcmp.eq.f32.partialorder %v3198_v36, 8.507059e+37  ;;  %v18314_v36 = vld [vmem:[#allocation95_spill] sm:$0xff] }
 0x28c   :  { %v3135_v2 = vpop.f32.mrf.mxu1  ;;  %v3211_v60 = vmul.f32 %v14846_v10, %v3210_v38 }
 0x28e   :  { %v2950_v53 = vpop.f32.mrf.mxu2  ;;  %v3087_v57 = vpop.f32.mrf.mxu3 }
 0x28f   :  { %v2951_v54 = vadd.f32 %v2950_v53, %v2921_v6 }
 0x291   :  { %v2978_v23 = vadd.f32 %v2977_v52, %v2951_v54  ;;  %v18310_v54 = vld [vmem:[#allocation91_spill] sm:$0xff] }
 0x292   :  { %v2852_v56 = vadd.f32 %v18310_v54, %v2850_v32 }
 0x293   :  { %v3011_v35 = vadd.f32 %v3010_v17, %v2978_v23  ;;  %v3192_v23 = vmul.f32 %v14844_v61, %v3191_v39 }
 0x295   :  { %v3036_v25 = vadd.f32 %v3035_v14, %v3011_v35  ;;  %v3193_v48 = vadd.f32 %v14844_v61, %v3192_v23  ;;  %v3212_v14 = vadd.f32 %v14846_v10, %v3211_v60  ;;  %v3219_v35 = vand.u32 2147483648, %v3207_v0 }
 0x296   :  { %v3061_v31 = vpop.f32.mrf.mxu2  ;;  %v3181_v50 = vpop.f32.mrf.mxu3 }
 0x297   :  { %v3062_v45 = vadd.f32 %v3061_v31, %v3036_v25  ;;  %v3197_v31 = vsel %vm3196_vm6, %v14844_v61, %v3193_v48  ;;  %v18311_v48 = vld [vmem:[#allocation96_spill] sm:$0xff] }
 0x299   :  { %v3088_v7 = vadd.f32 %v3087_v57, %v3062_v45  ;;  %v3200_v57 = vand.u32 2147483648, %v3188_v41  ;;  %v3216_v45 = vsel %vm3215_vm7, %v14846_v10, %v3212_v14 }
 0x29b   :  { %v3112_v55 = vadd.f32 %v3111_v29, %v3088_v7  ;;  %v3220_v7 = vor.u32 1.1754944e-38, %v3219_v35  ;;  %v18312_v35 = vld [vmem:[#allocation94_spill] sm:$0xff] }
 0x29d   :  { %v3136_v46 = vadd.f32 %v3135_v2, %v3112_v55  ;;  %v3201_v2 = vor.u32 1.1754944e-38, %v3200_v57  ;;  %v3221_v33 = vsel %vm3218_vm9, %v3220_v7, %v3216_v45  ;;  %v18313_v57 = vld [vmem:[#allocation10_spill] sm:$0xff] }
 0x29e   :  { %v3159_v28 = vpop.f32.mrf.mxu2  ;;  %v3243_v26 = vmul.f32 %v3221_v33, %v15671_v40 }
 0x29f   :  { %v3160_v52 = vadd.f32 %v3159_v28, %v3136_v46  ;;  %v3202_v55 = vsel %vm3199_vm8, %v3201_v2, %v3197_v31  ;;  %v18317_v31 = vld [vmem:[#allocation13_spill] sm:$0xff] }
 0x2a1   :  { %v3182_v6 = vadd.f32 %v3181_v50, %v3160_v52 }
 0x2a3   :  { %v3184_v53 = vadd.f32 %v18309_v27, %v3182_v6 }
 0x2a5   :  { %v14767_v17 = vmul.f32 -1.442695, %v3184_v53  ;;  %v14116_v53 = vrot.slane %v15674_v63, 4 }
 0x2a7   :  { %14847 = vpow2.f32 %v14767_v17 }
 0x2a8   :  { %14849 = vtanh.f32 %v2852_v56 }
 0x2ad   :  { %v14848_v25 = vpop.eup %14847 }
 0x2ae   :  { %v3227_v29 = vadd.f32 1.0, %v14848_v25  ;;  %v14850_v37 = vpop.eup %14849  ;;  %v18316_v25 = vld [vmem:[#allocation12_spill] sm:$0xff] }
 0x2af   :  { %v3244_v46 = vmul.f32 %v14850_v37, %v3202_v55 }
 0x2b0   :  { %14851 = vrcp.f32 %v3227_v29  ;;  %v3239_v61 = vand.u32 2147483648, %v3227_v29  ;;  %v3237_v50 = vand.u32 2147483647, %v3227_v29  ;;  %vm3233_vm11 = vweird.f32 %v3227_v29 }
 0x2b1   :  { %v15977_v28 = vadd.f32 %v3244_v46, %v3243_v26 }
 0x2b2   :  { %v3240_v32 = vor.u32 1.1754944e-38, %v3239_v61  ;;  %vm3238_vm2 = vcmp.eq.f32.partialorder %v3237_v50, 8.507059e+37 }
 0x2b3   :  { %14853 = vtanh.f32 %v15977_v28 }
 0x2b6   :  { %v14852_v30 = vpop.eup %14851 }
 0x2b7   :  { %v3229_v41 = vmul.f32 %v14852_v30, %v3227_v29  ;;  %vm3234_vm10 = vweird.f32 %v14852_v30 }
 0x2b8   :  { %vm3235_vm12 = vmor %vm3233_vm11, %vm3234_vm10 }
 0x2b9   :  { %v3230_v0 = vsub.f32 1.0, %v3229_v41  ;;  %v14854_v39 = vpop.eup %14853 }
 0x2bb   :  { %v3231_v10 = vmul.f32 %v14852_v30, %v3230_v0 }
 0x2bd   :  { %v3232_v52 = vadd.f32 %v14852_v30, %v3231_v10 }
 0x2bf   :  { %v3236_v6 = vsel %vm3235_vm12, %v14852_v30, %v3232_v52 }
 0x2c0   :  { %v3241_v38 = vsel %vm3238_vm2, %v3240_v32, %v3236_v6  ;;  %v14771_v6 = vld [vmem:[%s17850_s0 + $0x10] sm:$0x1f] }
 0x2c1   :  { %v3247_v40 = vmul.f32 %v14854_v39, %v3241_v38  ;;  %v3792_v38 = vsel %vm267_vm0, %v14771_v6, 0  ;;  %v18336_v6 = vld [vmem:[#allocation29_spill] sm:$0xff] }
 0x2c3   :  { %14768 = vst.msk [vmem:[%s17857_s7 + $0x8] sm:$0x1f] %vm1489_vm14, %v3247_v40  ;;  %v3251_v27 = vsel %vm78_vm13, %v3247_v40, 0  ;;  %v14118_v54 = vrot.slane %v3247_v40, 3  ;;  %v16043_v40 = vand.u32 4294901760, %v3792_v38 }
 0x2c4   :  { %v15986_v56 = vand.u32 4294901760, %v3251_v27 }
 0x2c5   :  { %v15989_v17 = vsel %vm14130_vm3, %v14116_v53, %v14118_v54 }
 0x2c6   :  { %3319 = vmatmul.f32.vlgmr.msrb.gmra.mxu1 %v15986_v56  ;;  %v15993_v60 = vsub.f32 %v3251_v27, %v15986_v56  ;;  %v16053_v27 = vsub.f32 %v3792_v38, %v16043_v40  ;;  %v18338_v38 = vld [vmem:[#allocation51_spill] sm:$0xff] }
 0x2c7   :  { %3541 = vmatpush.msrb.mxu1 %v15704_v24 }
 0x2c8   :  { %3349 = vmatmul.f32.vlgmr.msrb.gmra.mxu2 %v15993_v60  ;;  %v15998_v23 = vand.u32 4294901760, %v15993_v60  ;;  %v16062_v53 = vand.u32 4294901760, %v16053_v27 }
 0x2c9   :  { %3543 = vmatpush.msrb.mxu1 %v15712_v1  ;;  %3568 = vmatpush.msrb.mxu2 %v15717_v58 }
 0x2ca   :  { %3376 = vmatmul.f32.vlgmr.msrb.gmra.mxu3 %v15998_v23  ;;  %v3276_v63 = vsub.f32 %v15993_v60, %v15998_v23  ;;  %v3814_v54 = vsub.f32 %v16053_v27, %v16062_v53 }
 0x2cb   :  { %3593 = vmatpush.msrb.mxu3 %v15704_v24  ;;  %3572 = vmatpush.msrb.mxu2 %v18311_v48 }
 0x2cc   :  { %v16007_v14 = vand.u32 4294901760, %v3276_v63  ;;  %v18318_v63 = vld [vmem:[#allocation31_spill] sm:$0xff] }
 0x2cd   :  { %3595 = vmatpush.msrb.mxu3 %v15712_v1 }
 0x2ce   :  { %3278 = vmatmul.f32.vlgmr.msrb.gmra.mxu0 %v16007_v14  ;;  %3434 = vmatmul.f32.vlgmr.msra.gmra.mxu1 %v15986_v56 }
 0x2cf   :  { %3516 = vmatpush.msrb.mxu0 %v18312_v35  ;;  %3652 = vmatpush.msra.mxu1 %v18313_v57 }
 0x2d1   :  { %3519 = vmatpush.msrb.mxu0 %v18314_v36  ;;  %3658 = vmatpush.msra.mxu1 %v18315_v49 }
 0x2d3   :  { %3664 = vmatpush.msra.mxu1 %v18316_v25 }
 0x2d5   :  { %3670 = vmatpush.msra.mxu1 %v18317_v31 }
 0x2d6   :  { %3409 = vmatmul.f32.vlgmr.msra.gmra.mxu0 %v15986_v56 }
 0x2d7   :  { %3619 = vmatpush.msra.mxu0 %v15051_v3 }
 0x2d9   :  { %3621 = vmatpush.msra.mxu0 %v15053_v4 }
 0x2db   :  { %3623 = vmatpush.msra.mxu0 %v15055_v5 }
 0x2dd   :  { %3625 = vmatpush.msra.mxu0 %v15063_v8 }
 0x343   :  { %v3320_v45 = vpop.f32.mrf.mxu1 }
 0x34b   :  { %v3279_v29 = vpop.f32.mrf.mxu0  ;;  %v3350_v2 = vpop.f32.mrf.mxu2 }
 0x34c   :  { %v3280_v37 = vadd.f32 %v15754_v51, %v3279_v29  ;;  %v3435_v41 = vpop.f32.mrf.mxu1  ;;  %v16079_v29 = vand.u32 4294901760, %v3814_v54  ;;  %v18339_v54 = vld [vmem:[#allocation41_spill] sm:$0xff] }
 0x34d   :  { %v3377_v33 = vpop.f32.mrf.mxu3 }
 0x34e   :  { %v3321_v7 = vadd.f32 %v3320_v45, %v3280_v37  ;;  %v18319_v45 = vld [vmem:[#allocation21_spill] sm:$0xff]  ;;  %v18320_v37 = vld [vmem:[#allocation32_spill] sm:$0xff] }
 0x350   :  { %v3351_v55 = vadd.f32 %v3350_v2, %v3321_v7  ;;  %v18321_v7 = vld [vmem:[#allocation23_spill] sm:$0xff]  ;;  %v18322_v2 = vld [vmem:[#allocation26_spill] sm:$0xff] }
 0x352   :  { %v3378_v46 = vadd.f32 %v3377_v33, %v3351_v55  ;;  %v18323_v55 = vld [vmem:[#allocation17_spill] sm:$0xff]  ;;  %v18324_v33 = vld [vmem:[#allocation27_spill] sm:$0xff] }
 0x353   :  { %v3410_v26 = vpop.f32.mrf.mxu0 }
 0x354   :  { %v3411_v30 = vadd.f32 %v3410_v26, %v3378_v46  ;;  %v18325_v46 = vld [vmem:[#allocation34_spill] sm:$0xff] }
 0x355   :  { %v18326_v26 = vld [vmem:[#allocation18_spill] sm:$0xff] }
 0x356   :  { %v3436_v0 = vadd.f32 %v3435_v41, %v3411_v30  ;;  %v18327_v30 = vld [vmem:[#allocation25_spill] sm:$0xff]  ;;  %v18328_v41 = vld [vmem:[#allocation22_spill] sm:$0xff] }
 0x358   :  { %v3438_v61 = vmax.f32 %v3436_v0, 0.0  ;;  %v18329_v0 = vld [vmem:[#allocation24_spill] sm:$0xff] }
 0x35a   :  { %v3440_v10 = vsel %vm1686_vm15, %v3438_v61, 0  ;;  %v18330_v61 = vld [vmem:[#allocation20_spill] sm:$0xff] }
 0x35b   :  { %v3460_v50 = vand.u32 4294901760, %v3440_v10 }
 0x35d   :  { %v3461_v52 = vsub.f32 %v3440_v10, %v3460_v50  ;;  %3496 = vmatmul.f32.vlgmr.msra.gmra.mxu3 %v3460_v50  ;;  %v18331_v10 = vld [vmem:[#allocation33_spill] sm:$0xff] }
 0x35e   :  { %3719 = vmatpush.msra.mxu3 %v15051_v3 }
 0x35f   :  { %v3462_v32 = vand.u32 4294901760, %v3461_v52  ;;  %3522 = vmatmul.f32.vlgmr.msrb.gmra.mxu0 %v3461_v52 }
 0x360   :  { %3721 = vmatpush.msra.mxu3 %v15053_v4  ;;  %3748 = vmatpush.msrb.mxu0 %v15093_v18 }
 0x361   :  { %v3463_v51 = vsub.f32 %v3461_v52, %v3462_v32  ;;  %3547 = vmatmul.f32.vlgmr.msrb.gmra.mxu1 %v3462_v32  ;;  %v18333_v52 = vld [vmem:[#allocation49_spill] sm:$0xff] }
 0x362   :  { %3723 = vmatpush.msra.mxu3 %v15055_v5  ;;  %3752 = vmatpush.msrb.mxu0 %v15096_v19  ;;  %v18334_v32 = vld [vmem:[#allocation37_spill] sm:$0xff] }
 0x363   :  { %v3464_v39 = vand.u32 4294901760, %v3463_v51  ;;  %3779 = vmatpush.msrb.mxu1 %v15051_v3  ;;  %v18335_v51 = vld [vmem:[#allocation50_spill] sm:$0xff] }
 0x364   :  { %3725 = vmatpush.msra.mxu3 %v15063_v8  ;;  %3756 = vmatpush.msrb.mxu0 %v15099_v20 }
 0x365   :  { %3465 = vmatmul.f32.vlgmr.msra.gmra.mxu2 %v3464_v39  ;;  %3597 = vmatmul.f32.vlgmr.msrb.gmra.mxu3 %v3460_v50  ;;  %v18337_v39 = vld [vmem:[#allocation39_spill] sm:$0xff] }
 0x366   :  { %3781 = vmatpush.msrb.mxu1 %v15053_v4  ;;  %3690 = vmatpush.msra.mxu2 %v15071_v11 }
 0x367   :  { %3631 = vmatmul.f32.vlgmr.msra.gmra.mxu0 %v16007_v14  ;;  %3840 = vmatpush.msrb.mxu3 %v15138_v34 }
 0x368   :  { %3760 = vmatpush.msrb.mxu0 %v15106_v22  ;;  %3783 = vmatpush.msrb.mxu1 %v15055_v5 }
 0x369   :  { %3672 = vmatmul.f32.vlgmr.msra.gmra.mxu1 %v15986_v56  ;;  %3693 = vmatpush.msra.mxu2 %v15075_v12 }
 0x36a   :  { %3785 = vmatpush.msrb.mxu1 %v15063_v8  ;;  %3863 = vmatpush.msra.mxu0 %v15086_v16 }
 0x36b   :  { %3696 = vmatpush.msra.mxu2 %v15079_v13 }
 0x36c   :  { %3886 = vmatpush.msra.mxu1 %v15065_v9 }
 0x36d   :  { %3574 = vmatmul.f32.vlgmr.msrb.gmra.mxu2 %v3460_v50  ;;  %3729 = vmatmul.f32.vlgmr.msra.gmra.mxu3 %v15998_v23  ;;  %v18332_v50 = vld [vmem:[#allocation35_spill] sm:$0xff] }
 0x36e   :  { %3699 = vmatpush.msra.mxu2 %v15083_v15  ;;  %3934 = vmatpush.msra.mxu3 %v15065_v9 }
 0x36f   :  { %3762 = vmatmul.f32.vlgmr.msrb.gmra.mxu0 %v15986_v56 }
 0x370   :  { %3810 = vmatpush.msrb.mxu2 %v15065_v9  ;;  %3954 = vmatpush.msrb.mxu0 %v15164_v42 }
 0x371   :  { %3787 = vmatmul.f32.vlgmr.msrb.gmra.mxu1 %v15986_v56 }
 0x372   :  { %3956 = vmatpush.msrb.mxu0 %v15166_v43  ;;  %3987 = vmatpush.msrb.mxu1 %v15227_v59 }
 0x374   :  { %3958 = vmatpush.msrb.mxu0 %v15168_v44  ;;  %3993 = vmatpush.msrb.mxu1 %v15240_v62 }
 0x375   :  { %3702 = vmatmul.f32.vlgmr.msra.gmra.mxu2 %v15993_v60  ;;  %3842 = vmatmul.f32.vlgmr.msrb.gmra.mxu3 %v16043_v40 }
 0x376   :  { %3912 = vmatpush.msra.mxu2 %v15103_v21  ;;  %3960 = vmatpush.msrb.mxu0 %v15180_v47 }
 0x377   :  { %3866 = vmatmul.f32.vlgmr.msra.gmra.mxu0 %v16053_v27  ;;  %3999 = vmatpush.msrb.mxu1 %v18318_v63 }
 0x378   :  { %4054 = vmatpush.msrb.mxu3 %v15164_v42  ;;  %4083 = vmatpush.msra.mxu0 %v18319_v45 }
 0x379   :  { %3890 = vmatmul.f32.vlgmr.msra.gmra.mxu1 %v16062_v53 }
 0x37a   :  { %4005 = vmatpush.msrb.mxu1 %v18320_v37  ;;  %4056 = vmatpush.msrb.mxu3 %v15166_v43 }
 0x37b   :  { %4087 = vmatpush.msra.mxu0 %v18321_v7 }
 0x37c   :  { %4114 = vmatpush.msra.mxu1 %v15164_v42  ;;  %4058 = vmatpush.msrb.mxu3 %v15168_v44 }
 0x37d   :  { %3816 = vmatmul.f32.vlgmr.msrb.gmra.mxu2 %v16079_v29  ;;  %3936 = vmatmul.f32.vlgmr.msra.gmra.mxu3 %v16043_v40 }
 0x37e   :  { %4060 = vmatpush.msrb.mxu3 %v15180_v47  ;;  %4091 = vmatpush.msra.mxu0 %v18322_v2 }
 0x37f   :  { %3966 = vmatmul.f32.vlgmr.msrb.gmra.mxu0 %v16007_v14  ;;  %4116 = vmatpush.msra.mxu1 %v15166_v43 }
 0x380   :  { %4025 = vmatpush.msrb.mxu2 %v18323_v55  ;;  %4095 = vmatpush.msra.mxu0 %v18324_v33 }
 0x381   :  { %4007 = vmatmul.f32.vlgmr.msrb.gmra.mxu1 %v15986_v56  ;;  %4172 = vmatpush.msra.mxu3 %v18325_v46 }
 0x382   :  { %4118 = vmatpush.msra.mxu1 %v15168_v44  ;;  %4028 = vmatpush.msrb.mxu2 %v18326_v26 }
 0x383   :  { %4195 = vmatpush.msrb.mxu0 %v18327_v30 }
 0x384   :  { %4120 = vmatpush.msra.mxu1 %v15180_v47  ;;  %4031 = vmatpush.msrb.mxu2 %v18328_v41 }
 0x385   :  { %3914 = vmatmul.f32.vlgmr.msra.gmra.mxu2 %v16043_v40  ;;  %4064 = vmatmul.f32.vlgmr.msrb.gmra.mxu3 %v15998_v23 }
 0x386   :  { %4034 = vmatpush.msrb.mxu2 %v18329_v0  ;;  %4218 = vmatpush.msrb.mxu1 %v18330_v61 }
 0x387   :  { %4097 = vmatmul.f32.vlgmr.msra.gmra.mxu0 %v15986_v56  ;;  %4266 = vmatpush.msrb.mxu3 %v18330_v61 }
 0x388   :  { %4142 = vmatpush.msra.mxu2 %v18330_v61  ;;  %4286 = vmatpush.msra.mxu0 %v18331_v10 }
 0x389   :  { %4122 = vmatmul.f32.vlgmr.msra.gmra.mxu1 %v15986_v56 }
 0x38a   :  { %4288 = vmatpush.msra.mxu0 %v18332_v50  ;;  %4319 = vmatpush.msra.mxu1 %v18333_v52  ;;  %v18340_v52 = vld [vmem:[#allocation52_spill] sm:$0xff] }
 0x38c   :  { %4290 = vmatpush.msra.mxu0 %v18334_v32  ;;  %4325 = vmatpush.msra.mxu1 %v18335_v51  ;;  %v18341_v51 = vld [vmem:[#allocation43_spill] sm:$0xff] }
 0x38d   :  { %4037 = vmatmul.f32.vlgmr.msrb.gmra.mxu2 %v15993_v60  ;;  %4174 = vmatmul.f32.vlgmr.msra.gmra.mxu3 %v16043_v40 }
 0x38e   :  { %4244 = vmatpush.msrb.mxu2 %v18336_v6  ;;  %4292 = vmatpush.msra.mxu0 %v18337_v39  ;;  %v18346_v6 = vld [vmem:[#allocation38_spill] sm:$0xff] }
 0x38f   :  { %4198 = vmatmul.f32.vlgmr.msrb.gmra.mxu0 %v16053_v27  ;;  %4331 = vmatpush.msra.mxu1 %v18338_v38  ;;  %v18342_v38 = vld [vmem:[#allocation46_spill] sm:$0xff] }
 0x390   :  { %4386 = vmatpush.msra.mxu3 %v18331_v10  ;;  %4415 = vmatpush.msrb.mxu0 %v18339_v54  ;;  %v18344_v54 = vld [vmem:[#allocation47_spill] sm:$0xff] }
 0x391   :  { %4222 = vmatmul.f32.vlgmr.msrb.gmra.mxu1 %v16062_v53 }
 0x392   :  { %4337 = vmatpush.msra.mxu1 %v18340_v52  ;;  %4388 = vmatpush.msra.mxu3 %v18332_v50  ;;  %v18343_v52 = vld [vmem:[#allocation36_spill] sm:$0xff] }
 0x393   :  { %4419 = vmatpush.msrb.mxu0 %v18341_v51  ;;  %v18345_v51 = vld [vmem:[#allocation53_spill] sm:$0xff] }
 0x394   :  { %4446 = vmatpush.msrb.mxu1 %v18331_v10  ;;  %4390 = vmatpush.msra.mxu3 %v18334_v32  ;;  %v18347_v10 = vld [vmem:[#allocation45_spill] sm:$0xff] }
 0x395   :  { %4148 = vmatmul.f32.vlgmr.msra.gmra.mxu2 %v16079_v29  ;;  %4268 = vmatmul.f32.vlgmr.msrb.gmra.mxu3 %v16043_v40 }
 0x396   :  { %4392 = vmatpush.msra.mxu3 %v18337_v39  ;;  %4423 = vmatpush.msrb.mxu0 %v18342_v38  ;;  %v18348_v38 = vld [vmem:[#allocation42_spill] sm:$0xff] }
 0x397   :  { %4298 = vmatmul.f32.vlgmr.msra.gmra.mxu0 %v16007_v14  ;;  %4448 = vmatpush.msrb.mxu1 %v18332_v50  ;;  %v18359_v50 = vld [vmem:[#allocation61_spill] sm:$0xff] }
 0x398   :  { %4357 = vmatpush.msra.mxu2 %v18343_v52  ;;  %4427 = vmatpush.msrb.mxu0 %v18344_v54  ;;  %v18349_v52 = vld [vmem:[#allocation44_spill] sm:$0xff] }
 0x399   :  { %4339 = vmatmul.f32.vlgmr.msra.gmra.mxu1 %v15986_v56  ;;  %4504 = vmatpush.msrb.mxu3 %v18345_v51  ;;  %v18350_v54 = vld [vmem:[#allocation40_spill] sm:$0xff]  ;;  %v18351_v51 = vld [vmem:[#allocation54_spill] sm:$0xff] }
 0x39a   :  { %4450 = vmatpush.msrb.mxu1 %v18334_v32  ;;  %4360 = vmatpush.msra.mxu2 %v18346_v6  ;;  %v18354_v6 = vld [vmem:[#allocation57_spill] sm:$0xff]  ;;  %v18357_v32 = vld [vmem:[#allocation59_spill] sm:$0xff] }
 0x39b   :  { %4527 = vmatpush.msra.mxu0 %v18347_v10  ;;  %v18352_v10 = vld [vmem:[#allocation55_spill] sm:$0xff] }
 0x39c   :  { %4452 = vmatpush.msrb.mxu1 %v18337_v39  ;;  %4363 = vmatpush.msra.mxu2 %v18348_v38  ;;  %v18353_v38 = vld [vmem:[#allocation69_spill] sm:$0xff]  ;;  %v18355_v39 = vld [vmem:[#allocation70_spill] sm:$0xff] }
 0x39d   :  { %4246 = vmatmul.f32.vlgmr.msrb.gmra.mxu2 %v16043_v40  ;;  %4396 = vmatmul.f32.vlgmr.msra.gmra.mxu3 %v15998_v23 }
 0x39e   :  { %4366 = vmatpush.msra.mxu2 %v18349_v52  ;;  %4550 = vmatpush.msra.mxu1 %v18350_v54  ;;  %v18356_v52 = vld [vmem:[#allocation48_spill] sm:$0xff] }
 0x39f   :  { %4429 = vmatmul.f32.vlgmr.msrb.gmra.mxu0 %v15986_v56  ;;  %4598 = vmatpush.msra.mxu3 %v18350_v54 }
 0x3a0   :  { %4474 = vmatpush.msrb.mxu2 %v18350_v54  ;;  %4618 = vmatpush.msrb.mxu0 %v18351_v51  ;;  %v18358_v54 = vld [vmem:[#allocation71_spill] sm:$0xff] }
 0x3a1   :  { %4454 = vmatmul.f32.vlgmr.msrb.gmra.mxu1 %v15986_v56 }
 0x3a2   :  { %4620 = vmatpush.msrb.mxu0 %v18352_v10  ;;  %4651 = vmatpush.msrb.mxu1 %v18353_v38  ;;  %v18360_v38 = vld [vmem:[#allocation72_spill] sm:$0xff] }
 0x3a4   :  { %4622 = vmatpush.msrb.mxu0 %v18354_v6  ;;  %4657 = vmatpush.msrb.mxu1 %v18355_v39  ;;  %v18361_v39 = vld [vmem:[#allocation63_spill] sm:$0xff] }
 0x3a5   :  { %4369 = vmatmul.f32.vlgmr.msra.gmra.mxu2 %v15993_v60  ;;  %4506 = vmatmul.f32.vlgmr.msrb.gmra.mxu3 %v16043_v40 }
 0x3a6   :  { %4576 = vmatpush.msra.mxu2 %v18356_v52  ;;  %4624 = vmatpush.msrb.mxu0 %v18357_v32  ;;  %v18366_v52 = vld [vmem:[#allocation58_spill] sm:$0xff] }
 0x3a7   :  { %4530 = vmatmul.f32.vlgmr.msra.gmra.mxu0 %v16053_v27  ;;  %4663 = vmatpush.msrb.mxu1 %v18358_v54  ;;  %v18362_v54 = vld [vmem:[#allocation66_spill] sm:$0xff] }
 0x3a8   :  { %4718 = vmatpush.msrb.mxu3 %v18351_v51  ;;  %4747 = vmatpush.msra.mxu0 %v18359_v50  ;;  %v18364_v50 = vld [vmem:[#allocation67_spill] sm:$0xff] }
 0x3a9   :  { %4554 = vmatmul.f32.vlgmr.msra.gmra.mxu1 %v16062_v53 }
 0x3aa   :  { %4669 = vmatpush.msrb.mxu1 %v18360_v38  ;;  %4720 = vmatpush.msrb.mxu3 %v18352_v10  ;;  %v18363_v38 = vld [vmem:[#allocation56_spill] sm:$0xff] }
 0x3ab   :  { %4751 = vmatpush.msra.mxu0 %v18361_v39  ;;  %v18365_v39 = vld [vmem:[#allocation73_spill] sm:$0xff] }
 0x3ac   :  { %4778 = vmatpush.msra.mxu1 %v18351_v51  ;;  %4722 = vmatpush.msrb.mxu3 %v18354_v6  ;;  %v18367_v51 = vld [vmem:[#allocation65_spill] sm:$0xff] }
 0x3ad   :  { %4480 = vmatmul.f32.vlgmr.msrb.gmra.mxu2 %v16079_v29  ;;  %4600 = vmatmul.f32.vlgmr.msra.gmra.mxu3 %v16043_v40 }
 0x3ae   :  { %4724 = vmatpush.msrb.mxu3 %v18357_v32  ;;  %4755 = vmatpush.msra.mxu0 %v18362_v54  ;;  %v18368_v54 = vld [vmem:[#allocation62_spill] sm:$0xff] }
 0x3af   :  { %4630 = vmatmul.f32.vlgmr.msrb.gmra.mxu0 %v16007_v14  ;;  %4780 = vmatpush.msra.mxu1 %v18352_v10  ;;  %v18369_v14 = vld [vmem:[#allocation64_spill] sm:$0xff] }
 0x3b0   :  { %4689 = vmatpush.msrb.mxu2 %v18363_v38  ;;  %4759 = vmatpush.msra.mxu0 %v18364_v50  ;;  %v18370_v50 = vld [vmem:[#allocation60_spill] sm:$0xff] }
 0x3b1   :  { %4671 = vmatmul.f32.vlgmr.msrb.gmra.mxu1 %v15986_v56  ;;  %4836 = vmatpush.msra.mxu3 %v18365_v39  ;;  %v18374_v39 = vld [vmem:[#allocation89_spill] sm:$0xff]  ;;  %v18377_v38 = vld [vmem:[#allocation92_spill] sm:$0xff] }
 0x3b2   :  { %4782 = vmatpush.msra.mxu1 %v18354_v6  ;;  %4692 = vmatpush.msrb.mxu2 %v18366_v52  ;;  %v18371_v52 = vld [vmem:[#allocation76_spill] sm:$0xff] }
 0x3b3   :  { %4859 = vmatpush.msrb.mxu0 %v18367_v51  ;;  %v18372_v51 = vld [vmem:[#allocation85_spill] sm:$0xff] }
 0x3b4   :  { %4784 = vmatpush.msra.mxu1 %v18357_v32  ;;  %4695 = vmatpush.msrb.mxu2 %v18368_v54  ;;  %v18373_v54 = vld [vmem:[#allocation78_spill] sm:$0xff] }
 0x3b5   :  { %4578 = vmatmul.f32.vlgmr.msra.gmra.mxu2 %v16043_v40  ;;  %4728 = vmatmul.f32.vlgmr.msrb.gmra.mxu3 %v15998_v23  ;;  %v18375_v23 = vld [vmem:[#allocation81_spill] sm:$0xff] }
 0x3b6   :  { %4698 = vmatpush.msrb.mxu2 %v18369_v14  ;;  %4930 = vmatpush.msrb.mxu3 %v18370_v50  ;;  %v18376_v14 = vld [vmem:[#allocation68_spill] sm:$0xff] }
 0x3b7   :  { %4761 = vmatmul.f32.vlgmr.msra.gmra.mxu0 %v15986_v56  ;;  %4882 = vmatpush.msrb.mxu1 %v18370_v50 }
 0x3b8   :  { %4806 = vmatpush.msra.mxu2 %v18370_v50  ;;  %5018 = vmatpush.msra.mxu0 %v18371_v52 }
 0x3b9   :  { %4786 = vmatmul.f32.vlgmr.msra.gmra.mxu1 %v15986_v56  ;;  %v18378_v56 = vld [vmem:[#allocation93_spill] sm:$0xff] }
 0x3ba   :  { %5051 = vmatpush.msra.mxu1 %v18372_v51  ;;  %5020 = vmatpush.msra.mxu0 %v18373_v54  ;;  %v18379_v51 = vld [vmem:[#allocation84_spill] sm:$0xff] }
 0x3bc   :  { %5057 = vmatpush.msra.mxu1 %v18374_v39  ;;  %5022 = vmatpush.msra.mxu0 %v18375_v23  ;;  %v18389_v39 = vld [vmem:[#allocation87_spill] sm:$0xff] }
 0x3bd   :  { %4701 = vmatmul.f32.vlgmr.msrb.gmra.mxu2 %v15993_v60  ;;  %4838 = vmatmul.f32.vlgmr.msra.gmra.mxu3 %v16043_v40  ;;  %v18380_v60 = vld [vmem:[#allocation79_spill] sm:$0xff] }
 0x3be   :  { %4908 = vmatpush.msrb.mxu2 %v18376_v14  ;;  %5063 = vmatpush.msra.mxu1 %v18377_v38  ;;  %v18381_v38 = vld [vmem:[#allocation82_spill] sm:$0xff] }
 0x3bf   :  { %4862 = vmatmul.f32.vlgmr.msrb.gmra.mxu0 %v16053_v27  ;;  %5118 = vmatpush.msra.mxu3 %v18371_v52  ;;  %v18382_v27 = vld [vmem:[#allocation77_spill] sm:$0xff]  ;;  %v18386_v14 = vld [vmem:[#allocation90_spill] sm:$0xff] }
 0x3c0   :  { %5069 = vmatpush.msra.mxu1 %v18378_v56  ;;  %5024 = vmatpush.msra.mxu0 %v18379_v51  ;;  %v18384_v56 = vld [vmem:[#allocation80_spill] sm:$0xff] }
 0x3c1   :  { %4886 = vmatmul.f32.vlgmr.msrb.gmra.mxu1 %v16062_v53  ;;  %5120 = vmatpush.msra.mxu3 %v18373_v54  ;;  %v18383_v53 = vld [vmem:[#allocation86_spill] sm:$0xff] }
 0x3c2   :  { %5178 = vmatpush.msrb.mxu1 %v18371_v52  ;;  %5147 = vmatpush.msrb.mxu0 %v18380_v60  ;;  %v18385_v60 = vld [vmem:[#allocation97_spill] sm:$0xff] }
 0x3c3   :  { %5122 = vmatpush.msra.mxu3 %v18375_v23 }
 0x3c4   :  { %5180 = vmatpush.msrb.mxu1 %v18373_v54  ;;  %5151 = vmatpush.msrb.mxu0 %v18381_v38  ;;  %v18387_v38 = vld [vmem:[#allocation83_spill] sm:$0xff] }
 0x3c5   :  { %4812 = vmatmul.f32.vlgmr.msra.gmra.mxu2 %v16079_v29  ;;  %4932 = vmatmul.f32.vlgmr.msrb.gmra.mxu3 %v16043_v40  ;;  %v18388_v29 = vld [vmem:[#allocation98_spill] sm:$0xff] }
 0x3c6   :  { %5089 = vmatpush.msra.mxu2 %v18382_v27  ;;  %5124 = vmatpush.msra.mxu3 %v18379_v51 }
 0x3c7   :  { %5182 = vmatpush.msrb.mxu1 %v18375_v23  ;;  %5155 = vmatpush.msrb.mxu0 %v18383_v53 }
 0x3c8   :  { %5092 = vmatpush.msra.mxu2 %v18384_v56  ;;  %5240 = vmatpush.msrb.mxu3 %v18385_v60 }
 0x3c9   :  { %5184 = vmatpush.msrb.mxu1 %v18379_v51  ;;  %5159 = vmatpush.msrb.mxu0 %v18386_v14  ;;  %v18390_v14 = vld [vmem:[#allocation99_spill] sm:$0xff] }
 0x3ca   :  { %5095 = vmatpush.msra.mxu2 %v18387_v38  ;;  %5246 = vmatpush.msrb.mxu3 %v18388_v29 }
 0x3cc   :  { %5098 = vmatpush.msra.mxu2 %v18389_v39 }
 0x3cd   :  { %4910 = vmatmul.f32.vlgmr.msrb.gmra.mxu2 %v16043_v40 }
 0x3ce   :  { %5209 = vmatpush.msrb.mxu2 %v15704_v24 }
 0x3d0   :  { %5211 = vmatpush.msrb.mxu2 %v15712_v1 }
 0x3dc   :  { %v3523_v53 = vpop.f32.mrf.mxu0 }
 0x3de   :  { %v3548_v56 = vpop.f32.mrf.mxu1 }
 0x3e0   :  { %v3497_v27 = vpop.f32.mrf.mxu3 }
 0x3e4   :  { %v3632_v60 = vpop.f32.mrf.mxu0 }
 0x3e6   :  { %v3673_v23 = vpop.f32.mrf.mxu1 }
 0x3e8   :  { %v3466_v51 = vpop.f32.mrf.mxu2  ;;  %v3598_v54 = vpop.f32.mrf.mxu3 }
 0x3e9   :  { %v3467_v52 = vadd.f32 %v18390_v14, %v3466_v51 }
 0x3eb   :  { %v3498_v38 = vadd.f32 %v3497_v27, %v3467_v52  ;;  %v3674_v27 = vadd.f32 %v3673_v23, %v3632_v60 }
 0x3ec   :  { %v3763_v50 = vpop.f32.mrf.mxu0 }
 0x3ed   :  { %v3524_v29 = vadd.f32 %v3523_v53, %v3498_v38 }
 0x3ee   :  { %v3788_v32 = vpop.f32.mrf.mxu1 }
 0x3ef   :  { %v3549_v39 = vadd.f32 %v3548_v56, %v3524_v29 }
 0x3f0   :  { %v3575_v6 = vpop.f32.mrf.mxu2  ;;  %v3730_v40 = vpop.f32.mrf.mxu3 }
 0x3f1   :  { %v3576_v10 = vadd.f32 %v3575_v6, %v3549_v39 }
 0x3f3   :  { %v3599_v61 = vadd.f32 %v3598_v54, %v3576_v10 }
 0x3f4   :  { %v3867_v0 = vpop.f32.mrf.mxu0 }
 0x3f5   :  { %14769 = vst.msk [vmem:[%s17855_s5 + $0x8] sm:$0x1f] %vm1849_vm1, %v3599_v61 }
 0x3f6   :  { %v3891_v41 = vpop.f32.mrf.mxu1 }
 0x3f8   :  { %v3703_v30 = vpop.f32.mrf.mxu2  ;;  %v3843_v26 = vpop.f32.mrf.mxu3 }
 0x3f9   :  { %v3704_v6 = vadd.f32 %v3703_v30, %v3674_v27 }
 0x3fb   :  { %v3731_v10 = vadd.f32 %v3730_v40, %v3704_v6 }
 0x3fc   :  { %v3967_v46 = vpop.f32.mrf.mxu0 }
 0x3fd   :  { %v3764_v2 = vadd.f32 %v3763_v50, %v3731_v10 }
 0x3fe   :  { %v4008_v51 = vpop.f32.mrf.mxu1 }
 0x3ff   :  { %v4009_v39 = vadd.f32 %v4008_v51, %v3967_v46  ;;  %v3789_v45 = vadd.f32 %v3788_v32, %v3764_v2 }
 0x400   :  { %v3817_v52 = vpop.f32.mrf.mxu2  ;;  %v3937_v14 = vpop.f32.mrf.mxu3 }
 0x401   :  { %v3818_v44 = vadd.f32 %v3817_v52, %v3789_v45 }
 0x403   :  { %v3844_v43 = vadd.f32 %v3843_v26, %v3818_v44 }
 0x404   :  { %v4098_v38 = vpop.f32.mrf.mxu0 }
 0x405   :  { %v3868_v51 = vadd.f32 %v3867_v0, %v3844_v43  ;;  %v16237_v43 = vld [vmem:[%s17852_s2] ss:$0 sm:$0xff] }
 0x406   :  { %v4123_v56 = vpop.f32.mrf.mxu1 }
 0x407   :  { %v3892_v50 = vadd.f32 %v3891_v41, %v3868_v51 }
 0x408   :  { %v3915_v53 = vpop.f32.mrf.mxu2  ;;  %v4065_v29 = vpop.f32.mrf.mxu3 }
 0x409   :  { %v3916_v2 = vadd.f32 %v3915_v53, %v3892_v50 }
 0x40b   :  { %v3938_v32 = vadd.f32 %v3937_v14, %v3916_v2 }
 0x40c   :  { %v4199_v54 = vpop.f32.mrf.mxu0 }
 0x40e   :  { %v4223_v7 = vpop.f32.mrf.mxu1 }
 0x410   :  { %v4038_v33 = vpop.f32.mrf.mxu2  ;;  %v4175_v55 = vpop.f32.mrf.mxu3 }
 0x411   :  { %v4039_v61 = vadd.f32 %v4038_v33, %v4009_v39 }
 0x413   :  { %v4066_v37 = vadd.f32 %v4065_v29, %v4039_v61 }
 0x414   :  { %v4299_v23 = vpop.f32.mrf.mxu0 }
 0x415   :  { %v4099_v63 = vadd.f32 %v4098_v38, %v4066_v37 }
 0x416   :  { %v4340_v59 = vpop.f32.mrf.mxu1 }
 0x417   :  { %v4124_v47 = vadd.f32 %v4123_v56, %v4099_v63  ;;  %v4341_v38 = vadd.f32 %v4340_v59, %v4299_v23 }
 0x418   :  { %v4149_v21 = vpop.f32.mrf.mxu2  ;;  %v4269_v62 = vpop.f32.mrf.mxu3 }
 0x419   :  { %v4150_v60 = vadd.f32 %v4149_v21, %v4124_v47 }
 0x41b   :  { %v4176_v30 = vadd.f32 %v4175_v55, %v4150_v60  ;;  %v3940_v55 = vadd.f32 %v16237_v43, %v3938_v32 }
 0x41c   :  { %v4430_v6 = vpop.f32.mrf.mxu0 }
 0x41d   :  { %v4200_v27 = vadd.f32 %v4199_v54, %v4176_v30  ;;  %v14772_v41 = vmul.f32 -1.442695, %v3940_v55 }
 0x41e   :  { %v4455_v33 = vpop.f32.mrf.mxu1 }
 0x41f   :  { %v4224_v10 = vadd.f32 %v4223_v7, %v4200_v27  ;;  %v16243_v7 = vld [vmem:[%s17852_s2 + $0x1] ss:$0 sm:$0xff]  ;;  %14855 = vpow2.f32 %v14772_v41 }
 0x420   :  { %v4247_v40 = vpop.f32.mrf.mxu2  ;;  %v4397_v46 = vpop.f32.mrf.mxu3 }
 0x421   :  { %v4248_v37 = vadd.f32 %v4247_v40, %v4224_v10 }
 0x423   :  { %v4270_v45 = vadd.f32 %v4269_v62, %v4248_v37 }
 0x424   :  { %v4531_v52 = vpop.f32.mrf.mxu0 }
 0x425   :  { %v4272_v26 = vadd.f32 %v16243_v7, %v4270_v45  ;;  %v14856_v23 = vpop.eup %14855 }
 0x426   :  { %v4555_v47 = vpop.f32.mrf.mxu1  ;;  %v4940_v50 = vadd.f32 1.0, %v14856_v23 }
 0x427   :  { %v14773_v0 = vmul.f32 -1.442695, %v4272_v26 }
 0x428   :  { %v4370_v29 = vpop.f32.mrf.mxu2  ;;  %v4507_v63 = vpop.f32.mrf.mxu3  ;;  %vm4946_vm6 = vweird.f32 %v4940_v50 }
 0x429   :  { %v4371_v21 = vadd.f32 %v4370_v29, %v4341_v38  ;;  %14857 = vpow2.f32 %v14773_v0 }
 0x42a   :  { %14859 = vrcp.f32 %v4940_v50 }
 0x42b   :  { %v4398_v59 = vadd.f32 %v4397_v46, %v4371_v21 }
 0x42c   :  { %v4631_v56 = vpop.f32.mrf.mxu0 }
 0x42d   :  { %v4431_v14 = vadd.f32 %v4430_v6, %v4398_v59 }
 0x42e   :  { %v4672_v39 = vpop.f32.mrf.mxu1 }
 0x42f   :  { %v4456_v54 = vadd.f32 %v4455_v33, %v4431_v14  ;;  %v4673_v60 = vadd.f32 %v4672_v39, %v4631_v56  ;;  %v14858_v40 = vpop.eup %14857 }
 0x430   :  { %v4481_v44 = vpop.f32.mrf.mxu2  ;;  %v4601_v62 = vpop.f32.mrf.mxu3  ;;  %v4959_v46 = vadd.f32 1.0, %v14858_v40 }
 0x431   :  { %v4482_v30 = vadd.f32 %v4481_v44, %v4456_v54  ;;  %v14860_v59 = vpop.eup %14859 }
 0x432   :  { %14861 = vrcp.f32 %v4959_v46  ;;  %vm4947_vm4 = vweird.f32 %v14860_v59  ;;  %vm4965_vm7 = vweird.f32 %v4959_v46 }
 0x433   :  { %v4508_v29 = vadd.f32 %v4507_v63, %v4482_v30  ;;  %v4942_v63 = vmul.f32 %v14860_v59, %v4940_v50  ;;  %vm4948_vm8 = vmor %vm4946_vm6, %vm4947_vm4  ;;  %vm14132_vm6 = vcmask 1041408  }
 0x434   :  { %v4762_v10 = vpop.f32.mrf.mxu0 }
 0x435   :  { %v4532_v38 = vadd.f32 %v4531_v52, %v4508_v29  ;;  %v4943_v52 = vsub.f32 1.0, %v4942_v63 }
 0x436   :  { %v4787_v37 = vpop.f32.mrf.mxu1 }
 0x437   :  { %v4556_v26 = vadd.f32 %v4555_v47, %v4532_v38  ;;  %v16249_v47 = vld [vmem:[%s17852_s2 + $0x3] ss:$0 sm:$0xff]  ;;  %v4952_v38 = vand.u32 2147483648, %v4940_v50 }
 0x438   :  { %v4579_v53 = vpop.f32.mrf.mxu2  ;;  %v4729_v61 = vpop.f32.mrf.mxu3 }
 0x439   :  { %v14862_v0 = vpop.eup %14861  ;;  %v4580_v56 = vadd.f32 %v4579_v53, %v4556_v26  ;;  %v16255_v53 = vld [vmem:[%s17852_s2 + $0x2] ss:$0 sm:$0xff] }
 0x43a   :  { %v4961_v54 = vmul.f32 %v14862_v0, %v4959_v46  ;;  %vm4966_vm5 = vweird.f32 %v14862_v0 }
 0x43b   :  { %v4602_v30 = vadd.f32 %v4601_v62, %v4580_v56  ;;  %v4944_v62 = vmul.f32 %v14860_v59, %v4943_v52  ;;  %vm4967_vm9 = vmor %vm4965_vm7, %vm4966_vm5  ;;  %v4953_v56 = vor.u32 1.1754944e-38, %v4952_v38 }
 0x43c   :  { %v4863_v55 = vpop.f32.mrf.mxu0 }
 0x43e   :  { %v4887_v41 = vpop.f32.mrf.mxu1 }
 0x440   :  { %v4702_v51 = vpop.f32.mrf.mxu2  ;;  %v4839_v32 = vpop.f32.mrf.mxu3 }
 0x441   :  { %v4703_v27 = vadd.f32 %v4702_v51, %v4673_v60  ;;  %v4962_v51 = vsub.f32 1.0, %v4961_v54 }
 0x443   :  { %v4730_v2 = vadd.f32 %v4729_v61, %v4703_v27 }
 0x445   :  { %v4763_v6 = vadd.f32 %v4762_v10, %v4730_v2  ;;  %v4604_v10 = vadd.f32 %v16255_v53, %v4602_v30  ;;  %v4963_v2 = vmul.f32 %v14862_v0, %v4962_v51 }
 0x447   :  { %v4788_v45 = vadd.f32 %v4787_v37, %v4763_v6  ;;  %v4945_v37 = vadd.f32 %v14860_v59, %v4944_v62  ;;  %v4964_v6 = vadd.f32 %v14862_v0, %v4963_v2 }
 0x448   :  { %v4813_v33 = vpop.f32.mrf.mxu2  ;;  %v4933_v23 = vpop.f32.mrf.mxu3 }
 0x449   :  { %v4814_v21 = vadd.f32 %v4813_v33, %v4788_v45  ;;  %v4950_v45 = vand.u32 2147483647, %v4940_v50  ;;  %v4969_v33 = vand.u32 2147483647, %v4959_v46  ;;  %v4968_v26 = vsel %vm4967_vm9, %v14862_v0, %v4964_v6 }
 0x44b   :  { %v4840_v44 = vadd.f32 %v4839_v32, %v4814_v21  ;;  %v4971_v32 = vand.u32 2147483648, %v4959_v46  ;;  %vm4951_vm10 = vcmp.eq.f32.partialorder %v4950_v45, 8.507059e+37  ;;  %vm4970_vm11 = vcmp.eq.f32.partialorder %v4969_v33, 8.507059e+37 }
 0x44d   :  { %v4864_v14 = vadd.f32 %v4863_v55, %v4840_v44  ;;  %v4949_v55 = vsel %vm4948_vm8, %v14860_v59, %v4945_v37 }
 0x44f   :  { %v4888_v39 = vadd.f32 %v4887_v41, %v4864_v14  ;;  %v4972_v14 = vor.u32 1.1754944e-38, %v4971_v32 }
 0x450   :  { %v4911_v61 = vpop.f32.mrf.mxu2 }
 0x451   :  { %v4912_v60 = vadd.f32 %v4911_v61, %v4888_v39  ;;  %v4954_v39 = vsel %vm4951_vm10, %v4953_v56, %v4949_v55  ;;  %v4973_v63 = vsel %vm4970_vm11, %v4972_v14, %v4968_v26 }
 0x452   :  { %v4995_v61 = vmul.f32 %v4973_v63, %v15977_v28 }
 0x453   :  { %v4934_v40 = vadd.f32 %v4933_v23, %v4912_v60 }
 0x455   :  { %v4936_v27 = vadd.f32 %v16249_v47, %v4934_v40 }
 0x457   :  { %v14774_v29 = vmul.f32 -1.442695, %v4936_v27 }
 0x459   :  { %14863 = vpow2.f32 %v14774_v29 }
 0x45a   :  { %14865 = vtanh.f32 %v4604_v10 }
 0x45f   :  { %v14864_v21 = vpop.eup %14863 }
 0x460   :  { %v4979_v44 = vadd.f32 1.0, %v14864_v21  ;;  %v14866_v41 = vpop.eup %14865  ;;  %v16308_v21 = vld [vmem:[%s17854_s4] ss:$0 sm:$0xff] }
 0x461   :  { %v4996_v54 = vmul.f32 %v14866_v41, %v4954_v39 }
 0x462   :  { %14867 = vrcp.f32 %v4979_v44  ;;  %v4991_v59 = vand.u32 2147483648, %v4979_v44  ;;  %v4989_v30 = vand.u32 2147483647, %v4979_v44  ;;  %vm4985_vm2 = vweird.f32 %v4979_v44 }
 0x463   :  { %v16259_v60 = vadd.f32 %v4996_v54, %v4995_v61 }
 0x464   :  { %v4992_v52 = vor.u32 1.1754944e-38, %v4991_v59  ;;  %vm4990_vm5 = vcmp.eq.f32.partialorder %v4989_v30, 8.507059e+37 }
 0x465   :  { %14869 = vtanh.f32 %v16259_v60 }
 0x468   :  { %v14868_v23 = vpop.eup %14867 }
 0x469   :  { %v4981_v50 = vmul.f32 %v14868_v23, %v4979_v44  ;;  %vm4986_vm12 = vweird.f32 %v14868_v23 }
 0x46a   :  { %vm4987_vm4 = vmor %vm4985_vm2, %vm4986_vm12 }
 0x46b   :  { %v4982_v46 = vsub.f32 1.0, %v4981_v50  ;;  %v14870_v27 = vpop.eup %14869 }
 0x46d   :  { %v4983_v0 = vmul.f32 %v14868_v23, %v4982_v46 }
 0x46f   :  { %v4984_v40 = vadd.f32 %v14868_v23, %v4983_v0 }
 0x471   :  { %v4988_v51 = vsel %vm4987_vm4, %v14868_v23, %v4984_v40  ;;  %v14778_v40 = vld [vmem:[%s17850_s0 + $0x18] sm:$0x1f] }
 0x472   :  { %v4993_v10 = vsel %vm4990_vm5, %v4992_v52, %v4988_v51  ;;  %v5544_v51 = vsel %vm267_vm0, %v14778_v40, 0  ;;  %v18410_v40 = vld [vmem:[#allocation33_spill] sm:$0xff] }
 0x473   :  { %v4999_v28 = vmul.f32 %v14870_v27, %v4993_v10  ;;  %v16330_v27 = vand.u32 4294901760, %v5544_v51 }
 0x475   :  { %14775 = vst.msk [vmem:[%s17857_s7 + $0x10] sm:$0x1f] %vm1489_vm14, %v4999_v28  ;;  %v5003_v29 = vsel %vm78_vm13, %v4999_v28, 0  ;;  %v14120_v2 = vrot.slane %v4999_v28, 2  ;;  %v16340_v10 = vsub.f32 %v5544_v51, %v16330_v27  ;;  %v18412_v51 = vld [vmem:[#allocation49_spill] sm:$0xff] }
 0x476   :  { %v16267_v62 = vand.u32 4294901760, %v5003_v29 }
 0x477   :  { %v16271_v37 = vsel %vm14132_vm6, %v15989_v17, %v14120_v2  ;;  %v16349_v28 = vand.u32 4294901760, %v16340_v10  ;;  %v18392_v2 = vld [vmem:[#allocation28_spill] sm:$0xff] }
 0x478   :  { %5071 = vmatmul.f32.vlgmr.msra.gmra.mxu1 %v16267_v62  ;;  %v16275_v6 = vsub.f32 %v5003_v29, %v16267_v62  ;;  %v18391_v29 = vld [vmem:[#allocation15_spill] sm:$0xff] }
 0x479   :  { %5293 = vmatpush.msra.mxu1 %v15704_v24 }
 0x47a   :  { %5101 = vmatmul.f32.vlgmr.msra.gmra.mxu2 %v16275_v6  ;;  %v16280_v32 = vand.u32 4294901760, %v16275_v6 }
 0x47b   :  { %5295 = vmatpush.msra.mxu1 %v15712_v1  ;;  %5320 = vmatpush.msra.mxu2 %v15717_v58 }
 0x47c   :  { %5128 = vmatmul.f32.vlgmr.msra.gmra.mxu3 %v16280_v32  ;;  %v5028_v17 = vsub.f32 %v16275_v6, %v16280_v32 }
 0x47d   :  { %5345 = vmatpush.msra.mxu3 %v15704_v24  ;;  %5324 = vmatpush.msra.mxu2 %v18311_v48 }
 0x47e   :  { %v16289_v38 = vand.u32 4294901760, %v5028_v17  ;;  %v18393_v17 = vld [vmem:[#allocation16_spill] sm:$0xff] }
 0x47f   :  { %5347 = vmatpush.msra.mxu3 %v15712_v1 }
 0x480   :  { %5030 = vmatmul.f32.vlgmr.msra.gmra.mxu0 %v16289_v38  ;;  %5186 = vmatmul.f32.vlgmr.msrb.gmra.mxu1 %v16267_v62 }
 0x481   :  { %5268 = vmatpush.msra.mxu0 %v18312_v35  ;;  %5404 = vmatpush.msrb.mxu1 %v18313_v57 }
 0x483   :  { %5271 = vmatpush.msra.mxu0 %v18314_v36  ;;  %5410 = vmatpush.msrb.mxu1 %v18315_v49 }
 0x485   :  { %5416 = vmatpush.msrb.mxu1 %v18316_v25 }
 0x487   :  { %5422 = vmatpush.msrb.mxu1 %v18317_v31 }
 0x488   :  { %5161 = vmatmul.f32.vlgmr.msrb.gmra.mxu0 %v16267_v62 }
 0x489   :  { %5371 = vmatpush.msrb.mxu0 %v15051_v3 }
 0x48b   :  { %5373 = vmatpush.msrb.mxu0 %v15053_v4 }
 0x48d   :  { %5375 = vmatpush.msrb.mxu0 %v15055_v5 }
 0x48f   :  { %5377 = vmatpush.msrb.mxu0 %v15063_v8 }
 0x4f5   :  { %v5072_v45 = vpop.f32.mrf.mxu1 }
 0x4fd   :  { %v5031_v33 = vpop.f32.mrf.mxu0  ;;  %v5102_v44 = vpop.f32.mrf.mxu2 }
 0x4fe   :  { %v5032_v55 = vadd.f32 %v16308_v21, %v5031_v33  ;;  %v5187_v54 = vpop.f32.mrf.mxu1  ;;  %v5566_v33 = vsub.f32 %v16340_v10, %v16349_v28 }
 0x4ff   :  { %v5129_v14 = vpop.f32.mrf.mxu3 }
 0x500   :  { %v5073_v26 = vadd.f32 %v5072_v45, %v5032_v55  ;;  %v18394_v45 = vld [vmem:[#allocation30_spill] sm:$0xff]  ;;  %v18395_v55 = vld [vmem:[#allocation9_spill] sm:$0xff] }
 0x502   :  { %v5103_v41 = vadd.f32 %v5102_v44, %v5073_v26  ;;  %v18396_v26 = vld [vmem:[#allocation19_spill] sm:$0xff] }
 0x503   :  { %v18397_v44 = vld [vmem:[#allocation31_spill] sm:$0xff] }
 0x504   :  { %v5130_v56 = vadd.f32 %v5129_v14, %v5103_v41  ;;  %v18398_v41 = vld [vmem:[#allocation21_spill] sm:$0xff]  ;;  %v16366_v14 = vand.u32 4294901760, %v5566_v33 }
 0x505   :  { %v5162_v39 = vpop.f32.mrf.mxu0  ;;  %v18413_v33 = vld [vmem:[#allocation37_spill] sm:$0xff] }
 0x506   :  { %v5163_v63 = vadd.f32 %v5162_v39, %v5130_v56  ;;  %v18399_v56 = vld [vmem:[#allocation32_spill] sm:$0xff]  ;;  %v18400_v39 = vld [vmem:[#allocation23_spill] sm:$0xff] }
 0x508   :  { %v5188_v61 = vadd.f32 %v5187_v54, %v5163_v63  ;;  %v18401_v63 = vld [vmem:[#allocation26_spill] sm:$0xff]  ;;  %v18402_v54 = vld [vmem:[#allocation17_spill] sm:$0xff] }
 0x50a   :  { %v5190_v23 = vmax.f32 %v5188_v61, 0.0  ;;  %v18403_v61 = vld [vmem:[#allocation27_spill] sm:$0xff] }
 0x50c   :  { %v5192_v50 = vsel %vm1686_vm15, %v5190_v23, 0  ;;  %v18404_v23 = vld [vmem:[#allocation34_spill] sm:$0xff] }
 0x50d   :  { %v5212_v46 = vand.u32 4294901760, %v5192_v50 }
 0x50f   :  { %v5213_v59 = vsub.f32 %v5192_v50, %v5212_v46  ;;  %5248 = vmatmul.f32.vlgmr.msrb.gmra.mxu3 %v5212_v46  ;;  %v18405_v50 = vld [vmem:[#allocation18_spill] sm:$0xff] }
 0x510   :  { %5471 = vmatpush.msrb.mxu3 %v15051_v3 }
 0x511   :  { %v5214_v0 = vand.u32 4294901760, %v5213_v59  ;;  %5274 = vmatmul.f32.vlgmr.msra.gmra.mxu0 %v5213_v59 }
 0x512   :  { %5473 = vmatpush.msrb.mxu3 %v15053_v4  ;;  %5500 = vmatpush.msra.mxu0 %v15093_v18 }
 0x513   :  { %v5215_v30 = vsub.f32 %v5213_v59, %v5214_v0  ;;  %5299 = vmatmul.f32.vlgmr.msra.gmra.mxu1 %v5214_v0  ;;  %v18407_v59 = vld [vmem:[#allocation22_spill] sm:$0xff]  ;;  %v18408_v0 = vld [vmem:[#allocation24_spill] sm:$0xff] }
 0x514   :  { %5475 = vmatpush.msrb.mxu3 %v15055_v5  ;;  %5504 = vmatpush.msra.mxu0 %v15096_v19 }
 0x515   :  { %v5216_v52 = vand.u32 4294901760, %v5215_v30  ;;  %5531 = vmatpush.msra.mxu1 %v15051_v3  ;;  %v18409_v30 = vld [vmem:[#allocation20_spill] sm:$0xff] }
 0x516   :  { %5477 = vmatpush.msrb.mxu3 %v15063_v8  ;;  %5508 = vmatpush.msra.mxu0 %v15099_v20 }
 0x517   :  { %5217 = vmatmul.f32.vlgmr.msrb.gmra.mxu2 %v5216_v52  ;;  %5349 = vmatmul.f32.vlgmr.msra.gmra.mxu3 %v5212_v46  ;;  %v18411_v52 = vld [vmem:[#allocation35_spill] sm:$0xff] }
 0x518   :  { %5533 = vmatpush.msra.mxu1 %v15053_v4  ;;  %5442 = vmatpush.msrb.mxu2 %v15071_v11 }
 0x519   :  { %5383 = vmatmul.f32.vlgmr.msrb.gmra.mxu0 %v16289_v38  ;;  %5592 = vmatpush.msra.mxu3 %v15138_v34 }
 0x51a   :  { %5512 = vmatpush.msra.mxu0 %v15106_v22  ;;  %5535 = vmatpush.msra.mxu1 %v15055_v5 }
 0x51b   :  { %5424 = vmatmul.f32.vlgmr.msrb.gmra.mxu1 %v16267_v62  ;;  %5445 = vmatpush.msrb.mxu2 %v15075_v12 }
 0x51c   :  { %5537 = vmatpush.msra.mxu1 %v15063_v8  ;;  %5615 = vmatpush.msrb.mxu0 %v15086_v16 }
 0x51d   :  { %5448 = vmatpush.msrb.mxu2 %v15079_v13 }
 0x51e   :  { %5638 = vmatpush.msrb.mxu1 %v15065_v9 }
 0x51f   :  { %5326 = vmatmul.f32.vlgmr.msra.gmra.mxu2 %v5212_v46  ;;  %5481 = vmatmul.f32.vlgmr.msrb.gmra.mxu3 %v16280_v32  ;;  %v18406_v46 = vld [vmem:[#allocation25_spill] sm:$0xff] }
 0x520   :  { %5451 = vmatpush.msrb.mxu2 %v15083_v15  ;;  %5686 = vmatpush.msrb.mxu3 %v15065_v9 }
 0x521   :  { %5514 = vmatmul.f32.vlgmr.msra.gmra.mxu0 %v16267_v62 }
 0x522   :  { %5562 = vmatpush.msra.mxu2 %v15065_v9  ;;  %5706 = vmatpush.msra.mxu0 %v15164_v42 }
 0x523   :  { %5539 = vmatmul.f32.vlgmr.msra.gmra.mxu1 %v16267_v62 }
 0x524   :  { %5708 = vmatpush.msra.mxu0 %v18391_v29  ;;  %5739 = vmatpush.msra.mxu1 %v18392_v2 }
 0x526   :  { %5710 = vmatpush.msra.mxu0 %v18393_v17  ;;  %5745 = vmatpush.msra.mxu1 %v18394_v45 }
 0x527   :  { %5454 = vmatmul.f32.vlgmr.msrb.gmra.mxu2 %v16275_v6  ;;  %5594 = vmatmul.f32.vlgmr.msra.gmra.mxu3 %v16330_v27 }
 0x528   :  { %5664 = vmatpush.msrb.mxu2 %v18395_v55  ;;  %5712 = vmatpush.msra.mxu0 %v18396_v26 }
 0x529   :  { %5618 = vmatmul.f32.vlgmr.msrb.gmra.mxu0 %v16340_v10  ;;  %5751 = vmatpush.msra.mxu1 %v18397_v44 }
 0x52a   :  { %5806 = vmatpush.msra.mxu3 %v15164_v42  ;;  %5835 = vmatpush.msrb.mxu0 %v18398_v41 }
 0x52b   :  { %5642 = vmatmul.f32.vlgmr.msrb.gmra.mxu1 %v16349_v28 }
 0x52c   :  { %5757 = vmatpush.msra.mxu1 %v18399_v56  ;;  %5808 = vmatpush.msra.mxu3 %v18391_v29 }
 0x52d   :  { %5839 = vmatpush.msrb.mxu0 %v18400_v39 }
 0x52e   :  { %5866 = vmatpush.msrb.mxu1 %v15164_v42  ;;  %5810 = vmatpush.msra.mxu3 %v18393_v17 }
 0x52f   :  { %5568 = vmatmul.f32.vlgmr.msra.gmra.mxu2 %v16366_v14  ;;  %5688 = vmatmul.f32.vlgmr.msrb.gmra.mxu3 %v16330_v27 }
 0x530   :  { %5812 = vmatpush.msra.mxu3 %v18396_v26  ;;  %5843 = vmatpush.msrb.mxu0 %v18401_v63 }
 0x531   :  { %5718 = vmatmul.f32.vlgmr.msra.gmra.mxu0 %v16289_v38  ;;  %5868 = vmatpush.msrb.mxu1 %v18391_v29 }
 0x532   :  { %5777 = vmatpush.msra.mxu2 %v18402_v54  ;;  %5847 = vmatpush.msrb.mxu0 %v18403_v61 }
 0x533   :  { %5759 = vmatmul.f32.vlgmr.msra.gmra.mxu1 %v16267_v62  ;;  %5924 = vmatpush.msrb.mxu3 %v18404_v23 }
 0x534   :  { %5870 = vmatpush.msrb.mxu1 %v18393_v17  ;;  %5780 = vmatpush.msra.mxu2 %v18405_v50  ;;  %v18418_v50 = vld [vmem:[#allocation41_spill] sm:$0xff] }
 0x535   :  { %5947 = vmatpush.msra.mxu0 %v18406_v46  ;;  %v18416_v46 = vld [vmem:[#allocation39_spill] sm:$0xff] }
 0x536   :  { %5872 = vmatpush.msrb.mxu1 %v18396_v26  ;;  %5783 = vmatpush.msra.mxu2 %v18407_v59  ;;  %v18414_v59 = vld [vmem:[#allocation50_spill] sm:$0xff] }
 0x537   :  { %5666 = vmatmul.f32.vlgmr.msrb.gmra.mxu2 %v16330_v27  ;;  %5816 = vmatmul.f32.vlgmr.msra.gmra.mxu3 %v16280_v32 }
 0x538   :  { %5786 = vmatpush.msra.mxu2 %v18408_v0  ;;  %5970 = vmatpush.msra.mxu1 %v18409_v30  ;;  %v18415_v0 = vld [vmem:[#allocation29_spill] sm:$0xff] }
 0x539   :  { %5849 = vmatmul.f32.vlgmr.msrb.gmra.mxu0 %v16267_v62  ;;  %6018 = vmatpush.msra.mxu3 %v18409_v30 }
 0x53a   :  { %5894 = vmatpush.msrb.mxu2 %v18409_v30  ;;  %6038 = vmatpush.msrb.mxu0 %v18410_v40  ;;  %v18417_v30 = vld [vmem:[#allocation51_spill] sm:$0xff] }
 0x53b   :  { %5874 = vmatmul.f32.vlgmr.msrb.gmra.mxu1 %v16267_v62 }
 0x53c   :  { %6040 = vmatpush.msrb.mxu0 %v18411_v52  ;;  %6071 = vmatpush.msrb.mxu1 %v18412_v51  ;;  %v18419_v51 = vld [vmem:[#allocation52_spill] sm:$0xff] }
 0x53e   :  { %6042 = vmatpush.msrb.mxu0 %v18413_v33  ;;  %6077 = vmatpush.msrb.mxu1 %v18414_v59  ;;  %v18420_v59 = vld [vmem:[#allocation43_spill] sm:$0xff] }
 0x53f   :  { %5789 = vmatmul.f32.vlgmr.msra.gmra.mxu2 %v16275_v6  ;;  %5926 = vmatmul.f32.vlgmr.msrb.gmra.mxu3 %v16330_v27 }
 0x540   :  { %5996 = vmatpush.msra.mxu2 %v18415_v0  ;;  %6044 = vmatpush.msrb.mxu0 %v18416_v46  ;;  %v18425_v0 = vld [vmem:[#allocation38_spill] sm:$0xff] }
 0x541   :  { %5950 = vmatmul.f32.vlgmr.msra.gmra.mxu0 %v16340_v10  ;;  %6083 = vmatpush.msrb.mxu1 %v18417_v30  ;;  %v18421_v30 = vld [vmem:[#allocation46_spill] sm:$0xff] }
 0x542   :  { %6138 = vmatpush.msrb.mxu3 %v18410_v40  ;;  %6167 = vmatpush.msra.mxu0 %v18418_v50  ;;  %v18423_v50 = vld [vmem:[#allocation47_spill] sm:$0xff] }
 0x543   :  { %5974 = vmatmul.f32.vlgmr.msra.gmra.mxu1 %v16349_v28 }
 0x544   :  { %6089 = vmatpush.msrb.mxu1 %v18419_v51  ;;  %6140 = vmatpush.msrb.mxu3 %v18411_v52  ;;  %v18422_v51 = vld [vmem:[#allocation36_spill] sm:$0xff] }
 0x545   :  { %6171 = vmatpush.msra.mxu0 %v18420_v59  ;;  %v18424_v59 = vld [vmem:[#allocation53_spill] sm:$0xff] }
 0x546   :  { %6198 = vmatpush.msra.mxu1 %v18410_v40  ;;  %6142 = vmatpush.msrb.mxu3 %v18413_v33  ;;  %v18426_v40 = vld [vmem:[#allocation45_spill] sm:$0xff] }
 0x547   :  { %5900 = vmatmul.f32.vlgmr.msrb.gmra.mxu2 %v16366_v14  ;;  %6020 = vmatmul.f32.vlgmr.msra.gmra.mxu3 %v16330_v27 }
 0x548   :  { %6144 = vmatpush.msrb.mxu3 %v18416_v46  ;;  %6175 = vmatpush.msra.mxu0 %v18421_v30  ;;  %v18427_v30 = vld [vmem:[#allocation42_spill] sm:$0xff] }
 0x549   :  { %6050 = vmatmul.f32.vlgmr.msrb.gmra.mxu0 %v16289_v38  ;;  %6200 = vmatpush.msra.mxu1 %v18411_v52  ;;  %v18438_v52 = vld [vmem:[#allocation61_spill] sm:$0xff] }
 0x54a   :  { %6109 = vmatpush.msrb.mxu2 %v18422_v51  ;;  %6179 = vmatpush.msra.mxu0 %v18423_v50  ;;  %v18428_v51 = vld [vmem:[#allocation44_spill] sm:$0xff] }
 0x54b   :  { %6091 = vmatmul.f32.vlgmr.msrb.gmra.mxu1 %v16267_v62  ;;  %6256 = vmatpush.msra.mxu3 %v18424_v59  ;;  %v18429_v50 = vld [vmem:[#allocation40_spill] sm:$0xff]  ;;  %v18430_v59 = vld [vmem:[#allocation54_spill] sm:$0xff] }
 0x54c   :  { %6202 = vmatpush.msra.mxu1 %v18413_v33  ;;  %6112 = vmatpush.msrb.mxu2 %v18425_v0  ;;  %v18433_v0 = vld [vmem:[#allocation57_spill] sm:$0xff]  ;;  %v18436_v33 = vld [vmem:[#allocation59_spill] sm:$0xff] }
 0x54d   :  { %6279 = vmatpush.msrb.mxu0 %v18426_v40  ;;  %v18431_v40 = vld [vmem:[#allocation55_spill] sm:$0xff] }
 0x54e   :  { %6204 = vmatpush.msra.mxu1 %v18416_v46  ;;  %6115 = vmatpush.msrb.mxu2 %v18427_v30  ;;  %v18432_v30 = vld [vmem:[#allocation69_spill] sm:$0xff]  ;;  %v18434_v46 = vld [vmem:[#allocation70_spill] sm:$0xff] }
 0x54f   :  { %5998 = vmatmul.f32.vlgmr.msra.gmra.mxu2 %v16330_v27  ;;  %6148 = vmatmul.f32.vlgmr.msrb.gmra.mxu3 %v16280_v32 }
 0x550   :  { %6118 = vmatpush.msrb.mxu2 %v18428_v51  ;;  %6302 = vmatpush.msrb.mxu1 %v18429_v50  ;;  %v18435_v51 = vld [vmem:[#allocation48_spill] sm:$0xff] }
 0x551   :  { %6181 = vmatmul.f32.vlgmr.msra.gmra.mxu0 %v16267_v62  ;;  %6350 = vmatpush.msrb.mxu3 %v18429_v50 }
 0x552   :  { %6226 = vmatpush.msra.mxu2 %v18429_v50  ;;  %6370 = vmatpush.msra.mxu0 %v18430_v59  ;;  %v18437_v50 = vld [vmem:[#allocation71_spill] sm:$0xff] }
 0x553   :  { %6206 = vmatmul.f32.vlgmr.msra.gmra.mxu1 %v16267_v62 }
 0x554   :  { %6372 = vmatpush.msra.mxu0 %v18431_v40  ;;  %6403 = vmatpush.msra.mxu1 %v18432_v30  ;;  %v18439_v30 = vld [vmem:[#allocation72_spill] sm:$0xff] }
 0x556   :  { %6374 = vmatpush.msra.mxu0 %v18433_v0  ;;  %6409 = vmatpush.msra.mxu1 %v18434_v46  ;;  %v18440_v46 = vld [vmem:[#allocation63_spill] sm:$0xff] }
 0x557   :  { %6121 = vmatmul.f32.vlgmr.msrb.gmra.mxu2 %v16275_v6  ;;  %6258 = vmatmul.f32.vlgmr.msra.gmra.mxu3 %v16330_v27 }
 0x558   :  { %6328 = vmatpush.msrb.mxu2 %v18435_v51  ;;  %6376 = vmatpush.msra.mxu0 %v18436_v33  ;;  %v18445_v51 = vld [vmem:[#allocation58_spill] sm:$0xff] }
 0x559   :  { %6282 = vmatmul.f32.vlgmr.msrb.gmra.mxu0 %v16340_v10  ;;  %6415 = vmatpush.msra.mxu1 %v18437_v50  ;;  %v18441_v50 = vld [vmem:[#allocation66_spill] sm:$0xff] }
 0x55a   :  { %6470 = vmatpush.msra.mxu3 %v18430_v59  ;;  %6499 = vmatpush.msrb.mxu0 %v18438_v52  ;;  %v18443_v52 = vld [vmem:[#allocation67_spill] sm:$0xff] }
 0x55b   :  { %6306 = vmatmul.f32.vlgmr.msrb.gmra.mxu1 %v16349_v28 }
 0x55c   :  { %6421 = vmatpush.msra.mxu1 %v18439_v30  ;;  %6472 = vmatpush.msra.mxu3 %v18431_v40  ;;  %v18442_v30 = vld [vmem:[#allocation56_spill] sm:$0xff] }
 0x55d   :  { %6503 = vmatpush.msrb.mxu0 %v18440_v46  ;;  %v18444_v46 = vld [vmem:[#allocation73_spill] sm:$0xff] }
 0x55e   :  { %6530 = vmatpush.msrb.mxu1 %v18430_v59  ;;  %6474 = vmatpush.msra.mxu3 %v18433_v0  ;;  %v18446_v59 = vld [vmem:[#allocation65_spill] sm:$0xff] }
 0x55f   :  { %6232 = vmatmul.f32.vlgmr.msra.gmra.mxu2 %v16366_v14  ;;  %6352 = vmatmul.f32.vlgmr.msrb.gmra.mxu3 %v16330_v27 }
 0x560   :  { %6476 = vmatpush.msra.mxu3 %v18436_v33  ;;  %6507 = vmatpush.msrb.mxu0 %v18441_v50  ;;  %v18447_v50 = vld [vmem:[#allocation62_spill] sm:$0xff] }
 0x561   :  { %6382 = vmatmul.f32.vlgmr.msra.gmra.mxu0 %v16289_v38  ;;  %6532 = vmatpush.msrb.mxu1 %v18431_v40  ;;  %v18448_v38 = vld [vmem:[#allocation64_spill] sm:$0xff] }
 0x562   :  { %6441 = vmatpush.msra.mxu2 %v18442_v30  ;;  %6511 = vmatpush.msrb.mxu0 %v18443_v52  ;;  %v18449_v52 = vld [vmem:[#allocation60_spill] sm:$0xff] }
 0x563   :  { %6423 = vmatmul.f32.vlgmr.msra.gmra.mxu1 %v16267_v62  ;;  %6588 = vmatpush.msrb.mxu3 %v18444_v46  ;;  %v18453_v46 = vld [vmem:[#allocation89_spill] sm:$0xff]  ;;  %v18456_v30 = vld [vmem:[#allocation92_spill] sm:$0xff] }
 0x564   :  { %6534 = vmatpush.msrb.mxu1 %v18433_v0  ;;  %6444 = vmatpush.msra.mxu2 %v18445_v51  ;;  %v18450_v51 = vld [vmem:[#allocation76_spill] sm:$0xff] }
 0x565   :  { %6611 = vmatpush.msra.mxu0 %v18446_v59  ;;  %v18451_v59 = vld [vmem:[#allocation85_spill] sm:$0xff] }
 0x566   :  { %6536 = vmatpush.msrb.mxu1 %v18436_v33  ;;  %6447 = vmatpush.msra.mxu2 %v18447_v50  ;;  %v18452_v50 = vld [vmem:[#allocation78_spill] sm:$0xff] }
 0x567   :  { %6330 = vmatmul.f32.vlgmr.msrb.gmra.mxu2 %v16330_v27  ;;  %6480 = vmatmul.f32.vlgmr.msra.gmra.mxu3 %v16280_v32  ;;  %v18454_v32 = vld [vmem:[#allocation81_spill] sm:$0xff] }
 0x568   :  { %6450 = vmatpush.msra.mxu2 %v18448_v38  ;;  %6682 = vmatpush.msra.mxu3 %v18449_v52  ;;  %v18455_v38 = vld [vmem:[#allocation68_spill] sm:$0xff] }
 0x569   :  { %6513 = vmatmul.f32.vlgmr.msrb.gmra.mxu0 %v16267_v62  ;;  %6634 = vmatpush.msra.mxu1 %v18449_v52 }
 0x56a   :  { %6558 = vmatpush.msrb.mxu2 %v18449_v52  ;;  %6770 = vmatpush.msrb.mxu0 %v18450_v51 }
 0x56b   :  { %6538 = vmatmul.f32.vlgmr.msrb.gmra.mxu1 %v16267_v62  ;;  %v18457_v62 = vld [vmem:[#allocation93_spill] sm:$0xff] }
 0x56c   :  { %6803 = vmatpush.msrb.mxu1 %v18451_v59  ;;  %6772 = vmatpush.msrb.mxu0 %v18452_v50  ;;  %v18458_v59 = vld [vmem:[#allocation84_spill] sm:$0xff] }
 0x56e   :  { %6809 = vmatpush.msrb.mxu1 %v18453_v46  ;;  %6774 = vmatpush.msrb.mxu0 %v18454_v32  ;;  %v18468_v46 = vld [vmem:[#allocation87_spill] sm:$0xff] }
 0x56f   :  { %6453 = vmatmul.f32.vlgmr.msra.gmra.mxu2 %v16275_v6  ;;  %6590 = vmatmul.f32.vlgmr.msrb.gmra.mxu3 %v16330_v27  ;;  %v18459_v6 = vld [vmem:[#allocation79_spill] sm:$0xff] }
 0x570   :  { %6660 = vmatpush.msra.mxu2 %v18455_v38  ;;  %6815 = vmatpush.msrb.mxu1 %v18456_v30  ;;  %v18460_v30 = vld [vmem:[#allocation82_spill] sm:$0xff] }
 0x571   :  { %6614 = vmatmul.f32.vlgmr.msra.gmra.mxu0 %v16340_v10  ;;  %6870 = vmatpush.msrb.mxu3 %v18450_v51  ;;  %v18461_v10 = vld [vmem:[#allocation77_spill] sm:$0xff]  ;;  %v18465_v38 = vld [vmem:[#allocation90_spill] sm:$0xff] }
 0x572   :  { %6821 = vmatpush.msrb.mxu1 %v18457_v62  ;;  %6776 = vmatpush.msrb.mxu0 %v18458_v59  ;;  %v18463_v62 = vld [vmem:[#allocation80_spill] sm:$0xff] }
 0x573   :  { %6638 = vmatmul.f32.vlgmr.msra.gmra.mxu1 %v16349_v28  ;;  %6872 = vmatpush.msrb.mxu3 %v18452_v50  ;;  %v18462_v28 = vld [vmem:[#allocation86_spill] sm:$0xff] }
 0x574   :  { %6930 = vmatpush.msra.mxu1 %v18450_v51  ;;  %6899 = vmatpush.msra.mxu0 %v18459_v6  ;;  %v18464_v6 = vld [vmem:[#allocation97_spill] sm:$0xff] }
 0x575   :  { %6874 = vmatpush.msrb.mxu3 %v18454_v32 }
 0x576   :  { %6932 = vmatpush.msra.mxu1 %v18452_v50  ;;  %6903 = vmatpush.msra.mxu0 %v18460_v30  ;;  %v18466_v30 = vld [vmem:[#allocation83_spill] sm:$0xff] }
 0x577   :  { %6564 = vmatmul.f32.vlgmr.msrb.gmra.mxu2 %v16366_v14  ;;  %6684 = vmatmul.f32.vlgmr.msra.gmra.mxu3 %v16330_v27  ;;  %v18467_v14 = vld [vmem:[#allocation98_spill] sm:$0xff] }
 0x578   :  { %6841 = vmatpush.msrb.mxu2 %v18461_v10  ;;  %6876 = vmatpush.msrb.mxu3 %v18458_v59 }
 0x579   :  { %6934 = vmatpush.msra.mxu1 %v18454_v32  ;;  %6907 = vmatpush.msra.mxu0 %v18462_v28 }
 0x57a   :  { %6844 = vmatpush.msrb.mxu2 %v18463_v62  ;;  %6992 = vmatpush.msra.mxu3 %v18464_v6 }
 0x57b   :  { %6936 = vmatpush.msra.mxu1 %v18458_v59  ;;  %6911 = vmatpush.msra.mxu0 %v18465_v38 }
 0x57c   :  { %6847 = vmatpush.msrb.mxu2 %v18466_v30  ;;  %6998 = vmatpush.msra.mxu3 %v18467_v14  ;;  %v16519_v30 = vld [vmem:[%s17854_s4 + $0x1] ss:$0 sm:$0xff] }
 0x57d   :  { %18469 = vst [vmem:[#allocation74_spill] sm:$0xff] %v16519_v30 }
 0x57e   :  { %6850 = vmatpush.msrb.mxu2 %v18468_v46 }
 0x57f   :  { %6662 = vmatmul.f32.vlgmr.msra.gmra.mxu2 %v16330_v27 }
 0x580   :  { %6961 = vmatpush.msra.mxu2 %v15704_v24 }
 0x582   :  { %6963 = vmatpush.msra.mxu2 %v15712_v1 }
 0x58e   :  { %v5275_v28 = vpop.f32.mrf.mxu0 }
 0x590   :  { %v5300_v62 = vpop.f32.mrf.mxu1 }
 0x592   :  { %v5249_v10 = vpop.f32.mrf.mxu3 }
 0x596   :  { %v5384_v6 = vpop.f32.mrf.mxu0 }
 0x598   :  { %v5425_v32 = vpop.f32.mrf.mxu1 }
 0x59a   :  { %v5218_v59 = vpop.f32.mrf.mxu2  ;;  %v5350_v50 = vpop.f32.mrf.mxu3 }
 0x59b   :  { %v5219_v46 = vadd.f32 %v16519_v30, %v5218_v59 }
 0x59d   :  { %v5250_v14 = vadd.f32 %v5249_v10, %v5219_v46 }
 0x59e   :  { %v5515_v27 = vpop.f32.mrf.mxu0 }
 0x59f   :  { %v5276_v38 = vadd.f32 %v5275_v28, %v5250_v14  ;;  %v5426_v14 = vadd.f32 %v5425_v32, %v5384_v6 }
 0x5a0   :  { %v5540_v51 = vpop.f32.mrf.mxu1 }
 0x5a1   :  { %v5301_v52 = vadd.f32 %v5300_v62, %v5276_v38 }
 0x5a2   :  { %v5327_v33 = vpop.f32.mrf.mxu2  ;;  %v5482_v0 = vpop.f32.mrf.mxu3 }
 0x5a3   :  { %v5328_v40 = vadd.f32 %v5327_v33, %v5301_v52 }
 0x5a5   :  { %v5351_v23 = vadd.f32 %v5350_v50, %v5328_v40 }
 0x5a6   :  { %v5619_v61 = vpop.f32.mrf.mxu0 }
 0x5a7   :  { %14776 = vst.msk [vmem:[%s17855_s5 + $0x10] sm:$0x1f] %vm1849_vm1, %v5351_v23 }
 0x5a8   :  { %v5643_v54 = vpop.f32.mrf.mxu1 }
 0x5aa   :  { %v5455_v63 = vpop.f32.mrf.mxu2  ;;  %v5595_v39 = vpop.f32.mrf.mxu3 }
 0x5ab   :  { %v5456_v52 = vadd.f32 %v5455_v63, %v5426_v14 }
 0x5ad   :  { %v5483_v50 = vadd.f32 %v5482_v0, %v5456_v52 }
 0x5ae   :  { %v5719_v56 = vpop.f32.mrf.mxu0 }
 0x5af   :  { %v5516_v26 = vadd.f32 %v5515_v27, %v5483_v50 }
 0x5b0   :  { %v5760_v59 = vpop.f32.mrf.mxu1 }
 0x5b1   :  { %v5761_v40 = vadd.f32 %v5760_v59, %v5719_v56  ;;  %v5541_v17 = vadd.f32 %v5540_v51, %v5516_v26 }
 0x5b2   :  { %v5569_v46 = vpop.f32.mrf.mxu2  ;;  %v5689_v10 = vpop.f32.mrf.mxu3 }
 0x5b3   :  { %v5570_v9 = vadd.f32 %v5569_v46, %v5541_v17 }
 0x5b5   :  { %v5596_v16 = vadd.f32 %v5595_v39, %v5570_v9 }
 0x5b6   :  { %v5850_v28 = vpop.f32.mrf.mxu0 }
 0x5b7   :  { %v5620_v59 = vadd.f32 %v5619_v61, %v5596_v16 }
 0x5b8   :  { %v5875_v38 = vpop.f32.mrf.mxu1 }
 0x5b9   :  { %v5644_v27 = vadd.f32 %v5643_v54, %v5620_v59 }
 0x5ba   :  { %v5667_v62 = vpop.f32.mrf.mxu2  ;;  %v5817_v30 = vpop.f32.mrf.mxu3 }
 0x5bb   :  { %v5668_v26 = vadd.f32 %v5667_v62, %v5644_v27 }
 0x5bd   :  { %v5690_v51 = vadd.f32 %v5689_v10, %v5668_v26 }
 0x5be   :  { %v5951_v33 = vpop.f32.mrf.mxu0 }
 0x5c0   :  { %v5975_v55 = vpop.f32.mrf.mxu1 }
 0x5c2   :  { %v5790_v41 = vpop.f32.mrf.mxu2  ;;  %v5927_v44 = vpop.f32.mrf.mxu3 }
 0x5c3   :  { %v5791_v23 = vadd.f32 %v5790_v41, %v5761_v40 }
 0x5c5   :  { %v5818_v45 = vadd.f32 %v5817_v30, %v5791_v23 }
 0x5c6   :  { %v6051_v32 = vpop.f32.mrf.mxu0 }
 0x5c7   :  { %v5851_v2 = vadd.f32 %v5850_v28, %v5818_v45 }
 0x5c8   :  { %v6092_v13 = vpop.f32.mrf.mxu1 }
 0x5c9   :  { %v5876_v29 = vadd.f32 %v5875_v38, %v5851_v2  ;;  %v6093_v28 = vadd.f32 %v6092_v13, %v6051_v32 }
 0x5ca   :  { %v5901_v42 = vpop.f32.mrf.mxu2  ;;  %v6021_v15 = vpop.f32.mrf.mxu3 }
 0x5cb   :  { %v5902_v6 = vadd.f32 %v5901_v42, %v5876_v29 }
 0x5cd   :  { %v5928_v63 = vadd.f32 %v5927_v44, %v5902_v6  ;;  %v5692_v44 = vadd.f32 %v16237_v43, %v5690_v51 }
 0x5ce   :  { %v6182_v52 = vpop.f32.mrf.mxu0 }
 0x5cf   :  { %v5952_v14 = vadd.f32 %v5951_v33, %v5928_v63  ;;  %v14779_v54 = vmul.f32 -1.442695, %v5692_v44 }
 0x5d0   :  { %v6207_v41 = vpop.f32.mrf.mxu1 }
 0x5d1   :  { %v5976_v50 = vadd.f32 %v5975_v55, %v5952_v14  ;;  %14871 = vpow2.f32 %v14779_v54 }
 0x5d2   :  { %v5999_v0 = vpop.f32.mrf.mxu2  ;;  %v6149_v56 = vpop.f32.mrf.mxu3 }
 0x5d3   :  { %v6000_v45 = vadd.f32 %v5999_v0, %v5976_v50 }
 0x5d5   :  { %v6022_v17 = vadd.f32 %v6021_v15, %v6000_v45 }
 0x5d6   :  { %v6283_v46 = vpop.f32.mrf.mxu0 }
 0x5d7   :  { %v6024_v16 = vadd.f32 %v16243_v7, %v6022_v17  ;;  %v14872_v33 = vpop.eup %14871 }
 0x5d8   :  { %v6307_v29 = vpop.f32.mrf.mxu1  ;;  %v6692_v0 = vadd.f32 1.0, %v14872_v33 }
 0x5d9   :  { %v14780_v38 = vmul.f32 -1.442695, %v6024_v16 }
 0x5da   :  { %v6122_v30 = vpop.f32.mrf.mxu2  ;;  %v6259_v2 = vpop.f32.mrf.mxu3  ;;  %vm6698_vm9 = vweird.f32 %v6692_v0 }
 0x5db   :  { %v6123_v42 = vadd.f32 %v6122_v30, %v6093_v28  ;;  %14873 = vpow2.f32 %v14780_v38 }
 0x5dc   :  { %14875 = vrcp.f32 %v6692_v0 }
 0x5dd   :  { %v6150_v39 = vadd.f32 %v6149_v56, %v6123_v42 }
 0x5de   :  { %v6383_v40 = vpop.f32.mrf.mxu0 }
 0x5df   :  { %v6183_v55 = vadd.f32 %v6182_v52, %v6150_v39 }
 0x5e0   :  { %v6424_v10 = vpop.f32.mrf.mxu1 }
 0x5e1   :  { %v6208_v13 = vadd.f32 %v6207_v41, %v6183_v55  ;;  %v6425_v23 = vadd.f32 %v6424_v10, %v6383_v40  ;;  %v14874_v6 = vpop.eup %14873 }
 0x5e2   :  { %v6233_v9 = vpop.f32.mrf.mxu2  ;;  %v6353_v61 = vpop.f32.mrf.mxu3  ;;  %v6711_v56 = vadd.f32 1.0, %v14874_v6 }
 0x5e3   :  { %v6234_v32 = vadd.f32 %v6233_v9, %v6208_v13  ;;  %v14876_v42 = vpop.eup %14875 }
 0x5e4   :  { %14877 = vrcp.f32 %v6711_v56  ;;  %vm6699_vm7 = vweird.f32 %v14876_v42  ;;  %vm6717_vm10 = vweird.f32 %v6711_v56 }
 0x5e5   :  { %v6260_v59 = vadd.f32 %v6259_v2, %v6234_v32  ;;  %v6694_v2 = vmul.f32 %v14876_v42, %v6692_v0  ;;  %vm6700_vm11 = vmor %vm6698_vm9, %vm6699_vm7 }
 0x5e6   :  { %v6514_v7 = vpop.f32.mrf.mxu0 }
 0x5e7   :  { %v6284_v30 = vadd.f32 %v6283_v46, %v6260_v59  ;;  %v6695_v46 = vsub.f32 1.0, %v6694_v2  ;;  %v6704_v59 = vand.u32 2147483648, %v6692_v0 }
 0x5e8   :  { %v6539_v27 = vpop.f32.mrf.mxu1 }
 0x5e9   :  { %v6308_v28 = vadd.f32 %v6307_v29, %v6284_v30 }
 0x5ea   :  { %v6331_v62 = vpop.f32.mrf.mxu2  ;;  %v6481_v15 = vpop.f32.mrf.mxu3 }
 0x5eb   :  { %v14878_v44 = vpop.eup %14877  ;;  %v6332_v39 = vadd.f32 %v6331_v62, %v6308_v28 }
 0x5ec   :  { %v6713_v38 = vmul.f32 %v14878_v44, %v6711_v56  ;;  %vm6718_vm8 = vweird.f32 %v14878_v44 }
 0x5ed   :  { %v6354_v13 = vadd.f32 %v6353_v61, %v6332_v39  ;;  %v6702_v61 = vand.u32 2147483647, %v6692_v0  ;;  %vm6719_vm12 = vmor %vm6717_vm10, %vm6718_vm8  ;;  %vm18133_vm10 = vcmask 1042432  }
 0x5ee   :  { %v6615_v51 = vpop.f32.mrf.mxu0  ;;  %v6714_v33 = vsub.f32 1.0, %v6713_v38 }
 0x5ef   :  { %v6356_v29 = vadd.f32 %v16255_v53, %v6354_v13  ;;  %vm6703_vm2 = vcmp.eq.f32.partialorder %v6702_v61, 8.507059e+37 }
 0x5f0   :  { %v6639_v9 = vpop.f32.mrf.mxu1  ;;  %v6715_v6 = vmul.f32 %v14878_v44, %v6714_v33 }
 0x5f2   :  { %v6454_v63 = vpop.f32.mrf.mxu2  ;;  %v6591_v50 = vpop.f32.mrf.mxu3 }
 0x5f3   :  { %v6455_v43 = vadd.f32 %v6454_v63, %v6425_v23  ;;  %v6696_v63 = vmul.f32 %v14876_v42, %v6695_v46 }
 0x5f5   :  { %v6482_v14 = vadd.f32 %v6481_v15, %v6455_v43  ;;  %v6697_v62 = vadd.f32 %v14876_v42, %v6696_v63  ;;  %v6716_v43 = vadd.f32 %v14878_v44, %v6715_v6 }
 0x5f7   :  { %v6515_v52 = vadd.f32 %v6514_v7, %v6482_v14  ;;  %v6723_v7 = vand.u32 2147483648, %v6711_v56  ;;  %v6721_v14 = vand.u32 2147483647, %v6711_v56  ;;  %v6720_v53 = vsel %vm6719_vm12, %v14878_v44, %v6716_v43 }
 0x5f9   :  { %v6540_v26 = vadd.f32 %v6539_v27, %v6515_v52  ;;  %v6724_v30 = vor.u32 1.1754944e-38, %v6723_v7  ;;  %vm6722_vm4 = vcmp.eq.f32.partialorder %v6721_v14, 8.507059e+37 }
 0x5fa   :  { %v6565_v41 = vpop.f32.mrf.mxu2  ;;  %v6685_v40 = vpop.f32.mrf.mxu3 }
 0x5fb   :  { %v6566_v45 = vadd.f32 %v6565_v41, %v6540_v26  ;;  %v6705_v26 = vor.u32 1.1754944e-38, %v6704_v59 }
 0x5fd   :  { %v6592_v17 = vadd.f32 %v6591_v50, %v6566_v45  ;;  %v6725_v45 = vsel %vm6722_vm4, %v6724_v30, %v6720_v53 }
 0x5fe   :  { %v6747_v28 = vmul.f32 %v6725_v45, %v16259_v60 }
 0x5ff   :  { %v6616_v16 = vadd.f32 %v6615_v51, %v6592_v17 }
 0x601   :  { %v6640_v54 = vadd.f32 %v6639_v9, %v6616_v16 }
 0x602   :  { %v6663_v55 = vpop.f32.mrf.mxu2 }
 0x603   :  { %v6664_v10 = vadd.f32 %v6663_v55, %v6640_v54 }
 0x605   :  { %v6686_v15 = vadd.f32 %v6685_v40, %v6664_v10 }
 0x607   :  { %v6688_v23 = vadd.f32 %v16249_v47, %v6686_v15  ;;  %v6701_v47 = vsel %vm6700_vm11, %v14876_v42, %v6697_v62 }
 0x608   :  { %v6706_v41 = vsel %vm6703_vm2, %v6705_v26, %v6701_v47 }
 0x609   :  { %v14781_v32 = vmul.f32 -1.442695, %v6688_v23 }
 0x60b   :  { %14879 = vpow2.f32 %v14781_v32 }
 0x60c   :  { %14881 = vtanh.f32 %v6356_v29 }
 0x611   :  { %v14880_v27 = vpop.eup %14879 }
 0x612   :  { %v6731_v52 = vadd.f32 1.0, %v14880_v27  ;;  %v14882_v50 = vpop.eup %14881 }
 0x613   :  { %v6748_v51 = vmul.f32 %v14882_v50, %v6706_v41  ;;  %v14785_v41 = vld [vmem:[%s17850_s0 + $0x20] sm:$0x1f] }
 0x614   :  { %14883 = vrcp.f32 %v6731_v52  ;;  %v6743_v42 = vand.u32 2147483648, %v6731_v52  ;;  %v6741_v16 = vand.u32 2147483647, %v6731_v52  ;;  %vm6737_vm7 = vweird.f32 %v6731_v52 }
 0x615   :  { %v16531_v9 = vadd.f32 %v6748_v51, %v6747_v28  ;;  %v7296_v51 = vsel %vm267_vm0, %v14785_v41, 0  ;;  %v18499_v41 = vld [vmem:[#allocation29_spill] sm:$0xff] }
 0x616   :  { %v6744_v54 = vor.u32 1.1754944e-38, %v6743_v42  ;;  %vm6742_vm9 = vcmp.eq.f32.partialorder %v6741_v16, 8.507059e+37  ;;  %v16597_v28 = vand.u32 4294901760, %v7296_v51  ;;  %v18474_v16 = vld [vmem:[#allocation14_spill] sm:$0xff] }
 0x617   :  { %14885 = vtanh.f32 %v16531_v9 }
 0x618   :  { %v16607_v42 = vsub.f32 %v7296_v51, %v16597_v28  ;;  %v18501_v51 = vld [vmem:[#allocation51_spill] sm:$0xff] }
 0x61a   :  { %v14884_v17 = vpop.eup %14883 }
 0x61b   :  { %v6733_v0 = vmul.f32 %v14884_v17, %v6731_v52  ;;  %vm6738_vm5 = vweird.f32 %v14884_v17 }
 0x61c   :  { %vm6739_vm8 = vmor %vm6737_vm7, %vm6738_vm5 }
 0x61d   :  { %v6734_v56 = vsub.f32 1.0, %v6733_v0  ;;  %v14886_v38 = vpop.eup %14885  ;;  %v18471_v0 = vld [vmem:[#allocation6_spill] sm:$0xff] }
 0x61f   :  { %v6735_v44 = vmul.f32 %v14884_v17, %v6734_v56  ;;  %v18472_v56 = vld [vmem:[#allocation5_spill] sm:$0xff] }
 0x621   :  { %v6736_v39 = vadd.f32 %v14884_v17, %v6735_v44  ;;  %v18473_v44 = vld [vmem:[#allocation7_spill] sm:$0xff] }
 0x623   :  { %v6740_v2 = vsel %vm6739_vm8, %v14884_v17, %v6736_v39  ;;  %v18470_v17 = vld [vmem:[#allocation8_spill] sm:$0xff]  ;;  %v16616_v39 = vand.u32 4294901760, %v16607_v42 }
 0x624   :  { %v6745_v55 = vsel %vm6742_vm9, %v6744_v54, %v6740_v2  ;;  %v18475_v54 = vld [vmem:[#allocation15_spill] sm:$0xff]  ;;  %v18476_v2 = vld [vmem:[#allocation28_spill] sm:$0xff] }
 0x625   :  { %v6751_v60 = vmul.f32 %v14886_v38, %v6745_v55  ;;  %v18477_v38 = vld [vmem:[#allocation16_spill] sm:$0xff]  ;;  %v18478_v55 = vld [vmem:[#allocation30_spill] sm:$0xff] }
 0x627   :  { %14782 = vst.msk [vmem:[%s17857_s7 + $0x18] sm:$0x1f] %vm1489_vm14, %v6751_v60  ;;  %v6755_v40 = vsel %vm78_vm13, %v6751_v60, 0  ;;  %v14122_v10 = vrot.slane %v6751_v60, 1  ;;  %v7318_v60 = vsub.f32 %v16607_v42, %v16616_v39 }
 0x628   :  { %v16539_v13 = vand.u32 4294901760, %v6755_v40 }
 0x629   :  { %v16543_v15 = vsel %vm18133_vm10, %v16271_v37, %v14122_v10  ;;  %v18480_v10 = vld [vmem:[#allocation19_spill] sm:$0xff] }
 0x62a   :  { %6823 = vmatmul.f32.vlgmr.msrb.gmra.mxu1 %v16539_v13  ;;  %v16547_v46 = vsub.f32 %v6755_v40, %v16539_v13  ;;  %v18479_v40 = vld [vmem:[#allocation9_spill] sm:$0xff] }
 0x62b   :  { %7045 = vmatpush.msrb.mxu1 %v15704_v24 }
 0x62c   :  { %6853 = vmatmul.f32.vlgmr.msrb.gmra.mxu2 %v16547_v46  ;;  %v16552_v33 = vand.u32 4294901760, %v16547_v46 }
 0x62d   :  { %7047 = vmatpush.msrb.mxu1 %v15712_v1  ;;  %7072 = vmatpush.msrb.mxu2 %v15717_v58 }
 0x62e   :  { %6880 = vmatmul.f32.vlgmr.msrb.gmra.mxu3 %v16552_v33  ;;  %v6780_v37 = vsub.f32 %v16547_v46, %v16552_v33 }
 0x62f   :  { %7097 = vmatpush.msrb.mxu3 %v15704_v24  ;;  %7076 = vmatpush.msrb.mxu2 %v18311_v48 }
 0x630   :  { %v16561_v23 = vand.u32 4294901760, %v6780_v37  ;;  %v18481_v37 = vld [vmem:[#allocation31_spill] sm:$0xff] }
 0x631   :  { %7099 = vmatpush.msrb.mxu3 %v15712_v1 }
 0x632   :  { %6782 = vmatmul.f32.vlgmr.msrb.gmra.mxu0 %v16561_v23  ;;  %6938 = vmatmul.f32.vlgmr.msra.gmra.mxu1 %v16539_v13 }
 0x633   :  { %7020 = vmatpush.msrb.mxu0 %v18312_v35  ;;  %7156 = vmatpush.msra.mxu1 %v18313_v57 }
 0x635   :  { %7023 = vmatpush.msrb.mxu0 %v18314_v36  ;;  %7162 = vmatpush.msra.mxu1 %v18315_v49 }
 0x637   :  { %7168 = vmatpush.msra.mxu1 %v18316_v25 }
 0x639   :  { %7174 = vmatpush.msra.mxu1 %v18317_v31 }
 0x63a   :  { %6913 = vmatmul.f32.vlgmr.msra.gmra.mxu0 %v16539_v13 }
 0x63b   :  { %7123 = vmatpush.msra.mxu0 %v15051_v3 }
 0x63d   :  { %7125 = vmatpush.msra.mxu0 %v15053_v4 }
 0x63f   :  { %7127 = vmatpush.msra.mxu0 %v15055_v5 }
 0x641   :  { %7129 = vmatpush.msra.mxu0 %v15063_v8 }
 0x6a7   :  { %v6824_v29 = vpop.f32.mrf.mxu1 }
 0x6af   :  { %v6783_v32 = vpop.f32.mrf.mxu0  ;;  %v6854_v62 = vpop.f32.mrf.mxu2 }
 0x6b0   :  { %v6784_v6 = vadd.f32 %v16308_v21, %v6783_v32  ;;  %v6939_v27 = vpop.f32.mrf.mxu1  ;;  %v16633_v32 = vand.u32 4294901760, %v7318_v60  ;;  %v18502_v60 = vld [vmem:[#allocation41_spill] sm:$0xff] }
 0x6b1   :  { %v6881_v7 = vpop.f32.mrf.mxu3 }
 0x6b2   :  { %v6825_v63 = vadd.f32 %v6824_v29, %v6784_v6  ;;  %v18482_v29 = vld [vmem:[#allocation21_spill] sm:$0xff]  ;;  %v18483_v6 = vld [vmem:[#allocation32_spill] sm:$0xff] }
 0x6b4   :  { %v6855_v43 = vadd.f32 %v6854_v62, %v6825_v63  ;;  %v18484_v63 = vld [vmem:[#allocation23_spill] sm:$0xff]  ;;  %v18485_v62 = vld [vmem:[#allocation26_spill] sm:$0xff] }
 0x6b6   :  { %v6882_v59 = vadd.f32 %v6881_v7, %v6855_v43  ;;  %v18486_v43 = vld [vmem:[#allocation17_spill] sm:$0xff]  ;;  %v18487_v7 = vld [vmem:[#allocation27_spill] sm:$0xff] }
 0x6b7   :  { %v6914_v61 = vpop.f32.mrf.mxu0 }
 0x6b8   :  { %v6915_v14 = vadd.f32 %v6914_v61, %v6882_v59  ;;  %v18488_v59 = vld [vmem:[#allocation34_spill] sm:$0xff] }
 0x6b9   :  { %v18489_v61 = vld [vmem:[#allocation18_spill] sm:$0xff] }
 0x6ba   :  { %v6940_v47 = vadd.f32 %v6939_v27, %v6915_v14  ;;  %v18490_v14 = vld [vmem:[#allocation25_spill] sm:$0xff]  ;;  %v18491_v27 = vld [vmem:[#allocation22_spill] sm:$0xff] }
 0x6bc   :  { %v6942_v53 = vmax.f32 %v6940_v47, 0.0  ;;  %v18492_v47 = vld [vmem:[#allocation24_spill] sm:$0xff] }
 0x6be   :  { %v6944_v52 = vsel %vm1686_vm15, %v6942_v53, 0  ;;  %v18493_v53 = vld [vmem:[#allocation20_spill] sm:$0xff] }
 0x6bf   :  { %v6964_v50 = vand.u32 4294901760, %v6944_v52 }
 0x6c1   :  { %v6965_v30 = vsub.f32 %v6944_v52, %v6964_v50  ;;  %7000 = vmatmul.f32.vlgmr.msra.gmra.mxu3 %v6964_v50  ;;  %v18494_v52 = vld [vmem:[#allocation33_spill] sm:$0xff] }
 0x6c2   :  { %7223 = vmatpush.msra.mxu3 %v15051_v3 }
 0x6c3   :  { %v6966_v26 = vand.u32 4294901760, %v6965_v30  ;;  %7026 = vmatmul.f32.vlgmr.msrb.gmra.mxu0 %v6965_v30 }
 0x6c4   :  { %7225 = vmatpush.msra.mxu3 %v15053_v4  ;;  %7252 = vmatpush.msrb.mxu0 %v15093_v18 }
 0x6c5   :  { %v6967_v21 = vsub.f32 %v6965_v30, %v6966_v26  ;;  %7051 = vmatmul.f32.vlgmr.msrb.gmra.mxu1 %v6966_v26  ;;  %v18496_v30 = vld [vmem:[#allocation49_spill] sm:$0xff] }
 0x6c6   :  { %7227 = vmatpush.msra.mxu3 %v15055_v5  ;;  %7256 = vmatpush.msrb.mxu0 %v15096_v19  ;;  %v18497_v26 = vld [vmem:[#allocation37_spill] sm:$0xff] }
 0x6c7   :  { %v6968_v45 = vand.u32 4294901760, %v6967_v21  ;;  %7283 = vmatpush.msrb.mxu1 %v15051_v3  ;;  %v18498_v21 = vld [vmem:[#allocation50_spill] sm:$0xff] }
 0x6c8   :  { %7229 = vmatpush.msra.mxu3 %v15063_v8  ;;  %7260 = vmatpush.msrb.mxu0 %v15099_v20 }
 0x6c9   :  { %6969 = vmatmul.f32.vlgmr.msra.gmra.mxu2 %v6968_v45  ;;  %7101 = vmatmul.f32.vlgmr.msrb.gmra.mxu3 %v6964_v50  ;;  %v18500_v45 = vld [vmem:[#allocation39_spill] sm:$0xff] }
 0x6ca   :  { %7285 = vmatpush.msrb.mxu1 %v15053_v4  ;;  %7194 = vmatpush.msra.mxu2 %v15071_v11 }
 0x6cb   :  { %7135 = vmatmul.f32.vlgmr.msra.gmra.mxu0 %v16561_v23  ;;  %7344 = vmatpush.msrb.mxu3 %v15138_v34 }
 0x6cc   :  { %7264 = vmatpush.msrb.mxu0 %v15106_v22  ;;  %7287 = vmatpush.msrb.mxu1 %v15055_v5 }
 0x6cd   :  { %7176 = vmatmul.f32.vlgmr.msra.gmra.mxu1 %v16539_v13  ;;  %7197 = vmatpush.msra.mxu2 %v15075_v12 }
 0x6ce   :  { %7289 = vmatpush.msrb.mxu1 %v15063_v8  ;;  %7367 = vmatpush.msra.mxu0 %v18470_v17 }
 0x6cf   :  { %7200 = vmatpush.msra.mxu2 %v18471_v0 }
 0x6d0   :  { %7390 = vmatpush.msra.mxu1 %v18472_v56 }
 0x6d1   :  { %7078 = vmatmul.f32.vlgmr.msrb.gmra.mxu2 %v6964_v50  ;;  %7233 = vmatmul.f32.vlgmr.msra.gmra.mxu3 %v16552_v33  ;;  %v18495_v50 = vld [vmem:[#allocation35_spill] sm:$0xff] }
 0x6d2   :  { %7203 = vmatpush.msra.mxu2 %v18473_v44  ;;  %7438 = vmatpush.msra.mxu3 %v18472_v56 }
 0x6d3   :  { %7266 = vmatmul.f32.vlgmr.msrb.gmra.mxu0 %v16539_v13 }
 0x6d4   :  { %7314 = vmatpush.msrb.mxu2 %v18472_v56  ;;  %7458 = vmatpush.msrb.mxu0 %v18474_v16 }
 0x6d5   :  { %7291 = vmatmul.f32.vlgmr.msrb.gmra.mxu1 %v16539_v13 }
 0x6d6   :  { %7460 = vmatpush.msrb.mxu0 %v18475_v54  ;;  %7491 = vmatpush.msrb.mxu1 %v18476_v2 }
 0x6d8   :  { %7462 = vmatpush.msrb.mxu0 %v18477_v38  ;;  %7497 = vmatpush.msrb.mxu1 %v18478_v55 }
 0x6d9   :  { %7206 = vmatmul.f32.vlgmr.msra.gmra.mxu2 %v16547_v46  ;;  %7346 = vmatmul.f32.vlgmr.msrb.gmra.mxu3 %v16597_v28 }
 0x6da   :  { %7416 = vmatpush.msra.mxu2 %v18479_v40  ;;  %7464 = vmatpush.msrb.mxu0 %v18480_v10 }
 0x6db   :  { %7370 = vmatmul.f32.vlgmr.msra.gmra.mxu0 %v16607_v42  ;;  %7503 = vmatpush.msrb.mxu1 %v18481_v37 }
 0x6dc   :  { %7558 = vmatpush.msrb.mxu3 %v18474_v16  ;;  %7587 = vmatpush.msra.mxu0 %v18482_v29 }
 0x6dd   :  { %7394 = vmatmul.f32.vlgmr.msra.gmra.mxu1 %v16616_v39 }
 0x6de   :  { %7509 = vmatpush.msrb.mxu1 %v18483_v6  ;;  %7560 = vmatpush.msrb.mxu3 %v18475_v54 }
 0x6df   :  { %7591 = vmatpush.msra.mxu0 %v18484_v63 }
 0x6e0   :  { %7618 = vmatpush.msra.mxu1 %v18474_v16  ;;  %7562 = vmatpush.msrb.mxu3 %v18477_v38 }
 0x6e1   :  { %7320 = vmatmul.f32.vlgmr.msrb.gmra.mxu2 %v16633_v32  ;;  %7440 = vmatmul.f32.vlgmr.msra.gmra.mxu3 %v16597_v28 }
 0x6e2   :  { %7564 = vmatpush.msrb.mxu3 %v18480_v10  ;;  %7595 = vmatpush.msra.mxu0 %v18485_v62 }
 0x6e3   :  { %7470 = vmatmul.f32.vlgmr.msrb.gmra.mxu0 %v16561_v23  ;;  %7620 = vmatpush.msra.mxu1 %v18475_v54 }
 0x6e4   :  { %7529 = vmatpush.msrb.mxu2 %v18486_v43  ;;  %7599 = vmatpush.msra.mxu0 %v18487_v7 }
 0x6e5   :  { %7511 = vmatmul.f32.vlgmr.msrb.gmra.mxu1 %v16539_v13  ;;  %7676 = vmatpush.msra.mxu3 %v18488_v59 }
 0x6e6   :  { %7622 = vmatpush.msra.mxu1 %v18477_v38  ;;  %7532 = vmatpush.msrb.mxu2 %v18489_v61 }
 0x6e7   :  { %7699 = vmatpush.msrb.mxu0 %v18490_v14 }
 0x6e8   :  { %7624 = vmatpush.msra.mxu1 %v18480_v10  ;;  %7535 = vmatpush.msrb.mxu2 %v18491_v27 }
 0x6e9   :  { %7418 = vmatmul.f32.vlgmr.msra.gmra.mxu2 %v16597_v28  ;;  %7568 = vmatmul.f32.vlgmr.msrb.gmra.mxu3 %v16552_v33 }
 0x6ea   :  { %7538 = vmatpush.msrb.mxu2 %v18492_v47  ;;  %7722 = vmatpush.msrb.mxu1 %v18493_v53 }
 0x6eb   :  { %7601 = vmatmul.f32.vlgmr.msra.gmra.mxu0 %v16539_v13  ;;  %7770 = vmatpush.msrb.mxu3 %v18493_v53 }
 0x6ec   :  { %7646 = vmatpush.msra.mxu2 %v18493_v53  ;;  %7790 = vmatpush.msra.mxu0 %v18494_v52 }
 0x6ed   :  { %7626 = vmatmul.f32.vlgmr.msra.gmra.mxu1 %v16539_v13 }
 0x6ee   :  { %7792 = vmatpush.msra.mxu0 %v18495_v50  ;;  %7823 = vmatpush.msra.mxu1 %v18496_v30  ;;  %v18503_v30 = vld [vmem:[#allocation52_spill] sm:$0xff] }
 0x6f0   :  { %7794 = vmatpush.msra.mxu0 %v18497_v26  ;;  %7829 = vmatpush.msra.mxu1 %v18498_v21  ;;  %v18504_v21 = vld [vmem:[#allocation43_spill] sm:$0xff] }
 0x6f1   :  { %7541 = vmatmul.f32.vlgmr.msrb.gmra.mxu2 %v16547_v46  ;;  %7678 = vmatmul.f32.vlgmr.msra.gmra.mxu3 %v16597_v28 }
 0x6f2   :  { %7748 = vmatpush.msrb.mxu2 %v18499_v41  ;;  %7796 = vmatpush.msra.mxu0 %v18500_v45  ;;  %v18509_v41 = vld [vmem:[#allocation38_spill] sm:$0xff] }
 0x6f3   :  { %7702 = vmatmul.f32.vlgmr.msrb.gmra.mxu0 %v16607_v42  ;;  %7835 = vmatpush.msra.mxu1 %v18501_v51  ;;  %v18505_v51 = vld [vmem:[#allocation46_spill] sm:$0xff] }
 0x6f4   :  { %7890 = vmatpush.msra.mxu3 %v18494_v52  ;;  %7919 = vmatpush.msrb.mxu0 %v18502_v60  ;;  %v18507_v60 = vld [vmem:[#allocation47_spill] sm:$0xff] }
 0x6f5   :  { %7726 = vmatmul.f32.vlgmr.msrb.gmra.mxu1 %v16616_v39 }
 0x6f6   :  { %7841 = vmatpush.msra.mxu1 %v18503_v30  ;;  %7892 = vmatpush.msra.mxu3 %v18495_v50  ;;  %v18506_v30 = vld [vmem:[#allocation36_spill] sm:$0xff] }
 0x6f7   :  { %7923 = vmatpush.msrb.mxu0 %v18504_v21  ;;  %v18508_v21 = vld [vmem:[#allocation53_spill] sm:$0xff] }
 0x6f8   :  { %7950 = vmatpush.msrb.mxu1 %v18494_v52  ;;  %7894 = vmatpush.msra.mxu3 %v18497_v26  ;;  %v18510_v52 = vld [vmem:[#allocation45_spill] sm:$0xff] }
 0x6f9   :  { %7652 = vmatmul.f32.vlgmr.msra.gmra.mxu2 %v16633_v32  ;;  %7772 = vmatmul.f32.vlgmr.msrb.gmra.mxu3 %v16597_v28 }
 0x6fa   :  { %7896 = vmatpush.msra.mxu3 %v18500_v45  ;;  %7927 = vmatpush.msrb.mxu0 %v18505_v51  ;;  %v18511_v51 = vld [vmem:[#allocation42_spill] sm:$0xff] }
 0x6fb   :  { %7802 = vmatmul.f32.vlgmr.msra.gmra.mxu0 %v16561_v23  ;;  %7952 = vmatpush.msrb.mxu1 %v18495_v50  ;;  %v18522_v50 = vld [vmem:[#allocation61_spill] sm:$0xff] }
 0x6fc   :  { %7861 = vmatpush.msra.mxu2 %v18506_v30  ;;  %7931 = vmatpush.msrb.mxu0 %v18507_v60  ;;  %v18512_v30 = vld [vmem:[#allocation44_spill] sm:$0xff] }
 0x6fd   :  { %7843 = vmatmul.f32.vlgmr.msra.gmra.mxu1 %v16539_v13  ;;  %8008 = vmatpush.msrb.mxu3 %v18508_v21  ;;  %v18513_v60 = vld [vmem:[#allocation40_spill] sm:$0xff]  ;;  %v18514_v21 = vld [vmem:[#allocation54_spill] sm:$0xff] }
 0x6fe   :  { %7954 = vmatpush.msrb.mxu1 %v18497_v26  ;;  %7864 = vmatpush.msra.mxu2 %v18509_v41  ;;  %v18517_v41 = vld [vmem:[#allocation57_spill] sm:$0xff]  ;;  %v18520_v26 = vld [vmem:[#allocation59_spill] sm:$0xff] }
 0x6ff   :  { %8031 = vmatpush.msra.mxu0 %v18510_v52  ;;  %v18515_v52 = vld [vmem:[#allocation55_spill] sm:$0xff] }
 0x700   :  { %7956 = vmatpush.msrb.mxu1 %v18500_v45  ;;  %7867 = vmatpush.msra.mxu2 %v18511_v51  ;;  %v18516_v51 = vld [vmem:[#allocation69_spill] sm:$0xff]  ;;  %v18518_v45 = vld [vmem:[#allocation70_spill] sm:$0xff] }
 0x701   :  { %7750 = vmatmul.f32.vlgmr.msrb.gmra.mxu2 %v16597_v28  ;;  %7900 = vmatmul.f32.vlgmr.msra.gmra.mxu3 %v16552_v33 }
 0x702   :  { %7870 = vmatpush.msra.mxu2 %v18512_v30  ;;  %8054 = vmatpush.msra.mxu1 %v18513_v60  ;;  %v18519_v30 = vld [vmem:[#allocation48_spill] sm:$0xff] }
 0x703   :  { %7933 = vmatmul.f32.vlgmr.msrb.gmra.mxu0 %v16539_v13  ;;  %8102 = vmatpush.msra.mxu3 %v18513_v60 }
 0x704   :  { %7978 = vmatpush.msrb.mxu2 %v18513_v60  ;;  %8122 = vmatpush.msrb.mxu0 %v18514_v21  ;;  %v18521_v60 = vld [vmem:[#allocation71_spill] sm:$0xff] }
 0x705   :  { %7958 = vmatmul.f32.vlgmr.msrb.gmra.mxu1 %v16539_v13 }
 0x706   :  { %8124 = vmatpush.msrb.mxu0 %v18515_v52  ;;  %8155 = vmatpush.msrb.mxu1 %v18516_v51  ;;  %v18523_v51 = vld [vmem:[#allocation72_spill] sm:$0xff] }
 0x708   :  { %8126 = vmatpush.msrb.mxu0 %v18517_v41  ;;  %8161 = vmatpush.msrb.mxu1 %v18518_v45  ;;  %v18524_v45 = vld [vmem:[#allocation63_spill] sm:$0xff] }
 0x709   :  { %7873 = vmatmul.f32.vlgmr.msra.gmra.mxu2 %v16547_v46  ;;  %8010 = vmatmul.f32.vlgmr.msrb.gmra.mxu3 %v16597_v28 }
 0x70a   :  { %8080 = vmatpush.msra.mxu2 %v18519_v30  ;;  %8128 = vmatpush.msrb.mxu0 %v18520_v26  ;;  %v18529_v30 = vld [vmem:[#allocation58_spill] sm:$0xff] }
 0x70b   :  { %8034 = vmatmul.f32.vlgmr.msra.gmra.mxu0 %v16607_v42  ;;  %8167 = vmatpush.msrb.mxu1 %v18521_v60  ;;  %v18525_v60 = vld [vmem:[#allocation66_spill] sm:$0xff] }
 0x70c   :  { %8222 = vmatpush.msrb.mxu3 %v18514_v21  ;;  %8251 = vmatpush.msra.mxu0 %v18522_v50  ;;  %v18527_v50 = vld [vmem:[#allocation67_spill] sm:$0xff] }
 0x70d   :  { %8058 = vmatmul.f32.vlgmr.msra.gmra.mxu1 %v16616_v39 }
 0x70e   :  { %8173 = vmatpush.msrb.mxu1 %v18523_v51  ;;  %8224 = vmatpush.msrb.mxu3 %v18515_v52  ;;  %v18526_v51 = vld [vmem:[#allocation56_spill] sm:$0xff] }
 0x70f   :  { %8255 = vmatpush.msra.mxu0 %v18524_v45  ;;  %v18528_v45 = vld [vmem:[#allocation73_spill] sm:$0xff] }
 0x710   :  { %8282 = vmatpush.msra.mxu1 %v18514_v21  ;;  %8226 = vmatpush.msrb.mxu3 %v18517_v41  ;;  %v18530_v21 = vld [vmem:[#allocation65_spill] sm:$0xff] }
 0x711   :  { %7984 = vmatmul.f32.vlgmr.msrb.gmra.mxu2 %v16633_v32  ;;  %8104 = vmatmul.f32.vlgmr.msra.gmra.mxu3 %v16597_v28 }
 0x712   :  { %8228 = vmatpush.msrb.mxu3 %v18520_v26  ;;  %8259 = vmatpush.msra.mxu0 %v18525_v60  ;;  %v18531_v60 = vld [vmem:[#allocation62_spill] sm:$0xff] }
 0x713   :  { %8134 = vmatmul.f32.vlgmr.msrb.gmra.mxu0 %v16561_v23  ;;  %8284 = vmatpush.msra.mxu1 %v18515_v52  ;;  %v18532_v23 = vld [vmem:[#allocation64_spill] sm:$0xff] }
 0x714   :  { %8193 = vmatpush.msrb.mxu2 %v18526_v51  ;;  %8263 = vmatpush.msra.mxu0 %v18527_v50  ;;  %v18533_v50 = vld [vmem:[#allocation60_spill] sm:$0xff] }
 0x715   :  { %8175 = vmatmul.f32.vlgmr.msrb.gmra.mxu1 %v16539_v13  ;;  %8340 = vmatpush.msra.mxu3 %v18528_v45  ;;  %v18537_v45 = vld [vmem:[#allocation89_spill] sm:$0xff]  ;;  %v18540_v51 = vld [vmem:[#allocation92_spill] sm:$0xff] }
 0x716   :  { %8286 = vmatpush.msra.mxu1 %v18517_v41  ;;  %8196 = vmatpush.msrb.mxu2 %v18529_v30  ;;  %v18534_v30 = vld [vmem:[#allocation76_spill] sm:$0xff] }
 0x717   :  { %8363 = vmatpush.msrb.mxu0 %v18530_v21  ;;  %v18535_v21 = vld [vmem:[#allocation85_spill] sm:$0xff] }
 0x718   :  { %8288 = vmatpush.msra.mxu1 %v18520_v26  ;;  %8199 = vmatpush.msrb.mxu2 %v18531_v60  ;;  %v18536_v60 = vld [vmem:[#allocation78_spill] sm:$0xff] }
 0x719   :  { %8082 = vmatmul.f32.vlgmr.msra.gmra.mxu2 %v16597_v28  ;;  %8232 = vmatmul.f32.vlgmr.msrb.gmra.mxu3 %v16552_v33  ;;  %v18538_v33 = vld [vmem:[#allocation81_spill] sm:$0xff] }
 0x71a   :  { %8202 = vmatpush.msrb.mxu2 %v18532_v23  ;;  %8434 = vmatpush.msrb.mxu3 %v18533_v50  ;;  %v18539_v23 = vld [vmem:[#allocation68_spill] sm:$0xff] }
 0x71b   :  { %8265 = vmatmul.f32.vlgmr.msra.gmra.mxu0 %v16539_v13  ;;  %8386 = vmatpush.msrb.mxu1 %v18533_v50 }
 0x71c   :  { %8310 = vmatpush.msra.mxu2 %v18533_v50  ;;  %8522 = vmatpush.msra.mxu0 %v18534_v30 }
 0x71d   :  { %8290 = vmatmul.f32.vlgmr.msra.gmra.mxu1 %v16539_v13  ;;  %v18541_v13 = vld [vmem:[#allocation93_spill] sm:$0xff] }
 0x71e   :  { %8555 = vmatpush.msra.mxu1 %v18535_v21  ;;  %8524 = vmatpush.msra.mxu0 %v18536_v60  ;;  %v18542_v21 = vld [vmem:[#allocation84_spill] sm:$0xff] }
 0x720   :  { %8561 = vmatpush.msra.mxu1 %v18537_v45  ;;  %8526 = vmatpush.msra.mxu0 %v18538_v33  ;;  %v18552_v45 = vld [vmem:[#allocation87_spill] sm:$0xff] }
 0x721   :  { %8205 = vmatmul.f32.vlgmr.msrb.gmra.mxu2 %v16547_v46  ;;  %8342 = vmatmul.f32.vlgmr.msra.gmra.mxu3 %v16597_v28  ;;  %v18543_v46 = vld [vmem:[#allocation79_spill] sm:$0xff] }
 0x722   :  { %8412 = vmatpush.msrb.mxu2 %v18539_v23  ;;  %8567 = vmatpush.msra.mxu1 %v18540_v51  ;;  %v18544_v51 = vld [vmem:[#allocation82_spill] sm:$0xff] }
 0x723   :  { %8366 = vmatmul.f32.vlgmr.msrb.gmra.mxu0 %v16607_v42  ;;  %8622 = vmatpush.msra.mxu3 %v18534_v30  ;;  %v18545_v42 = vld [vmem:[#allocation77_spill] sm:$0xff]  ;;  %v18549_v23 = vld [vmem:[#allocation90_spill] sm:$0xff] }
 0x724   :  { %8573 = vmatpush.msra.mxu1 %v18541_v13  ;;  %8528 = vmatpush.msra.mxu0 %v18542_v21  ;;  %v18547_v13 = vld [vmem:[#allocation80_spill] sm:$0xff] }
 0x725   :  { %8390 = vmatmul.f32.vlgmr.msrb.gmra.mxu1 %v16616_v39  ;;  %8624 = vmatpush.msra.mxu3 %v18536_v60  ;;  %v18546_v39 = vld [vmem:[#allocation86_spill] sm:$0xff] }
 0x726   :  { %8682 = vmatpush.msrb.mxu1 %v18534_v30  ;;  %8651 = vmatpush.msrb.mxu0 %v18543_v46  ;;  %v18548_v46 = vld [vmem:[#allocation97_spill] sm:$0xff] }
 0x727   :  { %8626 = vmatpush.msra.mxu3 %v18538_v33 }
 0x728   :  { %8684 = vmatpush.msrb.mxu1 %v18536_v60  ;;  %8655 = vmatpush.msrb.mxu0 %v18544_v51  ;;  %v18550_v51 = vld [vmem:[#allocation83_spill] sm:$0xff] }
 0x729   :  { %8316 = vmatmul.f32.vlgmr.msra.gmra.mxu2 %v16633_v32  ;;  %8436 = vmatmul.f32.vlgmr.msrb.gmra.mxu3 %v16597_v28  ;;  %v18551_v32 = vld [vmem:[#allocation98_spill] sm:$0xff] }
 0x72a   :  { %8593 = vmatpush.msra.mxu2 %v18545_v42  ;;  %8628 = vmatpush.msra.mxu3 %v18542_v21 }
 0x72b   :  { %8686 = vmatpush.msrb.mxu1 %v18538_v33  ;;  %8659 = vmatpush.msrb.mxu0 %v18546_v39 }
 0x72c   :  { %8596 = vmatpush.msra.mxu2 %v18547_v13  ;;  %8744 = vmatpush.msrb.mxu3 %v18548_v46 }
 0x72d   :  { %8688 = vmatpush.msrb.mxu1 %v18542_v21  ;;  %8663 = vmatpush.msrb.mxu0 %v18549_v23  ;;  %v18553_v23 = vld [vmem:[#allocation74_spill] sm:$0xff] }
 0x72e   :  { %8599 = vmatpush.msra.mxu2 %v18550_v51  ;;  %8750 = vmatpush.msrb.mxu3 %v18551_v32 }
 0x730   :  { %8602 = vmatpush.msra.mxu2 %v18552_v45 }
 0x731   :  { %8414 = vmatmul.f32.vlgmr.msrb.gmra.mxu2 %v16597_v28 }
 0x732   :  { %8713 = vmatpush.msrb.mxu2 %v15704_v24 }
 0x734   :  { %8715 = vmatpush.msrb.mxu2 %v15712_v1 }
 0x740   :  { %v7027_v39 = vpop.f32.mrf.mxu0 }
 0x742   :  { %v7052_v13 = vpop.f32.mrf.mxu1 }
 0x744   :  { %v7001_v42 = vpop.f32.mrf.mxu3 }
 0x748   :  { %v7136_v46 = vpop.f32.mrf.mxu0 }
 0x74a   :  { %v7177_v33 = vpop.f32.mrf.mxu1 }
 0x74c   :  { %v6970_v21 = vpop.f32.mrf.mxu2  ;;  %v7102_v60 = vpop.f32.mrf.mxu3 }
 0x74d   :  { %v6971_v30 = vadd.f32 %v18553_v23, %v6970_v21 }
 0x74f   :  { %v7002_v51 = vadd.f32 %v7001_v42, %v6971_v30  ;;  %v7178_v42 = vadd.f32 %v7177_v33, %v7136_v46 }
 0x750   :  { %v7267_v50 = vpop.f32.mrf.mxu0 }
 0x751   :  { %v7028_v32 = vadd.f32 %v7027_v39, %v7002_v51 }
 0x752   :  { %v7292_v26 = vpop.f32.mrf.mxu1 }
 0x753   :  { %v7053_v45 = vadd.f32 %v7052_v13, %v7028_v32 }
 0x754   :  { %v7079_v41 = vpop.f32.mrf.mxu2  ;;  %v7234_v28 = vpop.f32.mrf.mxu3 }
 0x755   :  { %v7080_v52 = vadd.f32 %v7079_v41, %v7053_v45 }
 0x757   :  { %v7103_v53 = vadd.f32 %v7102_v60, %v7080_v52 }
 0x758   :  { %v7371_v47 = vpop.f32.mrf.mxu0 }
 0x759   :  { %14783 = vst.msk [vmem:[%s17855_s5 + $0x18] sm:$0x1f] %vm1849_vm1, %v7103_v53 }
 0x75a   :  { %v7395_v27 = vpop.f32.mrf.mxu1 }
 0x75c   :  { %v7207_v14 = vpop.f32.mrf.mxu2  ;;  %v7347_v61 = vpop.f32.mrf.mxu3 }
 0x75d   :  { %v7208_v41 = vadd.f32 %v7207_v14, %v7178_v42 }
 0x75f   :  { %v7235_v52 = vadd.f32 %v7234_v28, %v7208_v41 }
 0x760   :  { %v7471_v59 = vpop.f32.mrf.mxu0 }
 0x761   :  { %v7268_v62 = vadd.f32 %v7267_v50, %v7235_v52 }
 0x762   :  { %v7512_v21 = vpop.f32.mrf.mxu1 }
 0x763   :  { %v7513_v45 = vadd.f32 %v7512_v21, %v7471_v59  ;;  %v7293_v29 = vadd.f32 %v7292_v26, %v7268_v62 }
 0x764   :  { %v7321_v30 = vpop.f32.mrf.mxu2  ;;  %v7441_v23 = vpop.f32.mrf.mxu3 }
 0x765   :  { %v7322_v38 = vadd.f32 %v7321_v30, %v7293_v29 }
 0x767   :  { %v7348_v54 = vadd.f32 %v7347_v61, %v7322_v38 }
 0x768   :  { %v7602_v51 = vpop.f32.mrf.mxu0 }
 0x769   :  { %v7372_v21 = vadd.f32 %v7371_v47, %v7348_v54  ;;  %v16791_v54 = vld [vmem:[%s17852_s2] ss:$0 sm:$0xff] }
 0x76a   :  { %v7627_v13 = vpop.f32.mrf.mxu1 }
 0x76b   :  { %v7396_v50 = vadd.f32 %v7395_v27, %v7372_v21 }
 0x76c   :  { %v7419_v39 = vpop.f32.mrf.mxu2  ;;  %v7569_v32 = vpop.f32.mrf.mxu3 }
 0x76d   :  { %v7420_v62 = vadd.f32 %v7419_v39, %v7396_v50 }
 0x76f   :  { %v7442_v26 = vadd.f32 %v7441_v23, %v7420_v62 }
 0x770   :  { %v7703_v60 = vpop.f32.mrf.mxu0 }
 0x772   :  { %v7727_v63 = vpop.f32.mrf.mxu1 }
 0x774   :  { %v7542_v7 = vpop.f32.mrf.mxu2  ;;  %v7679_v43 = vpop.f32.mrf.mxu3 }
 0x775   :  { %v7543_v53 = vadd.f32 %v7542_v7, %v7513_v45 }
 0x777   :  { %v7570_v6 = vadd.f32 %v7569_v32, %v7543_v53 }
 0x778   :  { %v7803_v33 = vpop.f32.mrf.mxu0 }
 0x779   :  { %v7603_v37 = vadd.f32 %v7602_v51, %v7570_v6 }
 0x77a   :  { %v7844_v2 = vpop.f32.mrf.mxu1 }
 0x77b   :  { %v7628_v10 = vadd.f32 %v7627_v13, %v7603_v37  ;;  %v7845_v51 = vadd.f32 %v7844_v2, %v7803_v33 }
 0x77c   :  { %v7653_v40 = vpop.f32.mrf.mxu2  ;;  %v7773_v55 = vpop.f32.mrf.mxu3 }
 0x77d   :  { %v7654_v46 = vadd.f32 %v7653_v40, %v7628_v10 }
 0x77f   :  { %v7680_v14 = vadd.f32 %v7679_v43, %v7654_v46  ;;  %v7444_v43 = vadd.f32 %v16791_v54, %v7442_v26 }
 0x780   :  { %v7934_v41 = vpop.f32.mrf.mxu0 }
 0x781   :  { %v7704_v42 = vadd.f32 %v7703_v60, %v7680_v14  ;;  %v14786_v27 = vmul.f32 -1.442695, %v7444_v43 }
 0x782   :  { %v7959_v7 = vpop.f32.mrf.mxu1 }
 0x783   :  { %v7728_v52 = vadd.f32 %v7727_v63, %v7704_v42  ;;  %v16797_v63 = vld [vmem:[%s17852_s2 + $0x1] ss:$0 sm:$0xff]  ;;  %14887 = vpow2.f32 %v14786_v27 }
 0x784   :  { %v7751_v28 = vpop.f32.mrf.mxu2  ;;  %v7901_v59 = vpop.f32.mrf.mxu3 }
 0x785   :  { %v7752_v6 = vadd.f32 %v7751_v28, %v7728_v52 }
 0x787   :  { %v7774_v29 = vadd.f32 %v7773_v55, %v7752_v6 }
 0x788   :  { %v8035_v30 = vpop.f32.mrf.mxu0 }
 0x789   :  { %v7776_v61 = vadd.f32 %v16797_v63, %v7774_v29  ;;  %v14888_v33 = vpop.eup %14887 }
 0x78a   :  { %v8059_v10 = vpop.f32.mrf.mxu1  ;;  %v8444_v50 = vadd.f32 1.0, %v14888_v33 }
 0x78b   :  { %v14787_v47 = vmul.f32 -1.442695, %v7776_v61 }
 0x78c   :  { %v7874_v32 = vpop.f32.mrf.mxu2  ;;  %v8011_v37 = vpop.f32.mrf.mxu3  ;;  %vm8450_vm2 = vweird.f32 %v8444_v50 }
 0x78d   :  { %v7875_v40 = vadd.f32 %v7874_v32, %v7845_v51  ;;  %14889 = vpow2.f32 %v14787_v47 }
 0x78e   :  { %14891 = vrcp.f32 %v8444_v50 }
 0x78f   :  { %v7902_v2 = vadd.f32 %v7901_v59, %v7875_v40 }
 0x790   :  { %v8135_v13 = vpop.f32.mrf.mxu0 }
 0x791   :  { %v7935_v23 = vadd.f32 %v7934_v41, %v7902_v2 }
 0x792   :  { %v8176_v45 = vpop.f32.mrf.mxu1 }
 0x793   :  { %v7960_v60 = vadd.f32 %v7959_v7, %v7935_v23  ;;  %v8177_v46 = vadd.f32 %v8176_v45, %v8135_v13  ;;  %v14890_v28 = vpop.eup %14889 }
 0x794   :  { %v7985_v38 = vpop.f32.mrf.mxu2  ;;  %v8105_v55 = vpop.f32.mrf.mxu3  ;;  %v8463_v59 = vadd.f32 1.0, %v14890_v28 }
 0x795   :  { %v7986_v14 = vadd.f32 %v7985_v38, %v7960_v60  ;;  %v14892_v2 = vpop.eup %14891 }
 0x796   :  { %14893 = vrcp.f32 %v8463_v59  ;;  %vm8451_vm11 = vweird.f32 %v14892_v2  ;;  %vm8469_vm4 = vweird.f32 %v8463_v59 }
 0x797   :  { %v8012_v32 = vadd.f32 %v8011_v37, %v7986_v14  ;;  %v8446_v37 = vmul.f32 %v14892_v2, %v8444_v50  ;;  %vm8452_vm5 = vmor %vm8450_vm2, %vm8451_vm11 }
 0x798   :  { %v8266_v52 = vpop.f32.mrf.mxu0 }
 0x799   :  { %v8036_v51 = vadd.f32 %v8035_v30, %v8012_v32  ;;  %v8447_v30 = vsub.f32 1.0, %v8446_v37 }
 0x79a   :  { %v8291_v6 = vpop.f32.mrf.mxu1 }
 0x79b   :  { %v8060_v61 = vadd.f32 %v8059_v10, %v8036_v51  ;;  %v16803_v10 = vld [vmem:[%s17852_s2 + $0x3] ss:$0 sm:$0xff]  ;;  %v8456_v51 = vand.u32 2147483648, %v8444_v50 }
 0x79c   :  { %v8083_v39 = vpop.f32.mrf.mxu2  ;;  %v8233_v53 = vpop.f32.mrf.mxu3 }
 0x79d   :  { %v14894_v47 = vpop.eup %14893  ;;  %v8084_v13 = vadd.f32 %v8083_v39, %v8060_v61  ;;  %v16809_v39 = vld [vmem:[%s17852_s2 + $0x2] ss:$0 sm:$0xff] }
 0x79e   :  { %v8465_v60 = vmul.f32 %v14894_v47, %v8463_v59  ;;  %vm8470_vm12 = vweird.f32 %v14894_v47 }
 0x79f   :  { %v8106_v14 = vadd.f32 %v8105_v55, %v8084_v13  ;;  %v8448_v55 = vmul.f32 %v14892_v2, %v8447_v30  ;;  %vm8471_vm7 = vmor %vm8469_vm4, %vm8470_vm12  ;;  %v8457_v13 = vor.u32 1.1754944e-38, %v8456_v51 }
 0x7a0   :  { %v8367_v43 = vpop.f32.mrf.mxu0 }
 0x7a2   :  { %v8391_v27 = vpop.f32.mrf.mxu1 }
 0x7a4   :  { %v8206_v21 = vpop.f32.mrf.mxu2  ;;  %v8343_v26 = vpop.f32.mrf.mxu3 }
 0x7a5   :  { %v8207_v42 = vadd.f32 %v8206_v21, %v8177_v46  ;;  %v8466_v21 = vsub.f32 1.0, %v8465_v60 }
 0x7a7   :  { %v8234_v62 = vadd.f32 %v8233_v53, %v8207_v42 }
 0x7a9   :  { %v8267_v41 = vadd.f32 %v8266_v52, %v8234_v62  ;;  %v8108_v52 = vadd.f32 %v16809_v39, %v8106_v14  ;;  %v8467_v62 = vmul.f32 %v14894_v47, %v8466_v21 }
 0x7ab   :  { %v8292_v29 = vadd.f32 %v8291_v6, %v8267_v41  ;;  %v8449_v6 = vadd.f32 %v14892_v2, %v8448_v55  ;;  %v8468_v41 = vadd.f32 %v14894_v47, %v8467_v62 }
 0x7ac   :  { %v8317_v7 = vpop.f32.mrf.mxu2  ;;  %v8437_v33 = vpop.f32.mrf.mxu3 }
 0x7ad   :  { %v8318_v40 = vadd.f32 %v8317_v7, %v8292_v29  ;;  %v8454_v29 = vand.u32 2147483647, %v8444_v50  ;;  %v8473_v7 = vand.u32 2147483647, %v8463_v59  ;;  %v8472_v61 = vsel %vm8471_vm7, %v14894_v47, %v8468_v41 }
 0x7af   :  { %v8344_v38 = vadd.f32 %v8343_v26, %v8318_v40  ;;  %v8475_v26 = vand.u32 2147483648, %v8463_v59  ;;  %vm8455_vm8 = vcmp.eq.f32.partialorder %v8454_v29, 8.507059e+37  ;;  %vm8474_vm9 = vcmp.eq.f32.partialorder %v8473_v7, 8.507059e+37  ;;  %v16862_v7 = vld [vmem:[%s17854_s4] ss:$0 sm:$0xff] }
 0x7b1   :  { %v8368_v23 = vadd.f32 %v8367_v43, %v8344_v38  ;;  %v8453_v43 = vsel %vm8452_vm5, %v14892_v2, %v8449_v6  ;;  %vm14136_vm5 = vcmask 1043456  }
 0x7b3   :  { %v8392_v45 = vadd.f32 %v8391_v27, %v8368_v23  ;;  %v8476_v23 = vor.u32 1.1754944e-38, %v8475_v26 }
 0x7b4   :  { %v8415_v53 = vpop.f32.mrf.mxu2 }
 0x7b5   :  { %v8416_v46 = vadd.f32 %v8415_v53, %v8392_v45  ;;  %v8458_v45 = vsel %vm8455_vm8, %v8457_v13, %v8453_v43  ;;  %v8477_v37 = vsel %vm8474_vm9, %v8476_v23, %v8472_v61 }
 0x7b6   :  { %v8499_v53 = vmul.f32 %v8477_v37, %v16531_v9 }
 0x7b7   :  { %v8438_v28 = vadd.f32 %v8437_v33, %v8416_v46 }
 0x7b9   :  { %v8440_v42 = vadd.f32 %v16803_v10, %v8438_v28 }
 0x7bb   :  { %v14788_v32 = vmul.f32 -1.442695, %v8440_v42 }
 0x7bd   :  { %14895 = vpow2.f32 %v14788_v32 }
 0x7be   :  { %14897 = vtanh.f32 %v8108_v52 }
 0x7c3   :  { %v14896_v40 = vpop.eup %14895 }
 0x7c4   :  { %v8483_v38 = vadd.f32 1.0, %v14896_v40  ;;  %v14898_v27 = vpop.eup %14897 }
 0x7c5   :  { %v8500_v60 = vmul.f32 %v14898_v27, %v8458_v45 }
 0x7c6   :  { %14899 = vrcp.f32 %v8483_v38  ;;  %v8495_v2 = vand.u32 2147483648, %v8483_v38  ;;  %v8493_v14 = vand.u32 2147483647, %v8483_v38  ;;  %vm8489_vm12 = vweird.f32 %v8483_v38 }
 0x7c7   :  { %v16813_v46 = vadd.f32 %v8500_v60, %v8499_v53 }
 0x7c8   :  { %v8496_v30 = vor.u32 1.1754944e-38, %v8495_v2  ;;  %vm8494_vm4 = vcmp.eq.f32.partialorder %v8493_v14, 8.507059e+37  ;;  %v14792_v14 = vld [vmem:[%s17850_s0 + $0x28] sm:$0x1f] }
 0x7c9   :  { %14901 = vtanh.f32 %v16813_v46 }
 0x7cc   :  { %v14900_v33 = vpop.eup %14899 }
 0x7cd   :  { %v8485_v50 = vmul.f32 %v14900_v33, %v8483_v38  ;;  %vm8490_vm11 = vweird.f32 %v14900_v33 }
 0x7ce   :  { %vm8491_vm2 = vmor %vm8489_vm12, %vm8490_vm11 }
 0x7cf   :  { %v8486_v59 = vsub.f32 1.0, %v8485_v50  ;;  %v14902_v42 = vpop.eup %14901 }
 0x7d1   :  { %v8487_v47 = vmul.f32 %v14900_v33, %v8486_v59 }
 0x7d3   :  { %v8488_v28 = vadd.f32 %v14900_v33, %v8487_v47 }
 0x7d5   :  { %v8492_v21 = vsel %vm8491_vm2, %v14900_v33, %v8488_v28 }
 0x7d6   :  { %v8497_v52 = vsel %vm8494_vm4, %v8496_v30, %v8492_v21  ;;  %v9048_v30 = vsel %vm267_vm0, %v14792_v14, 0  ;;  %v18573_v14 = vld [vmem:[#allocation33_spill] sm:$0xff] }
 0x7d7   :  { %v8503_v9 = vmul.f32 %v14902_v42, %v8497_v52  ;;  %v16884_v21 = vand.u32 4294901760, %v9048_v30 }
 0x7d9   :  { %14789 = vst.msk [vmem:[%s17857_s7 + $0x20] sm:$0x1f] %vm1489_vm14, %v8503_v9  ;;  %v8507_v32 = vsel %vm78_vm13, %v8503_v9, 0  ;;  %v16823_v62 = vsel %vm14136_vm5, %v16543_v15, %v8503_v9  ;;  %v16894_v42 = vsub.f32 %v9048_v30, %v16884_v21  ;;  %v18554_v9 = vld [vmem:[#allocation15_spill] sm:$0xff]  ;;  %v18575_v30 = vld [vmem:[#allocation49_spill] sm:$0xff] }
 0x7da   :  { %v16825_v55 = vand.u32 4294901760, %v8507_v32 }
 0x7db   :  { %v16903_v52 = vand.u32 4294901760, %v16894_v42 }
 0x7dc   :  { %8575 = vmatmul.f32.vlgmr.msra.gmra.mxu1 %v16825_v55  ;;  %v16829_v6 = vsub.f32 %v8507_v32, %v16825_v55  ;;  %v18555_v32 = vld [vmem:[#allocation28_spill] sm:$0xff] }
 0x7dd   :  { %8797 = vmatpush.msra.mxu1 %v15704_v24 }
 0x7de   :  { %8605 = vmatmul.f32.vlgmr.msra.gmra.mxu2 %v16829_v6  ;;  %v16834_v41 = vand.u32 4294901760, %v16829_v6 }
 0x7df   :  { %8799 = vmatpush.msra.mxu1 %v15712_v1  ;;  %8824 = vmatpush.msra.mxu2 %v15717_v58 }
 0x7e0   :  { %8632 = vmatmul.f32.vlgmr.msra.gmra.mxu3 %v16834_v41  ;;  %v8532_v15 = vsub.f32 %v16829_v6, %v16834_v41 }
 0x7e1   :  { %8849 = vmatpush.msra.mxu3 %v15704_v24  ;;  %8828 = vmatpush.msra.mxu2 %v18311_v48 }
 0x7e2   :  { %v16843_v26 = vand.u32 4294901760, %v8532_v15  ;;  %v18556_v15 = vld [vmem:[#allocation16_spill] sm:$0xff] }
 0x7e3   :  { %8851 = vmatpush.msra.mxu3 %v15712_v1 }
 0x7e4   :  { %8534 = vmatmul.f32.vlgmr.msra.gmra.mxu0 %v16843_v26  ;;  %8690 = vmatmul.f32.vlgmr.msrb.gmra.mxu1 %v16825_v55 }
 0x7e5   :  { %8772 = vmatpush.msra.mxu0 %v18312_v35  ;;  %8908 = vmatpush.msrb.mxu1 %v18313_v57 }
 0x7e7   :  { %8775 = vmatpush.msra.mxu0 %v18314_v36  ;;  %8914 = vmatpush.msrb.mxu1 %v18315_v49 }
 0x7e9   :  { %8920 = vmatpush.msrb.mxu1 %v18316_v25 }
 0x7eb   :  { %8926 = vmatpush.msrb.mxu1 %v18317_v31 }
 0x7ec   :  { %8665 = vmatmul.f32.vlgmr.msrb.gmra.mxu0 %v16825_v55 }
 0x7ed   :  { %8875 = vmatpush.msrb.mxu0 %v15051_v3 }
 0x7ef   :  { %8877 = vmatpush.msrb.mxu0 %v15053_v4 }
 0x7f1   :  { %8879 = vmatpush.msrb.mxu0 %v15055_v5 }
 0x7f3   :  { %8881 = vmatpush.msrb.mxu0 %v15063_v8 }
 0x859   :  { %v8576_v51 = vpop.f32.mrf.mxu1 }
 0x861   :  { %v8535_v29 = vpop.f32.mrf.mxu0  ;;  %v8606_v61 = vpop.f32.mrf.mxu2 }
 0x862   :  { %v8536_v40 = vadd.f32 %v16862_v7, %v8535_v29  ;;  %v8691_v37 = vpop.f32.mrf.mxu1  ;;  %v9070_v29 = vsub.f32 %v16894_v42, %v16903_v52 }
 0x863   :  { %v8633_v27 = vpop.f32.mrf.mxu3 }
 0x864   :  { %v8577_v43 = vadd.f32 %v8576_v51, %v8536_v40  ;;  %v18557_v51 = vld [vmem:[#allocation30_spill] sm:$0xff]  ;;  %v18558_v40 = vld [vmem:[#allocation9_spill] sm:$0xff] }
 0x866   :  { %v8607_v38 = vadd.f32 %v8606_v61, %v8577_v43  ;;  %v18559_v43 = vld [vmem:[#allocation19_spill] sm:$0xff] }
 0x867   :  { %v18560_v61 = vld [vmem:[#allocation31_spill] sm:$0xff] }
 0x868   :  { %v8634_v23 = vadd.f32 %v8633_v27, %v8607_v38  ;;  %v18561_v38 = vld [vmem:[#allocation21_spill] sm:$0xff]  ;;  %v16920_v27 = vand.u32 4294901760, %v9070_v29 }
 0x869   :  { %v8666_v13 = vpop.f32.mrf.mxu0  ;;  %v18576_v29 = vld [vmem:[#allocation37_spill] sm:$0xff] }
 0x86a   :  { %v8667_v45 = vadd.f32 %v8666_v13, %v8634_v23  ;;  %v18562_v23 = vld [vmem:[#allocation32_spill] sm:$0xff]  ;;  %v18563_v13 = vld [vmem:[#allocation23_spill] sm:$0xff] }
 0x86c   :  { %v8692_v60 = vadd.f32 %v8691_v37, %v8667_v45  ;;  %v18564_v45 = vld [vmem:[#allocation26_spill] sm:$0xff]  ;;  %v18565_v37 = vld [vmem:[#allocation17_spill] sm:$0xff] }
 0x86e   :  { %v8694_v53 = vmax.f32 %v8692_v60, 0.0  ;;  %v18566_v60 = vld [vmem:[#allocation27_spill] sm:$0xff] }
 0x870   :  { %v8696_v33 = vsel %vm1686_vm15, %v8694_v53, 0  ;;  %v18567_v53 = vld [vmem:[#allocation34_spill] sm:$0xff] }
 0x871   :  { %v8716_v50 = vand.u32 4294901760, %v8696_v33 }
 0x873   :  { %v8717_v59 = vsub.f32 %v8696_v33, %v8716_v50  ;;  %8752 = vmatmul.f32.vlgmr.msrb.gmra.mxu3 %v8716_v50  ;;  %v18568_v33 = vld [vmem:[#allocation18_spill] sm:$0xff] }
 0x874   :  { %8975 = vmatpush.msrb.mxu3 %v15051_v3 }
 0x875   :  { %v8718_v2 = vand.u32 4294901760, %v8717_v59  ;;  %8778 = vmatmul.f32.vlgmr.msra.gmra.mxu0 %v8717_v59 }
 0x876   :  { %8977 = vmatpush.msrb.mxu3 %v15053_v4  ;;  %9004 = vmatpush.msra.mxu0 %v15093_v18 }
 0x877   :  { %v8719_v47 = vsub.f32 %v8717_v59, %v8718_v2  ;;  %8803 = vmatmul.f32.vlgmr.msra.gmra.mxu1 %v8718_v2  ;;  %v18570_v59 = vld [vmem:[#allocation22_spill] sm:$0xff]  ;;  %v18571_v2 = vld [vmem:[#allocation24_spill] sm:$0xff] }
 0x878   :  { %8979 = vmatpush.msrb.mxu3 %v15055_v5  ;;  %9008 = vmatpush.msra.mxu0 %v15096_v19 }
 0x879   :  { %v8720_v28 = vand.u32 4294901760, %v8719_v47  ;;  %9035 = vmatpush.msra.mxu1 %v15051_v3  ;;  %v18572_v47 = vld [vmem:[#allocation20_spill] sm:$0xff] }
 0x87a   :  { %8981 = vmatpush.msrb.mxu3 %v15063_v8  ;;  %9012 = vmatpush.msra.mxu0 %v15099_v20 }
 0x87b   :  { %8721 = vmatmul.f32.vlgmr.msrb.gmra.mxu2 %v8720_v28  ;;  %8853 = vmatmul.f32.vlgmr.msra.gmra.mxu3 %v8716_v50  ;;  %v18574_v28 = vld [vmem:[#allocation35_spill] sm:$0xff] }
 0x87c   :  { %9037 = vmatpush.msra.mxu1 %v15053_v4  ;;  %8946 = vmatpush.msrb.mxu2 %v15071_v11 }
 0x87d   :  { %8887 = vmatmul.f32.vlgmr.msrb.gmra.mxu0 %v16843_v26  ;;  %9096 = vmatpush.msra.mxu3 %v15138_v34 }
 0x87e   :  { %9016 = vmatpush.msra.mxu0 %v15106_v22  ;;  %9039 = vmatpush.msra.mxu1 %v15055_v5 }
 0x87f   :  { %8928 = vmatmul.f32.vlgmr.msrb.gmra.mxu1 %v16825_v55  ;;  %8949 = vmatpush.msrb.mxu2 %v15075_v12 }
 0x880   :  { %9041 = vmatpush.msra.mxu1 %v15063_v8  ;;  %9119 = vmatpush.msrb.mxu0 %v18470_v17 }
 0x881   :  { %8952 = vmatpush.msrb.mxu2 %v18471_v0 }
 0x882   :  { %9142 = vmatpush.msrb.mxu1 %v18472_v56 }
 0x883   :  { %8830 = vmatmul.f32.vlgmr.msra.gmra.mxu2 %v8716_v50  ;;  %8985 = vmatmul.f32.vlgmr.msrb.gmra.mxu3 %v16834_v41  ;;  %v18569_v50 = vld [vmem:[#allocation25_spill] sm:$0xff] }
 0x884   :  { %8955 = vmatpush.msrb.mxu2 %v18473_v44  ;;  %9190 = vmatpush.msrb.mxu3 %v18472_v56 }
 0x885   :  { %9018 = vmatmul.f32.vlgmr.msra.gmra.mxu0 %v16825_v55 }
 0x886   :  { %9066 = vmatpush.msra.mxu2 %v18472_v56  ;;  %9210 = vmatpush.msra.mxu0 %v18474_v16 }
 0x887   :  { %9043 = vmatmul.f32.vlgmr.msra.gmra.mxu1 %v16825_v55 }
 0x888   :  { %9212 = vmatpush.msra.mxu0 %v18554_v9  ;;  %9243 = vmatpush.msra.mxu1 %v18555_v32 }
 0x88a   :  { %9214 = vmatpush.msra.mxu0 %v18556_v15  ;;  %9249 = vmatpush.msra.mxu1 %v18557_v51 }
 0x88b   :  { %8958 = vmatmul.f32.vlgmr.msrb.gmra.mxu2 %v16829_v6  ;;  %9098 = vmatmul.f32.vlgmr.msra.gmra.mxu3 %v16884_v21 }
 0x88c   :  { %9168 = vmatpush.msrb.mxu2 %v18558_v40  ;;  %9216 = vmatpush.msra.mxu0 %v18559_v43 }
 0x88d   :  { %9122 = vmatmul.f32.vlgmr.msrb.gmra.mxu0 %v16894_v42  ;;  %9255 = vmatpush.msra.mxu1 %v18560_v61 }
 0x88e   :  { %9310 = vmatpush.msra.mxu3 %v18474_v16  ;;  %9339 = vmatpush.msrb.mxu0 %v18561_v38 }
 0x88f   :  { %9146 = vmatmul.f32.vlgmr.msrb.gmra.mxu1 %v16903_v52 }
 0x890   :  { %9261 = vmatpush.msra.mxu1 %v18562_v23  ;;  %9312 = vmatpush.msra.mxu3 %v18554_v9 }
 0x891   :  { %9343 = vmatpush.msrb.mxu0 %v18563_v13 }
 0x892   :  { %9370 = vmatpush.msrb.mxu1 %v18474_v16  ;;  %9314 = vmatpush.msra.mxu3 %v18556_v15 }
 0x893   :  { %9072 = vmatmul.f32.vlgmr.msra.gmra.mxu2 %v16920_v27  ;;  %9192 = vmatmul.f32.vlgmr.msrb.gmra.mxu3 %v16884_v21 }
 0x894   :  { %9316 = vmatpush.msra.mxu3 %v18559_v43  ;;  %9347 = vmatpush.msrb.mxu0 %v18564_v45 }
 0x895   :  { %9222 = vmatmul.f32.vlgmr.msra.gmra.mxu0 %v16843_v26  ;;  %9372 = vmatpush.msrb.mxu1 %v18554_v9 }
 0x896   :  { %9281 = vmatpush.msra.mxu2 %v18565_v37  ;;  %9351 = vmatpush.msrb.mxu0 %v18566_v60 }
 0x897   :  { %9263 = vmatmul.f32.vlgmr.msra.gmra.mxu1 %v16825_v55  ;;  %9428 = vmatpush.msrb.mxu3 %v18567_v53 }
 0x898   :  { %9374 = vmatpush.msrb.mxu1 %v18556_v15  ;;  %9284 = vmatpush.msra.mxu2 %v18568_v33  ;;  %v18581_v33 = vld [vmem:[#allocation41_spill] sm:$0xff] }
 0x899   :  { %9451 = vmatpush.msra.mxu0 %v18569_v50  ;;  %v18579_v50 = vld [vmem:[#allocation39_spill] sm:$0xff] }
 0x89a   :  { %9376 = vmatpush.msrb.mxu1 %v18559_v43  ;;  %9287 = vmatpush.msra.mxu2 %v18570_v59  ;;  %v18577_v59 = vld [vmem:[#allocation50_spill] sm:$0xff] }
 0x89b   :  { %9170 = vmatmul.f32.vlgmr.msrb.gmra.mxu2 %v16884_v21  ;;  %9320 = vmatmul.f32.vlgmr.msra.gmra.mxu3 %v16834_v41 }
 0x89c   :  { %9290 = vmatpush.msra.mxu2 %v18571_v2  ;;  %9474 = vmatpush.msra.mxu1 %v18572_v47  ;;  %v18578_v2 = vld [vmem:[#allocation29_spill] sm:$0xff] }
 0x89d   :  { %9353 = vmatmul.f32.vlgmr.msrb.gmra.mxu0 %v16825_v55  ;;  %9522 = vmatpush.msra.mxu3 %v18572_v47 }
 0x89e   :  { %9398 = vmatpush.msrb.mxu2 %v18572_v47  ;;  %9542 = vmatpush.msrb.mxu0 %v18573_v14  ;;  %v18580_v47 = vld [vmem:[#allocation51_spill] sm:$0xff] }
 0x89f   :  { %9378 = vmatmul.f32.vlgmr.msrb.gmra.mxu1 %v16825_v55 }
 0x8a0   :  { %9544 = vmatpush.msrb.mxu0 %v18574_v28  ;;  %9575 = vmatpush.msrb.mxu1 %v18575_v30  ;;  %v18582_v30 = vld [vmem:[#allocation52_spill] sm:$0xff] }
 0x8a2   :  { %9546 = vmatpush.msrb.mxu0 %v18576_v29  ;;  %9581 = vmatpush.msrb.mxu1 %v18577_v59  ;;  %v18583_v59 = vld [vmem:[#allocation43_spill] sm:$0xff] }
 0x8a3   :  { %9293 = vmatmul.f32.vlgmr.msra.gmra.mxu2 %v16829_v6  ;;  %9430 = vmatmul.f32.vlgmr.msrb.gmra.mxu3 %v16884_v21 }
 0x8a4   :  { %9500 = vmatpush.msra.mxu2 %v18578_v2  ;;  %9548 = vmatpush.msrb.mxu0 %v18579_v50  ;;  %v18588_v2 = vld [vmem:[#allocation38_spill] sm:$0xff] }
 0x8a5   :  { %9454 = vmatmul.f32.vlgmr.msra.gmra.mxu0 %v16894_v42  ;;  %9587 = vmatpush.msrb.mxu1 %v18580_v47  ;;  %v18584_v47 = vld [vmem:[#allocation46_spill] sm:$0xff] }
 0x8a6   :  { %9642 = vmatpush.msrb.mxu3 %v18573_v14  ;;  %9671 = vmatpush.msra.mxu0 %v18581_v33  ;;  %v18586_v33 = vld [vmem:[#allocation47_spill] sm:$0xff] }
 0x8a7   :  { %9478 = vmatmul.f32.vlgmr.msra.gmra.mxu1 %v16903_v52 }
 0x8a8   :  { %9593 = vmatpush.msrb.mxu1 %v18582_v30  ;;  %9644 = vmatpush.msrb.mxu3 %v18574_v28  ;;  %v18585_v30 = vld [vmem:[#allocation36_spill] sm:$0xff] }
 0x8a9   :  { %9675 = vmatpush.msra.mxu0 %v18583_v59  ;;  %v18587_v59 = vld [vmem:[#allocation53_spill] sm:$0xff] }
 0x8aa   :  { %9702 = vmatpush.msra.mxu1 %v18573_v14  ;;  %9646 = vmatpush.msrb.mxu3 %v18576_v29  ;;  %v18589_v14 = vld [vmem:[#allocation45_spill] sm:$0xff] }
 0x8ab   :  { %9404 = vmatmul.f32.vlgmr.msrb.gmra.mxu2 %v16920_v27  ;;  %9524 = vmatmul.f32.vlgmr.msra.gmra.mxu3 %v16884_v21 }
 0x8ac   :  { %9648 = vmatpush.msrb.mxu3 %v18579_v50  ;;  %9679 = vmatpush.msra.mxu0 %v18584_v47  ;;  %v18590_v47 = vld [vmem:[#allocation42_spill] sm:$0xff] }
 0x8ad   :  { %9554 = vmatmul.f32.vlgmr.msrb.gmra.mxu0 %v16843_v26  ;;  %9704 = vmatpush.msra.mxu1 %v18574_v28  ;;  %v18601_v28 = vld [vmem:[#allocation61_spill] sm:$0xff] }
 0x8ae   :  { %9613 = vmatpush.msrb.mxu2 %v18585_v30  ;;  %9683 = vmatpush.msra.mxu0 %v18586_v33  ;;  %v18591_v30 = vld [vmem:[#allocation44_spill] sm:$0xff] }
 0x8af   :  { %9595 = vmatmul.f32.vlgmr.msrb.gmra.mxu1 %v16825_v55  ;;  %9760 = vmatpush.msra.mxu3 %v18587_v59  ;;  %v18592_v33 = vld [vmem:[#allocation40_spill] sm:$0xff]  ;;  %v18593_v59 = vld [vmem:[#allocation54_spill] sm:$0xff] }
 0x8b0   :  { %9706 = vmatpush.msra.mxu1 %v18576_v29  ;;  %9616 = vmatpush.msrb.mxu2 %v18588_v2  ;;  %v18596_v2 = vld [vmem:[#allocation57_spill] sm:$0xff]  ;;  %v18599_v29 = vld [vmem:[#allocation59_spill] sm:$0xff] }
 0x8b1   :  { %9783 = vmatpush.msrb.mxu0 %v18589_v14  ;;  %v18594_v14 = vld [vmem:[#allocation55_spill] sm:$0xff] }
 0x8b2   :  { %9708 = vmatpush.msra.mxu1 %v18579_v50  ;;  %9619 = vmatpush.msrb.mxu2 %v18590_v47  ;;  %v18595_v47 = vld [vmem:[#allocation69_spill] sm:$0xff]  ;;  %v18597_v50 = vld [vmem:[#allocation70_spill] sm:$0xff] }
 0x8b3   :  { %9502 = vmatmul.f32.vlgmr.msra.gmra.mxu2 %v16884_v21  ;;  %9652 = vmatmul.f32.vlgmr.msrb.gmra.mxu3 %v16834_v41 }
 0x8b4   :  { %9622 = vmatpush.msrb.mxu2 %v18591_v30  ;;  %9806 = vmatpush.msrb.mxu1 %v18592_v33  ;;  %v18598_v30 = vld [vmem:[#allocation48_spill] sm:$0xff] }
 0x8b5   :  { %9685 = vmatmul.f32.vlgmr.msra.gmra.mxu0 %v16825_v55  ;;  %9854 = vmatpush.msrb.mxu3 %v18592_v33 }
 0x8b6   :  { %9730 = vmatpush.msra.mxu2 %v18592_v33  ;;  %9874 = vmatpush.msra.mxu0 %v18593_v59  ;;  %v18600_v33 = vld [vmem:[#allocation71_spill] sm:$0xff] }
 0x8b7   :  { %9710 = vmatmul.f32.vlgmr.msra.gmra.mxu1 %v16825_v55 }
 0x8b8   :  { %9876 = vmatpush.msra.mxu0 %v18594_v14  ;;  %9907 = vmatpush.msra.mxu1 %v18595_v47  ;;  %v18602_v47 = vld [vmem:[#allocation72_spill] sm:$0xff] }
 0x8ba   :  { %9878 = vmatpush.msra.mxu0 %v18596_v2  ;;  %9913 = vmatpush.msra.mxu1 %v18597_v50  ;;  %v18603_v50 = vld [vmem:[#allocation63_spill] sm:$0xff] }
 0x8bb   :  { %9625 = vmatmul.f32.vlgmr.msrb.gmra.mxu2 %v16829_v6  ;;  %9762 = vmatmul.f32.vlgmr.msra.gmra.mxu3 %v16884_v21 }
 0x8bc   :  { %9832 = vmatpush.msrb.mxu2 %v18598_v30  ;;  %9880 = vmatpush.msra.mxu0 %v18599_v29  ;;  %v18608_v30 = vld [vmem:[#allocation58_spill] sm:$0xff] }
 0x8bd   :  { %9786 = vmatmul.f32.vlgmr.msrb.gmra.mxu0 %v16894_v42  ;;  %9919 = vmatpush.msra.mxu1 %v18600_v33  ;;  %v18604_v33 = vld [vmem:[#allocation66_spill] sm:$0xff] }
 0x8be   :  { %9974 = vmatpush.msra.mxu3 %v18593_v59  ;;  %10003 = vmatpush.msrb.mxu0 %v18601_v28  ;;  %v18606_v28 = vld [vmem:[#allocation67_spill] sm:$0xff] }
 0x8bf   :  { %9810 = vmatmul.f32.vlgmr.msrb.gmra.mxu1 %v16903_v52 }
 0x8c0   :  { %9925 = vmatpush.msra.mxu1 %v18602_v47  ;;  %9976 = vmatpush.msra.mxu3 %v18594_v14  ;;  %v18605_v47 = vld [vmem:[#allocation56_spill] sm:$0xff] }
 0x8c1   :  { %10007 = vmatpush.msrb.mxu0 %v18603_v50  ;;  %v18607_v50 = vld [vmem:[#allocation73_spill] sm:$0xff] }
 0x8c2   :  { %10034 = vmatpush.msrb.mxu1 %v18593_v59  ;;  %9978 = vmatpush.msra.mxu3 %v18596_v2  ;;  %v18609_v59 = vld [vmem:[#allocation65_spill] sm:$0xff] }
 0x8c3   :  { %9736 = vmatmul.f32.vlgmr.msra.gmra.mxu2 %v16920_v27  ;;  %9856 = vmatmul.f32.vlgmr.msrb.gmra.mxu3 %v16884_v21 }
 0x8c4   :  { %9980 = vmatpush.msra.mxu3 %v18599_v29  ;;  %10011 = vmatpush.msrb.mxu0 %v18604_v33  ;;  %v18610_v33 = vld [vmem:[#allocation62_spill] sm:$0xff] }
 0x8c5   :  { %9886 = vmatmul.f32.vlgmr.msra.gmra.mxu0 %v16843_v26  ;;  %10036 = vmatpush.msrb.mxu1 %v18594_v14  ;;  %v18611_v26 = vld [vmem:[#allocation64_spill] sm:$0xff] }
 0x8c6   :  { %9945 = vmatpush.msra.mxu2 %v18605_v47  ;;  %10015 = vmatpush.msrb.mxu0 %v18606_v28  ;;  %v18612_v28 = vld [vmem:[#allocation60_spill] sm:$0xff] }
 0x8c7   :  { %9927 = vmatmul.f32.vlgmr.msra.gmra.mxu1 %v16825_v55  ;;  %10092 = vmatpush.msrb.mxu3 %v18607_v50  ;;  %v18616_v50 = vld [vmem:[#allocation89_spill] sm:$0xff]  ;;  %v18619_v47 = vld [vmem:[#allocation92_spill] sm:$0xff] }
 0x8c8   :  { %10038 = vmatpush.msrb.mxu1 %v18596_v2  ;;  %9948 = vmatpush.msra.mxu2 %v18608_v30  ;;  %v18613_v30 = vld [vmem:[#allocation76_spill] sm:$0xff] }
 0x8c9   :  { %10115 = vmatpush.msra.mxu0 %v18609_v59  ;;  %v18614_v59 = vld [vmem:[#allocation85_spill] sm:$0xff] }
 0x8ca   :  { %10040 = vmatpush.msrb.mxu1 %v18599_v29  ;;  %9951 = vmatpush.msra.mxu2 %v18610_v33  ;;  %v18615_v33 = vld [vmem:[#allocation78_spill] sm:$0xff] }
 0x8cb   :  { %9834 = vmatmul.f32.vlgmr.msrb.gmra.mxu2 %v16884_v21  ;;  %9984 = vmatmul.f32.vlgmr.msra.gmra.mxu3 %v16834_v41  ;;  %v18617_v41 = vld [vmem:[#allocation81_spill] sm:$0xff] }
 0x8cc   :  { %9954 = vmatpush.msra.mxu2 %v18611_v26  ;;  %10186 = vmatpush.msra.mxu3 %v18612_v28  ;;  %v18618_v26 = vld [vmem:[#allocation68_spill] sm:$0xff] }
 0x8cd   :  { %10017 = vmatmul.f32.vlgmr.msrb.gmra.mxu0 %v16825_v55  ;;  %10138 = vmatpush.msra.mxu1 %v18612_v28 }
 0x8ce   :  { %10062 = vmatpush.msrb.mxu2 %v18612_v28  ;;  %10274 = vmatpush.msrb.mxu0 %v18613_v30 }
 0x8cf   :  { %10042 = vmatmul.f32.vlgmr.msrb.gmra.mxu1 %v16825_v55  ;;  %v18620_v55 = vld [vmem:[#allocation93_spill] sm:$0xff] }
 0x8d0   :  { %10307 = vmatpush.msrb.mxu1 %v18614_v59  ;;  %10276 = vmatpush.msrb.mxu0 %v18615_v33  ;;  %v18621_v59 = vld [vmem:[#allocation84_spill] sm:$0xff] }
 0x8d2   :  { %10313 = vmatpush.msrb.mxu1 %v18616_v50  ;;  %10278 = vmatpush.msrb.mxu0 %v18617_v41  ;;  %v18631_v50 = vld [vmem:[#allocation87_spill] sm:$0xff] }
 0x8d3   :  { %9957 = vmatmul.f32.vlgmr.msra.gmra.mxu2 %v16829_v6  ;;  %10094 = vmatmul.f32.vlgmr.msrb.gmra.mxu3 %v16884_v21  ;;  %v18622_v6 = vld [vmem:[#allocation79_spill] sm:$0xff] }
 0x8d4   :  { %10164 = vmatpush.msra.mxu2 %v18618_v26  ;;  %10319 = vmatpush.msrb.mxu1 %v18619_v47  ;;  %v18623_v47 = vld [vmem:[#allocation82_spill] sm:$0xff] }
 0x8d5   :  { %10118 = vmatmul.f32.vlgmr.msra.gmra.mxu0 %v16894_v42  ;;  %10374 = vmatpush.msrb.mxu3 %v18613_v30  ;;  %v18624_v42 = vld [vmem:[#allocation77_spill] sm:$0xff]  ;;  %v18628_v26 = vld [vmem:[#allocation90_spill] sm:$0xff] }
 0x8d6   :  { %10325 = vmatpush.msrb.mxu1 %v18620_v55  ;;  %10280 = vmatpush.msrb.mxu0 %v18621_v59  ;;  %v18626_v55 = vld [vmem:[#allocation80_spill] sm:$0xff] }
 0x8d7   :  { %10142 = vmatmul.f32.vlgmr.msra.gmra.mxu1 %v16903_v52  ;;  %10376 = vmatpush.msrb.mxu3 %v18615_v33  ;;  %v18625_v52 = vld [vmem:[#allocation86_spill] sm:$0xff] }
 0x8d8   :  { %10434 = vmatpush.msra.mxu1 %v18613_v30  ;;  %10403 = vmatpush.msra.mxu0 %v18622_v6  ;;  %v18627_v6 = vld [vmem:[#allocation97_spill] sm:$0xff] }
 0x8d9   :  { %10378 = vmatpush.msrb.mxu3 %v18617_v41 }
 0x8da   :  { %10436 = vmatpush.msra.mxu1 %v18615_v33  ;;  %10407 = vmatpush.msra.mxu0 %v18623_v47  ;;  %v18629_v47 = vld [vmem:[#allocation83_spill] sm:$0xff] }
 0x8db   :  { %10068 = vmatmul.f32.vlgmr.msrb.gmra.mxu2 %v16920_v27  ;;  %10188 = vmatmul.f32.vlgmr.msra.gmra.mxu3 %v16884_v21  ;;  %v18630_v27 = vld [vmem:[#allocation98_spill] sm:$0xff] }
 0x8dc   :  { %10345 = vmatpush.msrb.mxu2 %v18624_v42  ;;  %10380 = vmatpush.msrb.mxu3 %v18621_v59 }
 0x8dd   :  { %10438 = vmatpush.msra.mxu1 %v18617_v41  ;;  %10411 = vmatpush.msra.mxu0 %v18625_v52 }
 0x8de   :  { %10348 = vmatpush.msrb.mxu2 %v18626_v55  ;;  %10496 = vmatpush.msra.mxu3 %v18627_v6 }
 0x8df   :  { %10440 = vmatpush.msra.mxu1 %v18621_v59  ;;  %10415 = vmatpush.msra.mxu0 %v18628_v26 }
 0x8e0   :  { %10351 = vmatpush.msrb.mxu2 %v18629_v47  ;;  %10502 = vmatpush.msra.mxu3 %v18630_v27  ;;  %v17073_v47 = vld [vmem:[%s17854_s4 + $0x1] ss:$0 sm:$0xff] }
 0x8e1   :  { %18632 = vst [vmem:[#allocation75_spill] sm:$0xff] %v17073_v47 }
 0x8e2   :  { %10354 = vmatpush.msrb.mxu2 %v18631_v50 }
 0x8e3   :  { %10166 = vmatmul.f32.vlgmr.msra.gmra.mxu2 %v16884_v21 }
 0x8e4   :  { %10465 = vmatpush.msra.mxu2 %v15704_v24 }
 0x8e6   :  { %10467 = vmatpush.msra.mxu2 %v15712_v1 }
 0x8f2   :  { %v8779_v52 = vpop.f32.mrf.mxu0 }
 0x8f4   :  { %v8804_v55 = vpop.f32.mrf.mxu1 }
 0x8f6   :  { %v8753_v42 = vpop.f32.mrf.mxu3 }
 0x8fa   :  { %v8888_v6 = vpop.f32.mrf.mxu0 }
 0x8fc   :  { %v8929_v41 = vpop.f32.mrf.mxu1 }
 0x8fe   :  { %v8722_v59 = vpop.f32.mrf.mxu2  ;;  %v8854_v33 = vpop.f32.mrf.mxu3 }
 0x8ff   :  { %v8723_v50 = vadd.f32 %v17073_v47, %v8722_v59 }
 0x901   :  { %v8754_v27 = vadd.f32 %v8753_v42, %v8723_v50 }
 0x902   :  { %v9019_v21 = vpop.f32.mrf.mxu0 }
 0x903   :  { %v8780_v26 = vadd.f32 %v8779_v52, %v8754_v27  ;;  %v8930_v27 = vadd.f32 %v8929_v41, %v8888_v6 }
 0x904   :  { %v9044_v30 = vpop.f32.mrf.mxu1 }
 0x905   :  { %v8805_v28 = vadd.f32 %v8804_v55, %v8780_v26 }
 0x906   :  { %v8831_v29 = vpop.f32.mrf.mxu2  ;;  %v8986_v2 = vpop.f32.mrf.mxu3 }
 0x907   :  { %v8832_v14 = vadd.f32 %v8831_v29, %v8805_v28 }
 0x909   :  { %v8855_v53 = vadd.f32 %v8854_v33, %v8832_v14 }
 0x90a   :  { %v9123_v60 = vpop.f32.mrf.mxu0 }
 0x90b   :  { %14790 = vst.msk [vmem:[%s17855_s5 + $0x20] sm:$0x1f] %vm1849_vm1, %v8855_v53 }
 0x90c   :  { %v9147_v37 = vpop.f32.mrf.mxu1 }
 0x90e   :  { %v8959_v45 = vpop.f32.mrf.mxu2  ;;  %v9099_v13 = vpop.f32.mrf.mxu3 }
 0x90f   :  { %v8960_v28 = vadd.f32 %v8959_v45, %v8930_v27 }
 0x911   :  { %v8987_v33 = vadd.f32 %v8986_v2, %v8960_v28 }
 0x912   :  { %v9223_v23 = vpop.f32.mrf.mxu0 }
 0x913   :  { %v9020_v43 = vadd.f32 %v9019_v21, %v8987_v33 }
 0x914   :  { %v9264_v59 = vpop.f32.mrf.mxu1 }
 0x915   :  { %v9265_v14 = vadd.f32 %v9264_v59, %v9223_v23  ;;  %v9045_v15 = vadd.f32 %v9044_v30, %v9020_v43 }
 0x916   :  { %v9073_v50 = vpop.f32.mrf.mxu2  ;;  %v9193_v42 = vpop.f32.mrf.mxu3 }
 0x917   :  { %v9074_v56 = vadd.f32 %v9073_v50, %v9045_v15 }
 0x919   :  { %v9100_v17 = vadd.f32 %v9099_v13, %v9074_v56 }
 0x91a   :  { %v9354_v52 = vpop.f32.mrf.mxu0 }
 0x91b   :  { %v9124_v59 = vadd.f32 %v9123_v60, %v9100_v17 }
 0x91c   :  { %v9379_v26 = vpop.f32.mrf.mxu1 }
 0x91d   :  { %v9148_v21 = vadd.f32 %v9147_v37, %v9124_v59 }
 0x91e   :  { %v9171_v55 = vpop.f32.mrf.mxu2  ;;  %v9321_v47 = vpop.f32.mrf.mxu3 }
 0x91f   :  { %v9172_v43 = vadd.f32 %v9171_v55, %v9148_v21 }
 0x921   :  { %v9194_v30 = vadd.f32 %v9193_v42, %v9172_v43 }
 0x922   :  { %v9455_v29 = vpop.f32.mrf.mxu0 }
 0x924   :  { %v9479_v40 = vpop.f32.mrf.mxu1 }
 0x926   :  { %v9294_v38 = vpop.f32.mrf.mxu2  ;;  %v9431_v61 = vpop.f32.mrf.mxu3 }
 0x927   :  { %v9295_v53 = vadd.f32 %v9294_v38, %v9265_v14 }
 0x929   :  { %v9322_v51 = vadd.f32 %v9321_v47, %v9295_v53 }
 0x92a   :  { %v9555_v41 = vpop.f32.mrf.mxu0 }
 0x92b   :  { %v9355_v32 = vadd.f32 %v9354_v52, %v9322_v51 }
 0x92c   :  { %v9596_v0 = vpop.f32.mrf.mxu1 }
 0x92d   :  { %v9380_v9 = vadd.f32 %v9379_v26, %v9355_v32  ;;  %v9597_v52 = vadd.f32 %v9596_v0, %v9555_v41 }
 0x92e   :  { %v9405_v16 = vpop.f32.mrf.mxu2  ;;  %v9525_v44 = vpop.f32.mrf.mxu3 }
 0x92f   :  { %v9406_v6 = vadd.f32 %v9405_v16, %v9380_v9 }
 0x931   :  { %v9432_v45 = vadd.f32 %v9431_v61, %v9406_v6  ;;  %v9196_v61 = vadd.f32 %v16791_v54, %v9194_v30 }
 0x932   :  { %v9686_v28 = vpop.f32.mrf.mxu0 }
 0x933   :  { %v9456_v27 = vadd.f32 %v9455_v29, %v9432_v45  ;;  %v14793_v37 = vmul.f32 -1.442695, %v9196_v61 }
 0x934   :  { %v9711_v38 = vpop.f32.mrf.mxu1 }
 0x935   :  { %v9480_v33 = vadd.f32 %v9479_v40, %v9456_v27  ;;  %14903 = vpow2.f32 %v14793_v37 }
 0x936   :  { %v9503_v2 = vpop.f32.mrf.mxu2  ;;  %v9653_v23 = vpop.f32.mrf.mxu3 }
 0x937   :  { %v9504_v51 = vadd.f32 %v9503_v2, %v9480_v33 }
 0x939   :  { %v9526_v15 = vadd.f32 %v9525_v44, %v9504_v51 }
 0x93a   :  { %v9787_v50 = vpop.f32.mrf.mxu0 }
 0x93b   :  { %v9528_v17 = vadd.f32 %v16797_v63, %v9526_v15  ;;  %v14904_v29 = vpop.eup %14903 }
 0x93c   :  { %v9811_v9 = vpop.f32.mrf.mxu1  ;;  %v10196_v2 = vadd.f32 1.0, %v14904_v29 }
 0x93d   :  { %v14794_v26 = vmul.f32 -1.442695, %v9528_v17 }
 0x93e   :  { %v9626_v47 = vpop.f32.mrf.mxu2  ;;  %v9763_v32 = vpop.f32.mrf.mxu3  ;;  %vm10202_vm9 = vweird.f32 %v10196_v2 }
 0x93f   :  { %v9627_v16 = vadd.f32 %v9626_v47, %v9597_v52  ;;  %14905 = vpow2.f32 %v14794_v26 }
 0x940   :  { %14907 = vrcp.f32 %v10196_v2 }
 0x941   :  { %v9654_v13 = vadd.f32 %v9653_v23, %v9627_v16 }
 0x942   :  { %v9887_v14 = vpop.f32.mrf.mxu0 }
 0x943   :  { %v9687_v40 = vadd.f32 %v9686_v28, %v9654_v13 }
 0x944   :  { %v9928_v42 = vpop.f32.mrf.mxu1 }
 0x945   :  { %v9712_v0 = vadd.f32 %v9711_v38, %v9687_v40  ;;  %v9929_v53 = vadd.f32 %v9928_v42, %v9887_v14  ;;  %v14906_v6 = vpop.eup %14905 }
 0x946   :  { %v9737_v56 = vpop.f32.mrf.mxu2  ;;  %v9857_v60 = vpop.f32.mrf.mxu3  ;;  %v10215_v23 = vadd.f32 1.0, %v14906_v6 }
 0x947   :  { %v9738_v41 = vadd.f32 %v9737_v56, %v9712_v0  ;;  %v14908_v16 = vpop.eup %14907 }
 0x948   :  { %14909 = vrcp.f32 %v10215_v23  ;;  %vm10203_vm7 = vweird.f32 %v14908_v16  ;;  %vm10221_vm11 = vweird.f32 %v10215_v23 }
 0x949   :  { %v9764_v59 = vadd.f32 %v9763_v32, %v9738_v41  ;;  %v10198_v32 = vmul.f32 %v14908_v16, %v10196_v2  ;;  %vm10204_vm12 = vmor %vm10202_vm9, %vm10203_vm7 }
 0x94a   :  { %v10018_v63 = vpop.f32.mrf.mxu0 }
 0x94b   :  { %v9788_v47 = vadd.f32 %v9787_v50, %v9764_v59  ;;  %v10199_v50 = vsub.f32 1.0, %v10198_v32  ;;  %v10208_v59 = vand.u32 2147483648, %v10196_v2 }
 0x94c   :  { %v10043_v21 = vpop.f32.mrf.mxu1 }
 0x94d   :  { %v9812_v52 = vadd.f32 %v9811_v9, %v9788_v47 }
 0x94e   :  { %v9835_v55 = vpop.f32.mrf.mxu2  ;;  %v9985_v44 = vpop.f32.mrf.mxu3 }
 0x94f   :  { %v14910_v61 = vpop.eup %14909  ;;  %v9836_v13 = vadd.f32 %v9835_v55, %v9812_v52 }
 0x950   :  { %v10217_v26 = vmul.f32 %v14910_v61, %v10215_v23  ;;  %vm10222_vm8 = vweird.f32 %v14910_v61 }
 0x951   :  { %v9858_v0 = vadd.f32 %v9857_v60, %v9836_v13  ;;  %v10206_v60 = vand.u32 2147483647, %v10196_v2  ;;  %vm10223_vm2 = vmor %vm10221_vm11, %vm10222_vm8  ;;  %vm18152_vm11 = vcmask 1044480  }
 0x952   :  { %v10119_v30 = vpop.f32.mrf.mxu0  ;;  %v10218_v29 = vsub.f32 1.0, %v10217_v26 }
 0x953   :  { %v9860_v9 = vadd.f32 %v16809_v39, %v9858_v0  ;;  %vm10207_vm4 = vcmp.eq.f32.partialorder %v10206_v60, 8.507059e+37 }
 0x954   :  { %v10143_v56 = vpop.f32.mrf.mxu1  ;;  %v10219_v6 = vmul.f32 %v14910_v61, %v10218_v29 }
 0x956   :  { %v9958_v45 = vpop.f32.mrf.mxu2  ;;  %v10095_v33 = vpop.f32.mrf.mxu3 }
 0x957   :  { %v9959_v54 = vadd.f32 %v9958_v45, %v9929_v53  ;;  %v10200_v45 = vmul.f32 %v14908_v16, %v10199_v50 }
 0x959   :  { %v9986_v27 = vadd.f32 %v9985_v44, %v9959_v54  ;;  %v10201_v55 = vadd.f32 %v14908_v16, %v10200_v45  ;;  %v10220_v54 = vadd.f32 %v14910_v61, %v10219_v6 }
 0x95b   :  { %v10019_v28 = vadd.f32 %v10018_v63, %v9986_v27  ;;  %v10227_v63 = vand.u32 2147483648, %v10215_v23  ;;  %v10225_v27 = vand.u32 2147483647, %v10215_v23  ;;  %v10224_v39 = vsel %vm10223_vm2, %v14910_v61, %v10220_v54 }
 0x95d   :  { %v10044_v43 = vadd.f32 %v10043_v21, %v10019_v28  ;;  %v10228_v47 = vor.u32 1.1754944e-38, %v10227_v63  ;;  %vm10226_vm10 = vcmp.eq.f32.partialorder %v10225_v27, 8.507059e+37 }
 0x95e   :  { %v10069_v38 = vpop.f32.mrf.mxu2  ;;  %v10189_v14 = vpop.f32.mrf.mxu3 }
 0x95f   :  { %v10070_v51 = vadd.f32 %v10069_v38, %v10044_v43  ;;  %v10209_v43 = vor.u32 1.1754944e-38, %v10208_v59 }
 0x961   :  { %v10096_v15 = vadd.f32 %v10095_v33, %v10070_v51  ;;  %v10229_v51 = vsel %vm10226_vm10, %v10228_v47, %v10224_v39 }
 0x962   :  { %v10251_v52 = vmul.f32 %v10229_v51, %v16813_v46 }
 0x963   :  { %v10120_v17 = vadd.f32 %v10119_v30, %v10096_v15 }
 0x965   :  { %v10144_v37 = vadd.f32 %v10143_v56, %v10120_v17 }
 0x966   :  { %v10167_v40 = vpop.f32.mrf.mxu2 }
 0x967   :  { %v10168_v42 = vadd.f32 %v10167_v40, %v10144_v37 }
 0x969   :  { %v10190_v44 = vadd.f32 %v10189_v14, %v10168_v42 }
 0x96b   :  { %v10192_v53 = vadd.f32 %v16803_v10, %v10190_v44  ;;  %v10205_v10 = vsel %vm10204_vm12, %v14908_v16, %v10201_v55 }
 0x96c   :  { %v10210_v38 = vsel %vm10207_vm4, %v10209_v43, %v10205_v10 }
 0x96d   :  { %v14795_v41 = vmul.f32 -1.442695, %v10192_v53 }
 0x96f   :  { %14911 = vpow2.f32 %v14795_v41 }
 0x970   :  { %14913 = vtanh.f32 %v9860_v9 }
 0x975   :  { %v14912_v21 = vpop.eup %14911 }
 0x976   :  { %v10235_v28 = vadd.f32 1.0, %v14912_v21  ;;  %v14914_v33 = vpop.eup %14913 }
 0x977   :  { %v10252_v30 = vmul.f32 %v14914_v33, %v10210_v38  ;;  %v14799_v38 = vld [vmem:[%s17850_s0 + $0x30] sm:$0x1f] }
 0x978   :  { %14915 = vrcp.f32 %v10235_v28  ;;  %v10247_v16 = vand.u32 2147483648, %v10235_v28  ;;  %v10245_v17 = vand.u32 2147483647, %v10235_v28  ;;  %vm10241_vm8 = vweird.f32 %v10235_v28 }
 0x979   :  { %v17085_v56 = vadd.f32 %v10252_v30, %v10251_v52  ;;  %v10800_v30 = vsel %vm267_vm0, %v14799_v38, 0  ;;  %v18662_v38 = vld [vmem:[#allocation29_spill] sm:$0xff] }
 0x97a   :  { %v10248_v37 = vor.u32 1.1754944e-38, %v10247_v16  ;;  %vm10246_vm10 = vcmp.eq.f32.partialorder %v10245_v17, 8.507059e+37  ;;  %v17151_v52 = vand.u32 4294901760, %v10800_v30  ;;  %v18637_v17 = vld [vmem:[#allocation14_spill] sm:$0xff] }
 0x97b   :  { %14917 = vtanh.f32 %v17085_v56 }
 0x97c   :  { %v17161_v16 = vsub.f32 %v10800_v30, %v17151_v52  ;;  %v18664_v30 = vld [vmem:[#allocation51_spill] sm:$0xff] }
 0x97e   :  { %v14916_v15 = vpop.eup %14915 }
 0x97f   :  { %v10237_v2 = vmul.f32 %v14916_v15, %v10235_v28  ;;  %vm10242_vm7 = vweird.f32 %v14916_v15 }
 0x980   :  { %vm10243_vm9 = vmor %vm10241_vm8, %vm10242_vm7 }
 0x981   :  { %v10238_v23 = vsub.f32 1.0, %v10237_v2  ;;  %v14918_v26 = vpop.eup %14917  ;;  %v18634_v2 = vld [vmem:[#allocation6_spill] sm:$0xff] }
 0x983   :  { %v10239_v61 = vmul.f32 %v14916_v15, %v10238_v23  ;;  %v18635_v23 = vld [vmem:[#allocation5_spill] sm:$0xff] }
 0x985   :  { %v10240_v13 = vadd.f32 %v14916_v15, %v10239_v61  ;;  %v18636_v61 = vld [vmem:[#allocation7_spill] sm:$0xff] }
 0x987   :  { %v10244_v32 = vsel %vm10243_vm9, %v14916_v15, %v10240_v13  ;;  %v18633_v15 = vld [vmem:[#allocation8_spill] sm:$0xff]  ;;  %v17170_v13 = vand.u32 4294901760, %v17161_v16 }
 0x988   :  { %v10249_v40 = vsel %vm10246_vm10, %v10248_v37, %v10244_v32  ;;  %v18638_v37 = vld [vmem:[#allocation15_spill] sm:$0xff]  ;;  %v18639_v32 = vld [vmem:[#allocation28_spill] sm:$0xff] }
 0x989   :  { %v10255_v46 = vmul.f32 %v14918_v26, %v10249_v40  ;;  %v18640_v26 = vld [vmem:[#allocation16_spill] sm:$0xff]  ;;  %v18641_v40 = vld [vmem:[#allocation30_spill] sm:$0xff] }
 0x98b   :  { %14796 = vst.msk [vmem:[%s17857_s7 + $0x28] sm:$0x1f] %vm1489_vm14, %v10255_v46  ;;  %v10259_v14 = vsel %vm78_vm13, %v10255_v46, 0  ;;  %v14124_v42 = vrot.slane %v10255_v46, 7  ;;  %v10822_v46 = vsub.f32 %v17161_v16, %v17170_v13 }
 0x98c   :  { %v17093_v0 = vand.u32 4294901760, %v10259_v14 }
 0x98d   :  { %v17097_v44 = vsel %vm18152_vm11, %v16823_v62, %v14124_v42  ;;  %v18643_v42 = vld [vmem:[#allocation19_spill] sm:$0xff] }
 0x98e   :  { %10327 = vmatmul.f32.vlgmr.msrb.gmra.mxu1 %v17093_v0  ;;  %v17101_v50 = vsub.f32 %v10259_v14, %v17093_v0  ;;  %v18642_v14 = vld [vmem:[#allocation9_spill] sm:$0xff] }
 0x98f   :  { %10549 = vmatpush.msrb.mxu1 %v15704_v24 }
 0x990   :  { %10357 = vmatmul.f32.vlgmr.msrb.gmra.mxu2 %v17101_v50  ;;  %v17106_v29 = vand.u32 4294901760, %v17101_v50 }
 0x991   :  { %10551 = vmatpush.msrb.mxu1 %v15712_v1  ;;  %10576 = vmatpush.msrb.mxu2 %v15717_v58 }
 0x992   :  { %10384 = vmatmul.f32.vlgmr.msrb.gmra.mxu3 %v17106_v29  ;;  %v10284_v62 = vsub.f32 %v17101_v50, %v17106_v29 }
 0x993   :  { %10601 = vmatpush.msrb.mxu3 %v15704_v24  ;;  %10580 = vmatpush.msrb.mxu2 %v18311_v48 }
 0x994   :  { %v17115_v53 = vand.u32 4294901760, %v10284_v62  ;;  %v18644_v62 = vld [vmem:[#allocation31_spill] sm:$0xff] }
 0x995   :  { %10603 = vmatpush.msrb.mxu3 %v15712_v1 }
 0x996   :  { %10286 = vmatmul.f32.vlgmr.msrb.gmra.mxu0 %v17115_v53  ;;  %10442 = vmatmul.f32.vlgmr.msra.gmra.mxu1 %v17093_v0 }
 0x997   :  { %10524 = vmatpush.msrb.mxu0 %v18312_v35  ;;  %10660 = vmatpush.msra.mxu1 %v18313_v57 }
 0x999   :  { %10527 = vmatpush.msrb.mxu0 %v18314_v36  ;;  %10666 = vmatpush.msra.mxu1 %v18315_v49 }
 0x99b   :  { %10672 = vmatpush.msra.mxu1 %v18316_v25 }
 0x99d   :  { %10678 = vmatpush.msra.mxu1 %v18317_v31 }
 0x99e   :  { %10417 = vmatmul.f32.vlgmr.msra.gmra.mxu0 %v17093_v0 }
 0x99f   :  { %10627 = vmatpush.msra.mxu0 %v15051_v3 }
 0x9a1   :  { %10629 = vmatpush.msra.mxu0 %v15053_v4 }
 0x9a3   :  { %10631 = vmatpush.msra.mxu0 %v15055_v5 }
 0x9a5   :  { %10633 = vmatpush.msra.mxu0 %v15063_v8 }
 0xa0b   :  { %v10328_v9 = vpop.f32.mrf.mxu1 }
 0xa13   :  { %v10287_v41 = vpop.f32.mrf.mxu0  ;;  %v10358_v55 = vpop.f32.mrf.mxu2 }
 0xa14   :  { %v10288_v6 = vadd.f32 %v16862_v7, %v10287_v41  ;;  %v10443_v21 = vpop.f32.mrf.mxu1  ;;  %v17187_v41 = vand.u32 4294901760, %v10822_v46  ;;  %v18665_v46 = vld [vmem:[#allocation41_spill] sm:$0xff] }
 0xa15   :  { %v10385_v63 = vpop.f32.mrf.mxu3 }
 0xa16   :  { %v10329_v45 = vadd.f32 %v10328_v9, %v10288_v6  ;;  %v18645_v9 = vld [vmem:[#allocation21_spill] sm:$0xff]  ;;  %v18646_v6 = vld [vmem:[#allocation32_spill] sm:$0xff] }
 0xa18   :  { %v10359_v54 = vadd.f32 %v10358_v55, %v10329_v45  ;;  %v18647_v45 = vld [vmem:[#allocation23_spill] sm:$0xff]  ;;  %v18648_v55 = vld [vmem:[#allocation26_spill] sm:$0xff] }
 0xa1a   :  { %v10386_v59 = vadd.f32 %v10385_v63, %v10359_v54  ;;  %v18649_v54 = vld [vmem:[#allocation17_spill] sm:$0xff]  ;;  %v18650_v63 = vld [vmem:[#allocation27_spill] sm:$0xff] }
 0xa1b   :  { %v10418_v60 = vpop.f32.mrf.mxu0 }
 0xa1c   :  { %v10419_v27 = vadd.f32 %v10418_v60, %v10386_v59  ;;  %v18651_v59 = vld [vmem:[#allocation34_spill] sm:$0xff] }
 0xa1d   :  { %v18652_v60 = vld [vmem:[#allocation18_spill] sm:$0xff] }
 0xa1e   :  { %v10444_v10 = vadd.f32 %v10443_v21, %v10419_v27  ;;  %v18653_v27 = vld [vmem:[#allocation25_spill] sm:$0xff]  ;;  %v18654_v21 = vld [vmem:[#allocation22_spill] sm:$0xff] }
 0xa20   :  { %v10446_v39 = vmax.f32 %v10444_v10, 0.0  ;;  %v18655_v10 = vld [vmem:[#allocation24_spill] sm:$0xff] }
 0xa22   :  { %v10448_v28 = vsel %vm1686_vm15, %v10446_v39, 0  ;;  %v18656_v39 = vld [vmem:[#allocation20_spill] sm:$0xff] }
 0xa23   :  { %v10468_v33 = vand.u32 4294901760, %v10448_v28 }
 0xa25   :  { %v10469_v47 = vsub.f32 %v10448_v28, %v10468_v33  ;;  %10504 = vmatmul.f32.vlgmr.msra.gmra.mxu3 %v10468_v33  ;;  %v18657_v28 = vld [vmem:[#allocation33_spill] sm:$0xff] }
 0xa26   :  { %10727 = vmatpush.msra.mxu3 %v15051_v3 }
 0xa27   :  { %v10470_v43 = vand.u32 4294901760, %v10469_v47  ;;  %10530 = vmatmul.f32.vlgmr.msrb.gmra.mxu0 %v10469_v47 }
 0xa28   :  { %10729 = vmatpush.msra.mxu3 %v15053_v4  ;;  %10756 = vmatpush.msrb.mxu0 %v15093_v18 }
 0xa29   :  { %v10471_v7 = vsub.f32 %v10469_v47, %v10470_v43  ;;  %10555 = vmatmul.f32.vlgmr.msrb.gmra.mxu1 %v10470_v43  ;;  %v18659_v47 = vld [vmem:[#allocation49_spill] sm:$0xff] }
 0xa2a   :  { %10731 = vmatpush.msra.mxu3 %v15055_v5  ;;  %10760 = vmatpush.msrb.mxu0 %v15096_v19  ;;  %v18660_v43 = vld [vmem:[#allocation37_spill] sm:$0xff] }
 0xa2b   :  { %v10472_v51 = vand.u32 4294901760, %v10471_v7  ;;  %10787 = vmatpush.msrb.mxu1 %v15051_v3  ;;  %v18661_v7 = vld [vmem:[#allocation50_spill] sm:$0xff] }
 0xa2c   :  { %10733 = vmatpush.msra.mxu3 %v15063_v8  ;;  %10764 = vmatpush.msrb.mxu0 %v15099_v20 }
 0xa2d   :  { %10473 = vmatmul.f32.vlgmr.msra.gmra.mxu2 %v10472_v51  ;;  %10605 = vmatmul.f32.vlgmr.msrb.gmra.mxu3 %v10468_v33  ;;  %v18663_v51 = vld [vmem:[#allocation39_spill] sm:$0xff] }
 0xa2e   :  { %10789 = vmatpush.msrb.mxu1 %v15053_v4  ;;  %10698 = vmatpush.msra.mxu2 %v15071_v11 }
 0xa2f   :  { %10639 = vmatmul.f32.vlgmr.msra.gmra.mxu0 %v17115_v53  ;;  %10848 = vmatpush.msrb.mxu3 %v15138_v34 }
 0xa30   :  { %10768 = vmatpush.msrb.mxu0 %v15106_v22  ;;  %10791 = vmatpush.msrb.mxu1 %v15055_v5 }
 0xa31   :  { %10680 = vmatmul.f32.vlgmr.msra.gmra.mxu1 %v17093_v0  ;;  %10701 = vmatpush.msra.mxu2 %v15075_v12 }
 0xa32   :  { %10793 = vmatpush.msrb.mxu1 %v15063_v8  ;;  %10871 = vmatpush.msra.mxu0 %v18633_v15 }
 0xa33   :  { %10704 = vmatpush.msra.mxu2 %v18634_v2 }
 0xa34   :  { %10894 = vmatpush.msra.mxu1 %v18635_v23 }
 0xa35   :  { %10582 = vmatmul.f32.vlgmr.msrb.gmra.mxu2 %v10468_v33  ;;  %10737 = vmatmul.f32.vlgmr.msra.gmra.mxu3 %v17106_v29  ;;  %v18658_v33 = vld [vmem:[#allocation35_spill] sm:$0xff] }
 0xa36   :  { %10707 = vmatpush.msra.mxu2 %v18636_v61  ;;  %10942 = vmatpush.msra.mxu3 %v18635_v23 }
 0xa37   :  { %10770 = vmatmul.f32.vlgmr.msrb.gmra.mxu0 %v17093_v0 }
 0xa38   :  { %10818 = vmatpush.msrb.mxu2 %v18635_v23  ;;  %10962 = vmatpush.msrb.mxu0 %v18637_v17 }
 0xa39   :  { %10795 = vmatmul.f32.vlgmr.msrb.gmra.mxu1 %v17093_v0 }
 0xa3a   :  { %10964 = vmatpush.msrb.mxu0 %v18638_v37  ;;  %10995 = vmatpush.msrb.mxu1 %v18639_v32 }
 0xa3c   :  { %10966 = vmatpush.msrb.mxu0 %v18640_v26  ;;  %11001 = vmatpush.msrb.mxu1 %v18641_v40 }
 0xa3d   :  { %10710 = vmatmul.f32.vlgmr.msra.gmra.mxu2 %v17101_v50  ;;  %10850 = vmatmul.f32.vlgmr.msrb.gmra.mxu3 %v17151_v52 }
 0xa3e   :  { %10920 = vmatpush.msra.mxu2 %v18642_v14  ;;  %10968 = vmatpush.msrb.mxu0 %v18643_v42 }
 0xa3f   :  { %10874 = vmatmul.f32.vlgmr.msra.gmra.mxu0 %v17161_v16  ;;  %11007 = vmatpush.msrb.mxu1 %v18644_v62 }
 0xa40   :  { %11062 = vmatpush.msrb.mxu3 %v18637_v17  ;;  %11091 = vmatpush.msra.mxu0 %v18645_v9 }
 0xa41   :  { %10898 = vmatmul.f32.vlgmr.msra.gmra.mxu1 %v17170_v13 }
 0xa42   :  { %11013 = vmatpush.msrb.mxu1 %v18646_v6  ;;  %11064 = vmatpush.msrb.mxu3 %v18638_v37 }
 0xa43   :  { %11095 = vmatpush.msra.mxu0 %v18647_v45 }
 0xa44   :  { %11122 = vmatpush.msra.mxu1 %v18637_v17  ;;  %11066 = vmatpush.msrb.mxu3 %v18640_v26 }
 0xa45   :  { %10824 = vmatmul.f32.vlgmr.msrb.gmra.mxu2 %v17187_v41  ;;  %10944 = vmatmul.f32.vlgmr.msra.gmra.mxu3 %v17151_v52 }
 0xa46   :  { %11068 = vmatpush.msrb.mxu3 %v18643_v42  ;;  %11099 = vmatpush.msra.mxu0 %v18648_v55 }
 0xa47   :  { %10974 = vmatmul.f32.vlgmr.msrb.gmra.mxu0 %v17115_v53  ;;  %11124 = vmatpush.msra.mxu1 %v18638_v37 }
 0xa48   :  { %11033 = vmatpush.msrb.mxu2 %v18649_v54  ;;  %11103 = vmatpush.msra.mxu0 %v18650_v63 }
 0xa49   :  { %11015 = vmatmul.f32.vlgmr.msrb.gmra.mxu1 %v17093_v0  ;;  %11180 = vmatpush.msra.mxu3 %v18651_v59 }
 0xa4a   :  { %11126 = vmatpush.msra.mxu1 %v18640_v26  ;;  %11036 = vmatpush.msrb.mxu2 %v18652_v60 }
 0xa4b   :  { %11203 = vmatpush.msrb.mxu0 %v18653_v27 }
 0xa4c   :  { %11128 = vmatpush.msra.mxu1 %v18643_v42  ;;  %11039 = vmatpush.msrb.mxu2 %v18654_v21 }
 0xa4d   :  { %10922 = vmatmul.f32.vlgmr.msra.gmra.mxu2 %v17151_v52  ;;  %11072 = vmatmul.f32.vlgmr.msrb.gmra.mxu3 %v17106_v29 }
 0xa4e   :  { %11042 = vmatpush.msrb.mxu2 %v18655_v10  ;;  %11226 = vmatpush.msrb.mxu1 %v18656_v39 }
 0xa4f   :  { %11105 = vmatmul.f32.vlgmr.msra.gmra.mxu0 %v17093_v0  ;;  %11274 = vmatpush.msrb.mxu3 %v18656_v39 }
 0xa50   :  { %11150 = vmatpush.msra.mxu2 %v18656_v39  ;;  %11294 = vmatpush.msra.mxu0 %v18657_v28 }
 0xa51   :  { %11130 = vmatmul.f32.vlgmr.msra.gmra.mxu1 %v17093_v0 }
 0xa52   :  { %11296 = vmatpush.msra.mxu0 %v18658_v33  ;;  %11327 = vmatpush.msra.mxu1 %v18659_v47  ;;  %v18666_v47 = vld [vmem:[#allocation52_spill] sm:$0xff] }
 0xa54   :  { %11298 = vmatpush.msra.mxu0 %v18660_v43  ;;  %11333 = vmatpush.msra.mxu1 %v18661_v7  ;;  %v18667_v7 = vld [vmem:[#allocation43_spill] sm:$0xff] }
 0xa55   :  { %11045 = vmatmul.f32.vlgmr.msrb.gmra.mxu2 %v17101_v50  ;;  %11182 = vmatmul.f32.vlgmr.msra.gmra.mxu3 %v17151_v52 }
 0xa56   :  { %11252 = vmatpush.msrb.mxu2 %v18662_v38  ;;  %11300 = vmatpush.msra.mxu0 %v18663_v51  ;;  %v18672_v38 = vld [vmem:[#allocation38_spill] sm:$0xff] }
 0xa57   :  { %11206 = vmatmul.f32.vlgmr.msrb.gmra.mxu0 %v17161_v16  ;;  %11339 = vmatpush.msra.mxu1 %v18664_v30  ;;  %v18668_v30 = vld [vmem:[#allocation46_spill] sm:$0xff] }
 0xa58   :  { %11394 = vmatpush.msra.mxu3 %v18657_v28  ;;  %11423 = vmatpush.msrb.mxu0 %v18665_v46  ;;  %v18670_v46 = vld [vmem:[#allocation47_spill] sm:$0xff] }
 0xa59   :  { %11230 = vmatmul.f32.vlgmr.msrb.gmra.mxu1 %v17170_v13 }
 0xa5a   :  { %11345 = vmatpush.msra.mxu1 %v18666_v47  ;;  %11396 = vmatpush.msra.mxu3 %v18658_v33  ;;  %v18669_v47 = vld [vmem:[#allocation36_spill] sm:$0xff] }
 0xa5b   :  { %11427 = vmatpush.msrb.mxu0 %v18667_v7  ;;  %v18671_v7 = vld [vmem:[#allocation53_spill] sm:$0xff] }
 0xa5c   :  { %11454 = vmatpush.msrb.mxu1 %v18657_v28  ;;  %11398 = vmatpush.msra.mxu3 %v18660_v43  ;;  %v18673_v28 = vld [vmem:[#allocation45_spill] sm:$0xff] }
 0xa5d   :  { %11156 = vmatmul.f32.vlgmr.msra.gmra.mxu2 %v17187_v41  ;;  %11276 = vmatmul.f32.vlgmr.msrb.gmra.mxu3 %v17151_v52 }
 0xa5e   :  { %11400 = vmatpush.msra.mxu3 %v18663_v51  ;;  %11431 = vmatpush.msrb.mxu0 %v18668_v30  ;;  %v18674_v30 = vld [vmem:[#allocation42_spill] sm:$0xff] }
 0xa5f   :  { %11306 = vmatmul.f32.vlgmr.msra.gmra.mxu0 %v17115_v53  ;;  %11456 = vmatpush.msrb.mxu1 %v18658_v33  ;;  %v18685_v33 = vld [vmem:[#allocation61_spill] sm:$0xff] }
 0xa60   :  { %11365 = vmatpush.msra.mxu2 %v18669_v47  ;;  %11435 = vmatpush.msrb.mxu0 %v18670_v46  ;;  %v18675_v47 = vld [vmem:[#allocation44_spill] sm:$0xff] }
 0xa61   :  { %11347 = vmatmul.f32.vlgmr.msra.gmra.mxu1 %v17093_v0  ;;  %11512 = vmatpush.msrb.mxu3 %v18671_v7  ;;  %v18676_v46 = vld [vmem:[#allocation40_spill] sm:$0xff]  ;;  %v18677_v7 = vld [vmem:[#allocation54_spill] sm:$0xff] }
 0xa62   :  { %11458 = vmatpush.msrb.mxu1 %v18660_v43  ;;  %11368 = vmatpush.msra.mxu2 %v18672_v38  ;;  %v18680_v38 = vld [vmem:[#allocation57_spill] sm:$0xff]  ;;  %v18683_v43 = vld [vmem:[#allocation59_spill] sm:$0xff] }
 0xa63   :  { %11535 = vmatpush.msra.mxu0 %v18673_v28  ;;  %v18678_v28 = vld [vmem:[#allocation55_spill] sm:$0xff] }
 0xa64   :  { %11460 = vmatpush.msrb.mxu1 %v18663_v51  ;;  %11371 = vmatpush.msra.mxu2 %v18674_v30  ;;  %v18679_v30 = vld [vmem:[#allocation69_spill] sm:$0xff]  ;;  %v18681_v51 = vld [vmem:[#allocation70_spill] sm:$0xff] }
 0xa65   :  { %11254 = vmatmul.f32.vlgmr.msrb.gmra.mxu2 %v17151_v52  ;;  %11404 = vmatmul.f32.vlgmr.msra.gmra.mxu3 %v17106_v29 }
 0xa66   :  { %11374 = vmatpush.msra.mxu2 %v18675_v47  ;;  %11558 = vmatpush.msra.mxu1 %v18676_v46  ;;  %v18682_v47 = vld [vmem:[#allocation48_spill] sm:$0xff] }
 0xa67   :  { %11437 = vmatmul.f32.vlgmr.msrb.gmra.mxu0 %v17093_v0  ;;  %11606 = vmatpush.msra.mxu3 %v18676_v46 }
 0xa68   :  { %11482 = vmatpush.msrb.mxu2 %v18676_v46  ;;  %11626 = vmatpush.msrb.mxu0 %v18677_v7  ;;  %v18684_v46 = vld [vmem:[#allocation71_spill] sm:$0xff] }
 0xa69   :  { %11462 = vmatmul.f32.vlgmr.msrb.gmra.mxu1 %v17093_v0 }
 0xa6a   :  { %11628 = vmatpush.msrb.mxu0 %v18678_v28  ;;  %11659 = vmatpush.msrb.mxu1 %v18679_v30  ;;  %v18686_v30 = vld [vmem:[#allocation72_spill] sm:$0xff] }
 0xa6c   :  { %11630 = vmatpush.msrb.mxu0 %v18680_v38  ;;  %11665 = vmatpush.msrb.mxu1 %v18681_v51  ;;  %v18687_v51 = vld [vmem:[#allocation63_spill] sm:$0xff] }
 0xa6d   :  { %11377 = vmatmul.f32.vlgmr.msra.gmra.mxu2 %v17101_v50  ;;  %11514 = vmatmul.f32.vlgmr.msrb.gmra.mxu3 %v17151_v52 }
 0xa6e   :  { %11584 = vmatpush.msra.mxu2 %v18682_v47  ;;  %11632 = vmatpush.msrb.mxu0 %v18683_v43  ;;  %v18692_v47 = vld [vmem:[#allocation58_spill] sm:$0xff] }
 0xa6f   :  { %11538 = vmatmul.f32.vlgmr.msra.gmra.mxu0 %v17161_v16  ;;  %11671 = vmatpush.msrb.mxu1 %v18684_v46  ;;  %v18688_v46 = vld [vmem:[#allocation66_spill] sm:$0xff] }
 0xa70   :  { %11726 = vmatpush.msrb.mxu3 %v18677_v7  ;;  %11755 = vmatpush.msra.mxu0 %v18685_v33  ;;  %v18690_v33 = vld [vmem:[#allocation67_spill] sm:$0xff] }
 0xa71   :  { %11562 = vmatmul.f32.vlgmr.msra.gmra.mxu1 %v17170_v13 }
 0xa72   :  { %11677 = vmatpush.msrb.mxu1 %v18686_v30  ;;  %11728 = vmatpush.msrb.mxu3 %v18678_v28  ;;  %v18689_v30 = vld [vmem:[#allocation56_spill] sm:$0xff] }
 0xa73   :  { %11759 = vmatpush.msra.mxu0 %v18687_v51  ;;  %v18691_v51 = vld [vmem:[#allocation73_spill] sm:$0xff] }
 0xa74   :  { %11786 = vmatpush.msra.mxu1 %v18677_v7  ;;  %11730 = vmatpush.msrb.mxu3 %v18680_v38  ;;  %v18693_v7 = vld [vmem:[#allocation65_spill] sm:$0xff] }
 0xa75   :  { %11488 = vmatmul.f32.vlgmr.msrb.gmra.mxu2 %v17187_v41  ;;  %11608 = vmatmul.f32.vlgmr.msra.gmra.mxu3 %v17151_v52 }
 0xa76   :  { %11732 = vmatpush.msrb.mxu3 %v18683_v43  ;;  %11763 = vmatpush.msra.mxu0 %v18688_v46  ;;  %v18694_v46 = vld [vmem:[#allocation62_spill] sm:$0xff] }
 0xa77   :  { %11638 = vmatmul.f32.vlgmr.msrb.gmra.mxu0 %v17115_v53  ;;  %11788 = vmatpush.msra.mxu1 %v18678_v28  ;;  %v18695_v53 = vld [vmem:[#allocation64_spill] sm:$0xff] }
 0xa78   :  { %11697 = vmatpush.msrb.mxu2 %v18689_v30  ;;  %11767 = vmatpush.msra.mxu0 %v18690_v33  ;;  %v18696_v33 = vld [vmem:[#allocation60_spill] sm:$0xff] }
 0xa79   :  { %11679 = vmatmul.f32.vlgmr.msrb.gmra.mxu1 %v17093_v0  ;;  %11844 = vmatpush.msra.mxu3 %v18691_v51  ;;  %v18700_v51 = vld [vmem:[#allocation89_spill] sm:$0xff]  ;;  %v18703_v30 = vld [vmem:[#allocation92_spill] sm:$0xff] }
 0xa7a   :  { %11790 = vmatpush.msra.mxu1 %v18680_v38  ;;  %11700 = vmatpush.msrb.mxu2 %v18692_v47  ;;  %v18697_v47 = vld [vmem:[#allocation76_spill] sm:$0xff] }
 0xa7b   :  { %11867 = vmatpush.msrb.mxu0 %v18693_v7  ;;  %v18698_v7 = vld [vmem:[#allocation85_spill] sm:$0xff] }
 0xa7c   :  { %11792 = vmatpush.msra.mxu1 %v18683_v43  ;;  %11703 = vmatpush.msrb.mxu2 %v18694_v46  ;;  %v18699_v46 = vld [vmem:[#allocation78_spill] sm:$0xff] }
 0xa7d   :  { %11586 = vmatmul.f32.vlgmr.msra.gmra.mxu2 %v17151_v52  ;;  %11736 = vmatmul.f32.vlgmr.msrb.gmra.mxu3 %v17106_v29  ;;  %v18701_v29 = vld [vmem:[#allocation81_spill] sm:$0xff] }
 0xa7e   :  { %11706 = vmatpush.msrb.mxu2 %v18695_v53  ;;  %11938 = vmatpush.msrb.mxu3 %v18696_v33  ;;  %v18702_v53 = vld [vmem:[#allocation68_spill] sm:$0xff] }
 0xa7f   :  { %11769 = vmatmul.f32.vlgmr.msra.gmra.mxu0 %v17093_v0  ;;  %11890 = vmatpush.msrb.mxu1 %v18696_v33 }
 0xa80   :  { %11814 = vmatpush.msra.mxu2 %v18696_v33  ;;  %12026 = vmatpush.msra.mxu0 %v18697_v47 }
 0xa81   :  { %11794 = vmatmul.f32.vlgmr.msra.gmra.mxu1 %v17093_v0  ;;  %v18704_v0 = vld [vmem:[#allocation93_spill] sm:$0xff] }
 0xa82   :  { %12059 = vmatpush.msra.mxu1 %v18698_v7  ;;  %12028 = vmatpush.msra.mxu0 %v18699_v46  ;;  %v18705_v7 = vld [vmem:[#allocation84_spill] sm:$0xff] }
 0xa84   :  { %12065 = vmatpush.msra.mxu1 %v18700_v51  ;;  %12030 = vmatpush.msra.mxu0 %v18701_v29  ;;  %v18715_v51 = vld [vmem:[#allocation87_spill] sm:$0xff] }
 0xa85   :  { %11709 = vmatmul.f32.vlgmr.msrb.gmra.mxu2 %v17101_v50  ;;  %11846 = vmatmul.f32.vlgmr.msra.gmra.mxu3 %v17151_v52  ;;  %v18706_v50 = vld [vmem:[#allocation79_spill] sm:$0xff] }
 0xa86   :  { %11916 = vmatpush.msrb.mxu2 %v18702_v53  ;;  %12071 = vmatpush.msra.mxu1 %v18703_v30  ;;  %v18707_v30 = vld [vmem:[#allocation82_spill] sm:$0xff] }
 0xa87   :  { %11870 = vmatmul.f32.vlgmr.msrb.gmra.mxu0 %v17161_v16  ;;  %12126 = vmatpush.msra.mxu3 %v18697_v47  ;;  %v18708_v16 = vld [vmem:[#allocation77_spill] sm:$0xff]  ;;  %v18712_v53 = vld [vmem:[#allocation90_spill] sm:$0xff] }
 0xa88   :  { %12077 = vmatpush.msra.mxu1 %v18704_v0  ;;  %12032 = vmatpush.msra.mxu0 %v18705_v7  ;;  %v18710_v0 = vld [vmem:[#allocation80_spill] sm:$0xff] }
 0xa89   :  { %11894 = vmatmul.f32.vlgmr.msrb.gmra.mxu1 %v17170_v13  ;;  %12128 = vmatpush.msra.mxu3 %v18699_v46  ;;  %v18709_v13 = vld [vmem:[#allocation86_spill] sm:$0xff] }
 0xa8a   :  { %12186 = vmatpush.msrb.mxu1 %v18697_v47  ;;  %12155 = vmatpush.msrb.mxu0 %v18706_v50  ;;  %v18711_v50 = vld [vmem:[#allocation97_spill] sm:$0xff] }
 0xa8b   :  { %12130 = vmatpush.msra.mxu3 %v18701_v29 }
 0xa8c   :  { %12188 = vmatpush.msrb.mxu1 %v18699_v46  ;;  %12159 = vmatpush.msrb.mxu0 %v18707_v30  ;;  %v18713_v30 = vld [vmem:[#allocation83_spill] sm:$0xff] }
 0xa8d   :  { %11820 = vmatmul.f32.vlgmr.msra.gmra.mxu2 %v17187_v41  ;;  %11940 = vmatmul.f32.vlgmr.msrb.gmra.mxu3 %v17151_v52  ;;  %v18714_v41 = vld [vmem:[#allocation98_spill] sm:$0xff] }
 0xa8e   :  { %12097 = vmatpush.msra.mxu2 %v18708_v16  ;;  %12132 = vmatpush.msra.mxu3 %v18705_v7 }
 0xa8f   :  { %12190 = vmatpush.msrb.mxu1 %v18701_v29  ;;  %12163 = vmatpush.msrb.mxu0 %v18709_v13 }
 0xa90   :  { %12100 = vmatpush.msra.mxu2 %v18710_v0  ;;  %12248 = vmatpush.msrb.mxu3 %v18711_v50 }
 0xa91   :  { %12192 = vmatpush.msrb.mxu1 %v18705_v7  ;;  %12167 = vmatpush.msrb.mxu0 %v18712_v53  ;;  %v18716_v53 = vld [vmem:[#allocation75_spill] sm:$0xff] }
 0xa92   :  { %12103 = vmatpush.msra.mxu2 %v18713_v30  ;;  %12254 = vmatpush.msrb.mxu3 %v18714_v41 }
 0xa94   :  { %12106 = vmatpush.msra.mxu2 %v18715_v51 }
 0xa95   :  { %11918 = vmatmul.f32.vlgmr.msrb.gmra.mxu2 %v17151_v52 }
 0xa96   :  { %12217 = vmatpush.msrb.mxu2 %v15704_v24 }
 0xa98   :  { %12219 = vmatpush.msrb.mxu2 %v15712_v1 }
 0xaa4   :  { %v10531_v13 = vpop.f32.mrf.mxu0 }
 0xaa6   :  { %v10556_v0 = vpop.f32.mrf.mxu1 }
 0xaa8   :  { %v10505_v16 = vpop.f32.mrf.mxu3 }
 0xaac   :  { %v10640_v50 = vpop.f32.mrf.mxu0 }
 0xaae   :  { %v10681_v29 = vpop.f32.mrf.mxu1 }
 0xab0   :  { %v10474_v7 = vpop.f32.mrf.mxu2  ;;  %v10606_v46 = vpop.f32.mrf.mxu3 }
 0xab1   :  { %v10475_v47 = vadd.f32 %v18716_v53, %v10474_v7 }
 0xab3   :  { %v10506_v30 = vadd.f32 %v10505_v16, %v10475_v47  ;;  %v10682_v16 = vadd.f32 %v10681_v29, %v10640_v50 }
 0xab4   :  { %v10771_v33 = vpop.f32.mrf.mxu0 }
 0xab5   :  { %v10532_v41 = vadd.f32 %v10531_v13, %v10506_v30 }
 0xab6   :  { %v10796_v43 = vpop.f32.mrf.mxu1 }
 0xab7   :  { %v10557_v51 = vadd.f32 %v10556_v0, %v10532_v41 }
 0xab8   :  { %v10583_v38 = vpop.f32.mrf.mxu2  ;;  %v10738_v52 = vpop.f32.mrf.mxu3 }
 0xab9   :  { %v10584_v28 = vadd.f32 %v10583_v38, %v10557_v51 }
 0xabb   :  { %v10607_v39 = vadd.f32 %v10606_v46, %v10584_v28 }
 0xabc   :  { %v10875_v10 = vpop.f32.mrf.mxu0 }
 0xabd   :  { %14797 = vst.msk [vmem:[%s17855_s5 + $0x28] sm:$0x1f] %vm1849_vm1, %v10607_v39 }
 0xabe   :  { %v10899_v21 = vpop.f32.mrf.mxu1 }
 0xac0   :  { %v10711_v27 = vpop.f32.mrf.mxu2  ;;  %v10851_v60 = vpop.f32.mrf.mxu3 }
 0xac1   :  { %v10712_v38 = vadd.f32 %v10711_v27, %v10682_v16 }
 0xac3   :  { %v10739_v28 = vadd.f32 %v10738_v52, %v10712_v38 }
 0xac4   :  { %v10975_v59 = vpop.f32.mrf.mxu0 }
 0xac5   :  { %v10772_v55 = vadd.f32 %v10771_v33, %v10739_v28 }
 0xac6   :  { %v11016_v7 = vpop.f32.mrf.mxu1 }
 0xac7   :  { %v11017_v51 = vadd.f32 %v11016_v7, %v10975_v59  ;;  %v10797_v9 = vadd.f32 %v10796_v43, %v10772_v55 }
 0xac8   :  { %v10825_v47 = vpop.f32.mrf.mxu2  ;;  %v10945_v53 = vpop.f32.mrf.mxu3 }
 0xac9   :  { %v10826_v26 = vadd.f32 %v10825_v47, %v10797_v9 }
 0xacb   :  { %v10852_v37 = vadd.f32 %v10851_v60, %v10826_v26 }
 0xacc   :  { %v11106_v30 = vpop.f32.mrf.mxu0 }
 0xacd   :  { %v10876_v7 = vadd.f32 %v10875_v10, %v10852_v37  ;;  %v17345_v37 = vld [vmem:[%s17852_s2] ss:$0 sm:$0xff] }
 0xace   :  { %v11131_v0 = vpop.f32.mrf.mxu1 }
 0xacf   :  { %v10900_v33 = vadd.f32 %v10899_v21, %v10876_v7 }
 0xad0   :  { %v10923_v13 = vpop.f32.mrf.mxu2  ;;  %v11073_v41 = vpop.f32.mrf.mxu3 }
 0xad1   :  { %v10924_v55 = vadd.f32 %v10923_v13, %v10900_v33 }
 0xad3   :  { %v10946_v43 = vadd.f32 %v10945_v53, %v10924_v55 }
 0xad4   :  { %v11207_v46 = vpop.f32.mrf.mxu0 }
 0xad6   :  { %v11231_v45 = vpop.f32.mrf.mxu1 }
 0xad8   :  { %v11046_v63 = vpop.f32.mrf.mxu2  ;;  %v11183_v54 = vpop.f32.mrf.mxu3 }
 0xad9   :  { %v11047_v39 = vadd.f32 %v11046_v63, %v11017_v51 }
 0xadb   :  { %v11074_v6 = vadd.f32 %v11073_v41, %v11047_v39 }
 0xadc   :  { %v11307_v29 = vpop.f32.mrf.mxu0 }
 0xadd   :  { %v11107_v62 = vadd.f32 %v11106_v30, %v11074_v6 }
 0xade   :  { %v11348_v32 = vpop.f32.mrf.mxu1 }
 0xadf   :  { %v11132_v42 = vadd.f32 %v11131_v0, %v11107_v62  ;;  %v11349_v30 = vadd.f32 %v11348_v32, %v11307_v29 }
 0xae0   :  { %v11157_v14 = vpop.f32.mrf.mxu2  ;;  %v11277_v40 = vpop.f32.mrf.mxu3 }
 0xae1   :  { %v11158_v50 = vadd.f32 %v11157_v14, %v11132_v42 }
 0xae3   :  { %v11184_v27 = vadd.f32 %v11183_v54, %v11158_v50  ;;  %v10948_v54 = vadd.f32 %v17345_v37, %v10946_v43 }
 0xae4   :  { %v11438_v38 = vpop.f32.mrf.mxu0 }
 0xae5   :  { %v11208_v16 = vadd.f32 %v11207_v46, %v11184_v27  ;;  %v14800_v21 = vmul.f32 -1.442695, %v10948_v54 }
 0xae6   :  { %v11463_v63 = vpop.f32.mrf.mxu1 }
 0xae7   :  { %v11232_v28 = vadd.f32 %v11231_v45, %v11208_v16  ;;  %v17351_v45 = vld [vmem:[%s17852_s2 + $0x1] ss:$0 sm:$0xff]  ;;  %14919 = vpow2.f32 %v14800_v21 }
 0xae8   :  { %v11255_v52 = vpop.f32.mrf.mxu2  ;;  %v11405_v59 = vpop.f32.mrf.mxu3 }
 0xae9   :  { %v11256_v6 = vadd.f32 %v11255_v52, %v11232_v28 }
 0xaeb   :  { %v11278_v9 = vadd.f32 %v11277_v40, %v11256_v6 }
 0xaec   :  { %v11539_v47 = vpop.f32.mrf.mxu0 }
 0xaed   :  { %v11280_v60 = vadd.f32 %v17351_v45, %v11278_v9  ;;  %v14920_v29 = vpop.eup %14919 }
 0xaee   :  { %v11563_v42 = vpop.f32.mrf.mxu1  ;;  %v11948_v33 = vadd.f32 1.0, %v14920_v29 }
 0xaef   :  { %v14801_v10 = vmul.f32 -1.442695, %v11280_v60 }
 0xaf0   :  { %v11378_v41 = vpop.f32.mrf.mxu2  ;;  %v11515_v62 = vpop.f32.mrf.mxu3  ;;  %vm11954_vm4 = vweird.f32 %v11948_v33 }
 0xaf1   :  { %v11379_v14 = vadd.f32 %v11378_v41, %v11349_v30  ;;  %14921 = vpow2.f32 %v14801_v10 }
 0xaf2   :  { %14923 = vrcp.f32 %v11948_v33 }
 0xaf3   :  { %v11406_v32 = vadd.f32 %v11405_v59, %v11379_v14 }
 0xaf4   :  { %v11639_v0 = vpop.f32.mrf.mxu0 }
 0xaf5   :  { %v11439_v53 = vadd.f32 %v11438_v38, %v11406_v32 }
 0xaf6   :  { %v11680_v51 = vpop.f32.mrf.mxu1 }
 0xaf7   :  { %v11464_v46 = vadd.f32 %v11463_v63, %v11439_v53  ;;  %v11681_v50 = vadd.f32 %v11680_v51, %v11639_v0  ;;  %v14922_v52 = vpop.eup %14921 }
 0xaf8   :  { %v11489_v26 = vpop.f32.mrf.mxu2  ;;  %v11609_v40 = vpop.f32.mrf.mxu3  ;;  %v11967_v59 = vadd.f32 1.0, %v14922_v52 }
 0xaf9   :  { %v11490_v27 = vadd.f32 %v11489_v26, %v11464_v46  ;;  %v14924_v32 = vpop.eup %14923 }
 0xafa   :  { %14925 = vrcp.f32 %v11967_v59  ;;  %vm11955_vm12 = vweird.f32 %v14924_v32  ;;  %vm11973_vm7 = vweird.f32 %v11967_v59 }
 0xafb   :  { %v11516_v41 = vadd.f32 %v11515_v62, %v11490_v27  ;;  %v11950_v62 = vmul.f32 %v14924_v32, %v11948_v33  ;;  %vm11956_vm8 = vmor %vm11954_vm4, %vm11955_vm12 }
 0xafc   :  { %v11770_v28 = vpop.f32.mrf.mxu0 }
 0xafd   :  { %v11540_v30 = vadd.f32 %v11539_v47, %v11516_v41  ;;  %v11951_v47 = vsub.f32 1.0, %v11950_v62 }
 0xafe   :  { %v11795_v6 = vpop.f32.mrf.mxu1 }
 0xaff   :  { %v11564_v60 = vadd.f32 %v11563_v42, %v11540_v30  ;;  %v17357_v42 = vld [vmem:[%s17852_s2 + $0x3] ss:$0 sm:$0xff]  ;;  %v11960_v30 = vand.u32 2147483648, %v11948_v33 }
 0xb00   :  { %v11587_v13 = vpop.f32.mrf.mxu2  ;;  %v11737_v39 = vpop.f32.mrf.mxu3 }
 0xb01   :  { %v14926_v10 = vpop.eup %14925  ;;  %v11588_v0 = vadd.f32 %v11587_v13, %v11564_v60  ;;  %v17363_v13 = vld [vmem:[%s17852_s2 + $0x2] ss:$0 sm:$0xff] }
 0xb02   :  { %v11969_v46 = vmul.f32 %v14926_v10, %v11967_v59  ;;  %vm11974_vm2 = vweird.f32 %v14926_v10 }
 0xb03   :  { %v11610_v27 = vadd.f32 %v11609_v40, %v11588_v0  ;;  %v11952_v40 = vmul.f32 %v14924_v32, %v11951_v47  ;;  %vm11975_vm9 = vmor %vm11973_vm7, %vm11974_vm2  ;;  %v11961_v0 = vor.u32 1.1754944e-38, %v11960_v30  ;;  %vm14140_vm7 = vcmask 1045504  }
 0xb04   :  { %v11871_v54 = vpop.f32.mrf.mxu0 }
 0xb06   :  { %v11895_v21 = vpop.f32.mrf.mxu1 }
 0xb08   :  { %v11710_v7 = vpop.f32.mrf.mxu2  ;;  %v11847_v43 = vpop.f32.mrf.mxu3 }
 0xb09   :  { %v11711_v16 = vadd.f32 %v11710_v7, %v11681_v50  ;;  %v11970_v7 = vsub.f32 1.0, %v11969_v46 }
 0xb0b   :  { %v11738_v55 = vadd.f32 %v11737_v39, %v11711_v16 }
 0xb0d   :  { %v11771_v38 = vadd.f32 %v11770_v28, %v11738_v55  ;;  %v11612_v28 = vadd.f32 %v17363_v13, %v11610_v27  ;;  %v11971_v55 = vmul.f32 %v14926_v10, %v11970_v7 }
 0xb0f   :  { %v11796_v9 = vadd.f32 %v11795_v6, %v11771_v38  ;;  %v11953_v6 = vadd.f32 %v14924_v32, %v11952_v40  ;;  %v11972_v38 = vadd.f32 %v14926_v10, %v11971_v55 }
 0xb10   :  { %v11821_v63 = vpop.f32.mrf.mxu2  ;;  %v11941_v29 = vpop.f32.mrf.mxu3 }
 0xb11   :  { %v11822_v14 = vadd.f32 %v11821_v63, %v11796_v9  ;;  %v11958_v9 = vand.u32 2147483647, %v11948_v33  ;;  %v11977_v63 = vand.u32 2147483647, %v11967_v59  ;;  %v11976_v60 = vsel %vm11975_vm9, %v14926_v10, %v11972_v38 }
 0xb13   :  { %v11848_v26 = vadd.f32 %v11847_v43, %v11822_v14  ;;  %v11979_v43 = vand.u32 2147483648, %v11967_v59  ;;  %vm11959_vm10 = vcmp.eq.f32.partialorder %v11958_v9, 8.507059e+37  ;;  %vm11978_vm11 = vcmp.eq.f32.partialorder %v11977_v63, 8.507059e+37 }
 0xb15   :  { %v11872_v53 = vadd.f32 %v11871_v54, %v11848_v26  ;;  %v11957_v54 = vsel %vm11956_vm8, %v14924_v32, %v11953_v6 }
 0xb17   :  { %v11896_v51 = vadd.f32 %v11895_v21, %v11872_v53  ;;  %v11980_v53 = vor.u32 1.1754944e-38, %v11979_v43 }
 0xb18   :  { %v11919_v39 = vpop.f32.mrf.mxu2 }
 0xb19   :  { %v11920_v50 = vadd.f32 %v11919_v39, %v11896_v51  ;;  %v11962_v51 = vsel %vm11959_vm10, %v11961_v0, %v11957_v54  ;;  %v11981_v62 = vsel %vm11978_vm11, %v11980_v53, %v11976_v60 }
 0xb1a   :  { %v12003_v39 = vmul.f32 %v11981_v62, %v17085_v56 }
 0xb1b   :  { %v11942_v52 = vadd.f32 %v11941_v29, %v11920_v50 }
 0xb1d   :  { %v11944_v16 = vadd.f32 %v17357_v42, %v11942_v52 }
 0xb1f   :  { %v14802_v41 = vmul.f32 -1.442695, %v11944_v16 }
 0xb21   :  { %14927 = vpow2.f32 %v14802_v41 }
 0xb22   :  { %14929 = vtanh.f32 %v11612_v28 }
 0xb27   :  { %v14928_v14 = vpop.eup %14927 }
 0xb28   :  { %v11987_v26 = vadd.f32 1.0, %v14928_v14  ;;  %v14930_v21 = vpop.eup %14929 }
 0xb29   :  { %v12004_v46 = vmul.f32 %v14930_v21, %v11962_v51 }
 0xb2a   :  { %14931 = vrcp.f32 %v11987_v26  ;;  %v11999_v32 = vand.u32 2147483648, %v11987_v26  ;;  %v11997_v27 = vand.u32 2147483647, %v11987_v26  ;;  %vm11993_vm2 = vweird.f32 %v11987_v26 }
 0xb2b   :  { %v17367_v50 = vadd.f32 %v12004_v46, %v12003_v39 }
 0xb2c   :  { %v12000_v47 = vor.u32 1.1754944e-38, %v11999_v32  ;;  %vm11998_vm11 = vcmp.eq.f32.partialorder %v11997_v27, 8.507059e+37  ;;  %v18727_v27 = vld [vmem:[#allocation26_spill] sm:$0xff] }
 0xb2d   :  { %14933 = vtanh.f32 %v17367_v50 }
 0xb30   :  { %v14932_v29 = vpop.eup %14931 }
 0xb31   :  { %v11989_v33 = vmul.f32 %v14932_v29, %v11987_v26  ;;  %vm11994_vm12 = vweird.f32 %v14932_v29 }
 0xb32   :  { %vm11995_vm4 = vmor %vm11993_vm2, %vm11994_vm12 }
 0xb33   :  { %v11990_v59 = vsub.f32 1.0, %v11989_v33  ;;  %v14934_v16 = vpop.eup %14933 }
 0xb35   :  { %v11991_v10 = vmul.f32 %v14932_v29, %v11990_v59  ;;  %v14806_v59 = vld [vmem:[%s17850_s0 + $0x38] sm:$0x1f] }
 0xb37   :  { %v11992_v52 = vadd.f32 %v14932_v29, %v11991_v10  ;;  %v18726_v10 = vld [vmem:[#allocation23_spill] sm:$0xff] }
 0xb39   :  { %v11996_v7 = vsel %vm11995_vm4, %v14932_v29, %v11992_v52  ;;  %v18728_v52 = vld [vmem:[#allocation17_spill] sm:$0xff] }
 0xb3a   :  { %v12001_v28 = vsel %vm11998_vm11, %v12000_v47, %v11996_v7  ;;  %v18729_v47 = vld [vmem:[#allocation27_spill] sm:$0xff]  ;;  %v18731_v7 = vld [vmem:[#allocation18_spill] sm:$0xff] }
 0xb3b   :  { %v12007_v56 = vmul.f32 %v14934_v16, %v12001_v28  ;;  %v18732_v16 = vld [vmem:[#allocation25_spill] sm:$0xff]  ;;  %v18733_v28 = vld [vmem:[#allocation22_spill] sm:$0xff] }
 0xb3d   :  { %14803 = vst.msk [vmem:[%s17857_s7 + $0x30] sm:$0x1f] %vm1489_vm14, %v12007_v56  ;;  %v12011_v41 = vsel %vm78_vm13, %v12007_v56, 0  ;;  %v14126_v55 = vrot.slane %v12007_v56, 6  ;;  %v18734_v56 = vld [vmem:[#allocation24_spill] sm:$0xff] }
 0xb3e   :  { %v17375_v40 = vand.u32 4294901760, %v12011_v41 }
 0xb3f   :  { %v17379_v6 = vsel %vm14140_vm7, %v17097_v44, %v14126_v55  ;;  %v18736_v55 = vld [vmem:[#allocation33_spill] sm:$0xff] }
 0xb40   :  { %12079 = vmatmul.f32.vlgmr.msra.gmra.mxu1 %v17375_v40  ;;  %v17383_v38 = vsub.f32 %v12011_v41, %v17375_v40  ;;  %v18735_v41 = vld [vmem:[#allocation20_spill] sm:$0xff] }
 0xb41   :  { %12301 = vmatpush.msra.mxu1 %v15704_v24 }
 0xb42   :  { %12109 = vmatmul.f32.vlgmr.msra.gmra.mxu2 %v17383_v38  ;;  %v17388_v43 = vand.u32 4294901760, %v17383_v38 }
 0xb43   :  { %12303 = vmatpush.msra.mxu1 %v15712_v1  ;;  %12328 = vmatpush.msra.mxu2 %v15717_v58 }
 0xb44   :  { %12136 = vmatmul.f32.vlgmr.msra.gmra.mxu3 %v17388_v43  ;;  %v12036_v44 = vsub.f32 %v17383_v38, %v17388_v43 }
 0xb45   :  { %12353 = vmatpush.msra.mxu3 %v15704_v24  ;;  %12332 = vmatpush.msra.mxu2 %v18311_v48 }
 0xb46   :  { %v17397_v30 = vand.u32 4294901760, %v12036_v44  ;;  %v18737_v44 = vld [vmem:[#allocation35_spill] sm:$0xff] }
 0xb47   :  { %12355 = vmatpush.msra.mxu3 %v15712_v1 }
 0xb48   :  { %12038 = vmatmul.f32.vlgmr.msra.gmra.mxu0 %v17397_v30  ;;  %12194 = vmatmul.f32.vlgmr.msrb.gmra.mxu1 %v17375_v40 }
 0xb49   :  { %12276 = vmatpush.msra.mxu0 %v18312_v35  ;;  %12412 = vmatpush.msrb.mxu1 %v18313_v57 }
 0xb4b   :  { %12279 = vmatpush.msra.mxu0 %v18314_v36  ;;  %12418 = vmatpush.msrb.mxu1 %v18315_v49  ;;  %v17416_v49 = vld [vmem:[%s17854_s4] ss:$0 sm:$0xff] }
 0xb4d   :  { %12424 = vmatpush.msrb.mxu1 %v18316_v25 }
 0xb4f   :  { %12430 = vmatpush.msrb.mxu1 %v18317_v31 }
 0xb50   :  { %12169 = vmatmul.f32.vlgmr.msrb.gmra.mxu0 %v17375_v40 }
 0xb51   :  { %12379 = vmatpush.msrb.mxu0 %v15051_v3 }
 0xb53   :  { %12381 = vmatpush.msrb.mxu0 %v15053_v4 }
 0xb55   :  { %12383 = vmatpush.msrb.mxu0 %v15055_v5 }
 0xb57   :  { %12385 = vmatpush.msrb.mxu0 %v15063_v8 }
 0xbbd   :  { %v12080_v9 = vpop.f32.mrf.mxu1 }
 0xbc5   :  { %v12039_v57 = vpop.f32.mrf.mxu0  ;;  %v12110_v63 = vpop.f32.mrf.mxu2 }
 0xbc6   :  { %v12040_v25 = vadd.f32 %v17416_v49, %v12039_v57  ;;  %v12195_v53 = vpop.f32.mrf.mxu1  ;;  %v18739_v57 = vld [vmem:[#allocation37_spill] sm:$0xff] }
 0xbc7   :  { %v12137_v54 = vpop.f32.mrf.mxu3 }
 0xbc8   :  { %v12081_v31 = vadd.f32 %v12080_v9, %v12040_v25  ;;  %v18738_v9 = vld [vmem:[#allocation49_spill] sm:$0xff]  ;;  %v18740_v25 = vld [vmem:[#allocation50_spill] sm:$0xff] }
 0xbca   :  { %v12111_v14 = vadd.f32 %v12110_v63, %v12081_v31  ;;  %v18741_v31 = vld [vmem:[#allocation29_spill] sm:$0xff]  ;;  %v18742_v63 = vld [vmem:[#allocation39_spill] sm:$0xff] }
 0xbcc   :  { %v12138_v60 = vadd.f32 %v12137_v54, %v12111_v14  ;;  %v18743_v14 = vld [vmem:[#allocation51_spill] sm:$0xff]  ;;  %v18744_v54 = vld [vmem:[#allocation41_spill] sm:$0xff] }
 0xbcd   :  { %v12170_v26 = vpop.f32.mrf.mxu0 }
 0xbce   :  { %v12171_v21 = vadd.f32 %v12170_v26, %v12138_v60  ;;  %v18745_v60 = vld [vmem:[#allocation52_spill] sm:$0xff]  ;;  %v18746_v26 = vld [vmem:[#allocation43_spill] sm:$0xff] }
 0xbd0   :  { %v12196_v0 = vadd.f32 %v12195_v53, %v12171_v21  ;;  %v18747_v21 = vld [vmem:[#allocation46_spill] sm:$0xff]  ;;  %v18748_v53 = vld [vmem:[#allocation36_spill] sm:$0xff] }
 0xbd2   :  { %v12198_v51 = vmax.f32 %v12196_v0, 0.0  ;;  %v18749_v0 = vld [vmem:[#allocation47_spill] sm:$0xff] }
 0xbd4   :  { %v12200_v62 = vsel %vm1686_vm15, %v12198_v51, 0  ;;  %v18750_v51 = vld [vmem:[#allocation53_spill] sm:$0xff] }
 0xbd5   :  { %v12220_v46 = vand.u32 4294901760, %v12200_v62 }
 0xbd7   :  { %v12221_v39 = vsub.f32 %v12200_v62, %v12220_v46  ;;  %12256 = vmatmul.f32.vlgmr.msrb.gmra.mxu3 %v12220_v46  ;;  %v18751_v62 = vld [vmem:[#allocation38_spill] sm:$0xff] }
 0xbd8   :  { %12479 = vmatpush.msrb.mxu3 %v15051_v3 }
 0xbd9   :  { %v12222_v29 = vand.u32 4294901760, %v12221_v39  ;;  %12282 = vmatmul.f32.vlgmr.msra.gmra.mxu0 %v12221_v39 }
 0xbda   :  { %12481 = vmatpush.msrb.mxu3 %v15053_v4  ;;  %12508 = vmatpush.msra.mxu0 %v15093_v18  ;;  %v12552_v18 = vsel %vm267_vm0, %v14806_v59, 0  ;;  %v18756_v59 = vld [vmem:[#allocation54_spill] sm:$0xff] }
 0xbdb   :  { %v12223_v33 = vsub.f32 %v12221_v39, %v12222_v29  ;;  %12307 = vmatmul.f32.vlgmr.msra.gmra.mxu1 %v12222_v29  ;;  %v18753_v39 = vld [vmem:[#allocation42_spill] sm:$0xff]  ;;  %v18754_v29 = vld [vmem:[#allocation44_spill] sm:$0xff] }
 0xbdc   :  { %12483 = vmatpush.msrb.mxu3 %v15055_v5  ;;  %12512 = vmatpush.msra.mxu0 %v15096_v19  ;;  %v18720_v19 = vld [vmem:[#allocation30_spill] sm:$0xff] }
 0xbdd   :  { %v12224_v32 = vand.u32 4294901760, %v12223_v33  ;;  %12539 = vmatpush.msra.mxu1 %v15051_v3  ;;  %v17438_v3 = vand.u32 4294901760, %v12552_v18  ;;  %v18755_v33 = vld [vmem:[#allocation40_spill] sm:$0xff] }
 0xbde   :  { %12485 = vmatpush.msrb.mxu3 %v15063_v8  ;;  %12516 = vmatpush.msra.mxu0 %v15099_v20 }
 0xbdf   :  { %12225 = vmatmul.f32.vlgmr.msrb.gmra.mxu2 %v12224_v32  ;;  %12357 = vmatmul.f32.vlgmr.msra.gmra.mxu3 %v12220_v46  ;;  %v18757_v32 = vld [vmem:[#allocation55_spill] sm:$0xff] }
 0xbe0   :  { %12541 = vmatpush.msra.mxu1 %v15053_v4  ;;  %12450 = vmatpush.msrb.mxu2 %v15071_v11  ;;  %v17448_v4 = vsub.f32 %v12552_v18, %v17438_v3  ;;  %v18718_v11 = vld [vmem:[#allocation28_spill] sm:$0xff]  ;;  %v18758_v18 = vld [vmem:[#allocation69_spill] sm:$0xff] }
 0xbe1   :  { %12391 = vmatmul.f32.vlgmr.msrb.gmra.mxu0 %v17397_v30  ;;  %12600 = vmatpush.msra.mxu3 %v15138_v34  ;;  %v18722_v34 = vld [vmem:[#allocation19_spill] sm:$0xff] }
 0xbe2   :  { %12520 = vmatpush.msra.mxu0 %v15106_v22  ;;  %12543 = vmatpush.msra.mxu1 %v15055_v5  ;;  %v17457_v5 = vand.u32 4294901760, %v17448_v4  ;;  %v18721_v22 = vld [vmem:[#allocation9_spill] sm:$0xff] }
 0xbe3   :  { %12432 = vmatmul.f32.vlgmr.msrb.gmra.mxu1 %v17375_v40  ;;  %12453 = vmatpush.msrb.mxu2 %v15075_v12  ;;  %v18719_v12 = vld [vmem:[#allocation16_spill] sm:$0xff] }
 0xbe4   :  { %12545 = vmatpush.msra.mxu1 %v15063_v8  ;;  %12623 = vmatpush.msrb.mxu0 %v18633_v15  ;;  %v18717_v8 = vld [vmem:[#allocation15_spill] sm:$0xff]  ;;  %v12574_v20 = vsub.f32 %v17448_v4, %v17457_v5 }
 0xbe5   :  { %12456 = vmatpush.msrb.mxu2 %v18634_v2  ;;  %v18723_v15 = vld [vmem:[#allocation31_spill] sm:$0xff]  ;;  %v18724_v2 = vld [vmem:[#allocation21_spill] sm:$0xff] }
 0xbe6   :  { %12646 = vmatpush.msrb.mxu1 %v18635_v23 }
 0xbe7   :  { %12334 = vmatmul.f32.vlgmr.msra.gmra.mxu2 %v12220_v46  ;;  %12489 = vmatmul.f32.vlgmr.msrb.gmra.mxu3 %v17388_v43  ;;  %v18752_v46 = vld [vmem:[#allocation45_spill] sm:$0xff] }
 0xbe8   :  { %12459 = vmatpush.msrb.mxu2 %v18636_v61  ;;  %12694 = vmatpush.msrb.mxu3 %v18635_v23  ;;  %v18725_v61 = vld [vmem:[#allocation32_spill] sm:$0xff] }
 0xbe9   :  { %12522 = vmatmul.f32.vlgmr.msra.gmra.mxu0 %v17375_v40 }
 0xbea   :  { %12570 = vmatpush.msra.mxu2 %v18635_v23  ;;  %12714 = vmatpush.msra.mxu0 %v18637_v17  ;;  %v17474_v23 = vand.u32 4294901760, %v12574_v20  ;;  %v18763_v20 = vld [vmem:[#allocation71_spill] sm:$0xff] }
 0xbeb   :  { %12547 = vmatmul.f32.vlgmr.msra.gmra.mxu1 %v17375_v40 }
 0xbec   :  { %12716 = vmatpush.msra.mxu0 %v18717_v8  ;;  %12747 = vmatpush.msra.mxu1 %v18718_v11  ;;  %v18760_v11 = vld [vmem:[#allocation70_spill] sm:$0xff] }
 0xbee   :  { %12718 = vmatpush.msra.mxu0 %v18719_v12  ;;  %12753 = vmatpush.msra.mxu1 %v18720_v19  ;;  %v18762_v19 = vld [vmem:[#allocation59_spill] sm:$0xff] }
 0xbef   :  { %12462 = vmatmul.f32.vlgmr.msrb.gmra.mxu2 %v17383_v38  ;;  %12602 = vmatmul.f32.vlgmr.msra.gmra.mxu3 %v17438_v3 }
 0xbf0   :  { %12672 = vmatpush.msrb.mxu2 %v18721_v22  ;;  %12720 = vmatpush.msra.mxu0 %v18722_v34  ;;  %v18764_v22 = vld [vmem:[#allocation61_spill] sm:$0xff] }
 0xbf1   :  { %12626 = vmatmul.f32.vlgmr.msrb.gmra.mxu0 %v17448_v4  ;;  %12759 = vmatpush.msra.mxu1 %v18723_v15  ;;  %v18766_v15 = vld [vmem:[#allocation63_spill] sm:$0xff] }
 0xbf2   :  { %12814 = vmatpush.msra.mxu3 %v18637_v17  ;;  %12843 = vmatpush.msrb.mxu0 %v18724_v2  ;;  %v18767_v2 = vld [vmem:[#allocation66_spill] sm:$0xff] }
 0xbf3   :  { %12650 = vmatmul.f32.vlgmr.msrb.gmra.mxu1 %v17457_v5 }
 0xbf4   :  { %12765 = vmatpush.msra.mxu1 %v18725_v61  ;;  %12816 = vmatpush.msra.mxu3 %v18717_v8  ;;  %v18768_v61 = vld [vmem:[#allocation56_spill] sm:$0xff] }
 0xbf5   :  { %12847 = vmatpush.msrb.mxu0 %v18726_v10  ;;  %v18769_v10 = vld [vmem:[#allocation67_spill] sm:$0xff] }
 0xbf6   :  { %12874 = vmatpush.msrb.mxu1 %v18637_v17  ;;  %12818 = vmatpush.msra.mxu3 %v18719_v12  ;;  %v18730_v17 = vld [vmem:[#allocation34_spill] sm:$0xff] }
 0xbf7   :  { %12576 = vmatmul.f32.vlgmr.msra.gmra.mxu2 %v17474_v23  ;;  %12696 = vmatmul.f32.vlgmr.msrb.gmra.mxu3 %v17438_v3 }
 0xbf8   :  { %12820 = vmatpush.msra.mxu3 %v18722_v34  ;;  %12851 = vmatpush.msrb.mxu0 %v18727_v27  ;;  %v18770_v27 = vld [vmem:[#allocation73_spill] sm:$0xff] }
 0xbf9   :  { %12726 = vmatmul.f32.vlgmr.msra.gmra.mxu0 %v17397_v30  ;;  %12876 = vmatpush.msrb.mxu1 %v18717_v8  ;;  %v18759_v8 = vld [vmem:[#allocation57_spill] sm:$0xff] }
 0xbfa   :  { %12785 = vmatpush.msra.mxu2 %v18728_v52  ;;  %12855 = vmatpush.msrb.mxu0 %v18729_v47  ;;  %v18771_v52 = vld [vmem:[#allocation58_spill] sm:$0xff]  ;;  %v18772_v47 = vld [vmem:[#allocation65_spill] sm:$0xff] }
 0xbfb   :  { %12767 = vmatmul.f32.vlgmr.msra.gmra.mxu1 %v17375_v40  ;;  %12932 = vmatpush.msrb.mxu3 %v18730_v17  ;;  %v18773_v17 = vld [vmem:[#allocation62_spill] sm:$0xff] }
 0xbfc   :  { %12878 = vmatpush.msrb.mxu1 %v18719_v12  ;;  %12788 = vmatpush.msra.mxu2 %v18731_v7  ;;  %v18761_v12 = vld [vmem:[#allocation48_spill] sm:$0xff] }
 0xbfd   :  { %12955 = vmatpush.msra.mxu0 %v18732_v16  ;;  %v18775_v7 = vld [vmem:[#allocation60_spill] sm:$0xff] }
 0xbfe   :  { %12880 = vmatpush.msrb.mxu1 %v18722_v34  ;;  %12791 = vmatpush.msra.mxu2 %v18733_v28  ;;  %v18765_v34 = vld [vmem:[#allocation72_spill] sm:$0xff]  ;;  %v18777_v28 = vld [vmem:[#allocation85_spill] sm:$0xff] }
 0xbff   :  { %12674 = vmatmul.f32.vlgmr.msrb.gmra.mxu2 %v17438_v3  ;;  %12824 = vmatmul.f32.vlgmr.msra.gmra.mxu3 %v17388_v43  ;;  %v18776_v16 = vld [vmem:[#allocation76_spill] sm:$0xff] }
 0xc00   :  { %12794 = vmatpush.msra.mxu2 %v18734_v56  ;;  %12978 = vmatpush.msra.mxu1 %v18735_v41  ;;  %v18778_v56 = vld [vmem:[#allocation78_spill] sm:$0xff] }
 0xc01   :  { %12857 = vmatmul.f32.vlgmr.msrb.gmra.mxu0 %v17375_v40  ;;  %13026 = vmatpush.msra.mxu3 %v18735_v41 }
 0xc02   :  { %12902 = vmatpush.msrb.mxu2 %v18735_v41  ;;  %13046 = vmatpush.msrb.mxu0 %v18736_v55  ;;  %v18779_v41 = vld [vmem:[#allocation89_spill] sm:$0xff] }
 0xc03   :  { %12882 = vmatmul.f32.vlgmr.msrb.gmra.mxu1 %v17375_v40 }
 0xc04   :  { %13048 = vmatpush.msrb.mxu0 %v18737_v44  ;;  %13079 = vmatpush.msrb.mxu1 %v18738_v9  ;;  %v18784_v9 = vld [vmem:[#allocation84_spill] sm:$0xff] }
 0xc06   :  { %13050 = vmatpush.msrb.mxu0 %v18739_v57  ;;  %13085 = vmatpush.msrb.mxu1 %v18740_v25  ;;  %v18789_v25 = vld [vmem:[#allocation80_spill] sm:$0xff] }
 0xc07   :  { %12797 = vmatmul.f32.vlgmr.msra.gmra.mxu2 %v17383_v38  ;;  %12934 = vmatmul.f32.vlgmr.msrb.gmra.mxu3 %v17438_v3 }
 0xc08   :  { %13004 = vmatpush.msra.mxu2 %v18741_v31  ;;  %13052 = vmatpush.msrb.mxu0 %v18742_v63  ;;  %v18790_v31 = vld [vmem:[#allocation97_spill] sm:$0xff] }
 0xc09   :  { %12958 = vmatmul.f32.vlgmr.msra.gmra.mxu0 %v17448_v4  ;;  %13091 = vmatpush.msrb.mxu1 %v18743_v14  ;;  %v18792_v14 = vld [vmem:[#allocation83_spill] sm:$0xff] }
 0xc0a   :  { %13146 = vmatpush.msrb.mxu3 %v18736_v55  ;;  %13175 = vmatpush.msra.mxu0 %v18744_v54  ;;  %v18794_v54 = vld [vmem:[#allocation87_spill] sm:$0xff] }
 0xc0b   :  { %12982 = vmatmul.f32.vlgmr.msra.gmra.mxu1 %v17457_v5 }
 0xc0c   :  { %13097 = vmatpush.msrb.mxu1 %v18745_v60  ;;  %13148 = vmatpush.msrb.mxu3 %v18737_v44 }
 0xc0d   :  { %13179 = vmatpush.msra.mxu0 %v18746_v26 }
 0xc0e   :  { %13206 = vmatpush.msra.mxu1 %v18736_v55  ;;  %13150 = vmatpush.msrb.mxu3 %v18739_v57  ;;  %v18781_v55 = vld [vmem:[#allocation68_spill] sm:$0xff] }
 0xc0f   :  { %12908 = vmatmul.f32.vlgmr.msrb.gmra.mxu2 %v17474_v23  ;;  %13028 = vmatmul.f32.vlgmr.msra.gmra.mxu3 %v17438_v3 }
 0xc10   :  { %13152 = vmatpush.msrb.mxu3 %v18742_v63  ;;  %13183 = vmatpush.msra.mxu0 %v18747_v21 }
 0xc11   :  { %13058 = vmatmul.f32.vlgmr.msrb.gmra.mxu0 %v17397_v30  ;;  %13208 = vmatpush.msra.mxu1 %v18737_v44  ;;  %v18782_v44 = vld [vmem:[#allocation92_spill] sm:$0xff] }
 0xc12   :  { %13117 = vmatpush.msrb.mxu2 %v18748_v53  ;;  %13187 = vmatpush.msra.mxu0 %v18749_v0 }
 0xc13   :  { %13099 = vmatmul.f32.vlgmr.msrb.gmra.mxu1 %v17375_v40  ;;  %13264 = vmatpush.msra.mxu3 %v18750_v51 }
 0xc14   :  { %13210 = vmatpush.msra.mxu1 %v18739_v57  ;;  %13120 = vmatpush.msrb.mxu2 %v18751_v62  ;;  %v18786_v57 = vld [vmem:[#allocation82_spill] sm:$0xff] }
 0xc15   :  { %13287 = vmatpush.msrb.mxu0 %v18752_v46  ;;  %v17627_v46 = vld [vmem:[%s17854_s4 + $0x1] ss:$0 sm:$0xff] }
 0xc16   :  { %13212 = vmatpush.msra.mxu1 %v18742_v63  ;;  %13123 = vmatpush.msrb.mxu2 %v18753_v39  ;;  %v18791_v63 = vld [vmem:[#allocation90_spill] sm:$0xff] }
 0xc17   :  { %13006 = vmatmul.f32.vlgmr.msra.gmra.mxu2 %v17438_v3  ;;  %13156 = vmatmul.f32.vlgmr.msrb.gmra.mxu3 %v17388_v43 }
 0xc18   :  { %13126 = vmatpush.msrb.mxu2 %v18754_v29  ;;  %13310 = vmatpush.msrb.mxu1 %v18755_v33 }
 0xc19   :  { %13189 = vmatmul.f32.vlgmr.msra.gmra.mxu0 %v17375_v40  ;;  %13358 = vmatpush.msrb.mxu3 %v18755_v33 }
 0xc1a   :  { %13234 = vmatpush.msra.mxu2 %v18755_v33  ;;  %13378 = vmatpush.msra.mxu0 %v18756_v59 }
 0xc1b   :  { %13214 = vmatmul.f32.vlgmr.msra.gmra.mxu1 %v17375_v40 }
 0xc1c   :  { %13380 = vmatpush.msra.mxu0 %v18757_v32  ;;  %13411 = vmatpush.msra.mxu1 %v18758_v18 }
 0xc1e   :  { %13382 = vmatpush.msra.mxu0 %v18759_v8  ;;  %13417 = vmatpush.msra.mxu1 %v18760_v11 }
 0xc1f   :  { %13129 = vmatmul.f32.vlgmr.msrb.gmra.mxu2 %v17383_v38  ;;  %13266 = vmatmul.f32.vlgmr.msra.gmra.mxu3 %v17438_v3 }
 0xc20   :  { %13336 = vmatpush.msrb.mxu2 %v18761_v12  ;;  %13384 = vmatpush.msra.mxu0 %v18762_v19 }
 0xc21   :  { %13290 = vmatmul.f32.vlgmr.msrb.gmra.mxu0 %v17448_v4  ;;  %13423 = vmatpush.msra.mxu1 %v18763_v20 }
 0xc22   :  { %13478 = vmatpush.msra.mxu3 %v18756_v59  ;;  %13507 = vmatpush.msrb.mxu0 %v18764_v22 }
 0xc23   :  { %13314 = vmatmul.f32.vlgmr.msrb.gmra.mxu1 %v17457_v5 }
 0xc24   :  { %13429 = vmatpush.msra.mxu1 %v18765_v34  ;;  %13480 = vmatpush.msra.mxu3 %v18757_v32 }
 0xc25   :  { %13511 = vmatpush.msrb.mxu0 %v18766_v15 }
 0xc26   :  { %13538 = vmatpush.msrb.mxu1 %v18756_v59  ;;  %13482 = vmatpush.msra.mxu3 %v18759_v8 }
 0xc27   :  { %13240 = vmatmul.f32.vlgmr.msra.gmra.mxu2 %v17474_v23  ;;  %13360 = vmatmul.f32.vlgmr.msrb.gmra.mxu3 %v17438_v3 }
 0xc28   :  { %13484 = vmatpush.msra.mxu3 %v18762_v19  ;;  %13515 = vmatpush.msrb.mxu0 %v18767_v2 }
 0xc29   :  { %13390 = vmatmul.f32.vlgmr.msra.gmra.mxu0 %v17397_v30  ;;  %13540 = vmatpush.msrb.mxu1 %v18757_v32  ;;  %v18774_v30 = vld [vmem:[#allocation64_spill] sm:$0xff] }
 0xc2a   :  { %13449 = vmatpush.msra.mxu2 %v18768_v61  ;;  %13519 = vmatpush.msrb.mxu0 %v18769_v10 }
 0xc2b   :  { %13431 = vmatmul.f32.vlgmr.msra.gmra.mxu1 %v17375_v40  ;;  %13596 = vmatpush.msrb.mxu3 %v18770_v27 }
 0xc2c   :  { %13542 = vmatpush.msrb.mxu1 %v18759_v8  ;;  %13452 = vmatpush.msra.mxu2 %v18771_v52 }
 0xc2d   :  { %13619 = vmatpush.msra.mxu0 %v18772_v47 }
 0xc2e   :  { %13544 = vmatpush.msrb.mxu1 %v18762_v19  ;;  %13455 = vmatpush.msra.mxu2 %v18773_v17 }
 0xc2f   :  { %13338 = vmatmul.f32.vlgmr.msrb.gmra.mxu2 %v17438_v3  ;;  %13488 = vmatmul.f32.vlgmr.msra.gmra.mxu3 %v17388_v43  ;;  %v18780_v43 = vld [vmem:[#allocation81_spill] sm:$0xff] }
 0xc30   :  { %13458 = vmatpush.msra.mxu2 %v18774_v30  ;;  %13690 = vmatpush.msra.mxu3 %v18775_v7 }
 0xc31   :  { %13521 = vmatmul.f32.vlgmr.msrb.gmra.mxu0 %v17375_v40  ;;  %13642 = vmatpush.msra.mxu1 %v18775_v7 }
 0xc32   :  { %13566 = vmatpush.msrb.mxu2 %v18775_v7  ;;  %13778 = vmatpush.msrb.mxu0 %v18776_v16 }
 0xc33   :  { %13546 = vmatmul.f32.vlgmr.msrb.gmra.mxu1 %v17375_v40  ;;  %v18783_v40 = vld [vmem:[#allocation93_spill] sm:$0xff] }
 0xc34   :  { %13811 = vmatpush.msrb.mxu1 %v18777_v28  ;;  %13780 = vmatpush.msrb.mxu0 %v18778_v56 }
 0xc36   :  { %13817 = vmatpush.msrb.mxu1 %v18779_v41  ;;  %13782 = vmatpush.msrb.mxu0 %v18780_v43 }
 0xc37   :  { %13461 = vmatmul.f32.vlgmr.msra.gmra.mxu2 %v17383_v38  ;;  %13598 = vmatmul.f32.vlgmr.msrb.gmra.mxu3 %v17438_v3  ;;  %v18785_v38 = vld [vmem:[#allocation79_spill] sm:$0xff] }
 0xc38   :  { %13668 = vmatpush.msra.mxu2 %v18781_v55  ;;  %13823 = vmatpush.msrb.mxu1 %v18782_v44 }
 0xc39   :  { %13622 = vmatmul.f32.vlgmr.msra.gmra.mxu0 %v17448_v4  ;;  %13878 = vmatpush.msrb.mxu3 %v18776_v16  ;;  %v18787_v4 = vld [vmem:[#allocation77_spill] sm:$0xff] }
 0xc3a   :  { %13829 = vmatpush.msrb.mxu1 %v18783_v40  ;;  %13784 = vmatpush.msrb.mxu0 %v18784_v9 }
 0xc3b   :  { %13646 = vmatmul.f32.vlgmr.msra.gmra.mxu1 %v17457_v5  ;;  %13880 = vmatpush.msrb.mxu3 %v18778_v56  ;;  %v18788_v5 = vld [vmem:[#allocation86_spill] sm:$0xff] }
 0xc3c   :  { %13938 = vmatpush.msra.mxu1 %v18776_v16  ;;  %13907 = vmatpush.msra.mxu0 %v18785_v38 }
 0xc3d   :  { %13882 = vmatpush.msrb.mxu3 %v18780_v43 }
 0xc3e   :  { %13940 = vmatpush.msra.mxu1 %v18778_v56  ;;  %13911 = vmatpush.msra.mxu0 %v18786_v57 }
 0xc3f   :  { %13572 = vmatmul.f32.vlgmr.msrb.gmra.mxu2 %v17474_v23  ;;  %13692 = vmatmul.f32.vlgmr.msra.gmra.mxu3 %v17438_v3  ;;  %v18793_v23 = vld [vmem:[#allocation98_spill] sm:$0xff] }
 0xc40   :  { %13849 = vmatpush.msrb.mxu2 %v18787_v4  ;;  %13884 = vmatpush.msrb.mxu3 %v18784_v9 }
 0xc41   :  { %13942 = vmatpush.msra.mxu1 %v18780_v43  ;;  %13915 = vmatpush.msra.mxu0 %v18788_v5 }
 0xc42   :  { %13852 = vmatpush.msrb.mxu2 %v18789_v25  ;;  %14000 = vmatpush.msra.mxu3 %v18790_v31 }
 0xc43   :  { %13944 = vmatpush.msra.mxu1 %v18784_v9  ;;  %13919 = vmatpush.msra.mxu0 %v18791_v63 }
 0xc44   :  { %13855 = vmatpush.msrb.mxu2 %v18792_v14  ;;  %14006 = vmatpush.msra.mxu3 %v18793_v23 }
 0xc46   :  { %13858 = vmatpush.msrb.mxu2 %v18794_v54 }
 0xc47   :  { %13670 = vmatmul.f32.vlgmr.msra.gmra.mxu2 %v17438_v3 }
 0xc48   :  { %13969 = vmatpush.msra.mxu2 %v15704_v24 }
 0xc4a   :  { %13971 = vmatpush.msra.mxu2 %v15712_v1 }
 0xc56   :  { %v12283_v60 = vpop.f32.mrf.mxu0 }
 0xc58   :  { %v12308_v26 = vpop.f32.mrf.mxu1 }
 0xc5a   :  { %v12257_v21 = vpop.f32.mrf.mxu3 }
 0xc5e   :  { %v12392_v53 = vpop.f32.mrf.mxu0 }
 0xc60   :  { %v12433_v0 = vpop.f32.mrf.mxu1 }
 0xc61   :  { %v12434_v52 = vadd.f32 %v12433_v0, %v12392_v53 }
 0xc62   :  { %v12226_v51 = vpop.f32.mrf.mxu2  ;;  %v12358_v62 = vpop.f32.mrf.mxu3 }
 0xc63   :  { %v12227_v39 = vadd.f32 %v17627_v46, %v12226_v51 }
 0xc65   :  { %v12258_v29 = vadd.f32 %v12257_v21, %v12227_v39 }
 0xc66   :  { %v12523_v3 = vpop.f32.mrf.mxu0 }
 0xc67   :  { %v12284_v33 = vadd.f32 %v12283_v60, %v12258_v29 }
 0xc68   :  { %v12548_v59 = vpop.f32.mrf.mxu1 }
 0xc69   :  { %v12309_v32 = vadd.f32 %v12308_v26, %v12284_v33 }
 0xc6a   :  { %v12335_v18 = vpop.f32.mrf.mxu2  ;;  %v12490_v8 = vpop.f32.mrf.mxu3 }
 0xc6b   :  { %v12336_v11 = vadd.f32 %v12335_v18, %v12309_v32 }
 0xc6d   :  { %v12359_v12 = vadd.f32 %v12358_v62, %v12336_v11 }
 0xc6e   :  { %v12627_v19 = vpop.f32.mrf.mxu0 }
 0xc6f   :  { %14804 = vst.msk [vmem:[%s17855_s5 + $0x30] sm:$0x1f] %vm1849_vm1, %v12359_v12 }
 0xc70   :  { %v12651_v20 = vpop.f32.mrf.mxu1 }
 0xc72   :  { %v12463_v22 = vpop.f32.mrf.mxu2  ;;  %v12603_v34 = vpop.f32.mrf.mxu3 }
 0xc73   :  { %v12464_v7 = vadd.f32 %v12463_v22, %v12434_v52 }
 0xc75   :  { %v12491_v16 = vadd.f32 %v12490_v8, %v12464_v7 }
 0xc76   :  { %v12727_v15 = vpop.f32.mrf.mxu0 }
 0xc77   :  { %v12524_v55 = vadd.f32 %v12523_v3, %v12491_v16 }
 0xc78   :  { %v12768_v2 = vpop.f32.mrf.mxu1 }
 0xc79   :  { %v12769_v28 = vadd.f32 %v12768_v2, %v12727_v15  ;;  %v12549_v38 = vadd.f32 %v12548_v59, %v12524_v55 }
 0xc7a   :  { %v12577_v61 = vpop.f32.mrf.mxu2  ;;  %v12697_v10 = vpop.f32.mrf.mxu3 }
 0xc7b   :  { %v12578_v31 = vadd.f32 %v12577_v61, %v12549_v38 }
 0xc7d   :  { %v12604_v54 = vadd.f32 %v12603_v34, %v12578_v31 }
 0xc7e   :  { %v12858_v27 = vpop.f32.mrf.mxu0 }
 0xc7f   :  { %v12628_v53 = vadd.f32 %v12627_v19, %v12604_v54 }
 0xc80   :  { %v12883_v47 = vpop.f32.mrf.mxu1 }
 0xc81   :  { %v12652_v62 = vadd.f32 %v12651_v20, %v12628_v53 }
 0xc82   :  { %v12675_v17 = vpop.f32.mrf.mxu2  ;;  %v12825_v30 = vpop.f32.mrf.mxu3 }
 0xc83   :  { %v12676_v33 = vadd.f32 %v12675_v17, %v12652_v62 }
 0xc85   :  { %v12698_v18 = vadd.f32 %v12697_v10, %v12676_v33 }
 0xc86   :  { %v12959_v56 = vpop.f32.mrf.mxu0 }
 0xc87   :  { %v12700_v2 = vadd.f32 %v17345_v37, %v12698_v18 }
 0xc88   :  { %v12983_v40 = vpop.f32.mrf.mxu1 }
 0xc89   :  { %v14807_v20 = vmul.f32 -1.442695, %v12700_v2 }
 0xc8a   :  { %v12798_v41 = vpop.f32.mrf.mxu2  ;;  %v12935_v43 = vpop.f32.mrf.mxu3 }
 0xc8b   :  { %v12799_v44 = vadd.f32 %v12798_v41, %v12769_v28  ;;  %14935 = vpow2.f32 %v14807_v20 }
 0xc8d   :  { %v12826_v9 = vadd.f32 %v12825_v30, %v12799_v44 }
 0xc8e   :  { %v13059_v63 = vpop.f32.mrf.mxu0 }
 0xc8f   :  { %v12859_v57 = vadd.f32 %v12858_v27, %v12826_v9 }
 0xc90   :  { %v13100_v23 = vpop.f32.mrf.mxu1 }
 0xc91   :  { %v12884_v4 = vadd.f32 %v12883_v47, %v12859_v57  ;;  %v13101_v8 = vadd.f32 %v13100_v23, %v13059_v63  ;;  %v14936_v28 = vpop.eup %14935 }
 0xc92   :  { %v12909_v5 = vpop.f32.mrf.mxu2  ;;  %v13029_v25 = vpop.f32.mrf.mxu3  ;;  %v13700_v44 = vadd.f32 1.0, %v14936_v28 }
 0xc93   :  { %v12910_v14 = vadd.f32 %v12909_v5, %v12884_v4 }
 0xc94   :  { %vm13706_vm9 = vweird.f32 %v13700_v44 }
 0xc95   :  { %v12936_v60 = vadd.f32 %v12935_v43, %v12910_v14 }
 0xc96   :  { %v13190_v51 = vpop.f32.mrf.mxu0 }
 0xc97   :  { %v12960_v0 = vadd.f32 %v12959_v56, %v12936_v60 }
 0xc98   :  { %v13215_v39 = vpop.f32.mrf.mxu1 }
 0xc99   :  { %v12984_v29 = vadd.f32 %v12983_v40, %v12960_v0 }
 0xc9a   :  { %v13007_v26 = vpop.f32.mrf.mxu2  ;;  %v13157_v21 = vpop.f32.mrf.mxu3 }
 0xc9b   :  { %v13008_v59 = vadd.f32 %v13007_v26, %v12984_v29 }
 0xc9d   :  { %v13030_v11 = vadd.f32 %v13029_v25, %v13008_v59 }
 0xc9e   :  { %v13291_v12 = vpop.f32.mrf.mxu0 }
 0xc9f   :  { %v13032_v19 = vadd.f32 %v17351_v45, %v13030_v11 }
 0xca0   :  { %v13315_v15 = vpop.f32.mrf.mxu1 }
 0xca1   :  { %v14808_v52 = vmul.f32 -1.442695, %v13032_v19 }
 0xca2   :  { %v13130_v3 = vpop.f32.mrf.mxu2  ;;  %v13267_v32 = vpop.f32.mrf.mxu3 }
 0xca3   :  { %v13131_v22 = vadd.f32 %v13130_v3, %v13101_v8  ;;  %14937 = vpow2.f32 %v14808_v52  ;;  %v13712_v52 = vand.u32 2147483648, %v13700_v44 }
 0xca4   :  { %14939 = vrcp.f32 %v13700_v44 }
 0xca5   :  { %v13158_v61 = vadd.f32 %v13157_v21, %v13131_v22 }
 0xca6   :  { %v13391_v30 = vpop.f32.mrf.mxu0 }
 0xca7   :  { %v13191_v47 = vadd.f32 %v13190_v51, %v13158_v61 }
 0xca8   :  { %v13432_v10 = vpop.f32.mrf.mxu1 }
 0xca9   :  { %v13216_v7 = vadd.f32 %v13215_v39, %v13191_v47  ;;  %v13433_v56 = vadd.f32 %v13432_v10, %v13391_v30  ;;  %v14938_v43 = vpop.eup %14937 }
 0xcaa   :  { %v13241_v34 = vpop.f32.mrf.mxu2  ;;  %v13361_v27 = vpop.f32.mrf.mxu3  ;;  %v13719_v40 = vadd.f32 1.0, %v14938_v43 }
 0xcab   :  { %v13242_v41 = vadd.f32 %v13241_v34, %v13216_v7  ;;  %v14940_v26 = vpop.eup %14939 }
 0xcac   :  { %14941 = vrcp.f32 %v13719_v40  ;;  %v13702_v39 = vmul.f32 %v14940_v26, %v13700_v44  ;;  %vm13707_vm0 = vweird.f32 %v14940_v26  ;;  %v13731_v20 = vand.u32 2147483648, %v13719_v40 }
 0xcad   :  { %v13268_v9 = vadd.f32 %v13267_v32, %v13242_v41  ;;  %vm13725_vm10 = vweird.f32 %v13719_v40  ;;  %vm13708_vm12 = vmor %vm13706_vm9, %vm13707_vm0  ;;  %v13729_v47 = vand.u32 2147483647, %v13719_v40 }
 0xcae   :  { %v13522_v45 = vpop.f32.mrf.mxu0  ;;  %v13703_v8 = vsub.f32 1.0, %v13702_v39  ;;  %v13732_v7 = vor.u32 1.1754944e-38, %v13731_v20  ;;  %v66_v39 = vld [vmem:[%s17853_s3 + $0x58] sm:$0xff]  ;;  %v14805_v20 = vld [vmem:[%s17850_s0 + $0x35] sm:$0x1] }
 0xcaf   :  { %v13292_v25 = vadd.f32 %v13291_v12, %v13268_v9  ;;  %vm13730_vm11 = vcmp.eq.f32.partialorder %v13729_v47, 8.507059e+37 }
 0xcb0   :  { %v13547_v57 = vpop.f32.mrf.mxu1  ;;  %v13704_v2 = vmul.f32 %v14940_v26, %v13703_v8 }
 0xcb1   :  { %v13316_v54 = vadd.f32 %v13315_v15, %v13292_v25 }
 0xcb2   :  { %v13339_v17 = vpop.f32.mrf.mxu2  ;;  %v13489_v16 = vpop.f32.mrf.mxu3  ;;  %v13705_v19 = vadd.f32 %v14940_v26, %v13704_v2 }
 0xcb3   :  { %v14942_v53 = vpop.eup %14941  ;;  %v13340_v51 = vadd.f32 %v13339_v17, %v13316_v54 }
 0xcb4   :  { %v13721_v29 = vmul.f32 %v14942_v53, %v13719_v40  ;;  %vm13726_vm8 = vweird.f32 %v14942_v53 }
 0xcb5   :  { %v13362_v32 = vadd.f32 %v13361_v27, %v13340_v51  ;;  %v13710_v27 = vand.u32 2147483647, %v13700_v44  ;;  %vm13727_vm2 = vmor %vm13725_vm10, %vm13726_vm8 }
 0xcb6   :  { %v13623_v23 = vpop.f32.mrf.mxu0  ;;  %v13722_v11 = vsub.f32 1.0, %v13721_v29  ;;  %v14791_v29 = vld [vmem:[%s17850_s0 + $0x25] sm:$0x1] }
 0xcb7   :  { %v13364_v22 = vadd.f32 %v17363_v13, %v13362_v32  ;;  %vm13711_vm4 = vcmp.eq.f32.partialorder %v13710_v27, 8.507059e+37 }
 0xcb8   :  { %v13647_v21 = vpop.f32.mrf.mxu1  ;;  %v13723_v34 = vmul.f32 %v14942_v53, %v13722_v11 }
 0xcba   :  { %v13462_v55 = vpop.f32.mrf.mxu2  ;;  %v13599_v5 = vpop.f32.mrf.mxu3  ;;  %v13724_v61 = vadd.f32 %v14942_v53, %v13723_v34 }
 0xcbb   :  { %v13463_v37 = vadd.f32 %v13462_v55, %v13433_v56 }
 0xcbc   :  { %v13728_v13 = vsel %vm13727_vm2, %v14942_v53, %v13724_v61 }
 0xcbd   :  { %v13490_v38 = vadd.f32 %v13489_v16, %v13463_v37  ;;  %v13713_v16 = vor.u32 1.1754944e-38, %v13712_v52  ;;  %v13733_v56 = vsel %vm13730_vm11, %v13732_v7, %v13728_v13  ;;  %v14812_v7 = vld [vmem:[%s17850_s0 + $0x3d] sm:$0x1] }
 0xcbe   :  { %v13755_v43 = vmul.f32 %v13733_v56, %v17367_v50  ;;  %v14163_v56 = vrot.slane %v14812_v7, 1  ;;  %v69_v7 = vld [vmem:[%s17853_s3 + $0x70] sm:$0xff] }
 0xcbf   :  { %v13523_v4 = vadd.f32 %v13522_v45, %v13490_v38 }
 0xcc1   :  { %v13548_v31 = vadd.f32 %v13547_v57, %v13523_v4 }
 0xcc2   :  { %v13573_v63 = vpop.f32.mrf.mxu2  ;;  %v13693_v33 = vpop.f32.mrf.mxu3 }
 0xcc3   :  { %v13574_v14 = vadd.f32 %v13573_v63, %v13548_v31 }
 0xcc5   :  { %v13600_v60 = vadd.f32 %v13599_v5, %v13574_v14 }
 0xcc7   :  { %v13624_v0 = vadd.f32 %v13623_v23, %v13600_v60 }
 0xcc9   :  { %v13648_v62 = vadd.f32 %v13647_v21, %v13624_v0 }
 0xcca   :  { %v13671_v3 = vpop.f32.mrf.mxu2 }
 0xccb   :  { %v13672_v59 = vadd.f32 %v13671_v3, %v13648_v62 }
 0xccd   :  { %v13694_v18 = vadd.f32 %v13693_v33, %v13672_v59  ;;  %v17685_v59 = vand.u32 4294901760, %v66_v39 }
 0xccf   :  { %v13696_v12 = vadd.f32 %v17357_v42, %v13694_v18  ;;  %v13709_v42 = vsel %vm13708_vm12, %v14940_v26, %v13705_v19  ;;  %vm14142_vm12 = vcmask 1046528   ;;  %v65_v18 = vld [vmem:[%s17853_s3 + $0x50] sm:$0xff] }
 0xcd0   :  { %v13714_v28 = vsel %vm13711_vm4, %v13713_v16, %v13709_v42  ;;  %v17693_v11 = vand.u32 4294901760, %v65_v18 }
 0xcd1   :  { %v14809_v15 = vmul.f32 -1.442695, %v13696_v12  ;;  %v17696_v12 = vsub.f32 %v66_v39, %v17685_v59 }
 0xcd2   :  { %v17708_v61 = vsub.f32 %v65_v18, %v17693_v11 }
 0xcd3   :  { %14943 = vpow2.f32 %v14809_v15  ;;  %v14154_v15 = vrot.slane %v14791_v29, 4  ;;  %v14228_v19 = vand.u32 4294901760, %v17696_v12 }
 0xcd4   :  { %14945 = vtanh.f32 %v13364_v22  ;;  %v14798_v22 = vld [vmem:[%s17850_s0 + $0x2d] sm:$0x1] }
 0xcd5   :  { %v14157_v52 = vrot.slane %v14798_v22, 3  ;;  %v14229_v47 = vsub.f32 %v17696_v12, %v14228_v19 }
 0xcd7   :  { %v14230_v13 = vand.u32 4294901760, %v14229_v47 }
 0xcd9   :  { %v14944_v30 = vpop.eup %14943 }
 0xcda   :  { %v13739_v17 = vadd.f32 1.0, %v14944_v30  ;;  %v14946_v10 = vpop.eup %14945  ;;  %v14234_v30 = vand.u32 4294901760, %v17708_v61 }
 0xcdb   :  { %v13756_v41 = vmul.f32 %v14946_v10, %v13714_v28  ;;  %v14160_v10 = vrot.slane %v14805_v20, 2 }
 0xcdc   :  { %14947 = vrcp.f32 %v13739_v17  ;;  %v13751_v40 = vand.u32 2147483648, %v13739_v17  ;;  %v13749_v38 = vand.u32 2147483647, %v13739_v17  ;;  %vm13745_vm8 = vweird.f32 %v13739_v17 }
 0xcdd   :  { %v13757_v37 = vadd.f32 %v13756_v41, %v13755_v43 }
 0xcde   :  { %v13752_v4 = vor.u32 1.1754944e-38, %v13751_v40  ;;  %vm13750_vm10 = vcmp.eq.f32.partialorder %v13749_v38, 8.507059e+37 }
 0xcdf   :  { %14949 = vtanh.f32 %v13757_v37 }
 0xce2   :  { %v14948_v55 = vpop.eup %14947 }
 0xce3   :  { %v13741_v44 = vmul.f32 %v14948_v55, %v13739_v17  ;;  %vm13746_vm0 = vweird.f32 %v14948_v55  ;;  %v14235_v17 = vsub.f32 %v17708_v61, %v14234_v30 }
 0xce4   :  { %vm13747_vm9 = vmor %vm13745_vm8, %vm13746_vm0 }
 0xce5   :  { %v13742_v45 = vsub.f32 1.0, %v13741_v44  ;;  %v14950_v25 = vpop.eup %14949  ;;  %v14236_v28 = vand.u32 4294901760, %v14235_v17 }
 0xce7   :  { %v13743_v9 = vmul.f32 %v14948_v55, %v13742_v45 }
 0xce9   :  { %v13744_v57 = vadd.f32 %v14948_v55, %v13743_v9 }
 0xceb   :  { %v13748_v5 = vsel %vm13747_vm9, %v14948_v55, %v13744_v57  ;;  %v64_v57 = vld [vmem:[%s17853_s3 + $0x48] sm:$0xff] }
 0xcec   :  { %v13753_v31 = vsel %vm13750_vm10, %v13752_v4, %v13748_v5 }
 0xced   :  { %v13759_v63 = vmul.f32 %v14950_v25, %v13753_v31  ;;  %v63_v25 = vld [vmem:[%s17853_s3 + $0x40] sm:$0xff] }
 0xcef   :  { %14810 = vst.msk [vmem:[%s17857_s7 + $0x38] sm:$0x1f] %vm1489_vm14, %v13759_v63  ;;  %v13763_v50 = vsel %vm78_vm13, %v13759_v63, 0  ;;  %v14128_v14 = vrot.slane %v13759_v63, 5  ;;  %vm18795_vm14 = vcmask 1042432  }
 0xcf0   :  { %v13785_v23 = vand.u32 4294901760, %v13763_v50 }
 0xcf1   :  { %v17646_v54 = vsel %vm14142_vm12, %v17379_v6, %v14128_v14  ;;  %v62_v14 = vld [vmem:[%s17853_s3 + $0x38] sm:$0xff] }
 0xcf2   :  { %13831 = vmatmul.f32.vlgmr.msrb.gmra.mxu1 %v13785_v23  ;;  %v13786_v60 = vsub.f32 %v13763_v50, %v13785_v23  ;;  %v14352_v17 = vsel %vm78_vm13, %v17646_v54, 0  ;;  %vm14710_vm13 = vcmask 15360  }
 0xcf3   :  { %14053 = vmatpush.msrb.mxu1 %v15704_v24 }
 0xcf4   :  { %13861 = vmatmul.f32.vlgmr.msrb.gmra.mxu2 %v13786_v60  ;;  %v13787_v26 = vand.u32 4294901760, %v13786_v60 }
 0xcf5   :  { %14055 = vmatpush.msrb.mxu1 %v15712_v1  ;;  %14080 = vmatpush.msrb.mxu2 %v15717_v58  ;;  %v14770_v58 = vld [vmem:[%s17850_s0 + $0xd] sm:$0x1] }
 0xcf6   :  { %13888 = vmatmul.f32.vlgmr.msrb.gmra.mxu3 %v13787_v26  ;;  %v13788_v21 = vsub.f32 %v13786_v60, %v13787_v26  ;;  %v14145_v6 = vrot.slane %v14770_v58, 7  ;;  %v17741_v60 = vand.u32 4294901760, %v63_v25  ;;  %v17749_v58 = vand.u32 4294901760, %v62_v14 }
 0xcf7   :  { %14105 = vmatpush.msrb.mxu3 %v15704_v24  ;;  %14084 = vmatpush.msrb.mxu2 %v18311_v48  ;;  %v14777_v24 = vld [vmem:[%s17850_s0 + $0x15] sm:$0x1]  ;;  %v67_v48 = vld [vmem:[%s17853_s3 + $0x60] sm:$0xf] }
 0xcf8   :  { %v13789_v53 = vand.u32 4294901760, %v13788_v21  ;;  %v14177_v0 = vsel %vm14136_vm5, %v67_v48, 0  ;;  %v17763_v39 = vsub.f32 %v62_v14, %v17749_v58 }
 0xcf9   :  { %14107 = vmatpush.msrb.mxu3 %v15712_v1  ;;  %v1851_v1 = vld [vmem:[%s17850_s0 + $0x5] sm:$0x1]  ;;  %v17673_v62 = vand.u32 4294901760, %v14177_v0 }
 0xcfa   :  { %13790 = vmatmul.f32.vlgmr.msrb.gmra.mxu0 %v13789_v53  ;;  %13946 = vmatmul.f32.vlgmr.msra.gmra.mxu1 %v13785_v23  ;;  %v14165_v51 = vsel %vm14130_vm3, %v1851_v1, %v14145_v6  ;;  %vm18796_vm3 = vcmask 1044480   ;;  %v17755_v1 = vsub.f32 %v63_v25, %v17741_v60 }
 0xcfb   :  { %14028 = vmatpush.msrb.mxu0 %v18312_v35  ;;  %v14784_v35 = vld [vmem:[%s17850_s0 + $0x1d] sm:$0x1]  ;;  %v17683_v33 = vsub.f32 %v14177_v0, %v17673_v62 }
 0xcfc   :  { %v14151_v3 = vrot.slane %v14784_v35, 5 }
 0xcfd   :  { %14031 = vmatpush.msrb.mxu0 %v18314_v36  ;;  %v14148_v36 = vrot.slane %v14777_v24, 6  ;;  %v14222_v8 = vand.u32 4294901760, %v17683_v33  ;;  %v61_v24 = vld [vmem:[%s17853_s3 + $0x30] sm:$0xff] }
 0xcfe   :  { %v17758_v35 = vand.u32 4294901760, %v61_v24 }
 0xcff   :  { %v14166_v32 = vsel %vm14132_vm6, %v14165_v51, %v14148_v36  ;;  %v14223_v2 = vsub.f32 %v17683_v33, %v14222_v8  ;;  %vm14172_vm6 = vcmask 162816  }
 0xd00   :  { %v14167_v34 = vsel %vm18795_vm14, %v14166_v32, %v14151_v3  ;;  %v14403_v3 = vand.u32 4294901760, %v17755_v1  ;;  %v17768_v32 = vsub.f32 %v61_v24, %v17758_v35 }
 0xd01   :  { %v14224_v27 = vand.u32 4294901760, %v14223_v2  ;;  %v14168_v42 = vsel %vm14136_vm5, %v14167_v34, %v14154_v15  ;;  %v14409_v34 = vand.u32 4294901760, %v17763_v39 }
 0xd02   :  { %13921 = vmatmul.f32.vlgmr.msra.gmra.mxu0 %v13785_v23  ;;  %v14169_v16 = vsel %vm18796_vm3, %v14168_v42, %v14157_v52  ;;  %v14404_v20 = vsub.f32 %v17755_v1, %v14403_v3  ;;  %v14415_v52 = vand.u32 4294901760, %v17768_v32 }
 0xd03   :  { %14193 = vmatpush.msra.mxu0 %v17673_v62  ;;  %14225 = vmatpush.msra.mxu1 %v14224_v27  ;;  %v14170_v41 = vsel %vm14140_vm7, %v14169_v16, %v14160_v10 }
 0xd04   :  { %v14171_v44 = vsel %vm14142_vm12, %v14170_v41, %v14163_v56  ;;  %v14565_v56 = vand.u32 4294901760, %v69_v7 }
 0xd05   :  { %14195 = vmatpush.msra.mxu0 %v17685_v59  ;;  %14231 = vmatpush.msra.mxu1 %v14230_v13  ;;  %v14174_v38 = vsel %vm14172_vm6, %v14171_v44, 0  ;;  %v14405_v13 = vand.u32 4294901760, %v14404_v20 }
 0xd06   :  { %v17734_v63 = vand.u32 4294901760, %v14174_v38 }
 0xd07   :  { %14197 = vmatpush.msra.mxu0 %v17693_v11  ;;  %14237 = vmatpush.msra.mxu1 %v14236_v28 }
 0xd08   :  { %v17744_v21 = vsub.f32 %v14174_v38, %v17734_v63 }
 0xd0a   :  { %v14200_v0 = vand.u32 4294901760, %v17744_v21 }
 0xd0c   :  { %v14201_v22 = vsub.f32 %v17744_v21, %v14200_v0 }
 0xd0e   :  { %v14202_v47 = vand.u32 4294901760, %v14201_v22 }
 0xd6f   :  { %v13832_v43 = vpop.f32.mrf.mxu1 }
 0xd77   :  { %v13791_v55 = vpop.f32.mrf.mxu0  ;;  %v13862_v40 = vpop.f32.mrf.mxu2 }
 0xd78   :  { %v13792_v37 = vadd.f32 %v17416_v49, %v13791_v55  ;;  %v17736_v49 = vand.u32 4294901760, %v64_v57  ;;  %v13947_v23 = vpop.f32.mrf.mxu1  ;;  %v14593_v55 = vsub.f32 %v69_v7, %v14565_v56 }
 0xd79   :  { %v13889_v4 = vpop.f32.mrf.mxu3 }
 0xd7a   :  { %v13833_v45 = vadd.f32 %v13832_v43, %v13792_v37  ;;  %v17747_v53 = vsub.f32 %v64_v57, %v17736_v49  ;;  %v68_v43 = vld [vmem:[%s17853_s3 + $0x68] sm:$0xff] }
 0xd7b   :  { %v14567_v37 = vand.u32 4294901760, %v68_v43 }
 0xd7c   :  { %v13863_v9 = vadd.f32 %v13862_v40, %v13833_v45  ;;  %v14397_v51 = vand.u32 4294901760, %v17747_v53  ;;  %v14594_v40 = vand.u32 4294901760, %v14593_v55 }
 0xd7e   :  { %v13890_v5 = vadd.f32 %v13889_v4, %v13863_v9  ;;  %v14398_v15 = vsub.f32 %v17747_v53, %v14397_v51  ;;  %v14599_v9 = vsub.f32 %v68_v43, %v14567_v37  ;;  %v14595_v57 = vsub.f32 %v14593_v55, %v14594_v40 }
 0xd7f   :  { %v13922_v31 = vpop.f32.mrf.mxu0 }
 0xd80   :  { %v13923_v50 = vadd.f32 %v13922_v31, %v13890_v5  ;;  %v14399_v42 = vand.u32 4294901760, %v14398_v15  ;;  %v14600_v4 = vand.u32 4294901760, %v14599_v9  ;;  %v14596_v31 = vand.u32 4294901760, %v14595_v57  ;;  %v14821_v15 = vld [vmem:[%s17854_s4 + $0x2] ss:$0 sm:$0xff] }
 0xd82   :  { %v13948_v26 = vadd.f32 %v13947_v23, %v13923_v50 }
 0xd84   :  { %v13950_v6 = vmax.f32 %v13948_v26, 0.0 }
 0xd86   :  { %v13952_v48 = vsel %vm1686_vm15, %v13950_v6, 0 }
 0xd87   :  { %v13972_v36 = vand.u32 4294901760, %v13952_v48 }
 0xd89   :  { %v13973_v29 = vsub.f32 %v13952_v48, %v13972_v36  ;;  %14008 = vmatmul.f32.vlgmr.msra.gmra.mxu3 %v13972_v36 }
 0xd8a   :  { %14285 = vmatpush.msra.mxu3 %v17673_v62 }
 0xd8b   :  { %v13974_v18 = vand.u32 4294901760, %v13973_v29  ;;  %14034 = vmatmul.f32.vlgmr.msrb.gmra.mxu0 %v13973_v29 }
 0xd8c   :  { %14287 = vmatpush.msra.mxu3 %v17685_v59  ;;  %14313 = vmatpush.msrb.mxu0 %v14222_v8  ;;  %v14410_v8 = vsub.f32 %v17763_v39, %v14409_v34 }
 0xd8d   :  { %v13975_v2 = vsub.f32 %v13973_v29, %v13974_v18  ;;  %14059 = vmatmul.f32.vlgmr.msrb.gmra.mxu1 %v13974_v18 }
 0xd8e   :  { %14289 = vmatpush.msra.mxu3 %v17693_v11  ;;  %14317 = vmatpush.msrb.mxu0 %v14228_v19  ;;  %v14416_v19 = vsub.f32 %v17768_v32, %v14415_v52 }
 0xd8f   :  { %v13976_v27 = vand.u32 4294901760, %v13975_v2  ;;  %14341 = vmatpush.msrb.mxu1 %v17673_v62  ;;  %v14411_v62 = vand.u32 4294901760, %v14410_v8 }
 0xd90   :  { %14321 = vmatpush.msrb.mxu0 %v14234_v30 }
 0xd91   :  { %13977 = vmatmul.f32.vlgmr.msra.gmra.mxu2 %v13976_v27  ;;  %14109 = vmatmul.f32.vlgmr.msrb.gmra.mxu3 %v13972_v36 }
 0xd92   :  { %14258 = vmatpush.msra.mxu2 %v17683_v33  ;;  %14343 = vmatpush.msrb.mxu1 %v17685_v59  ;;  %v14417_v33 = vand.u32 4294901760, %v14416_v19  ;;  %v14374_v59 = vand.u32 4294901760, %v14352_v17 }
 0xd93   :  { %14203 = vmatmul.f32.vlgmr.msra.gmra.mxu0 %v14202_v47  ;;  %14400 = vmatpush.msrb.mxu3 %v14399_v42 }
 0xd94   :  { %14261 = vmatpush.msra.mxu2 %v17696_v12  ;;  %14345 = vmatpush.msrb.mxu1 %v17693_v11  ;;  %v14375_v54 = vsub.f32 %v14352_v17, %v14374_v59 }
 0xd95   :  { %14239 = vmatmul.f32.vlgmr.msra.gmra.mxu1 %v17734_v63  ;;  %14406 = vmatpush.msrb.mxu3 %v14405_v13 }
 0xd96   :  { %14438 = vmatpush.msra.mxu0 %v17747_v53  ;;  %14467 = vmatpush.msra.mxu1 %v17736_v49  ;;  %v14376_v11 = vand.u32 4294901760, %v14375_v54 }
 0xd97   :  { %14412 = vmatpush.msrb.mxu3 %v14411_v62  ;;  %14264 = vmatpush.msra.mxu2 %v17708_v61  ;;  %v14822_v62 = vld [vmem:[%s17854_s4 + $0x3] ss:$0 sm:$0xff] }
 0xd98   :  { %14441 = vmatpush.msra.mxu0 %v17755_v1  ;;  %14469 = vmatpush.msra.mxu1 %v17741_v60  ;;  %v14377_v12 = vsub.f32 %v14375_v54, %v14376_v11 }
 0xd99   :  { %14086 = vmatmul.f32.vlgmr.msrb.gmra.mxu2 %v13972_v36  ;;  %14293 = vmatmul.f32.vlgmr.msra.gmra.mxu3 %v14200_v0 }
 0xd9a   :  { %14418 = vmatpush.msrb.mxu3 %v14417_v33  ;;  %14444 = vmatpush.msra.mxu0 %v17763_v39  ;;  %v14378_v61 = vand.u32 4294901760, %v14377_v12 }
 0xd9b   :  { %14323 = vmatmul.f32.vlgmr.msrb.gmra.mxu0 %v17734_v63  ;;  %14367 = vmatpush.msrb.mxu2 %v17736_v49 }
 0xd9c   :  { %14447 = vmatpush.msra.mxu0 %v17768_v32  ;;  %14471 = vmatpush.msra.mxu1 %v17749_v58 }
 0xd9d   :  { %14347 = vmatmul.f32.vlgmr.msrb.gmra.mxu1 %v17734_v63  ;;  %14527 = vmatpush.msra.mxu3 %v17736_v49  ;;  %v14601_v63 = vsub.f32 %v14599_v9, %v14600_v4 }
 0xd9e   :  { %14369 = vmatpush.msrb.mxu2 %v17741_v60  ;;  %14473 = vmatpush.msra.mxu1 %v17758_v35 }
 0xd9f   :  { %14529 = vmatpush.msra.mxu3 %v17741_v60  ;;  %14566 = vmatpush.msrb.mxu0 %v14565_v56  ;;  %v14602_v14 = vand.u32 4294901760, %v14601_v63 }
 0xda0   :  { %14371 = vmatpush.msrb.mxu2 %v17749_v58  ;;  %14597 = vmatpush.msrb.mxu1 %v14596_v31 }
 0xda1   :  { %14267 = vmatmul.f32.vlgmr.msra.gmra.mxu2 %v17744_v21  ;;  %14420 = vmatmul.f32.vlgmr.msrb.gmra.mxu3 %v14374_v59 }
 0xda2   :  { %14531 = vmatpush.msra.mxu3 %v17749_v58  ;;  %14373 = vmatpush.msrb.mxu2 %v17758_v35 }
 0xda3   :  { %14450 = vmatmul.f32.vlgmr.msra.gmra.mxu0 %v14375_v54  ;;  %14603 = vmatpush.msrb.mxu1 %v14602_v14 }
 0xda4   :  { %14496 = vmatpush.msra.mxu2 %v14397_v51  ;;  %14533 = vmatpush.msra.mxu3 %v17758_v35 }
 0xda5   :  { %14477 = vmatmul.f32.vlgmr.msra.gmra.mxu1 %v14376_v11  ;;  %14568 = vmatpush.msrb.mxu0 %v14567_v37 }
 0xda6   :  { %14500 = vmatpush.msra.mxu2 %v14403_v3  ;;  %14650 = vmatpush.msrb.mxu3 %v14565_v56 }
 0xda7   :  { %14677 = vmatpush.msra.mxu0 %v14594_v40  ;;  %14702 = vmatpush.msra.mxu1 %v14565_v56 }
 0xda8   :  { %14504 = vmatpush.msra.mxu2 %v14409_v34  ;;  %14652 = vmatpush.msrb.mxu3 %v14567_v37 }
 0xda9   :  { %14379 = vmatmul.f32.vlgmr.msrb.gmra.mxu2 %v14378_v61  ;;  %14535 = vmatmul.f32.vlgmr.msra.gmra.mxu3 %v14374_v59 }
 0xdaa   :  { %14508 = vmatpush.msra.mxu2 %v14415_v52  ;;  %14681 = vmatpush.msra.mxu0 %v14600_v4 }
 0xdab   :  { %14704 = vmatpush.msra.mxu1 %v14567_v37 }
 0xdac   :  { %14625 = vmatpush.msrb.mxu2 %v14593_v55 }
 0xdae   :  { %14628 = vmatpush.msrb.mxu2 %v14599_v9 }
 0xdb1   :  { %14510 = vmatmul.f32.vlgmr.msra.gmra.mxu2 %v14374_v59 }
 0xe08   :  { %v14035_v10 = vpop.f32.mrf.mxu0 }
 0xe0a   :  { %v14060_v16 = vpop.f32.mrf.mxu1 }
 0xe0c   :  { %v14009_v30 = vpop.f32.mrf.mxu3 }
 0xe10   :  { %v14204_v5 = vpop.f32.mrf.mxu0 }
 0xe12   :  { %v14240_v50 = vpop.f32.mrf.mxu1 }
 0xe13   :  { %v14241_v26 = vadd.f32 %v14240_v50, %v14204_v5 }
 0xe14   :  { %v13978_v28 = vpop.f32.mrf.mxu2  ;;  %v14110_v45 = vpop.f32.mrf.mxu3 }
 0xe15   :  { %v13979_v41 = vadd.f32 %v17627_v46, %v13978_v28 }
 0xe17   :  { %v14010_v44 = vadd.f32 %v14009_v30, %v13979_v41 }
 0xe18   :  { %v14324_v58 = vpop.f32.mrf.mxu0 }
 0xe19   :  { %v14036_v38 = vadd.f32 %v14035_v10, %v14010_v44 }
 0xe1a   :  { %v14348_v6 = vpop.f32.mrf.mxu1 }
 0xe1b   :  { %v14061_v46 = vadd.f32 %v14060_v16, %v14036_v38 }
 0xe1c   :  { %v14087_v25 = vpop.f32.mrf.mxu2  ;;  %v14294_v60 = vpop.f32.mrf.mxu3 }
 0xe1d   :  { %v14088_v49 = vadd.f32 %v14087_v25, %v14061_v46 }
 0xe1f   :  { %v14111_v23 = vadd.f32 %v14110_v45, %v14088_v49 }
 0xe20   :  { %v14451_v39 = vpop.f32.mrf.mxu0 }
 0xe21   :  { %14811 = vst.msk [vmem:[%s17855_s5 + $0x38] sm:$0x1f] %vm1849_vm1, %v14111_v23 }
 0xe22   :  { %v14478_v3 = vpop.f32.mrf.mxu1 }
 0xe24   :  { %v14268_v21 = vpop.f32.mrf.mxu2  ;;  %v14421_v35 = vpop.f32.mrf.mxu3 }
 0xe25   :  { %v14269_v53 = vadd.f32 %v14268_v21, %v14241_v26 }
 0xe27   :  { %v14295_v24 = vadd.f32 %v14294_v60, %v14269_v53 }
 0xe29   :  { %v14325_v1 = vadd.f32 %v14324_v58, %v14295_v24 }
 0xe2b   :  { %v14349_v48 = vadd.f32 %v14348_v6, %v14325_v1 }
 0xe2c   :  { %v14380_v36 = vpop.f32.mrf.mxu2  ;;  %v14536_v34 = vpop.f32.mrf.mxu3 }
 0xe2d   :  { %v14381_v0 = vadd.f32 %v14380_v36, %v14349_v48 }
 0xe2f   :  { %v14422_v51 = vadd.f32 %v14421_v35, %v14381_v0 }
 0xe31   :  { %v14452_v29 = vadd.f32 %v14451_v39, %v14422_v51 }
 0xe33   :  { %v14479_v32 = vadd.f32 %v14478_v3, %v14452_v29 }
 0xe34   :  { %v14511_v18 = vpop.f32.mrf.mxu2 }
 0xe35   :  { %v14512_v22 = vadd.f32 %v14511_v18, %v14479_v32 }
 0xe37   :  { %v14537_v2 = vadd.f32 %v14536_v34, %v14512_v22 }
 0xe39   :  { %v14542_v20 = vadd.f32 %v14821_v15, %v14537_v2 }
 0xe3b   :  { %v14544_v52 = vmax.f32 %v14542_v20, 0.0  ;;  %14543 = vst.msk [vmem:[#allocation2] sm:$0xff] %vm1686_vm15, %v14542_v20 }
 0xe3c   :  { %14728 = dma.vmem_to_hbm [thread:$0]  %s14724_s23, 128, %s14726_s1, [#allocation3]  }
 0xe3d   :  { %v14549_v27 = vsel %vm1686_vm15, %v14544_v52, 0 }
 0xe3e   :  { %v14569_v47 = vand.u32 4294901760, %v14549_v27 }
 0xe40   :  { %v14570_v42 = vsub.f32 %v14549_v27, %v14569_v47  ;;  %14605 = vmatmul.f32.vlgmr.msrb.gmra.mxu1 %v14569_v47 }
 0xe42   :  { %14631 = vmatmul.f32.vlgmr.msrb.gmra.mxu2 %v14570_v42  ;;  %v14571_v8 = vand.u32 4294901760, %v14570_v42 }
 0xe44   :  { %14656 = vmatmul.f32.vlgmr.msrb.gmra.mxu3 %v14571_v8  ;;  %v14572_v13 = vsub.f32 %v14570_v42, %v14571_v8 }
 0xe46   :  { %v14573_v19 = vand.u32 4294901760, %v14572_v13 }
 0xe48   :  { %14574 = vmatmul.f32.vlgmr.msrb.gmra.mxu0 %v14573_v19  ;;  %14706 = vmatmul.f32.vlgmr.msra.gmra.mxu1 %v14569_v47 }
 0xe50   :  { %14683 = vmatmul.f32.vlgmr.msra.gmra.mxu0 %v14569_v47 }
 0xebd   :  { %v14606_v17 = vpop.f32.mrf.mxu1 }
 0xec5   :  { %v14575_v33 = vpop.f32.mrf.mxu0  ;;  %v14632_v11 = vpop.f32.mrf.mxu2 }
 0xec6   :  { %v14576_v59 = vadd.f32 %v14822_v62, %v14575_v33  ;;  %v14707_v16 = vpop.f32.mrf.mxu1 }
 0xec7   :  { %v14657_v61 = vpop.f32.mrf.mxu3 }
 0xec8   :  { %v14607_v54 = vadd.f32 %v14606_v17, %v14576_v59 }
 0xeca   :  { %v14633_v12 = vadd.f32 %v14632_v11, %v14607_v54 }
 0xecc   :  { %v14658_v30 = vadd.f32 %v14657_v61, %v14633_v12 }
 0xecd   :  { %v14684_v10 = vpop.f32.mrf.mxu0 }
 0xece   :  { %v14685_v7 = vadd.f32 %v14684_v10, %v14658_v30 }
 0xed0   :  { %v14708_v28 = vadd.f32 %v14707_v16, %v14685_v7 }
 0xed2   :  { %14711 = vst.msk [vmem:[%s17856_s6] sm:$0xff] %vm14710_vm13, %v14708_v28 }
 0xed3   :  { %14993 = dma.done.wait [#allocation3], 128  }
 0xed4   :  { %14994 = vsyncadd [#allocation3], 4294967168 }
 0xed5   :  { %14739 = vsyncpa [#allocation3], 1 }

</bundles_post_ra>
